<compile_context>
chip_gen: v6e
topology: v6e:2x2x1
jax: 0.10.0
libtpu: 0.0.40
codegen_flags: <defaults>
</compile_context>

<pallas_src>
import jax
import jax.numpy as jnp
from jax.experimental import pallas as pl
from jax.experimental.pallas import tpu as pltpu

# ---------------- configuration (small, consistent with the module) --------
S = 8             # sequence length
IN_DIM = 16       # raw input feature dim
D = 32            # model dim (d_model)
H = 4             # attention heads
DH = D // H       # per-head dim
FF = 64           # FFN hidden dim
NUM_CLASSES = 10  # head output dim
LN_EPS = 1e-5

CLS_PAD = 16      # classes padded to 16 so S*CLS_PAD == 128 (one dense row/seq)

SD = S * D        # 256  packed per-token model width
HS = H * S        # 32   one (q, h) slot per lane in the reduced score form
SIN = S * IN_DIM  # 128  packed input width
SFF = S * FF      # 512  packed FFN width
SCP = S * CLS_PAD # 128  packed (lane-dense) logits width

# ---- packed weight slab (W_ROWS, W_COLS): column offsets (all 128-aligned) --
C_WIN = 0                     # (128, 256) block-diag Linear(IN_DIM->D)
C_WQKV = C_WIN + SD           # (256, 768) block-diag [Wq*scale | Wk | Wv]
C_WO = C_WQKV + 3 * SD        # (256, 256) block-diag Wo
C_W1 = C_WO + SD              # (256, 512) block-diag W1
C_W2A = C_W1 + SFF            # (256, 256) top half of block-diag W2
C_W2B = C_W2A + SD            # (256, 256) bottom half of block-diag W2
C_WH = C_W2B + SD             # (256, 128) block-diag head (classes padded to 16)
C_A = C_WH + SCP              # (256, 256) per-token group-mean matrix (LayerNorm)
C_R8 = C_A + SD               # (256, 32)  sum-over-d reduction (q,h) matrix
C_E8 = C_R8 + 128             # (32, 256)  (q,h) -> d broadcast matrix (= R8^T)
W_COLS = C_E8 + SD            # 3072
W_ROWS = SD                   # 256

# ---- packed bias / LN / mask slab (V_ROWS, 3*SD): one row per vector -------
V_BIN, V_BQKV, V_BO, V_B1, V_B2 = 0, 1, 2, 3, 4
V_LN1W, V_LN1B, V_LN2W, V_LN2B, V_BH, V_MASK = 5, 6, 7, 8, 9, 10
V_ROWS = 16
V_COLS = 3 * SD               # 768


# ---------------------------- Pallas kernel --------------------------------
def make_transformer_kernel(has_mask):
    """Kernel over a (bt, SIN) block of packed sequences (bt = block batch)."""

    def kernel(x_ref, w_ref, v_ref, o_ref):
        f32 = jnp.float32

        def roll_l(x, k):
            # result[:, l] = x[:, (l + k) % n]  (lane rotation toward lower lanes;
            # Mosaic lowers the slice+concat to XLU lane rotates).
            k = k % x.shape[1]
            if k == 0:
                return x
            return jnp.concatenate([x[:, k:], x[:, :k]], axis=1)

        def dotf(a, b):
            return jnp.dot(a, b, preferred_element_type=f32)

        def grp8_allreduce(x, op):
            # Reduce over the 8 lanes {c, c+32, ..., c+224} of every residue
            # class c (mod 32) and broadcast the result back to each member:
            # 3 rolls by 32/64/128 cover all 8 cyclic positions.
            for sh in (HS, 2 * HS, 4 * HS):
                x = op(x, roll_l(x, sh))
            return x

        # ---- bias / LayerNorm / mask rows (each broadcast over the bt rows) --
        b_in = v_ref[V_BIN:V_BIN + 1, :SD]
        bqkv = v_ref[V_BQKV:V_BQKV + 1, :3 * SD]
        bo = v_ref[V_BO:V_BO + 1, :SD]
        b1 = v_ref[V_B1:V_B1 + 1, :SFF]
        b2 = v_ref[V_B2:V_B2 + 1, :SD]
        ln1w = v_ref[V_LN1W:V_LN1W + 1, :SD]
        ln1b = v_ref[V_LN1B:V_LN1B + 1, :SD]
        ln2w = v_ref[V_LN2W:V_LN2W + 1, :SD]
        ln2b = v_ref[V_LN2B:V_LN2B + 1, :SD]
        bh = v_ref[V_BH:V_BH + 1, :SCP]

        a_mat = w_ref[:, C_A:C_A + SD]       # (256, 256) per-token mean matrix
        r8 = w_ref[:, C_R8:C_R8 + HS]        # (256, 32)  sum d within (q, h)
        e8 = w_ref[:HS, C_E8:C_E8 + SD]      # (32, 256)  broadcast (q, h) -> d

        def layernorm(z, wrow, brow):
            # LayerNorm over each token's 32-lane group, via the block-mean
            # matrix A (keeps everything a dense MXU matmul + VPU elementwise).
            m = dotf(z, a_mat)
            c = z - m
            var = dotf(c * c, a_mat)
            return c * jax.lax.rsqrt(var + LN_EPS) * wrow + brow

        # ---- input_processor: per-token Linear(IN_DIM -> D), block-diag ------
        h = dotf(x_ref[...], w_ref[:SIN, C_WIN:C_WIN + SD]) + b_in   # (bt, 256)

        # ---- fused per-token QKV projection (1/sqrt(DH) folded into Q block) -
        qkv = dotf(h, w_ref[:, C_WQKV:C_WQKV + 3 * SD]) + bqkv       # (bt, 768)
        q = qkv[:, :SD]
        k = qkv[:, SD:2 * SD]
        v = qkv[:, 2 * SD:3 * SD]

        # ---- attention scores in "diagonal" form:
        #      lane j*32 + q*4 + h holds score[b, q, key=(q+j)%S, h]
        parts = []
        for j in range(S):                       # static unroll, 8 key offsets
            kj = roll_l(k, D * j)
            parts.append(dotf(q * kj, r8))       # (bt, 32)
        scores = jnp.concatenate(parts, axis=1)  # (bt, 256), fully lane-dense
        if has_mask:
            scores = scores + v_ref[V_MASK:V_MASK + 1, :S * S * H]

        # ---- softmax over the key offset j (stride-32 lane classes) ----------
        # Exact division (the approx EUP reciprocal was the previous 5e-3 error).
        m = grp8_allreduce(scores, jnp.maximum)
        e = jnp.exp(scores - m)
        den = grp8_allreduce(e, jnp.add)
        p = e / den

        # ---- P @ V, accumulated over the 8 key offsets ------------------------
        attn = jnp.zeros_like(q)                 # (bt, 256)
        for j in range(S):
            pj = p[:, j * HS:(j + 1) * HS]       # (bt, 32)
            attn = attn + dotf(pj, e8) * roll_l(v, D * j)

        # ---- output projection + residual + LayerNorm 1 (post-norm) ----------
        attn = dotf(attn, w_ref[:, C_WO:C_WO + SD]) + bo
        h1 = layernorm(h + attn, ln1w, ln1b)

        # ---- FFN: Linear(D->FF) -> ReLU -> Linear(FF->D), block-diag ---------
        f = jnp.maximum(dotf(h1, w_ref[:, C_W1:C_W1 + SFF]) + b1, 0.0)  # (bt,512)
        f = dotf(f[:, :SD], w_ref[:, C_W2A:C_W2A + SD]) + \
            dotf(f[:, SD:], w_ref[:, C_W2B:C_W2B + SD]) + b2
        h2 = layernorm(h1 + f, ln2w, ln2b)

        # ---- head: per-token Linear(D -> 16-padded classes) ------------------
        # The block-diag head weight emits the packed (bt, 128) logits row
        # (lane = q*16 + class) directly: lane-dense store, 8x less writeback.
        o_ref[...] = dotf(h2, w_ref[:, C_WH:C_WH + SCP]) + bh

    return kernel


# ---------------------------- parameter setup -------------------------------
def make_params(key):
    """Deterministic synthetic parameters (shapes implied by the module)."""
    ks = jax.random.split(key, 24)
    it = iter(ks)

    def lin(fan_in, fan_out):
        w = jax.random.normal(next(it), (fan_in, fan_out), jnp.float32) / jnp.sqrt(
            jnp.float32(fan_in))
        b = 0.01 * jax.random.normal(next(it), (1, fan_out), jnp.float32)
        return w, b

    params = {}
    params["w_in"], params["b_in"] = lin(IN_DIM, D)
    params["wq"], params["bq"] = lin(D, D)
    params["wk"], params["bk"] = lin(D, D)
    params["wv"], params["bv"] = lin(D, D)
    params["wo"], params["bo"] = lin(D, D)
    params["ln1_w"] = jnp.ones((1, D), jnp.float32)
    params["ln1_b"] = jnp.zeros((1, D), jnp.float32)
    params["w1"], params["b1"] = lin(D, FF)
    params["w2"], params["b2"] = lin(FF, D)
    params["ln2_w"] = jnp.ones((1, D), jnp.float32)
    params["ln2_b"] = jnp.zeros((1, D), jnp.float32)
    params["wh"], params["bh"] = lin(D, NUM_CLASSES)
    return params


def pack_params(p):
    """Pack the 22 small tensors into 2 kernel inputs (weights + vector slab)."""
    scale = 1.0 / (DH ** 0.5)

    def bd(block):
        # block-diagonal over the S tokens of a sequence
        kk, nn = block.shape
        out = jnp.zeros((S * kk, S * nn), jnp.float32)
        for t in range(S):
            out = out.at[t * kk:(t + 1) * kk, t * nn:(t + 1) * nn].set(block)
        return out

    def tile_row(v, pad_to=None):
        v = jnp.asarray(v, jnp.float32).reshape(1, -1)
        if pad_to is not None and v.shape[1] < pad_to:
            v = jnp.pad(v, ((0, 0), (0, pad_to - v.shape[1])))
        return jnp.tile(v, (1, S))

    w = jnp.zeros((W_ROWS, W_COLS), jnp.float32)
    w = w.at[:SIN, C_WIN:C_WIN + SD].set(bd(p["w_in"]))
    w = w.at[:, C_WQKV:C_WQKV + SD].set(bd(p["wq"] * scale))
    w = w.at[:, C_WQKV + SD:C_WQKV + 2 * SD].set(bd(p["wk"]))
    w = w.at[:, C_WQKV + 2 * SD:C_WQKV + 3 * SD].set(bd(p["wv"]))
    w = w.at[:, C_WO:C_WO + SD].set(bd(p["wo"]))
    w = w.at[:, C_W1:C_W1 + SFF].set(bd(p["w1"]))
    w2_bd = bd(p["w2"])                                   # (512, 256)
    w = w.at[:, C_W2A:C_W2A + SD].set(w2_bd[:SD, :])
    w = w.at[:, C_W2B:C_W2B + SD].set(w2_bd[SD:, :])
    wh_pad = jnp.pad(p["wh"], ((0, 0), (0, CLS_PAD - NUM_CLASSES)))   # (32, 16)
    w = w.at[:, C_WH:C_WH + SCP].set(bd(wh_pad))

    # LayerNorm group-mean matrix: 1/D within each token's 32-lane block
    lane_tok = jnp.arange(SD) // D
    a_mat = (lane_tok[:, None] == lane_tok[None, :]).astype(jnp.float32) / D
    w = w.at[:, C_A:C_A + SD].set(a_mat)

    # R8: sum d within each (q, h) group of 8 lanes; E8 = R8^T expands it back
    r8 = (jnp.arange(HS)[None, :] ==
          (jnp.arange(SD)[:, None] // DH)).astype(jnp.float32)        # (256, 32)
    w = w.at[:, C_R8:C_R8 + HS].set(r8)
    w = w.at[:HS, C_E8:C_E8 + SD].set(r8.T)

    vec = jnp.zeros((V_ROWS, V_COLS), jnp.float32)

    def setrow(vm, r, row):
        return vm.at[r:r + 1, :row.shape[1]].set(row)

    vec = setrow(vec, V_BIN, tile_row(p["b_in"]))
    bqkv = jnp.concatenate(
        [tile_row(p["bq"] * scale), tile_row(p["bk"]), tile_row(p["bv"])], axis=1)
    vec = setrow(vec, V_BQKV, bqkv)
    vec = setrow(vec, V_BO, tile_row(p["bo"]))
    vec = setrow(vec, V_B1, tile_row(p["b1"]))
    vec = setrow(vec, V_B2, tile_row(p["b2"]))
    vec = setrow(vec, V_LN1W, tile_row(p["ln1_w"]))
    vec = setrow(vec, V_LN1B, tile_row(p["ln1_b"]))
    vec = setrow(vec, V_LN2W, tile_row(p["ln2_w"]))
    vec = setrow(vec, V_LN2B, tile_row(p["ln2_b"]))
    vec = setrow(vec, V_BH, tile_row(p["bh"], pad_to=CLS_PAD))
    return w, vec


def pack_mask(mask):
    """(S,S) additive mask -> (1, 256) row with lane = j*32 + q*4 + h."""
    qi = jnp.arange(S)
    mp = mask[qi[None, :], (qi[None, :] + qi[:, None]) % S]   # mp[j, q]
    return jnp.repeat(mp[:, :, None], H, axis=2).reshape(1, S * S * H).astype(
        jnp.float32)


# ---------------------------- wrapper ---------------------------------------
def modular_transformer_forward(x, params, mask=None, block_batch=64):
    """x: (B, S, IN_DIM) float32; mask: optional (S, S) additive mask.

    block_batch: sequences per grid step.  Default 64 keeps >=2 steps per v7x
    TensorCore at B=256; raise toward 128-256 on v5e/v6e for large B (working
    set stays well inside the default scoped VMEM).
    """
    B = x.shape[0]
    assert x.shape[1] == S and x.shape[2] == IN_DIM, x.shape

    bt = max(8, min(int(block_batch), B))
    bt = ((bt + 7) // 8) * 8                 # sublane-aligned block batch
    nb = pl.cdiv(B, bt)
    bp = nb * bt
    if bp != B:
        # Padded sequences flow through LayerNorm with ~zero variance
        # (rsqrt(eps)); results are finite and sliced off below.
        x = jnp.pad(x, ((0, bp - B), (0, 0), (0, 0)))
    x_packed = x.reshape(bp, SIN).astype(jnp.float32)   # lane = q*IN_DIM + i

    w_slab, v_slab = pack_params(params)
    has_mask = mask is not None
    if has_mask:
        v_slab = v_slab.at[V_MASK:V_MASK + 1, :S * S * H].set(
            pack_mask(mask.astype(jnp.float32)))

    out = pl.pallas_call(
        make_transformer_kernel(has_mask),
        out_shape=jax.ShapeDtypeStruct((bp, SCP), jnp.float32),
        grid_spec=pltpu.PrefetchScalarGridSpec(
            num_scalar_prefetch=0,
            grid=(nb,),
            in_specs=[
                pl.BlockSpec((bt, SIN), lambda i: (i, 0)),
                pl.BlockSpec(w_slab.shape, lambda i: (0, 0)),   # fetched once
                pl.BlockSpec(v_slab.shape, lambda i: (0, 0)),   # fetched once
            ],
            out_specs=pl.BlockSpec((bt, SCP), lambda i: (i, 0)),
        ),
        compiler_params=pltpu.CompilerParams(
            dimension_semantics=("parallel",)),
    )(x_packed, w_slab, v_slab)

    # (bp, 128) packed logits -> (B, S, NUM_CLASSES)
    return out.reshape(bp, S, CLS_PAD)[:B, :, :NUM_CLASSES]


# ---------------------------- reference (plain JAX) --------------------------
def reference_forward(x, params, mask=None):
    # Highest matmul precision so the reference is f32-accurate on TPU
    # (XLA's default bf16 matmul precision would otherwise dominate the diff).
    with jax.default_matmul_precision("highest"):
        if mask is None:
            mask = jnp.zeros((S, S), jnp.float32)
        p = params
        B = x.shape[0]
        h = x @ p["w_in"] + p["b_in"]
        q = h @ p["wq"] + p["bq"]
        k = h @ p["wk"] + p["bk"]
        v = h @ p["wv"] + p["bv"]
        qh = q.reshape(B, S, H, DH).transpose(0, 2, 1, 3)
        kh = k.reshape(B, S, H, DH).transpose(0, 2, 1, 3)
        vh = v.reshape(B, S, H, DH).transpose(0, 2, 1, 3)
        scores = (jnp.einsum("bhqd,bhkd->bhqk", qh, kh)
                  / jnp.sqrt(jnp.float32(DH)) + mask)
        pmat = jax.nn.softmax(scores, axis=-1)
        attn = jnp.einsum("bhqk,bhkd->bhqd", pmat, vh).transpose(
            0, 2, 1, 3).reshape(B, S, D)
        attn = attn @ p["wo"] + p["bo"]

        def ln(z, w, b):
            m = jnp.mean(z, axis=-1, keepdims=True)
            var = jnp.mean((z - m) ** 2, axis=-1, keepdims=True)
            return (z - m) * jax.lax.rsqrt(var + LN_EPS) * w + b

        h1 = ln(h + attn, p["ln1_w"], p["ln1_b"])
        f = jnp.maximum(h1 @ p["w1"] + p["b1"], 0.0) @ p["w2"] + p["b2"]
        h2 = ln(h1 + f, p["ln2_w"], p["ln2_b"])
        return h2 @ p["wh"] + p["bh"]


# ---------------------------- main -------------------------------------------
if __name__ == "__main__":
    key = jax.random.PRNGKey(0)
    k_params, k_x = jax.random.split(key)

    params = make_params(k_params)
    B = 256  # grid of 4 steps of 64 sequences (>=2 steps per v7x core)
    x = jax.random.normal(k_x, (B, S, IN_DIM), jnp.float32)

    # mask=None path (mask add compiled out entirely)
    out = jax.block_until_ready(modular_transformer_forward(x, params, mask=None))
    ref = reference_forward(x, params, mask=None)
    assert out.shape == (B, S, NUM_CLASSES), out.shape
    assert jnp.allclose(out, ref, atol=2e-3, rtol=2e-3), (
        float(jnp.max(jnp.abs(out - ref))))

    # additive (causal) mask path
    causal = jnp.where(jnp.arange(S)[:, None] >= jnp.arange(S)[None, :],
                       0.0, -1e9).astype(jnp.float32)
    out_m = jax.block_until_ready(
        modular_transformer_forward(x, params, mask=causal))
    ref_m = reference_forward(x, params, mask=causal)
    assert jnp.allclose(out_m, ref_m, atol=2e-3, rtol=2e-3), (
        float(jnp.max(jnp.abs(out_m - ref_m))))

    print("KERNEL_OK")
</pallas_src>

<mosaic_0001>
module attributes {stable_mosaic.version = 11 : i64} {
  func.func @kernel(%arg0: i32, %arg1: memref<64x128xf32, #tpu.memory_space<vmem>>, %arg2: memref<256x3072xf32, #tpu.memory_space<vmem>>, %arg3: memref<16x768xf32, #tpu.memory_space<vmem>>, %arg4: memref<64x128xf32, #tpu.memory_space<vmem>>) attributes {dimension_semantics = [#tpu.dimension_semantics<parallel>], iteration_bounds = array<i64: 4>, scalar_prefetch = 0 : i64, scratch_operands = 0 : i64, tpu.core_type = #tpu.core_type<tc>, window_params = [{transform_indices = @transform_0, window_bounds = array<i64: 64, 128>}, {pipeline_mode = #tpu.pipeline_mode<synchronous>, transform_indices = @transform_1, window_bounds = array<i64: 256, 3072>}, {pipeline_mode = #tpu.pipeline_mode<synchronous>, transform_indices = @transform_2, window_bounds = array<i64: 16, 768>}, {transform_indices = @transform_3, window_bounds = array<i64: 64, 128>}]} {
    %c0 = arith.constant 0 : index
    %c0_0 = arith.constant 0 : index
    %0 = vector.load %arg3[%c0, %c0_0] : memref<16x768xf32, #tpu.memory_space<vmem>>, vector<1x256xf32>
    %c1 = arith.constant 1 : index
    %c0_1 = arith.constant 0 : index
    %1 = vector.load %arg3[%c1, %c0_1] : memref<16x768xf32, #tpu.memory_space<vmem>>, vector<1x768xf32>
    %c2 = arith.constant 2 : index
    %c0_2 = arith.constant 0 : index
    %2 = vector.load %arg3[%c2, %c0_2] : memref<16x768xf32, #tpu.memory_space<vmem>>, vector<1x256xf32>
    %c3 = arith.constant 3 : index
    %c0_3 = arith.constant 0 : index
    %3 = vector.load %arg3[%c3, %c0_3] : memref<16x768xf32, #tpu.memory_space<vmem>>, vector<1x512xf32>
    %c4 = arith.constant 4 : index
    %c0_4 = arith.constant 0 : index
    %4 = vector.load %arg3[%c4, %c0_4] : memref<16x768xf32, #tpu.memory_space<vmem>>, vector<1x256xf32>
    %c5 = arith.constant 5 : index
    %c0_5 = arith.constant 0 : index
    %5 = vector.load %arg3[%c5, %c0_5] : memref<16x768xf32, #tpu.memory_space<vmem>>, vector<1x256xf32>
    %c6 = arith.constant 6 : index
    %c0_6 = arith.constant 0 : index
    %6 = vector.load %arg3[%c6, %c0_6] : memref<16x768xf32, #tpu.memory_space<vmem>>, vector<1x256xf32>
    %c7 = arith.constant 7 : index
    %c0_7 = arith.constant 0 : index
    %7 = vector.load %arg3[%c7, %c0_7] : memref<16x768xf32, #tpu.memory_space<vmem>>, vector<1x256xf32>
    %c8 = arith.constant 8 : index
    %c0_8 = arith.constant 0 : index
    %8 = vector.load %arg3[%c8, %c0_8] : memref<16x768xf32, #tpu.memory_space<vmem>>, vector<1x256xf32>
    %c9 = arith.constant 9 : index
    %c0_9 = arith.constant 0 : index
    %9 = vector.load %arg3[%c9, %c0_9] : memref<16x768xf32, #tpu.memory_space<vmem>>, vector<1x128xf32>
    %c0_10 = arith.constant 0 : index
    %c2432 = arith.constant 2432 : index
    %10 = vector.load %arg2[%c0_10, %c2432] : memref<256x3072xf32, #tpu.memory_space<vmem>>, vector<256x256xf32>
    %c0_11 = arith.constant 0 : index
    %c2688 = arith.constant 2688 : index
    %11 = vector.load %arg2[%c0_11, %c2688] : memref<256x3072xf32, #tpu.memory_space<vmem>>, vector<256x32xf32>
    %c0_12 = arith.constant 0 : index
    %c2816 = arith.constant 2816 : index
    %12 = vector.load %arg2[%c0_12, %c2816] : memref<256x3072xf32, #tpu.memory_space<vmem>>, vector<32x256xf32>
    %c0_13 = arith.constant 0 : index
    %c0_14 = arith.constant 0 : index
    %13 = vector.load %arg1[%c0_13, %c0_14] : memref<64x128xf32, #tpu.memory_space<vmem>>, vector<64x128xf32>
    %c0_15 = arith.constant 0 : index
    %c0_16 = arith.constant 0 : index
    %14 = vector.load %arg2[%c0_15, %c0_16] : memref<256x3072xf32, #tpu.memory_space<vmem>>, vector<128x256xf32>
    %cst = arith.constant dense<0.000000e+00> : vector<64x256xf32>
    %15 = tpu.matmul %13, %14, %cst {dimension_numbers = #tpu.dot_dimension_numbers<[1], [0], [0], [1], [0, 0, 1, 1], [], []>} : vector<64x128xf32>, vector<128x256xf32>, vector<64x256xf32> -> vector<64x256xf32>
    %16 = vector.broadcast %0 : vector<1x256xf32> to vector<64x256xf32>
    %17 = arith.addf %15, %16 : vector<64x256xf32>
    %c0_17 = arith.constant 0 : index
    %c256 = arith.constant 256 : index
    %18 = vector.load %arg2[%c0_17, %c256] : memref<256x3072xf32, #tpu.memory_space<vmem>>, vector<256x768xf32>
    %cst_18 = arith.constant dense<0.000000e+00> : vector<64x768xf32>
    %19 = tpu.matmul %17, %18, %cst_18 {dimension_numbers = #tpu.dot_dimension_numbers<[1], [0], [0], [1], [0, 0, 1, 1], [], []>} : vector<64x256xf32>, vector<256x768xf32>, vector<64x768xf32> -> vector<64x768xf32>
    %20 = vector.broadcast %1 : vector<1x768xf32> to vector<64x768xf32>
    %21 = arith.addf %19, %20 : vector<64x768xf32>
    %22 = vector.extract_strided_slice %21 {offsets = [0, 0], sizes = [64, 256], strides = [1, 1]} : vector<64x768xf32> to vector<64x256xf32>
    %23 = vector.extract_strided_slice %21 {offsets = [0, 256], sizes = [64, 256], strides = [1, 1]} : vector<64x768xf32> to vector<64x256xf32>
    %24 = vector.extract_strided_slice %21 {offsets = [0, 512], sizes = [64, 256], strides = [1, 1]} : vector<64x768xf32> to vector<64x256xf32>
    %25 = arith.mulf %22, %23 : vector<64x256xf32>
    %cst_19 = arith.constant dense<0.000000e+00> : vector<64x32xf32>
    %26 = tpu.matmul %25, %11, %cst_19 {dimension_numbers = #tpu.dot_dimension_numbers<[1], [0], [0], [1], [0, 0, 1, 1], [], []>} : vector<64x256xf32>, vector<256x32xf32>, vector<64x32xf32> -> vector<64x32xf32>
    %27 = vector.extract_strided_slice %23 {offsets = [0, 32], sizes = [64, 224], strides = [1, 1]} : vector<64x256xf32> to vector<64x224xf32>
    %28 = vector.extract_strided_slice %23 {offsets = [0, 0], sizes = [64, 32], strides = [1, 1]} : vector<64x256xf32> to vector<64x32xf32>
    %29 = tpu.concatenate %27, %28 in 1 : vector<64x224xf32>, vector<64x32xf32> -> vector<64x256xf32>
    %30 = arith.mulf %22, %29 : vector<64x256xf32>
    %cst_20 = arith.constant dense<0.000000e+00> : vector<64x32xf32>
    %31 = tpu.matmul %30, %11, %cst_20 {dimension_numbers = #tpu.dot_dimension_numbers<[1], [0], [0], [1], [0, 0, 1, 1], [], []>} : vector<64x256xf32>, vector<256x32xf32>, vector<64x32xf32> -> vector<64x32xf32>
    %32 = vector.extract_strided_slice %23 {offsets = [0, 64], sizes = [64, 192], strides = [1, 1]} : vector<64x256xf32> to vector<64x192xf32>
    %33 = vector.extract_strided_slice %23 {offsets = [0, 0], sizes = [64, 64], strides = [1, 1]} : vector<64x256xf32> to vector<64x64xf32>
    %34 = tpu.concatenate %32, %33 in 1 : vector<64x192xf32>, vector<64x64xf32> -> vector<64x256xf32>
    %35 = arith.mulf %22, %34 : vector<64x256xf32>
    %cst_21 = arith.constant dense<0.000000e+00> : vector<64x32xf32>
    %36 = tpu.matmul %35, %11, %cst_21 {dimension_numbers = #tpu.dot_dimension_numbers<[1], [0], [0], [1], [0, 0, 1, 1], [], []>} : vector<64x256xf32>, vector<256x32xf32>, vector<64x32xf32> -> vector<64x32xf32>
    %37 = vector.extract_strided_slice %23 {offsets = [0, 96], sizes = [64, 160], strides = [1, 1]} : vector<64x256xf32> to vector<64x160xf32>
    %38 = vector.extract_strided_slice %23 {offsets = [0, 0], sizes = [64, 96], strides = [1, 1]} : vector<64x256xf32> to vector<64x96xf32>
    %39 = tpu.concatenate %37, %38 in 1 : vector<64x160xf32>, vector<64x96xf32> -> vector<64x256xf32>
    %40 = arith.mulf %22, %39 : vector<64x256xf32>
    %cst_22 = arith.constant dense<0.000000e+00> : vector<64x32xf32>
    %41 = tpu.matmul %40, %11, %cst_22 {dimension_numbers = #tpu.dot_dimension_numbers<[1], [0], [0], [1], [0, 0, 1, 1], [], []>} : vector<64x256xf32>, vector<256x32xf32>, vector<64x32xf32> -> vector<64x32xf32>
    %42 = vector.extract_strided_slice %23 {offsets = [0, 128], sizes = [64, 128], strides = [1, 1]} : vector<64x256xf32> to vector<64x128xf32>
    %43 = vector.extract_strided_slice %23 {offsets = [0, 0], sizes = [64, 128], strides = [1, 1]} : vector<64x256xf32> to vector<64x128xf32>
    %44 = tpu.concatenate %42, %43 in 1 : vector<64x128xf32>, vector<64x128xf32> -> vector<64x256xf32>
    %45 = arith.mulf %22, %44 : vector<64x256xf32>
    %cst_23 = arith.constant dense<0.000000e+00> : vector<64x32xf32>
    %46 = tpu.matmul %45, %11, %cst_23 {dimension_numbers = #tpu.dot_dimension_numbers<[1], [0], [0], [1], [0, 0, 1, 1], [], []>} : vector<64x256xf32>, vector<256x32xf32>, vector<64x32xf32> -> vector<64x32xf32>
    %47 = vector.extract_strided_slice %23 {offsets = [0, 160], sizes = [64, 96], strides = [1, 1]} : vector<64x256xf32> to vector<64x96xf32>
    %48 = vector.extract_strided_slice %23 {offsets = [0, 0], sizes = [64, 160], strides = [1, 1]} : vector<64x256xf32> to vector<64x160xf32>
    %49 = tpu.concatenate %47, %48 in 1 : vector<64x96xf32>, vector<64x160xf32> -> vector<64x256xf32>
    %50 = arith.mulf %22, %49 : vector<64x256xf32>
    %cst_24 = arith.constant dense<0.000000e+00> : vector<64x32xf32>
    %51 = tpu.matmul %50, %11, %cst_24 {dimension_numbers = #tpu.dot_dimension_numbers<[1], [0], [0], [1], [0, 0, 1, 1], [], []>} : vector<64x256xf32>, vector<256x32xf32>, vector<64x32xf32> -> vector<64x32xf32>
    %52 = vector.extract_strided_slice %23 {offsets = [0, 192], sizes = [64, 64], strides = [1, 1]} : vector<64x256xf32> to vector<64x64xf32>
    %53 = vector.extract_strided_slice %23 {offsets = [0, 0], sizes = [64, 192], strides = [1, 1]} : vector<64x256xf32> to vector<64x192xf32>
    %54 = tpu.concatenate %52, %53 in 1 : vector<64x64xf32>, vector<64x192xf32> -> vector<64x256xf32>
    %55 = arith.mulf %22, %54 : vector<64x256xf32>
    %cst_25 = arith.constant dense<0.000000e+00> : vector<64x32xf32>
    %56 = tpu.matmul %55, %11, %cst_25 {dimension_numbers = #tpu.dot_dimension_numbers<[1], [0], [0], [1], [0, 0, 1, 1], [], []>} : vector<64x256xf32>, vector<256x32xf32>, vector<64x32xf32> -> vector<64x32xf32>
    %57 = vector.extract_strided_slice %23 {offsets = [0, 224], sizes = [64, 32], strides = [1, 1]} : vector<64x256xf32> to vector<64x32xf32>
    %58 = vector.extract_strided_slice %23 {offsets = [0, 0], sizes = [64, 224], strides = [1, 1]} : vector<64x256xf32> to vector<64x224xf32>
    %59 = tpu.concatenate %57, %58 in 1 : vector<64x32xf32>, vector<64x224xf32> -> vector<64x256xf32>
    %60 = arith.mulf %22, %59 : vector<64x256xf32>
    %cst_26 = arith.constant dense<0.000000e+00> : vector<64x32xf32>
    %61 = tpu.matmul %60, %11, %cst_26 {dimension_numbers = #tpu.dot_dimension_numbers<[1], [0], [0], [1], [0, 0, 1, 1], [], []>} : vector<64x256xf32>, vector<256x32xf32>, vector<64x32xf32> -> vector<64x32xf32>
    %62 = tpu.concatenate %26, %31, %36, %41, %46, %51, %56, %61 in 1 : vector<64x32xf32>, vector<64x32xf32>, vector<64x32xf32>, vector<64x32xf32>, vector<64x32xf32>, vector<64x32xf32>, vector<64x32xf32>, vector<64x32xf32> -> vector<64x256xf32>
    %63 = vector.extract_strided_slice %62 {offsets = [0, 32], sizes = [64, 224], strides = [1, 1]} : vector<64x256xf32> to vector<64x224xf32>
    %64 = vector.extract_strided_slice %62 {offsets = [0, 0], sizes = [64, 32], strides = [1, 1]} : vector<64x256xf32> to vector<64x32xf32>
    %65 = tpu.concatenate %63, %64 in 1 : vector<64x224xf32>, vector<64x32xf32> -> vector<64x256xf32>
    %66 = arith.maximumf %62, %65 : vector<64x256xf32>
    %67 = vector.extract_strided_slice %66 {offsets = [0, 64], sizes = [64, 192], strides = [1, 1]} : vector<64x256xf32> to vector<64x192xf32>
    %68 = vector.extract_strided_slice %66 {offsets = [0, 0], sizes = [64, 64], strides = [1, 1]} : vector<64x256xf32> to vector<64x64xf32>
    %69 = tpu.concatenate %67, %68 in 1 : vector<64x192xf32>, vector<64x64xf32> -> vector<64x256xf32>
    %70 = arith.maximumf %66, %69 : vector<64x256xf32>
    %71 = vector.extract_strided_slice %70 {offsets = [0, 128], sizes = [64, 128], strides = [1, 1]} : vector<64x256xf32> to vector<64x128xf32>
    %72 = vector.extract_strided_slice %70 {offsets = [0, 0], sizes = [64, 128], strides = [1, 1]} : vector<64x256xf32> to vector<64x128xf32>
    %73 = tpu.concatenate %71, %72 in 1 : vector<64x128xf32>, vector<64x128xf32> -> vector<64x256xf32>
    %74 = arith.maximumf %70, %73 : vector<64x256xf32>
    %75 = arith.subf %62, %74 : vector<64x256xf32>
    %76 = math.exp %75 : vector<64x256xf32>
    %77 = vector.extract_strided_slice %76 {offsets = [0, 32], sizes = [64, 224], strides = [1, 1]} : vector<64x256xf32> to vector<64x224xf32>
    %78 = vector.extract_strided_slice %76 {offsets = [0, 0], sizes = [64, 32], strides = [1, 1]} : vector<64x256xf32> to vector<64x32xf32>
    %79 = tpu.concatenate %77, %78 in 1 : vector<64x224xf32>, vector<64x32xf32> -> vector<64x256xf32>
    %80 = arith.addf %76, %79 : vector<64x256xf32>
    %81 = vector.extract_strided_slice %80 {offsets = [0, 64], sizes = [64, 192], strides = [1, 1]} : vector<64x256xf32> to vector<64x192xf32>
    %82 = vector.extract_strided_slice %80 {offsets = [0, 0], sizes = [64, 64], strides = [1, 1]} : vector<64x256xf32> to vector<64x64xf32>
    %83 = tpu.concatenate %81, %82 in 1 : vector<64x192xf32>, vector<64x64xf32> -> vector<64x256xf32>
    %84 = arith.addf %80, %83 : vector<64x256xf32>
    %85 = vector.extract_strided_slice %84 {offsets = [0, 128], sizes = [64, 128], strides = [1, 1]} : vector<64x256xf32> to vector<64x128xf32>
    %86 = vector.extract_strided_slice %84 {offsets = [0, 0], sizes = [64, 128], strides = [1, 1]} : vector<64x256xf32> to vector<64x128xf32>
    %87 = tpu.concatenate %85, %86 in 1 : vector<64x128xf32>, vector<64x128xf32> -> vector<64x256xf32>
    %88 = arith.addf %84, %87 : vector<64x256xf32>
    %89 = arith.divf %76, %88 : vector<64x256xf32>
    %cst_27 = arith.constant 0.000000e+00 : f32
    %90 = vector.broadcast %cst_27 : f32 to vector<64x256xf32>
    %91 = vector.extract_strided_slice %89 {offsets = [0, 0], sizes = [64, 32], strides = [1, 1]} : vector<64x256xf32> to vector<64x32xf32>
    %cst_28 = arith.constant dense<0.000000e+00> : vector<64x256xf32>
    %92 = tpu.matmul %91, %12, %cst_28 {dimension_numbers = #tpu.dot_dimension_numbers<[1], [0], [0], [1], [0, 0, 1, 1], [], []>} : vector<64x32xf32>, vector<32x256xf32>, vector<64x256xf32> -> vector<64x256xf32>
    %93 = arith.mulf %92, %24 : vector<64x256xf32>
    %94 = arith.addf %90, %93 : vector<64x256xf32>
    %95 = vector.extract_strided_slice %89 {offsets = [0, 32], sizes = [64, 32], strides = [1, 1]} : vector<64x256xf32> to vector<64x32xf32>
    %cst_29 = arith.constant dense<0.000000e+00> : vector<64x256xf32>
    %96 = tpu.matmul %95, %12, %cst_29 {dimension_numbers = #tpu.dot_dimension_numbers<[1], [0], [0], [1], [0, 0, 1, 1], [], []>} : vector<64x32xf32>, vector<32x256xf32>, vector<64x256xf32> -> vector<64x256xf32>
    %97 = vector.extract_strided_slice %24 {offsets = [0, 32], sizes = [64, 224], strides = [1, 1]} : vector<64x256xf32> to vector<64x224xf32>
    %98 = vector.extract_strided_slice %24 {offsets = [0, 0], sizes = [64, 32], strides = [1, 1]} : vector<64x256xf32> to vector<64x32xf32>
    %99 = tpu.concatenate %97, %98 in 1 : vector<64x224xf32>, vector<64x32xf32> -> vector<64x256xf32>
    %100 = arith.mulf %96, %99 : vector<64x256xf32>
    %101 = arith.addf %94, %100 : vector<64x256xf32>
    %102 = vector.extract_strided_slice %89 {offsets = [0, 64], sizes = [64, 32], strides = [1, 1]} : vector<64x256xf32> to vector<64x32xf32>
    %cst_30 = arith.constant dense<0.000000e+00> : vector<64x256xf32>
    %103 = tpu.matmul %102, %12, %cst_30 {dimension_numbers = #tpu.dot_dimension_numbers<[1], [0], [0], [1], [0, 0, 1, 1], [], []>} : vector<64x32xf32>, vector<32x256xf32>, vector<64x256xf32> -> vector<64x256xf32>
    %104 = vector.extract_strided_slice %24 {offsets = [0, 64], sizes = [64, 192], strides = [1, 1]} : vector<64x256xf32> to vector<64x192xf32>
    %105 = vector.extract_strided_slice %24 {offsets = [0, 0], sizes = [64, 64], strides = [1, 1]} : vector<64x256xf32> to vector<64x64xf32>
    %106 = tpu.concatenate %104, %105 in 1 : vector<64x192xf32>, vector<64x64xf32> -> vector<64x256xf32>
    %107 = arith.mulf %103, %106 : vector<64x256xf32>
    %108 = arith.addf %101, %107 : vector<64x256xf32>
    %109 = vector.extract_strided_slice %89 {offsets = [0, 96], sizes = [64, 32], strides = [1, 1]} : vector<64x256xf32> to vector<64x32xf32>
    %cst_31 = arith.constant dense<0.000000e+00> : vector<64x256xf32>
    %110 = tpu.matmul %109, %12, %cst_31 {dimension_numbers = #tpu.dot_dimension_numbers<[1], [0], [0], [1], [0, 0, 1, 1], [], []>} : vector<64x32xf32>, vector<32x256xf32>, vector<64x256xf32> -> vector<64x256xf32>
    %111 = vector.extract_strided_slice %24 {offsets = [0, 96], sizes = [64, 160], strides = [1, 1]} : vector<64x256xf32> to vector<64x160xf32>
    %112 = vector.extract_strided_slice %24 {offsets = [0, 0], sizes = [64, 96], strides = [1, 1]} : vector<64x256xf32> to vector<64x96xf32>
    %113 = tpu.concatenate %111, %112 in 1 : vector<64x160xf32>, vector<64x96xf32> -> vector<64x256xf32>
    %114 = arith.mulf %110, %113 : vector<64x256xf32>
    %115 = arith.addf %108, %114 : vector<64x256xf32>
    %116 = vector.extract_strided_slice %89 {offsets = [0, 128], sizes = [64, 32], strides = [1, 1]} : vector<64x256xf32> to vector<64x32xf32>
    %cst_32 = arith.constant dense<0.000000e+00> : vector<64x256xf32>
    %117 = tpu.matmul %116, %12, %cst_32 {dimension_numbers = #tpu.dot_dimension_numbers<[1], [0], [0], [1], [0, 0, 1, 1], [], []>} : vector<64x32xf32>, vector<32x256xf32>, vector<64x256xf32> -> vector<64x256xf32>
    %118 = vector.extract_strided_slice %24 {offsets = [0, 128], sizes = [64, 128], strides = [1, 1]} : vector<64x256xf32> to vector<64x128xf32>
    %119 = vector.extract_strided_slice %24 {offsets = [0, 0], sizes = [64, 128], strides = [1, 1]} : vector<64x256xf32> to vector<64x128xf32>
    %120 = tpu.concatenate %118, %119 in 1 : vector<64x128xf32>, vector<64x128xf32> -> vector<64x256xf32>
    %121 = arith.mulf %117, %120 : vector<64x256xf32>
    %122 = arith.addf %115, %121 : vector<64x256xf32>
    %123 = vector.extract_strided_slice %89 {offsets = [0, 160], sizes = [64, 32], strides = [1, 1]} : vector<64x256xf32> to vector<64x32xf32>
    %cst_33 = arith.constant dense<0.000000e+00> : vector<64x256xf32>
    %124 = tpu.matmul %123, %12, %cst_33 {dimension_numbers = #tpu.dot_dimension_numbers<[1], [0], [0], [1], [0, 0, 1, 1], [], []>} : vector<64x32xf32>, vector<32x256xf32>, vector<64x256xf32> -> vector<64x256xf32>
    %125 = vector.extract_strided_slice %24 {offsets = [0, 160], sizes = [64, 96], strides = [1, 1]} : vector<64x256xf32> to vector<64x96xf32>
    %126 = vector.extract_strided_slice %24 {offsets = [0, 0], sizes = [64, 160], strides = [1, 1]} : vector<64x256xf32> to vector<64x160xf32>
    %127 = tpu.concatenate %125, %126 in 1 : vector<64x96xf32>, vector<64x160xf32> -> vector<64x256xf32>
    %128 = arith.mulf %124, %127 : vector<64x256xf32>
    %129 = arith.addf %122, %128 : vector<64x256xf32>
    %130 = vector.extract_strided_slice %89 {offsets = [0, 192], sizes = [64, 32], strides = [1, 1]} : vector<64x256xf32> to vector<64x32xf32>
    %cst_34 = arith.constant dense<0.000000e+00> : vector<64x256xf32>
    %131 = tpu.matmul %130, %12, %cst_34 {dimension_numbers = #tpu.dot_dimension_numbers<[1], [0], [0], [1], [0, 0, 1, 1], [], []>} : vector<64x32xf32>, vector<32x256xf32>, vector<64x256xf32> -> vector<64x256xf32>
    %132 = vector.extract_strided_slice %24 {offsets = [0, 192], sizes = [64, 64], strides = [1, 1]} : vector<64x256xf32> to vector<64x64xf32>
    %133 = vector.extract_strided_slice %24 {offsets = [0, 0], sizes = [64, 192], strides = [1, 1]} : vector<64x256xf32> to vector<64x192xf32>
    %134 = tpu.concatenate %132, %133 in 1 : vector<64x64xf32>, vector<64x192xf32> -> vector<64x256xf32>
    %135 = arith.mulf %131, %134 : vector<64x256xf32>
    %136 = arith.addf %129, %135 : vector<64x256xf32>
    %137 = vector.extract_strided_slice %89 {offsets = [0, 224], sizes = [64, 32], strides = [1, 1]} : vector<64x256xf32> to vector<64x32xf32>
    %cst_35 = arith.constant dense<0.000000e+00> : vector<64x256xf32>
    %138 = tpu.matmul %137, %12, %cst_35 {dimension_numbers = #tpu.dot_dimension_numbers<[1], [0], [0], [1], [0, 0, 1, 1], [], []>} : vector<64x32xf32>, vector<32x256xf32>, vector<64x256xf32> -> vector<64x256xf32>
    %139 = vector.extract_strided_slice %24 {offsets = [0, 224], sizes = [64, 32], strides = [1, 1]} : vector<64x256xf32> to vector<64x32xf32>
    %140 = vector.extract_strided_slice %24 {offsets = [0, 0], sizes = [64, 224], strides = [1, 1]} : vector<64x256xf32> to vector<64x224xf32>
    %141 = tpu.concatenate %139, %140 in 1 : vector<64x32xf32>, vector<64x224xf32> -> vector<64x256xf32>
    %142 = arith.mulf %138, %141 : vector<64x256xf32>
    %143 = arith.addf %136, %142 : vector<64x256xf32>
    %c0_36 = arith.constant 0 : index
    %c1024 = arith.constant 1024 : index
    %144 = vector.load %arg2[%c0_36, %c1024] : memref<256x3072xf32, #tpu.memory_space<vmem>>, vector<256x256xf32>
    %cst_37 = arith.constant dense<0.000000e+00> : vector<64x256xf32>
    %145 = tpu.matmul %143, %144, %cst_37 {dimension_numbers = #tpu.dot_dimension_numbers<[1], [0], [0], [1], [0, 0, 1, 1], [], []>} : vector<64x256xf32>, vector<256x256xf32>, vector<64x256xf32> -> vector<64x256xf32>
    %146 = vector.broadcast %2 : vector<1x256xf32> to vector<64x256xf32>
    %147 = arith.addf %145, %146 : vector<64x256xf32>
    %148 = arith.addf %17, %147 : vector<64x256xf32>
    %cst_38 = arith.constant dense<0.000000e+00> : vector<64x256xf32>
    %149 = tpu.matmul %148, %10, %cst_38 {dimension_numbers = #tpu.dot_dimension_numbers<[1], [0], [0], [1], [0, 0, 1, 1], [], []>} : vector<64x256xf32>, vector<256x256xf32>, vector<64x256xf32> -> vector<64x256xf32>
    %150 = arith.subf %148, %149 : vector<64x256xf32>
    %151 = arith.mulf %150, %150 : vector<64x256xf32>
    %cst_39 = arith.constant dense<0.000000e+00> : vector<64x256xf32>
    %152 = tpu.matmul %151, %10, %cst_39 {dimension_numbers = #tpu.dot_dimension_numbers<[1], [0], [0], [1], [0, 0, 1, 1], [], []>} : vector<64x256xf32>, vector<256x256xf32>, vector<64x256xf32> -> vector<64x256xf32>
    %cst_40 = arith.constant 9.99999974E-6 : f32
    %153 = vector.broadcast %cst_40 : f32 to vector<64x256xf32>
    %154 = arith.addf %152, %153 : vector<64x256xf32>
    %155 = math.rsqrt %154 : vector<64x256xf32>
    %156 = arith.mulf %150, %155 : vector<64x256xf32>
    %157 = vector.broadcast %5 : vector<1x256xf32> to vector<64x256xf32>
    %158 = arith.mulf %156, %157 : vector<64x256xf32>
    %159 = vector.broadcast %6 : vector<1x256xf32> to vector<64x256xf32>
    %160 = arith.addf %158, %159 : vector<64x256xf32>
    %c0_41 = arith.constant 0 : index
    %c1280 = arith.constant 1280 : index
    %161 = vector.load %arg2[%c0_41, %c1280] : memref<256x3072xf32, #tpu.memory_space<vmem>>, vector<256x512xf32>
    %cst_42 = arith.constant dense<0.000000e+00> : vector<64x512xf32>
    %162 = tpu.matmul %160, %161, %cst_42 {dimension_numbers = #tpu.dot_dimension_numbers<[1], [0], [0], [1], [0, 0, 1, 1], [], []>} : vector<64x256xf32>, vector<256x512xf32>, vector<64x512xf32> -> vector<64x512xf32>
    %163 = vector.broadcast %3 : vector<1x512xf32> to vector<64x512xf32>
    %164 = arith.addf %162, %163 : vector<64x512xf32>
    %cst_43 = arith.constant 0.000000e+00 : f32
    %165 = vector.broadcast %cst_43 : f32 to vector<64x512xf32>
    %166 = arith.maximumf %164, %165 : vector<64x512xf32>
    %167 = vector.extract_strided_slice %166 {offsets = [0, 0], sizes = [64, 256], strides = [1, 1]} : vector<64x512xf32> to vector<64x256xf32>
    %c0_44 = arith.constant 0 : index
    %c1792 = arith.constant 1792 : index
    %168 = vector.load %arg2[%c0_44, %c1792] : memref<256x3072xf32, #tpu.memory_space<vmem>>, vector<256x256xf32>
    %cst_45 = arith.constant dense<0.000000e+00> : vector<64x256xf32>
    %169 = tpu.matmul %167, %168, %cst_45 {dimension_numbers = #tpu.dot_dimension_numbers<[1], [0], [0], [1], [0, 0, 1, 1], [], []>} : vector<64x256xf32>, vector<256x256xf32>, vector<64x256xf32> -> vector<64x256xf32>
    %170 = vector.extract_strided_slice %166 {offsets = [0, 256], sizes = [64, 256], strides = [1, 1]} : vector<64x512xf32> to vector<64x256xf32>
    %c0_46 = arith.constant 0 : index
    %c2048 = arith.constant 2048 : index
    %171 = vector.load %arg2[%c0_46, %c2048] : memref<256x3072xf32, #tpu.memory_space<vmem>>, vector<256x256xf32>
    %cst_47 = arith.constant dense<0.000000e+00> : vector<64x256xf32>
    %172 = tpu.matmul %170, %171, %cst_47 {dimension_numbers = #tpu.dot_dimension_numbers<[1], [0], [0], [1], [0, 0, 1, 1], [], []>} : vector<64x256xf32>, vector<256x256xf32>, vector<64x256xf32> -> vector<64x256xf32>
    %173 = arith.addf %169, %172 : vector<64x256xf32>
    %174 = vector.broadcast %4 : vector<1x256xf32> to vector<64x256xf32>
    %175 = arith.addf %173, %174 : vector<64x256xf32>
    %176 = arith.addf %160, %175 : vector<64x256xf32>
    %cst_48 = arith.constant dense<0.000000e+00> : vector<64x256xf32>
    %177 = tpu.matmul %176, %10, %cst_48 {dimension_numbers = #tpu.dot_dimension_numbers<[1], [0], [0], [1], [0, 0, 1, 1], [], []>} : vector<64x256xf32>, vector<256x256xf32>, vector<64x256xf32> -> vector<64x256xf32>
    %178 = arith.subf %176, %177 : vector<64x256xf32>
    %179 = arith.mulf %178, %178 : vector<64x256xf32>
    %cst_49 = arith.constant dense<0.000000e+00> : vector<64x256xf32>
    %180 = tpu.matmul %179, %10, %cst_49 {dimension_numbers = #tpu.dot_dimension_numbers<[1], [0], [0], [1], [0, 0, 1, 1], [], []>} : vector<64x256xf32>, vector<256x256xf32>, vector<64x256xf32> -> vector<64x256xf32>
    %cst_50 = arith.constant 9.99999974E-6 : f32
    %181 = vector.broadcast %cst_50 : f32 to vector<64x256xf32>
    %182 = arith.addf %180, %181 : vector<64x256xf32>
    %183 = math.rsqrt %182 : vector<64x256xf32>
    %184 = arith.mulf %178, %183 : vector<64x256xf32>
    %185 = vector.broadcast %7 : vector<1x256xf32> to vector<64x256xf32>
    %186 = arith.mulf %184, %185 : vector<64x256xf32>
    %187 = vector.broadcast %8 : vector<1x256xf32> to vector<64x256xf32>
    %188 = arith.addf %186, %187 : vector<64x256xf32>
    %c0_51 = arith.constant 0 : index
    %c2304 = arith.constant 2304 : index
    %189 = vector.load %arg2[%c0_51, %c2304] : memref<256x3072xf32, #tpu.memory_space<vmem>>, vector<256x128xf32>
    %cst_52 = arith.constant dense<0.000000e+00> : vector<64x128xf32>
    %190 = tpu.matmul %188, %189, %cst_52 {dimension_numbers = #tpu.dot_dimension_numbers<[1], [0], [0], [1], [0, 0, 1, 1], [], []>} : vector<64x256xf32>, vector<256x128xf32>, vector<64x128xf32> -> vector<64x128xf32>
    %191 = vector.broadcast %9 : vector<1x128xf32> to vector<64x128xf32>
    %192 = arith.addf %190, %191 : vector<64x128xf32>
    %c0_53 = arith.constant 0 : index
    %c0_54 = arith.constant 0 : index
    %193 = vector.load %arg4[%c0_53, %c0_54] : memref<64x128xf32, #tpu.memory_space<vmem>>, vector<64x128xf32>
    tpu.vector_store %arg4[%c0_53, %c0_54], %192 {strides = array<i32>} : memref<64x128xf32, #tpu.memory_space<vmem>>, vector<64x128xf32>,
    return
  }
  func.func @transform_0(%arg0: i32) -> (i32, i32) {
    %c0_i32 = arith.constant 0 : i32
    %c0_i32_0 = arith.constant 0 : i32
    return %arg0, %c0_i32 : i32, i32
  }
  func.func @transform_1(%arg0: i32) -> (i32, i32) {
    %c0_i32 = arith.constant 0 : i32
    %c0_i32_0 = arith.constant 0 : i32
    %c0_i32_1 = arith.constant 0 : i32
    return %c0_i32, %c0_i32_0 : i32, i32
  }
  func.func @transform_2(%arg0: i32) -> (i32, i32) {
    %c0_i32 = arith.constant 0 : i32
    %c0_i32_0 = arith.constant 0 : i32
    %c0_i32_1 = arith.constant 0 : i32
    return %c0_i32, %c0_i32_0 : i32, i32
  }
  func.func @transform_3(%arg0: i32) -> (i32, i32) {
    %c0_i32 = arith.constant 0 : i32
    %c0_i32_0 = arith.constant 0 : i32
    return %arg0, %c0_i32 : i32, i32
  }
}

</mosaic_0001>

<bundles_post_ra>
// kernel: tpu_custom_call.1
= control target key start
LH: loop header
LB: loop body
LE: loop exit
PB: predicated region body
PF: predicated region fallthrough
CT: control target
= control target key end

     0   :  { %8 = vsyncpa [#allocation3], 0  ;;  %s11733_s0 = inlined_call_operand.hbm [shape: f32[256,128], index: 0, kind: input, shape index: {}]   ;;  %s11734_s1 = inlined_call_operand.hbm [shape: f32[256,3072], index: 1, kind: input, shape index: {}]   ;;  %s11735_s2 = inlined_call_operand.hbm [shape: f32[16,768], index: 2, kind: input, shape index: {}]   ;;  %s11736_s3 = inlined_call_operand.hbm [shape: f32[256,128], index: 3, kind: output, shape index: {}]  }
   0x1   :  { %10 = vsyncpa [#allocation3 + $0x1], 0 }
   0x2   :  { %11 = vsyncpa [#allocation6], 0 }
   0x3   :  { %12 = vsyncpa [#allocation4], 0 }
   0x4   :  { %14 = vsyncpa [#allocation4 + $0x1], 0  ;;  %s7657_s12 = smov 0   ;;  %s7659_s13 = smov 0  }
   0x5   :  { %s7661_s14 = smov 0   ;;  %s7663_s15 = smov 0  }
   0x6 LB: > { %s7678_s16 = sadd.s32 4294967295, %s7619_s15   ;;  %s6596_s17 = sadd.s32 4294967294, %s7619_s15   ;;  %s7619_s15 = sphi %s7663_s15, %s12526_s15   ;;  %s7615_s14 = sphi %s7661_s14, %s12525_s14   ;;  %s7611_s13 = sphi %s7659_s13, %s12524_s13   ;;  %s7607_s12 = sphi %s7657_s12, %s12523_s12  }
   0x7   : > { %p40_p0 = scmp.ne.s32.totalorder %s7611_s13, %s7607_s12  ;;  %p11737_p1 = scmp.eq.s32.totalorder %s7678_s16, 0 }
   0x8   : > { %p112_p3 = scmp.eq.s32.totalorder %s6596_s17, 3  ;;  %p6597_p5 = scmp.ge.s32.totalorder %s7619_s15, 1 }
   0x9   : > { %p7687_p4 = por %p11737_p1, %p40_p0  ;;  %p119_p7 = scmp.lt.s32.totalorder %s7619_s15, 5 }
   0xa   : > { %p7692_p6 = por %p112_p3, %p40_p0  ;;  %s7621_s21 = smov [#allocation5]  }
   0xb   : > { %s11952_s18 = scalar_select %p7687_p4, 1, 0 }
   0xc   : > { %s11953_s19 = scalar_select %p7692_p6, 1, 0 }
   0xd   : > { %p7697_p8 = pnand %p6597_p5, %p119_p7  ;;  %s131_s22 = sshll.u32 %s7621_s21, 4  ;;  %s132_s22 = int_to_ptr.vmem [resolvable:$true] %s131_s22 }
   0xe   : > { %s7622_s24 = smov [#allocation7]   ;;  %s7482_s26 = scalar_lea.vmem %s132_s22, 98304 }
   0xf   : > { %s11954_s20 = scalar_select %p7697_p8, 1, 0 }
  0x10   : > { %p7196_p9 = pneg %p7697_p8  ;;  %s144_s25 = sshll.u32 %s7622_s24, 4  ;;  %s145_s25 = int_to_ptr.vmem [resolvable:$true] %s144_s25 }
  0x11   : > { %p7483_p12 = scmp.ne.s32.totalorder %s132_s22, %s7482_s26  ;;  %p7490_p3 = scmp.lt.s32.totalorder %s132_s22, %s132_s22 }
  0x12   : > { %p7705_p10 = pnand %p7196_p9, %p11737_p1  ;;  %p7491_p5 = scmp.lt.s32.totalorder %s7482_s26, %s7482_s26 }
  0x14   : > { %p7473_p11 = pneg %p7705_p10  ;;  %p7492_p7 = por %p7491_p5, %p7490_p3 }
  0x16   : > { %p7485_p13 = pnand %p7483_p12, %p7473_p11 }
  0x18   : > { %p7486_p0 = pneg %p7485_p13 }
  0x1a   : > { %p7493_p9 = pnand %p7492_p7, %p7486_p0 }
  0x1c   : > { %7496 = shalt.err (!%p7493_p9)
}
  0x1d   : > { %s7623_s27 = smov 3072   ;;  %s7624_s28 = smov 192  }
  0x1e   : > { %7199 = dma.hbm_to_vmem [thread:$0]  (!%p7705_p10), %s11734_s1, 98304, %s132_s22, [#allocation6], %s7623_s27, %s7623_s27, %s7624_s28  }
  0x1f   : > { %s7508_s4 = scalar_lea.vmem %s145_s25, 1536  ;;  %p7516_p2 = scmp.lt.s32.totalorder %s145_s25, %s145_s25 }
  0x20   : > { %p7509_p1 = scmp.ne.s32.totalorder %s145_s25, %s7508_s4  ;;  %p7517_p6 = scmp.lt.s32.totalorder %s7508_s4, %s7508_s4 }
  0x22   : > { %p7511_p12 = pnand %p7509_p1, %p7473_p11  ;;  %p7518_p3 = por %p7517_p6, %p7516_p2 }
  0x24   : > { %p7512_p13 = pneg %p7511_p12 }
  0x26   : > { %p7519_p0 = pnand %p7518_p3, %p7512_p13 }
  0x28   : > { %7522 = shalt.err (!%p7519_p0)
}
  0x29   : > { %s7625_s5 = smov 768   ;;  %s7626_s6 = smov 48  }
  0x2a   : > { %7202 = dma.hbm_to_vmem [thread:$0]  (!%p7705_p10), %s11735_s2, 1536, %s145_s25, [#allocation6], %s7625_s5, %s7625_s5, %s7626_s6  }
  0x2b   : > { %s7728_s9 = sadd.s32 1, %s7619_s15   ;;  %s27_s11 = sadd.s32 1, %s7615_s14 }
  0x2c   : > { %s24_s10 = ssub.s32 %s7619_s15, %s7728_s9  ;;  %p34_p2 = scmp.ne.s32.totalorder %s7615_s14, %s7611_s13 }
  0x2d   : > { %p25_p1 = scmp.eq.s32.totalorder %s24_s10, 0  ;;  %p35_p6 = scmp.eq.s32.totalorder %s7619_s15, 0 }
  0x2e   : > { %p11956_p5 = scmp.eq.s32.totalorder %s7678_s16, 3  ;;  %p7213_p9 = scmp.lt.s32.totalorder %s7619_s15, 4 }
  0x2f   : > { %s7737_s17 = scalar_select %p25_p1, %s7615_s14, %s27_s11  }
  0x30   : > { %p36_p11 = por %p35_p6, %p34_p2  ;;  %p7741_p7 = por %p11956_p5, %p34_p2 }
  0x31   : > { %s158_s22 = sand.u32 1, %s7615_s14   ;;  %s6678_s24 = sshll.u32 %s7619_s15, 10 }
  0x32   : > { %s11957_s21 = scalar_select %p7741_p7, 1, 0 }
  0x33   : > { %s6601_s23 = sshll.u32 %s158_s22, 6  ;;  %s7751_s27 = scalar_lea.hbm %s11733_s0, %s6678_s24 }
  0x34   : > { %s162_s28 = scalar_lea.vmem [#allocation2], %s6601_s23  ;;  %p7755_p10 = pnand %p7213_p9, %p36_p11 }
  0x35   : > { %s169_s29 = sshll.u32 %s162_s28, 4  ;;  %s7759_s4 = scalar_lea.sflag [#allocation3], %s158_s22  ;;  %s7753_s29 = int_to_ptr.vmem [resolvable:$true] %s169_s29 }
  0x36   : > { %s7523_s5 = scalar_lea.hbm %s7751_s27, 1024  ;;  %p7525_p13 = pneg %p7755_p10 }
  0x37   : > { %p7524_p12 = scmp.ne.s32.totalorder %s7751_s27, %s7523_s5  ;;  %s7528_s8 = scalar_lea.hbm %s11733_s0, 4096 }
  0x38   : > { %p7529_p1 = scmp.lt.s32.totalorder %s7751_s27, %s11733_s0  ;;  %p7530_p2 = scmp.lt.s32.totalorder %s7528_s8, %s7523_s5 }
  0x39   : > { %p7526_p3 = pnand %p7525_p13, %p7524_p12 }
  0x3a   : > { %p7531_p6 = por %p7530_p2, %p7529_p1 }
  0x3b   : > { %p7527_p0 = pneg %p7526_p3 }
  0x3d   : > { %p7532_p11 = pnand %p7531_p6, %p7527_p0 }
  0x3f   : > { %7535 = shalt.err (!%p7532_p11)
}
  0x40   : > { %s7536_s22 = scalar_lea.vmem %s7753_s29, 1024  ;;  %s7627_s23 = smov [#allocation2]  }
  0x41   : > { %p7537_p5 = scmp.ne.s32.totalorder %s7753_s29, %s7536_s22  ;;  %s7541_s24 = sshll.u32 %s7627_s23, 4  ;;  %s7542_s24 = int_to_ptr.vmem [resolvable:$false] %s7541_s24 }
  0x42   : > { %s7543_s25 = scalar_lea.vmem %s7542_s24, 2048  ;;  %p7544_p3 = scmp.lt.s32.totalorder %s7753_s29, %s7542_s24 }
  0x43   : > { %p7539_p9 = pnand %p7537_p5, %p7525_p13  ;;  %p7545_p7 = scmp.lt.s32.totalorder %s7543_s25, %s7536_s22 }
  0x45   : > { %p7540_p12 = pneg %p7539_p9  ;;  %p7546_p4 = por %p7545_p7, %p7544_p3 }
  0x47   : > { %p7547_p8 = pnand %p7546_p4, %p7540_p12 }
  0x49   : > { %7550 = shalt.err (!%p7547_p8)
}
  0x4a   : > { %s7628_s26 = smov 128   ;;  %s7629_s28 = smov 8  }
  0x4b   : > { %7206 = dma.hbm_to_vmem [thread:$0]  (!%p7755_p10), %s7751_s27, 1024, %s7753_s29, %s7759_s4, %s7628_s26, %s7628_s26, %s7629_s28  }
  0x4c   : > { %p11959_p13 = scmp.ne.s32.totalorder %s11954_s20, 0 }
  0x4e   : > { %181 = sbr.rel (%p11959_p13) target bundleno = 3762 (0xeb2), region = 32 }
  0x53   : > { %s7783_s5 = sand.u32 1, %s7611_s13   ;;  %p11960_p4 = scmp.ne.s32.totalorder %s11952_s18, 0 }
  0x54   : > { %s6605_s6 = sshll.u32 %s7783_s5, 6  ;;  %s184_s7 = scalar_lea.sflag [#allocation3], %s7783_s5 }
  0x55   : > { %s7789_s8 = scalar_lea.vmem [#allocation2], %s6605_s6 }
  0x56   : > { %7594 = dma.done.wait (%p11960_p4), %s184_s7, 1024  }
  0x57   : > { %7596 = vsyncadd (%p11960_p4), %s184_s7, 4294966272  ;;  %p11961_p8 = scmp.eq.s32.totalorder %s7678_s16, 0 }
  0x59   : > { %7598 = dma.done.wait (%p11961_p8), [#allocation6], 99840   ;;  %p11962_p7 = pmov %p11961_p8 }
  0x5a   : > { %v11742_v0 = vmov 0.0   ;;  %v383_v1 = vld [vmem:[#allocation5 + $0xb48] sm:$0xff]  ;;  %v382_v2 = vld [vmem:[#allocation5 + $0xb40] sm:$0xff]  ;;  %v599_v17 = vld [vmem:[#allocation5 + $0xb58] sm:$0xff]  ;;  %s7631_s18 = smov 96   ;;  %s7632_s20 = smov 64  }
  0x5b   : > { %7600 = vsyncadd (%p11962_p7), [#allocation6], 4294867456  ;;  %459 = vmatprep.mubr.f32.mxu0 %v11742_v0  ;;  %v381_v3 = vld [vmem:[#allocation5 + $0xa88] sm:$0xff]  ;;  %395 = vmatprep.subr.mxu0 %v383_v1  ;;  %v380_v4 = vld [vmem:[#allocation5 + $0xa80] sm:$0xff]  ;;  %s7633_s27 = smov 32   ;;  %vm1433_vm0 = vcmask 523264  }
  0x5c   : > { %396 = vmatpush1.msra.mxu0 %v382_v2  ;;  %v379_v5 = vld [vmem:[#allocation5 + $0x9c8] sm:$0xff]  ;;  %v378_v6 = vld [vmem:[#allocation5 + $0x9c0] sm:$0xff]  ;;  %v598_v18 = vld [vmem:[#allocation5 + $0xb50] sm:$0xff]  ;;  %731 = vmatprep.subr.mxu1 %v599_v17  ;;  %vm1239_vm1 = vcmask 785408   ;;  %vm1627_vm2 = vcmask 261120   ;;  %s11674_s29 = scalar_lea.vmem [#allocation8], %s6605_s6 }
  0x5d   : > { %397 = vmatprep.subr.mxu0 %v381_v3  ;;  %v377_v7 = vld [vmem:[#allocation5 + $0x908] sm:$0xff]  ;;  %v376_v8 = vld [vmem:[#allocation5 + $0x900] sm:$0xff]  ;;  %v593_v20 = vld [vmem:[#allocation5 + $0xa98] sm:$0xff]  ;;  %732 = vmatpush1.msra.mxu1 %v598_v18  ;;  %s6504_s30 = sshll.u32 %s11674_s29, 4  ;;  %s6679_s4 = sshll.u32 %s7678_s16, 10  ;;  %s11684_s30 = int_to_ptr.vmem [resolvable:$true] %s6504_s30 }
  0x5e   : > { %398 = vmatpush1.msra.mxu0 %v380_v4  ;;  %v375_v9 = vld [vmem:[#allocation5 + $0x848] sm:$0xff]  ;;  %v374_v10 = vld [vmem:[#allocation5 + $0x840] sm:$0xff]  ;;  %v592_v22 = vld [vmem:[#allocation5 + $0xa90] sm:$0xff]  ;;  %733 = vmatprep.subr.mxu1 %v593_v20  ;;  %s11690_s22 = scalar_lea.hbm %s11736_s3, %s6679_s4  ;;  %s6491_s23 = scalar_lea.sflag [#allocation4], %s7783_s5 }
  0x5f   : > { %399 = vmatprep.subr.mxu0 %v379_v5  ;;  %v373_v11 = vld [vmem:[#allocation5 + $0x788] sm:$0xff]  ;;  %v372_v12 = vld [vmem:[#allocation5 + $0x780] sm:$0xff]  ;;  %v587_v23 = vld [vmem:[#allocation5 + $0x9d8] sm:$0xff]  ;;  %734 = vmatpush1.msra.mxu1 %v592_v22  ;;  %s7551_s24 = scalar_lea.vmem %s11684_s30, 1024  ;;  %p12521_p0 = scmp.ne.s32.totalorder %s11957_s21, 0 }
  0x60   : > { %400 = vmatpush1.msra.mxu0 %v378_v6  ;;  %v371_v13 = vld [vmem:[#allocation5 + $0x6c8] sm:$0xff]  ;;  %v370_v14 = vld [vmem:[#allocation5 + $0x6c0] sm:$0xff]  ;;  %v586_v25 = vld [vmem:[#allocation5 + $0x9d0] sm:$0xff]  ;;  %735 = vmatprep.subr.mxu1 %v587_v23  ;;  %p7552_p10 = scmp.ne.s32.totalorder %s11684_s30, %s7551_s24  ;;  %s7634_s16 = smov [#allocation8]  }
  0x61   : > { %401 = vmatprep.subr.mxu0 %v377_v7  ;;  %v369_v15 = vld [vmem:[#allocation5 + $0x608] sm:$0xff]  ;;  %v368_v16 = vld [vmem:[#allocation5 + $0x600] sm:$0xff]  ;;  %v581_v27 = vld [vmem:[#allocation5 + $0x918] sm:$0xff]  ;;  %736 = vmatpush1.msra.mxu1 %v586_v25  ;;  %s7555_s25 = sshll.u32 %s7634_s16, 4  ;;  %s7556_s25 = int_to_ptr.vmem [resolvable:$false] %s7555_s25 }
  0x62   : > { %402 = vmatpush1.msra.mxu0 %v376_v8  ;;  %v367_v19 = vld [vmem:[#allocation5 + $0x548] sm:$0xff]  ;;  %v366_v21 = vld [vmem:[#allocation5 + $0x540] sm:$0xff]  ;;  %v580_v29 = vld [vmem:[#allocation5 + $0x910] sm:$0xff]  ;;  %737 = vmatprep.subr.mxu1 %v581_v27  ;;  %p7553_p1 = pnand %p7552_p10, %p12521_p0  ;;  %s7557_s26 = scalar_lea.vmem %s7556_s25, 2048 }
  0x63   : > { %403 = vmatprep.subr.mxu0 %v375_v9  ;;  %v365_v24 = vld [vmem:[#allocation5 + $0x488] sm:$0xff]  ;;  %v364_v26 = vld [vmem:[#allocation5 + $0x480] sm:$0xff]  ;;  %v575_v31 = vld [vmem:[#allocation5 + $0x858] sm:$0xff]  ;;  %738 = vmatpush1.msra.mxu1 %v580_v29  ;;  %p7558_p6 = scmp.lt.s32.totalorder %s11684_s30, %s7556_s25  ;;  %p7559_p11 = scmp.lt.s32.totalorder %s7557_s26, %s7551_s24 }
  0x64   : > { %404 = vmatpush1.msra.mxu0 %v374_v10  ;;  %v363_v28 = vld [vmem:[#allocation5 + $0x3c8] sm:$0xff]  ;;  %v362_v30 = vld [vmem:[#allocation5 + $0x3c0] sm:$0xff]  ;;  %v574_v33 = vld [vmem:[#allocation5 + $0x850] sm:$0xff]  ;;  %739 = vmatprep.subr.mxu1 %v575_v31  ;;  %p7554_p2 = pneg %p7553_p1 }
  0x65   : > { %405 = vmatprep.subr.mxu0 %v373_v11  ;;  %v361_v32 = vld [vmem:[#allocation5 + $0x308] sm:$0xff]  ;;  %v360_v34 = vld [vmem:[#allocation5 + $0x300] sm:$0xff]  ;;  %v569_v35 = vld [vmem:[#allocation5 + $0x798] sm:$0xff]  ;;  %740 = vmatpush1.msra.mxu1 %v574_v33  ;;  %p7560_p5 = por %p7559_p11, %p7558_p6 }
  0x66   : > { %406 = vmatpush1.msra.mxu0 %v372_v12  ;;  %v359_v36 = vld [vmem:[#allocation5 + $0x248] sm:$0xff]  ;;  %v568_v37 = vld [vmem:[#allocation5 + $0x790] sm:$0xff]  ;;  %v358_v38 = vld [vmem:[#allocation5 + $0x240] sm:$0xff]  ;;  %741 = vmatprep.subr.mxu1 %v569_v35 }
  0x67   : > { %407 = vmatprep.subr.mxu0 %v371_v13  ;;  %v563_v39 = vld [vmem:[#allocation5 + $0x6d8] sm:$0xff]  ;;  %v357_v40 = vld [vmem:[#allocation5 + $0x188] sm:$0xff]  ;;  %v562_v41 = vld [vmem:[#allocation5 + $0x6d0] sm:$0xff]  ;;  %742 = vmatpush1.msra.mxu1 %v568_v37  ;;  %p7561_p9 = pnand %p7560_p5, %p7554_p2 }
  0x68   : > { %408 = vmatpush1.msra.mxu0 %v370_v14  ;;  %v356_v42 = vld [vmem:[#allocation5 + $0x180] sm:$0xff]  ;;  %v557_v43 = vld [vmem:[#allocation5 + $0x618] sm:$0xff]  ;;  %v355_v44 = vld [vmem:[#allocation5 + $0xc8] sm:$0xff]  ;;  %743 = vmatprep.subr.mxu1 %v563_v39 }
  0x69   : > { %409 = vmatprep.subr.mxu0 %v369_v15  ;;  %v556_v45 = vld [vmem:[#allocation5 + $0x610] sm:$0xff]  ;;  %v354_v46 = vld [vmem:[#allocation5 + $0xc0] sm:$0xff]  ;;  %744 = vmatpush1.msra.mxu1 %v562_v41  ;;  %v551_v47 = vld [vmem:[#allocation5 + $0x558] sm:$0xff] }
  0x6a   : > { %410 = vmatpush1.msra.mxu0 %v368_v16  ;;  %v353_v48 = vld [vmem:[#allocation5 + $0x8] sm:$0xff]  ;;  %745 = vmatprep.subr.mxu1 %v557_v43  ;;  %v550_v49 = vld [vmem:[#allocation5 + $0x550] sm:$0xff]  ;;  %v352_v50 = vld [vmem:[#allocation5] sm:$0xff] }
  0x6b   : > { %411 = vmatprep.subr.mxu0 %v367_v19  ;;  %746 = vmatpush1.msra.mxu1 %v556_v45  ;;  %v545_v51 = vld [vmem:[#allocation5 + $0x498] sm:$0xff]  ;;  %v344_v52 = vld [vmem:[%s7789_s8] sm:$0xff]  ;;  %v601_v53 = vld [vmem:[#allocation5 + $0xb68] sm:$0xff] }
  0x6c   : > { %412 = vmatpush1.msra.mxu0 %v366_v21  ;;  %747 = vmatprep.subr.mxu1 %v551_v47  ;;  %v600_v54 = vld [vmem:[#allocation5 + $0xb60] sm:$0xff]  ;;  %v595_v55 = vld [vmem:[#allocation5 + $0xaa8] sm:$0xff]  ;;  %v544_v56 = vld [vmem:[#allocation5 + $0x490] sm:$0xff] }
  0x6d   : > { %413 = vmatprep.subr.mxu0 %v365_v24  ;;  %748 = vmatpush1.msra.mxu1 %v550_v49  ;;  %v594_v57 = vld [vmem:[#allocation5 + $0xaa0] sm:$0xff]  ;;  %v539_v58 = vld [vmem:[#allocation5 + $0x3d8] sm:$0xff]  ;;  %v345_v59 = vld [vmem:[%s7789_s8 + $0x8] sm:$0xff] }
  0x6e   : > { %414 = vmatpush1.msra.mxu0 %v364_v26  ;;  %749 = vmatprep.subr.mxu1 %v545_v51  ;;  %v589_v60 = vld [vmem:[#allocation5 + $0x9e8] sm:$0xff]  ;;  %v588_v61 = vld [vmem:[#allocation5 + $0x9e0] sm:$0xff]  ;;  %v538_v63 = vld [vmem:[#allocation5 + $0x3d0] sm:$0xff] }
  0x6f   : > { %415 = vmatprep.subr.mxu0 %v363_v28  ;;  %750 = vmatpush1.msra.mxu1 %v544_v56  ;;  %v583_v62 = vld [vmem:[#allocation5 + $0x928] sm:$0xff]  ;;  %v582_v1 = vld [vmem:[#allocation5 + $0x920] sm:$0xff]  ;;  %v533_v2 = vld [vmem:[#allocation5 + $0x318] sm:$0xff] }
  0x70   : > { %416 = vmatpush1.msra.mxu0 %v362_v30  ;;  %751 = vmatprep.subr.mxu1 %v539_v58  ;;  %v346_v3 = vld [vmem:[%s7789_s8 + $0x10] sm:$0xff]  ;;  %v577_v4 = vld [vmem:[#allocation5 + $0x868] sm:$0xff]  ;;  %v576_v5 = vld [vmem:[#allocation5 + $0x860] sm:$0xff] }
  0x71   : > { %417 = vmatprep.subr.mxu0 %v361_v32  ;;  %752 = vmatpush1.msra.mxu1 %v538_v63  ;;  %v571_v6 = vld [vmem:[#allocation5 + $0x7a8] sm:$0xff]  ;;  %v532_v7 = vld [vmem:[#allocation5 + $0x310] sm:$0xff]  ;;  %v570_v8 = vld [vmem:[#allocation5 + $0x7a0] sm:$0xff] }
  0x72   : > { %418 = vmatpush1.msra.mxu0 %v360_v34  ;;  %753 = vmatprep.subr.mxu1 %v533_v2  ;;  %v527_v9 = vld [vmem:[#allocation5 + $0x258] sm:$0xff]  ;;  %v565_v11 = vld [vmem:[#allocation5 + $0x6e8] sm:$0xff]  ;;  %v564_v12 = vld [vmem:[#allocation5 + $0x6e0] sm:$0xff] }
  0x73   : > { %419 = vmatprep.subr.mxu0 %v359_v36  ;;  %v347_v10 = vld [vmem:[%s7789_s8 + $0x18] sm:$0xff]  ;;  %754 = vmatpush1.msra.mxu1 %v532_v7  ;;  %v559_v13 = vld [vmem:[#allocation5 + $0x628] sm:$0xff]  ;;  %v526_v14 = vld [vmem:[#allocation5 + $0x250] sm:$0xff] }
  0x74   : > { %420 = vmatpush1.msra.mxu0 %v358_v38  ;;  %755 = vmatprep.subr.mxu1 %v527_v9  ;;  %v558_v15 = vld [vmem:[#allocation5 + $0x620] sm:$0xff]  ;;  %v521_v16 = vld [vmem:[#allocation5 + $0x198] sm:$0xff]  ;;  %v553_v18 = vld [vmem:[#allocation5 + $0x568] sm:$0xff] }
  0x75   : > { %421 = vmatprep.subr.mxu0 %v357_v40  ;;  %v348_v17 = vld [vmem:[%s7789_s8 + $0x20] sm:$0xff]  ;;  %756 = vmatpush1.msra.mxu1 %v526_v14  ;;  %v547_v20 = vld [vmem:[#allocation5 + $0x4a8] sm:$0xff]  ;;  %v520_v21 = vld [vmem:[#allocation5 + $0x190] sm:$0xff] }
  0x76   : > { %422 = vmatpush1.msra.mxu0 %v356_v42  ;;  %v552_v19 = vld [vmem:[#allocation5 + $0x560] sm:$0xff]  ;;  %757 = vmatprep.subr.mxu1 %v521_v16  ;;  %v515_v23 = vld [vmem:[#allocation5 + $0xd8] sm:$0xff]  ;;  %v349_v24 = vld [vmem:[%s7789_s8 + $0x28] sm:$0xff] }
  0x77   : > { %423 = vmatprep.subr.mxu0 %v355_v44  ;;  %v546_v22 = vld [vmem:[#allocation5 + $0x4a0] sm:$0xff]  ;;  %v541_v25 = vld [vmem:[#allocation5 + $0x3e8] sm:$0xff]  ;;  %758 = vmatpush1.msra.mxu1 %v520_v21  ;;  %v514_v28 = vld [vmem:[#allocation5 + $0xd0] sm:$0xff] }
  0x78   : > { %424 = vmatpush1.msra.mxu0 %v354_v46  ;;  %v540_v26 = vld [vmem:[#allocation5 + $0x3e0] sm:$0xff]  ;;  %v535_v27 = vld [vmem:[#allocation5 + $0x328] sm:$0xff]  ;;  %759 = vmatprep.subr.mxu1 %v515_v23  ;;  %v509_v30 = vld [vmem:[#allocation5 + $0x18] sm:$0xff] }
  0x79   : > { %425 = vmatprep.subr.mxu0 %v353_v48  ;;  %v534_v29 = vld [vmem:[#allocation5 + $0x320] sm:$0xff]  ;;  %v350_v31 = vld [vmem:[%s7789_s8 + $0x30] sm:$0xff]  ;;  %v529_v32 = vld [vmem:[#allocation5 + $0x268] sm:$0xff]  ;;  %760 = vmatpush1.msra.mxu1 %v514_v28 }
  0x7a   : > { %426 = vmatpush1.msra.mxu0 %v352_v50  ;;  %v528_v33 = vld [vmem:[#allocation5 + $0x260] sm:$0xff]  ;;  %v523_v34 = vld [vmem:[#allocation5 + $0x1a8] sm:$0xff]  ;;  %761 = vmatprep.subr.mxu1 %v509_v30  ;;  %v508_v35 = vld [vmem:[#allocation5 + $0x10] sm:$0xff] }
  0x7b   : > { %460 = vmatmul.mubr.f32.vlgmr.msra.gmra.mxu0 %v344_v52  ;;  %844 = vmatprep.subr.mxu0 %v601_v53  ;;  %v522_v36 = vld [vmem:[#allocation5 + $0x1a0] sm:$0xff]  ;;  %v695_v37 = vld [vmem:[#allocation5 + $0x1758] sm:$0xff]  ;;  %v517_v39 = vld [vmem:[#allocation5 + $0xe8] sm:$0xff] }
  0x7c   : > { %465 = vmatprep.mubr.f32.mxu0 %v11742_v0  ;;  %845 = vmatpush1.msra.mxu0 %v600_v54  ;;  %v351_v38 = vld [vmem:[%s7789_s8 + $0x38] sm:$0xff]  ;;  %v516_v40 = vld [vmem:[#allocation5 + $0xe0] sm:$0xff]  ;;  %v694_v41 = vld [vmem:[#allocation5 + $0x1750] sm:$0xff] }
  0x7d   : > { %846 = vmatprep.subr.mxu0 %v595_v55  ;;  %762 = vmatpush1.msra.mxu1 %v508_v35  ;;  %v511_v42 = vld [vmem:[#allocation5 + $0x28] sm:$0xff]  ;;  %v689_v43 = vld [vmem:[#allocation5 + $0x1698] sm:$0xff]  ;;  %v510_v44 = vld [vmem:[#allocation5 + $0x20] sm:$0xff] }
  0x7e   : > { %847 = vmatpush1.msra.mxu0 %v594_v57  ;;  %763 = vmatprep.subr.mxu1 %v695_v37  ;;  %v688_v45 = vld [vmem:[#allocation5 + $0x1690] sm:$0xff]  ;;  %v697_v46 = vld [vmem:[#allocation5 + $0x1768] sm:$0xff]  ;;  %v683_v47 = vld [vmem:[#allocation5 + $0x15d8] sm:$0xff] }
  0x7f   : > { %466 = vmatmul.mubr.f32.gmra.mxu0 %v345_v59  ;;  %848 = vmatprep.subr.mxu0 %v589_v60  ;;  %v696_v48 = vld [vmem:[#allocation5 + $0x1760] sm:$0xff]  ;;  %v682_v49 = vld [vmem:[#allocation5 + $0x15d0] sm:$0xff]  ;;  %v691_v50 = vld [vmem:[#allocation5 + $0x16a8] sm:$0xff] }
  0x80   : > { %471 = vmatprep.mubr.f32.mxu0 %v11742_v0  ;;  %849 = vmatpush1.msra.mxu0 %v588_v61  ;;  %v677_v51 = vld [vmem:[#allocation5 + $0x1518] sm:$0xff]  ;;  %v690_v52 = vld [vmem:[#allocation5 + $0x16a0] sm:$0xff]  ;;  %v676_v53 = vld [vmem:[#allocation5 + $0x1510] sm:$0xff] }
  0x81   : > { %850 = vmatprep.subr.mxu0 %v583_v62  ;;  %764 = vmatpush2.msra.mxu1 %v694_v41  ;;  %v685_v54 = vld [vmem:[#allocation5 + $0x15e8] sm:$0xff]  ;;  %v671_v55 = vld [vmem:[#allocation5 + $0x1458] sm:$0xff]  ;;  %v684_v56 = vld [vmem:[#allocation5 + $0x15e0] sm:$0xff] }
  0x82   : > { %851 = vmatpush1.msra.mxu0 %v582_v1  ;;  %765 = vmatprep.subr.mxu1 %v689_v43  ;;  %v670_v57 = vld [vmem:[#allocation5 + $0x1450] sm:$0xff]  ;;  %v679_v58 = vld [vmem:[#allocation5 + $0x1528] sm:$0xff]  ;;  %v665_v59 = vld [vmem:[#allocation5 + $0x1398] sm:$0xff] }
  0x83   : > { %472 = vmatmul.mubr.f32.gmra.mxu0 %v346_v3  ;;  %852 = vmatprep.subr.mxu0 %v577_v4  ;;  %v678_v60 = vld [vmem:[#allocation5 + $0x1520] sm:$0xff]  ;;  %v664_v61 = vld [vmem:[#allocation5 + $0x1390] sm:$0xff]  ;;  %v673_v62 = vld [vmem:[#allocation5 + $0x1468] sm:$0xff] }
  0x84   : > { %477 = vmatprep.mubr.f32.mxu0 %v11742_v0  ;;  %853 = vmatpush1.msra.mxu0 %v576_v5  ;;  %v659_v63 = vld [vmem:[#allocation5 + $0x12d8] sm:$0xff]  ;;  %v672_v1 = vld [vmem:[#allocation5 + $0x1460] sm:$0xff]  ;;  %v658_v2 = vld [vmem:[#allocation5 + $0x12d0] sm:$0xff] }
  0x85   : > { %854 = vmatprep.subr.mxu0 %v571_v6  ;;  %766 = vmatpush2.msra.mxu1 %v688_v45  ;;  %v667_v3 = vld [vmem:[#allocation5 + $0x13a8] sm:$0xff]  ;;  %v653_v4 = vld [vmem:[#allocation5 + $0x1218] sm:$0xff]  ;;  %v666_v5 = vld [vmem:[#allocation5 + $0x13a0] sm:$0xff]  ;;  %v385_v45 = vlaneseq }
  0x86   : > { %855 = vmatpush1.msra.mxu0 %v570_v8  ;;  %767 = vmatprep.subr.mxu1 %v683_v47  ;;  %v652_v6 = vld [vmem:[#allocation5 + $0x1210] sm:$0xff]  ;;  %v661_v7 = vld [vmem:[#allocation5 + $0x12e8] sm:$0xff]  ;;  %v647_v8 = vld [vmem:[#allocation5 + $0x1158] sm:$0xff] }
  0x87   : > { %478 = vmatmul.mubr.f32.gmra.mxu0 %v347_v10  ;;  %856 = vmatprep.subr.mxu0 %v565_v11  ;;  %v660_v9 = vld [vmem:[#allocation5 + $0x12e0] sm:$0xff]  ;;  %v646_v10 = vld [vmem:[#allocation5 + $0x1150] sm:$0xff]  ;;  %v655_v11 = vld [vmem:[#allocation5 + $0x1228] sm:$0xff] }
  0x88   : > { %483 = vmatprep.mubr.f32.mxu0 %v11742_v0  ;;  %857 = vmatpush1.msra.mxu0 %v564_v12  ;;  %v641_v12 = vld [vmem:[#allocation5 + $0x1098] sm:$0xff]  ;;  %v640_v14 = vld [vmem:[#allocation5 + $0x1090] sm:$0xff]  ;;  %v642_v21 = vld [vmem:[#allocation5 + $0x10a0] sm:$0xff] }
  0x89   : > { %858 = vmatprep.subr.mxu0 %v559_v13  ;;  %768 = vmatpush2.msra.mxu1 %v682_v49  ;;  %v654_v13 = vld [vmem:[#allocation5 + $0x1220] sm:$0xff]  ;;  %v635_v16 = vld [vmem:[#allocation5 + $0xfd8] sm:$0xff]  ;;  %v637_v23 = vld [vmem:[#allocation5 + $0xfe8] sm:$0xff] }
  0x8a   : > { %859 = vmatpush1.msra.mxu0 %v558_v15  ;;  %769 = vmatprep.subr.mxu1 %v677_v51  ;;  %v649_v15 = vld [vmem:[#allocation5 + $0x1168] sm:$0xff]  ;;  %v617_v28 = vld [vmem:[#allocation5 + $0xd98] sm:$0xff]  ;;  %v618_v35 = vld [vmem:[#allocation5 + $0xda0] sm:$0xff] }
  0x8b   : > { %484 = vmatmul.mubr.f32.gmra.mxu0 %v348_v17  ;;  %860 = vmatprep.subr.mxu0 %v553_v18  ;;  %v648_v17 = vld [vmem:[#allocation5 + $0x1160] sm:$0xff]  ;;  %v634_v18 = vld [vmem:[#allocation5 + $0xfd0] sm:$0xff]  ;;  %v625_v30 = vld [vmem:[#allocation5 + $0xe68] sm:$0xff] }
  0x8c   : > { %489 = vmatprep.mubr.f32.mxu0 %v11742_v0  ;;  %861 = vmatpush1.msra.mxu0 %v552_v19  ;;  %v643_v19 = vld [vmem:[#allocation5 + $0x10a8] sm:$0xff]  ;;  %v603_v43 = vld [vmem:[#allocation5 + $0xb78] sm:$0xff] }
  0x8d   : > { %862 = vmatprep.subr.mxu0 %v547_v20  ;;  %770 = vmatpush2.msra.mxu1 %v676_v53  ;;  %v629_v20 = vld [vmem:[#allocation5 + $0xf18] sm:$0xff]  ;;  %v613_v37 = vld [vmem:[#allocation5 + $0xce8] sm:$0xff] }
  0x8e   : > { %863 = vmatpush1.msra.mxu0 %v546_v22  ;;  %771 = vmatprep.subr.mxu1 %v671_v55  ;;  %v628_v22 = vld [vmem:[#allocation5 + $0xf10] sm:$0xff]  ;;  %v607_v41 = vld [vmem:[#allocation5 + $0xc28] sm:$0xff] }
  0x8f   : > { %490 = vmatmul.mubr.f32.gmra.mxu0 %v349_v24  ;;  %864 = vmatprep.subr.mxu0 %v541_v25  ;;  %v623_v24 = vld [vmem:[#allocation5 + $0xe58] sm:$0xff]  ;;  %v636_v25 = vld [vmem:[#allocation5 + $0xfe0] sm:$0xff] }
  0x90   : > { %495 = vmatprep.mubr.f32.mxu0 %v11742_v0  ;;  %865 = vmatpush1.msra.mxu0 %v540_v26  ;;  %v622_v26 = vld [vmem:[#allocation5 + $0xe50] sm:$0xff]  ;;  %v220_v49 = vld [vmem:[#allocation7] ss:$8 sm:$0x3] }
  0x91   : > { %866 = vmatprep.subr.mxu0 %v535_v27  ;;  %772 = vmatpush2.msra.mxu1 %v670_v57  ;;  %v631_v27 = vld [vmem:[#allocation5 + $0xf28] sm:$0xff]  ;;  %v602_v57 = vld [vmem:[#allocation5 + $0xb70] sm:$0xff] }
  0x92   : > { %867 = vmatpush1.msra.mxu0 %v534_v29  ;;  %773 = vmatprep.subr.mxu1 %v665_v59  ;;  %v630_v29 = vld [vmem:[#allocation5 + $0xf20] sm:$0xff]  ;;  %v597_v59 = vld [vmem:[#allocation5 + $0xab8] sm:$0xff] }
  0x93   : > { %496 = vmatmul.mubr.f32.gmra.mxu0 %v350_v31  ;;  %868 = vmatprep.subr.mxu0 %v529_v32  ;;  %v624_v31 = vld [vmem:[#allocation5 + $0xe60] sm:$0xff]  ;;  %v616_v32 = vld [vmem:[#allocation5 + $0xd90] sm:$0xff] }
  0x94   : > { %501 = vmatprep.mubr.f32.mxu0 %v11742_v0  ;;  %869 = vmatpush1.msra.mxu0 %v528_v33  ;;  %v619_v33 = vld [vmem:[#allocation5 + $0xda8] sm:$0xff] }
  0x95   : > { %870 = vmatprep.subr.mxu0 %v523_v34  ;;  %774 = vmatpush2.msra.mxu1 %v664_v61  ;;  %v611_v34 = vld [vmem:[#allocation5 + $0xcd8] sm:$0xff] }
  0x96   : > { %871 = vmatpush1.msra.mxu0 %v522_v36  ;;  %775 = vmatprep.subr.mxu1 %v659_v63  ;;  %v610_v36 = vld [vmem:[#allocation5 + $0xcd0] sm:$0xff] }
  0x97   : > { %502 = vmatmul.mubr.f32.gmra.mxu0 %v351_v38  ;;  %872 = vmatprep.subr.mxu0 %v517_v39  ;;  %v605_v38 = vld [vmem:[#allocation5 + $0xc18] sm:$0xff]  ;;  %v612_v39 = vld [vmem:[#allocation5 + $0xce0] sm:$0xff] }
  0x98   : > { %873 = vmatpush1.msra.mxu0 %v516_v40  ;;  %776 = vmatpush2.msra.mxu1 %v658_v2  ;;  %v604_v40 = vld [vmem:[#allocation5 + $0xc10] sm:$0xff]  ;;  %v591_v2 = vld [vmem:[#allocation5 + $0x9f8] sm:$0xff] }
  0x99   : > { %874 = vmatprep.subr.mxu0 %v511_v42  ;;  %777 = vmatprep.subr.mxu1 %v653_v4  ;;  %v606_v42 = vld [vmem:[#allocation5 + $0xc20] sm:$0xff]  ;;  %v590_v4 = vld [vmem:[#allocation5 + $0x9f0] sm:$0xff] }
  0x9a   : > { %875 = vmatpush1.msra.mxu0 %v510_v44  ;;  %778 = vmatpush2.msra.mxu1 %v652_v6  ;;  %v7815_v44 = vld [vmem:[#allocation5 + $0x17e8] sm:$0xff] }
  0x9b   : > { %876 = vmatprep.subr.mxu0 %v697_v46  ;;  %779 = vmatprep.subr.mxu1 %v647_v8  ;;  %v7818_v46 = vshrl.u32 %v385_v45, 7  ;;  %v531_v45 = vld [vmem:[#allocation5 + $0x278] sm:$0xff] }
  0x9c   : > { %877 = vmatpush2.msra.mxu0 %v696_v48  ;;  %780 = vmatpush2.msra.mxu1 %v646_v10  ;;  %v584_v10 = vld [vmem:[#allocation5 + $0x930] sm:$0xff] }
  0x9d   : > { %878 = vmatprep.subr.mxu0 %v691_v50  ;;  %781 = vmatprep.subr.mxu1 %v641_v12  ;;  %11963 = vst [vmem:[#allocation12_spill] sm:$0xff] %v7818_v46  ;;  %v7821_v47 = vsub.s32 1, %v7818_v46  ;;  %v7824_v48 = vsub.s32 0, %v7818_v46  ;;  %v579_v12 = vld [vmem:[#allocation5 + $0x878] sm:$0xff] }
  0x9e   : > { %879 = vmatpush2.msra.mxu0 %v690_v52  ;;  %782 = vmatpush2.msra.mxu1 %v640_v14 }
  0x9f   : > { %880 = vmatprep.subr.mxu0 %v685_v54  ;;  %783 = vmatprep.subr.mxu1 %v635_v16  ;;  %11964 = vst [vmem:[#allocation13_spill] sm:$0xff] %v7821_v47  ;;  %11965 = vst [vmem:[#allocation14_spill] sm:$0xff] %v7824_v48  ;;  %v7827_v50 = vrot.slane %v220_v49, %v7821_v47  ;;  %v7830_v51 = vrot.slane %v220_v49, %v7824_v48  ;;  %v530_v49 = vld [vmem:[#allocation5 + $0x270] sm:$0xff] }
  0xa0   : > { %881 = vmatpush2.msra.mxu0 %v684_v56  ;;  %784 = vmatpush2.msra.mxu1 %v634_v18  ;;  %v572_v18 = vld [vmem:[#allocation5 + $0x7b0] sm:$0xff] }
  0xa1   : > { %882 = vmatprep.subr.mxu0 %v679_v58  ;;  %785 = vmatprep.subr.mxu1 %v629_v20  ;;  %v7838_v58 = vld [vmem:[#allocation5 + $0xbe8] sm:$0xff]  ;;  %v567_v20 = vld [vmem:[#allocation5 + $0x6f8] sm:$0xff] }
  0xa2   : > { %883 = vmatpush2.msra.mxu0 %v678_v60  ;;  %786 = vmatpush2.msra.mxu1 %v628_v22  ;;  %v7842_v60 = vld [vmem:[#allocation5 + $0x1728] sm:$0xff] }
  0xa3   : > { %884 = vmatprep.subr.mxu0 %v673_v62  ;;  %787 = vmatprep.subr.mxu1 %v623_v24  ;;  %v596_v62 = vld [vmem:[#allocation5 + $0xab0] sm:$0xff] }
  0xa4   : > { %885 = vmatpush2.msra.mxu0 %v672_v1  ;;  %788 = vmatpush2.msra.mxu1 %v622_v26  ;;  %v560_v26 = vld [vmem:[#allocation5 + $0x630] sm:$0xff] }
  0xa5   : > { %886 = vmatprep.subr.mxu0 %v667_v3  ;;  %789 = vmatprep.subr.mxu1 %v617_v28  ;;  %v555_v28 = vld [vmem:[#allocation5 + $0x578] sm:$0xff] }
  0xa6   : > { %887 = vmatpush2.msra.mxu0 %v666_v5  ;;  %790 = vmatpush2.msra.mxu1 %v616_v32  ;;  %v7855_v5 = vld [vmem:[#allocation5 + $0xb28] sm:$0xff] }
  0xa7   : > { %888 = vmatprep.subr.mxu0 %v661_v7  ;;  %791 = vmatprep.subr.mxu1 %v611_v34  ;;  %v585_v7 = vld [vmem:[#allocation5 + $0x938] sm:$0xff]  ;;  %v548_v34 = vld [vmem:[#allocation5 + $0x4b0] sm:$0xff] }
  0xa8   : > { %889 = vmatpush2.msra.mxu0 %v660_v9  ;;  %792 = vmatpush2.msra.mxu1 %v610_v36  ;;  %v543_v36 = vld [vmem:[#allocation5 + $0x3f8] sm:$0xff] }
  0xa9   : > { %890 = vmatprep.subr.mxu0 %v655_v11  ;;  %793 = vmatprep.subr.mxu1 %v605_v38 }
  0xaa   : > { %891 = vmatpush2.msra.mxu0 %v654_v13  ;;  %794 = vmatpush2.msra.mxu1 %v604_v40  ;;  %v578_v13 = vld [vmem:[#allocation5 + $0x870] sm:$0xff] }
  0xab   : > { %892 = vmatprep.subr.mxu0 %v649_v15  ;;  %957 = vmatprep.subr.mxu1 %v603_v43  ;;  %v573_v15 = vld [vmem:[#allocation5 + $0x7b8] sm:$0xff] }
  0xac   : > { %893 = vmatpush2.msra.mxu0 %v648_v17 }
  0xad   : > { %894 = vmatprep.subr.mxu0 %v643_v19 }
  0xae   : > { %895 = vmatpush2.msra.mxu0 %v642_v21  ;;  %v566_v21 = vld [vmem:[#allocation5 + $0x6f0] sm:$0xff] }
  0xaf   : > { %896 = vmatprep.subr.mxu0 %v637_v23  ;;  %v561_v23 = vld [vmem:[#allocation5 + $0x638] sm:$0xff] }
  0xb0   : > { %897 = vmatpush2.msra.mxu0 %v636_v25 }
  0xb1   : > { %898 = vmatprep.subr.mxu0 %v631_v27 }
  0xb2   : > { %899 = vmatpush2.msra.mxu0 %v630_v29  ;;  %v554_v29 = vld [vmem:[#allocation5 + $0x570] sm:$0xff] }
  0xb3   : > { %900 = vmatprep.subr.mxu0 %v625_v30 }
  0xb4   : > { %901 = vmatpush2.msra.mxu0 %v624_v31  ;;  %v549_v31 = vld [vmem:[#allocation5 + $0x4b8] sm:$0xff] }
  0xb5   : > { %902 = vmatprep.subr.mxu0 %v619_v33 }
  0xb6   : > { %903 = vmatpush2.msra.mxu0 %v618_v35 }
  0xb7   : > { %904 = vmatprep.subr.mxu0 %v613_v37  ;;  %v542_v37 = vld [vmem:[#allocation5 + $0x3f0] sm:$0xff] }
  0xb8   : > { %905 = vmatpush2.msra.mxu0 %v612_v39  ;;  %v537_v39 = vld [vmem:[#allocation5 + $0x338] sm:$0xff] }
  0xb9   : > { %906 = vmatprep.subr.mxu0 %v607_v41 }
  0xba   : > { %907 = vmatpush2.msra.mxu0 %v606_v42  ;;  %v536_v42 = vld [vmem:[#allocation5 + $0x330] sm:$0xff] }
  0xbb   : > { %6680 = vmatprep.subr.mxu0 %v7815_v44 }
 0x13b   : > { %v461_v52 = vpop.f32.mrf.mxu0 }
 0x13c   : > { %v7836_v55 = vadd.f32 %v461_v52, %v7830_v51 }
 0x13d   : > { %v463_v53 = vpop.f32.mrf.mxu0 }
 0x13e   : > { %v7833_v54 = vadd.f32 %v463_v53, %v7827_v50  ;;  %11967 = vst [vmem:[#allocation16_spill] sm:$0xff] %v7836_v55  ;;  %v525_v53 = vld [vmem:[#allocation5 + $0x1b8] sm:$0xff] }
 0x13f   : > { %v467_v56 = vpop.f32.mrf.mxu0 }
 0x140   : > { %11966 = vst [vmem:[#allocation15_spill] sm:$0xff] %v7833_v54  ;;  %795 = vmatprep.mubr.f32.mxu1 %v7833_v54  ;;  %908 = vmatprep.mubr.f32.mxu0 %v7833_v54  ;;  %v7847_v63 = vadd.f32 %v467_v56, %v7830_v51 }
 0x141   : > { %v469_v61 = vpop.f32.mrf.mxu0  ;;  %796 = vmatmul.mubr.f32.vlgmr.msra.gmra.mxu1 %v7836_v55  ;;  %909 = vmatmul.mubr.f32.vlgmr.msra.gmra.mxu0 %v7836_v55 }
 0x142   : > { %11968 = vst [vmem:[#allocation17_spill] sm:$0xff] %v7847_v63  ;;  %v7850_v1 = vadd.f32 %v469_v61, %v7827_v50  ;;  %958 = vmatpush1.msra.mxu1 %v602_v57  ;;  %6681 = vmatpush3.msra.mxu0 %v7838_v58  ;;  %v519_v61 = vld [vmem:[#allocation5 + $0xf8] sm:$0xff] }
 0x143   : > { %959 = vmatprep.subr.mxu1 %v597_v59  ;;  %v473_v3 = vpop.f32.mrf.mxu0  ;;  %6682 = vmatprep.subr.mxu0 %v7842_v60  ;;  %v524_v59 = vld [vmem:[#allocation5 + $0x1b0] sm:$0xff] }
 0x144   : > { %11969 = vst [vmem:[#allocation18_spill] sm:$0xff] %v7850_v1  ;;  %960 = vmatpush1.msra.mxu1 %v596_v62  ;;  %801 = vmatprep.mubr.f32.mxu1 %v7850_v1  ;;  %v7859_v8 = vadd.f32 %v473_v3, %v7830_v51  ;;  %v518_v62 = vld [vmem:[#allocation5 + $0xf0] sm:$0xff]  ;;  %v699_v3 = vld [vmem:[#allocation5 + $0x1778] sm:$0xff] }
 0x145   : > { %914 = vmatprep.mubr.f32.mxu0 %v7850_v1  ;;  %961 = vmatprep.subr.mxu1 %v591_v2  ;;  %v475_v6 = vpop.f32.mrf.mxu0  ;;  %v513_v2 = vld [vmem:[#allocation5 + $0x38] sm:$0xff] }
 0x146   : > { %11970 = vst [vmem:[#allocation19_spill] sm:$0xff] %v7859_v8  ;;  %v7862_v9 = vadd.f32 %v475_v6, %v7827_v50  ;;  %802 = vmatmul.mubr.f32.gmra.mxu1 %v7847_v63  ;;  %915 = vmatmul.mubr.f32.gmra.mxu0 %v7847_v63  ;;  %v698_v6 = vld [vmem:[#allocation5 + $0x1770] sm:$0xff] }
 0x147   : > { %962 = vmatpush1.msra.mxu1 %v590_v4  ;;  %v479_v11 = vpop.f32.mrf.mxu0  ;;  %6683 = vmatpush3.msra.mxu0 %v7855_v5  ;;  %v7923_v4 = vld [vmem:[#allocation5 + $0xa68] sm:$0xff] }
 0x148   : > { %11971 = vst [vmem:[#allocation20_spill] sm:$0xff] %v7862_v9  ;;  %963 = vmatprep.subr.mxu1 %v585_v7  ;;  %807 = vmatprep.mubr.f32.mxu1 %v7862_v9  ;;  %v7870_v16 = vadd.f32 %v479_v11, %v7830_v51  ;;  %v7926_v7 = vld [vmem:[#allocation5 + $0x15a8] sm:$0xff] }
 0x149   : > { %964 = vmatpush1.msra.mxu1 %v584_v10  ;;  %v481_v14 = vpop.f32.mrf.mxu0  ;;  %920 = vmatprep.mubr.f32.mxu0 %v7862_v9  ;;  %v693_v10 = vld [vmem:[#allocation5 + $0x16b8] sm:$0xff]  ;;  %v7929_v11 = vld [vmem:[#allocation5 + $0x9a8] sm:$0xff] }
 0x14a   : > { %11972 = vst [vmem:[#allocation21_spill] sm:$0xff] %v7870_v16  ;;  %965 = vmatprep.subr.mxu1 %v579_v12  ;;  %v7873_v17 = vadd.f32 %v481_v14, %v7827_v50  ;;  %808 = vmatmul.mubr.f32.gmra.mxu1 %v7859_v8  ;;  %v692_v12 = vld [vmem:[#allocation5 + $0x16b0] sm:$0xff]  ;;  %v687_v14 = vld [vmem:[#allocation5 + $0x15f8] sm:$0xff] }
 0x14b   : > { %966 = vmatpush1.msra.mxu1 %v578_v13  ;;  %v485_v19 = vpop.f32.mrf.mxu0  ;;  %921 = vmatmul.mubr.f32.gmra.mxu0 %v7859_v8  ;;  %v7932_v13 = vld [vmem:[#allocation5 + $0x14e8] sm:$0xff] }
 0x14c   : > { %11973 = vst [vmem:[#allocation22_spill] sm:$0xff] %v7873_v17  ;;  %967 = vmatprep.subr.mxu1 %v573_v15  ;;  %813 = vmatprep.mubr.f32.mxu1 %v7873_v17  ;;  %v7880_v24 = vadd.f32 %v485_v19, %v7830_v51  ;;  %v7935_v15 = vld [vmem:[#allocation5 + $0x8e8] sm:$0xff] }
 0x14d   : > { %968 = vmatpush1.msra.mxu1 %v572_v18  ;;  %v487_v22 = vpop.f32.mrf.mxu0  ;;  %926 = vmatprep.mubr.f32.mxu0 %v7873_v17  ;;  %v686_v18 = vld [vmem:[#allocation5 + $0x15f0] sm:$0xff]  ;;  %v7938_v19 = vld [vmem:[#allocation5 + $0x1428] sm:$0xff] }
 0x14e   : > { %11974 = vst [vmem:[#allocation23_spill] sm:$0xff] %v7880_v24  ;;  %969 = vmatprep.subr.mxu1 %v567_v20  ;;  %v7883_v25 = vadd.f32 %v487_v22, %v7827_v50  ;;  %814 = vmatmul.mubr.f32.gmra.mxu1 %v7870_v16  ;;  %v681_v20 = vld [vmem:[#allocation5 + $0x1538] sm:$0xff]  ;;  %v680_v22 = vld [vmem:[#allocation5 + $0x1530] sm:$0xff] }
 0x14f   : > { %970 = vmatpush1.msra.mxu1 %v566_v21  ;;  %v491_v27 = vpop.f32.mrf.mxu0  ;;  %927 = vmatmul.mubr.f32.gmra.mxu0 %v7870_v16  ;;  %v7941_v21 = vld [vmem:[#allocation5 + $0x828] sm:$0xff] }
 0x150   : > { %11975 = vst [vmem:[#allocation24_spill] sm:$0xff] %v7883_v25  ;;  %971 = vmatprep.subr.mxu1 %v561_v23  ;;  %819 = vmatprep.mubr.f32.mxu1 %v7883_v25  ;;  %v7890_v32 = vadd.f32 %v491_v27, %v7830_v51  ;;  %v7944_v23 = vld [vmem:[#allocation5 + $0x1368] sm:$0xff] }
 0x151   : > { %972 = vmatpush1.msra.mxu1 %v560_v26  ;;  %v493_v30 = vpop.f32.mrf.mxu0  ;;  %932 = vmatprep.mubr.f32.mxu0 %v7883_v25  ;;  %v675_v26 = vld [vmem:[#allocation5 + $0x1478] sm:$0xff]  ;;  %v7947_v27 = vld [vmem:[#allocation5 + $0x768] sm:$0xff] }
 0x152   : > { %11976 = vst [vmem:[#allocation25_spill] sm:$0xff] %v7890_v32  ;;  %973 = vmatprep.subr.mxu1 %v555_v28  ;;  %v7893_v33 = vadd.f32 %v493_v30, %v7827_v50  ;;  %820 = vmatmul.mubr.f32.gmra.mxu1 %v7880_v24  ;;  %v674_v28 = vld [vmem:[#allocation5 + $0x1470] sm:$0xff]  ;;  %v669_v30 = vld [vmem:[#allocation5 + $0x13b8] sm:$0xff] }
 0x153   : > { %974 = vmatpush1.msra.mxu1 %v554_v29  ;;  %v497_v35 = vpop.f32.mrf.mxu0  ;;  %933 = vmatmul.mubr.f32.gmra.mxu0 %v7880_v24  ;;  %v7950_v29 = vld [vmem:[#allocation5 + $0x12a8] sm:$0xff] }
 0x154   : > { %11977 = vst [vmem:[#allocation26_spill] sm:$0xff] %v7893_v33  ;;  %975 = vmatprep.subr.mxu1 %v549_v31  ;;  %825 = vmatprep.mubr.f32.mxu1 %v7893_v33  ;;  %v7900_v40 = vadd.f32 %v497_v35, %v7830_v51  ;;  %v7953_v31 = vld [vmem:[#allocation5 + $0x6a8] sm:$0xff] }
 0x155   : > { %976 = vmatpush1.msra.mxu1 %v548_v34  ;;  %v499_v38 = vpop.f32.mrf.mxu0  ;;  %938 = vmatprep.mubr.f32.mxu0 %v7893_v33  ;;  %v668_v34 = vld [vmem:[#allocation5 + $0x13b0] sm:$0xff]  ;;  %v7956_v35 = vld [vmem:[#allocation5 + $0x11e8] sm:$0xff] }
 0x156   : > { %11978 = vst [vmem:[#allocation27_spill] sm:$0xff] %v7900_v40  ;;  %977 = vmatprep.subr.mxu1 %v543_v36  ;;  %v7903_v41 = vadd.f32 %v499_v38, %v7827_v50  ;;  %826 = vmatmul.mubr.f32.gmra.mxu1 %v7890_v32  ;;  %v663_v36 = vld [vmem:[#allocation5 + $0x12f8] sm:$0xff]  ;;  %v662_v38 = vld [vmem:[#allocation5 + $0x12f0] sm:$0xff] }
 0x157   : > { %978 = vmatpush1.msra.mxu1 %v542_v37  ;;  %v503_v43 = vpop.f32.mrf.mxu0  ;;  %939 = vmatmul.mubr.f32.gmra.mxu0 %v7890_v32  ;;  %v7959_v37 = vld [vmem:[#allocation5 + $0x5e8] sm:$0xff] }
 0x158   : > { %11979 = vst [vmem:[#allocation28_spill] sm:$0xff] %v7903_v41  ;;  %979 = vmatprep.subr.mxu1 %v537_v39  ;;  %831 = vmatprep.mubr.f32.mxu1 %v7903_v41  ;;  %v7910_v56 = vadd.f32 %v503_v43, %v7830_v51  ;;  %v7920_v51 = vld [vmem:[#allocation5 + $0x1668] sm:$0xff] }
 0x159   : > { %980 = vmatpush1.msra.mxu1 %v536_v42  ;;  %v505_v52 = vpop.f32.mrf.mxu0  ;;  %944 = vmatprep.mubr.f32.mxu0 %v7903_v41  ;;  %v7962_v39 = vld [vmem:[#allocation5 + $0x1128] sm:$0xff]  ;;  %v657_v42 = vld [vmem:[#allocation5 + $0x1238] sm:$0xff] }
 0x15a   : > { %11980 = vst [vmem:[#allocation29_spill] sm:$0xff] %v7910_v56  ;;  %981 = vmatprep.subr.mxu1 %v531_v45  ;;  %v7913_v57 = vadd.f32 %v505_v52, %v7827_v50  ;;  %832 = vmatmul.mubr.f32.gmra.mxu1 %v7900_v40  ;;  %v512_v50 = vld [vmem:[#allocation5 + $0x30] sm:$0xff]  ;;  %v7965_v43 = vld [vmem:[#allocation5 + $0x528] sm:$0xff]  ;;  %v651_v52 = vld [vmem:[#allocation5 + $0x1178] sm:$0xff] }
 0x15b   : > { %982 = vmatpush1.msra.mxu1 %v530_v49  ;;  %945 = vmatmul.mubr.f32.gmra.mxu0 %v7900_v40  ;;  %v656_v45 = vld [vmem:[#allocation5 + $0x1230] sm:$0xff]  ;;  %v7968_v49 = vld [vmem:[#allocation5 + $0x1068] sm:$0xff] }
 0x15c   : > { %11981 = vst [vmem:[#allocation30_spill] sm:$0xff] %v7913_v57  ;;  %983 = vmatprep.subr.mxu1 %v525_v53  ;;  %837 = vmatprep.mubr.f32.mxu1 %v7913_v57  ;;  %v7971_v53 = vld [vmem:[#allocation5 + $0x468] sm:$0xff] }
 0x15d   : > { %984 = vmatpush1.msra.mxu1 %v524_v59  ;;  %950 = vmatprep.mubr.f32.mxu0 %v7913_v57  ;;  %v650_v59 = vld [vmem:[#allocation5 + $0x1170] sm:$0xff] }
 0x15e   : > { %985 = vmatprep.subr.mxu1 %v519_v61  ;;  %838 = vmatmul.mubr.f32.gmra.mxu1 %v7910_v56  ;;  %v7974_v61 = vld [vmem:[#allocation5 + $0xfa8] sm:$0xff] }
 0x15f   : > { %986 = vmatpush1.msra.mxu1 %v518_v62  ;;  %1021 = vmatprep.mubr.f32.mxu1 %v7833_v54  ;;  %v645_v62 = vld [vmem:[#allocation5 + $0x10b8] sm:$0xff] }
 0x160   : > { %987 = vmatprep.subr.mxu1 %v513_v2  ;;  %951 = vmatmul.mubr.f32.gmra.mxu0 %v7910_v56  ;;  %v7977_v2 = vld [vmem:[#allocation5 + $0x3a8] sm:$0xff] }
 0x161   : > { %988 = vmatpush1.msra.mxu1 %v512_v50  ;;  %6684 = vmatprep.subr.mxu0 %v7920_v51  ;;  %v644_v50 = vld [vmem:[#allocation5 + $0x10b0] sm:$0xff] }
 0x162   : > { %989 = vmatprep.subr.mxu1 %v699_v3  ;;  %6685 = vmatpush3.msra.mxu0 %v7923_v4  ;;  %v639_v3 = vld [vmem:[#allocation5 + $0xff8] sm:$0xff] }
 0x163   : > { %990 = vmatpush2.msra.mxu1 %v698_v6  ;;  %6686 = vmatprep.subr.mxu0 %v7926_v7  ;;  %v638_v6 = vld [vmem:[#allocation5 + $0xff0] sm:$0xff] }
 0x164   : > { %991 = vmatprep.subr.mxu1 %v693_v10  ;;  %6687 = vmatpush3.msra.mxu0 %v7929_v11  ;;  %v633_v10 = vld [vmem:[#allocation5 + $0xf38] sm:$0xff] }
 0x165   : > { %992 = vmatpush2.msra.mxu1 %v692_v12  ;;  %6688 = vmatprep.subr.mxu0 %v7932_v13  ;;  %v632_v12 = vld [vmem:[#allocation5 + $0xf30] sm:$0xff] }
 0x166   : > { %993 = vmatprep.subr.mxu1 %v687_v14  ;;  %6689 = vmatpush3.msra.mxu0 %v7935_v15  ;;  %v627_v14 = vld [vmem:[#allocation5 + $0xe78] sm:$0xff] }
 0x167   : > { %994 = vmatpush2.msra.mxu1 %v686_v18  ;;  %6690 = vmatprep.subr.mxu0 %v7938_v19  ;;  %v626_v18 = vld [vmem:[#allocation5 + $0xe70] sm:$0xff] }
 0x168   : > { %995 = vmatprep.subr.mxu1 %v681_v20  ;;  %6691 = vmatpush3.msra.mxu0 %v7941_v21  ;;  %v621_v20 = vld [vmem:[#allocation5 + $0xdb8] sm:$0xff] }
 0x169   : > { %996 = vmatpush2.msra.mxu1 %v680_v22  ;;  %6692 = vmatprep.subr.mxu0 %v7944_v23  ;;  %v620_v22 = vld [vmem:[#allocation5 + $0xdb0] sm:$0xff] }
 0x16a   : > { %997 = vmatprep.subr.mxu1 %v675_v26  ;;  %6693 = vmatpush3.msra.mxu0 %v7947_v27  ;;  %v615_v26 = vld [vmem:[#allocation5 + $0xcf8] sm:$0xff] }
 0x16b   : > { %998 = vmatpush2.msra.mxu1 %v674_v28  ;;  %6694 = vmatprep.subr.mxu0 %v7950_v29  ;;  %v614_v28 = vld [vmem:[#allocation5 + $0xcf0] sm:$0xff] }
 0x16c   : > { %999 = vmatprep.subr.mxu1 %v669_v30  ;;  %6695 = vmatpush3.msra.mxu0 %v7953_v31  ;;  %v609_v30 = vld [vmem:[#allocation5 + $0xc38] sm:$0xff] }
 0x16d   : > { %1000 = vmatpush2.msra.mxu1 %v668_v34  ;;  %6696 = vmatprep.subr.mxu0 %v7956_v35  ;;  %v608_v34 = vld [vmem:[#allocation5 + $0xc30] sm:$0xff] }
 0x16e   : > { %1001 = vmatprep.subr.mxu1 %v663_v36  ;;  %6697 = vmatpush3.msra.mxu0 %v7959_v37  ;;  %v7983_v36 = vld [vmem:[#allocation5 + $0xee8] sm:$0xff] }
 0x16f   : > { %1002 = vmatpush2.msra.mxu1 %v662_v38  ;;  %6698 = vmatprep.subr.mxu0 %v7962_v39  ;;  %v7985_v38 = vld [vmem:[#allocation5 + $0x2e8] sm:$0xff] }
 0x170   : > { %1003 = vmatprep.subr.mxu1 %v657_v42  ;;  %6699 = vmatpush3.msra.mxu0 %v7965_v43  ;;  %v7991_v42 = vld [vmem:[#allocation5 + $0xe28] sm:$0xff] }
 0x171   : > { %1004 = vmatpush2.msra.mxu1 %v656_v45  ;;  %6700 = vmatprep.subr.mxu0 %v7968_v49  ;;  %v7993_v45 = vld [vmem:[#allocation5 + $0x228] sm:$0xff] }
 0x172   : > { %1005 = vmatprep.subr.mxu1 %v651_v52  ;;  %6701 = vmatpush3.msra.mxu0 %v7971_v53  ;;  %v8000_v52 = vld [vmem:[#allocation5 + $0xd68] sm:$0xff] }
 0x173   : > { %1006 = vmatpush2.msra.mxu1 %v650_v59  ;;  %6702 = vmatprep.subr.mxu0 %v7974_v61  ;;  %v8004_v59 = vld [vmem:[#allocation5 + $0x168] sm:$0xff] }
 0x174   : > { %1007 = vmatprep.subr.mxu1 %v645_v62  ;;  %6703 = vmatpush3.msra.mxu0 %v7977_v2  ;;  %v8007_v62 = vld [vmem:[#allocation5 + $0xca8] sm:$0xff] }
 0x175   : > { %1008 = vmatpush2.msra.mxu1 %v644_v50  ;;  %6704 = vmatprep.subr.mxu0 %v7983_v36  ;;  %v8011_v50 = vld [vmem:[#allocation5 + $0xa8] sm:$0xff] }
 0x176   : > { %1009 = vmatprep.subr.mxu1 %v639_v3  ;;  %6705 = vmatpush3.msra.mxu0 %v7985_v38  ;;  %v222_v3 = vld [vmem:[#allocation7 + $0x1] ss:$8 sm:$0xf] }
 0x177   : > { %1010 = vmatpush2.msra.mxu1 %v638_v6  ;;  %6706 = vmatprep.subr.mxu0 %v7991_v42  ;;  %v223_v6 = vld [vmem:[#allocation7 + $0x1] ss:$8 sm:$0x30] }
 0x178   : > { %1011 = vmatprep.subr.mxu1 %v633_v10  ;;  %6707 = vmatpush3.msra.mxu0 %v7993_v45  ;;  %v8055_v10 = vor.u32 %v223_v6, %v222_v3 }
 0x179   : > { %1012 = vmatpush2.msra.mxu1 %v632_v12  ;;  %6708 = vmatprep.subr.mxu0 %v8000_v52  ;;  %v11741_v12 = vsub.s32 2, %v7818_v46 }
 0x17a   : > { %1013 = vmatprep.subr.mxu1 %v627_v14  ;;  %6709 = vmatpush3.msra.mxu0 %v8004_v59  ;;  %11982 = vst [vmem:[#allocation31_spill] sm:$0xff] %v8055_v10  ;;  %v11745_v14 = vsub.s32 3, %v7818_v46 }
 0x17b   : > { %1014 = vmatpush2.msra.mxu1 %v626_v18  ;;  %6710 = vmatprep.subr.mxu0 %v8007_v62  ;;  %v8062_v18 = vrot.slane %v8055_v10, %v11741_v12 }
 0x17c   : > { %1015 = vmatprep.subr.mxu1 %v621_v20  ;;  %6711 = vmatpush3.msra.mxu0 %v8011_v50  ;;  %v8066_v20 = vrot.slane %v8055_v10, %v7824_v48 }
 0x17d   : > { %1016 = vmatpush2.msra.mxu1 %v620_v22  ;;  %6736 = vmatprep.subr.mxu0 %v7815_v44  ;;  %v8070_v22 = vrot.slane %v8055_v10, %v7821_v47 }
 0x17e   : > { %1017 = vmatprep.subr.mxu1 %v615_v26  ;;  %v8075_v26 = vrot.slane %v8055_v10, %v11745_v14 }
 0x17f   : > { %1018 = vmatpush2.msra.mxu1 %v614_v28 }
 0x180   : > { %1019 = vmatprep.subr.mxu1 %v609_v30 }
 0x181   : > { %1020 = vmatpush2.msra.mxu1 %v608_v34 }
 0x182   : > { %1022 = vmatmul.mubr.f32.vlgmr.msra.gmra.mxu1 %v7836_v55  ;;  %6792 = vmatprep.subr.mxu1 %v7815_v44 }
 0x183   : > { %1027 = vmatprep.mubr.f32.mxu1 %v7850_v1  ;;  %6793 = vmatpush3.msra.mxu1 %v7838_v58 }
 0x184   : > { %6794 = vmatprep.subr.mxu1 %v7842_v60 }
 0x185   : > { %6795 = vmatpush3.msra.mxu1 %v7855_v5 }
 0x186   : > { %1028 = vmatmul.mubr.f32.gmra.mxu1 %v7847_v63  ;;  %6796 = vmatprep.subr.mxu1 %v7920_v51 }
 0x187   : > { %1033 = vmatprep.mubr.f32.mxu1 %v7862_v9  ;;  %6797 = vmatpush3.msra.mxu1 %v7923_v4 }
 0x188   : > { %6798 = vmatprep.subr.mxu1 %v7926_v7 }
 0x189   : > { %6799 = vmatpush3.msra.mxu1 %v7929_v11 }
 0x18a   : > { %1034 = vmatmul.mubr.f32.gmra.mxu1 %v7859_v8  ;;  %6800 = vmatprep.subr.mxu1 %v7932_v13 }
 0x18b   : > { %1039 = vmatprep.mubr.f32.mxu1 %v7873_v17  ;;  %6801 = vmatpush3.msra.mxu1 %v7935_v15 }
 0x18c   : > { %6802 = vmatprep.subr.mxu1 %v7938_v19 }
 0x18d   : > { %6803 = vmatpush3.msra.mxu1 %v7941_v21 }
 0x18e   : > { %1040 = vmatmul.mubr.f32.gmra.mxu1 %v7870_v16  ;;  %6804 = vmatprep.subr.mxu1 %v7944_v23 }
 0x18f   : > { %1045 = vmatprep.mubr.f32.mxu1 %v7883_v25  ;;  %6805 = vmatpush3.msra.mxu1 %v7947_v27 }
 0x190   : > { %6806 = vmatprep.subr.mxu1 %v7950_v29 }
 0x191   : > { %6807 = vmatpush3.msra.mxu1 %v7953_v31 }
 0x192   : > { %1046 = vmatmul.mubr.f32.gmra.mxu1 %v7880_v24  ;;  %6808 = vmatprep.subr.mxu1 %v7956_v35 }
 0x193   : > { %1051 = vmatprep.mubr.f32.mxu1 %v7893_v33  ;;  %6809 = vmatpush3.msra.mxu1 %v7959_v37 }
 0x194   : > { %6810 = vmatprep.subr.mxu1 %v7962_v39 }
 0x195   : > { %6811 = vmatpush3.msra.mxu1 %v7965_v43 }
 0x196   : > { %1052 = vmatmul.mubr.f32.gmra.mxu1 %v7890_v32  ;;  %6812 = vmatprep.subr.mxu1 %v7968_v49 }
 0x197   : > { %1057 = vmatprep.mubr.f32.mxu1 %v7903_v41  ;;  %6813 = vmatpush3.msra.mxu1 %v7971_v53 }
 0x198   : > { %6814 = vmatprep.subr.mxu1 %v7974_v61 }
 0x199   : > { %6815 = vmatpush3.msra.mxu1 %v7977_v2 }
 0x19a   : > { %1058 = vmatmul.mubr.f32.gmra.mxu1 %v7900_v40  ;;  %6816 = vmatprep.subr.mxu1 %v7983_v36 }
 0x19b   : > { %1063 = vmatprep.mubr.f32.mxu1 %v7913_v57  ;;  %6817 = vmatpush3.msra.mxu1 %v7985_v38 }
 0x19c   : > { %6818 = vmatprep.subr.mxu1 %v7991_v42 }
 0x19d   : > { %6819 = vmatpush3.msra.mxu1 %v7993_v45 }
 0x19e   : > { %1064 = vmatmul.mubr.f32.gmra.mxu1 %v7910_v56  ;;  %6820 = vmatprep.subr.mxu1 %v8000_v52 }
 0x19f   : > { %6821 = vmatpush3.msra.mxu1 %v8004_v59 }
 0x1a0   : > { %6822 = vmatprep.subr.mxu1 %v8007_v62 }
 0x1a1   : > { %6823 = vmatpush3.msra.mxu1 %v8011_v50 }
 0x1a2   : > { %6904 = vmatprep.subr.mxu1 %v7815_v44 }
 0x201   : > { %v797_v28 = vpop.f32.mrf.mxu1  ;;  %v910_v30 = vpop.f32.mrf.mxu0 }
 0x202   : > { %v8078_v34 = vadd.f32 %v910_v30, %v8062_v18  ;;  %v8081_v3 = vadd.f32 %v797_v28, %v8066_v20 }
 0x203   : > { %v799_v6 = vpop.f32.mrf.mxu1  ;;  %v912_v12 = vpop.f32.mrf.mxu0 }
 0x204   : > { %11983 = vst [vmem:[#allocation32_spill] sm:$0xff] %v8078_v34  ;;  %v8084_v0 = vadd.f32 %v799_v6, %v8070_v22  ;;  %v8087_v56 = vadd.f32 %v912_v12, %v8075_v26  ;;  %1207 = vrot.lane.b32.xlu0 %v8078_v34, %s7631_s18  ;;  %v1070_v12 = vmul.f32 %v8078_v34, %v8081_v3 }
 0x206   : > { %11984 = vst [vmem:[#allocation33_spill] sm:$0xff] %v8087_v56  ;;  %v803_v14 = vpop.f32.mrf.mxu1  ;;  %v916_v57 = vpop.f32.mrf.mxu0  ;;  %1403 = vrot.lane.b32.xlu1 %v8087_v56, %s7632_s20  ;;  %v1071_v28 = vmul.f32 %v8087_v56, %v8084_v0 }
 0x207   : > { %v8096_v30 = vadd.f32 %v803_v14, %v8066_v20  ;;  %v8099_v6 = vadd.f32 %v916_v57, %v8062_v18 }
 0x208   : > { %v805_v40 = vpop.f32.mrf.mxu1  ;;  %v918_v41 = vpop.f32.mrf.mxu0  ;;  %1401 = vrot.lane.b32.xlu0 %v8078_v34, %s7632_s20  ;;  %1150 = vmatprep.mubr.f32.mxu0 %v1071_v28 }
 0x209   : > { %11985 = vst [vmem:[#allocation34_spill] sm:$0xff] %v8099_v6  ;;  %v8106_v32 = vadd.f32 %v805_v40, %v8070_v22  ;;  %v8109_v33 = vadd.f32 %v918_v41, %v8075_v26  ;;  %1151 = vmatmul.mubr.f32.vlgmr.msra.gmra.mxu0 %v1070_v12  ;;  %v1072_v57 = vmul.f32 %v8099_v6, %v8096_v30 }
 0x20a   : > { %1597 = vrot.lane.b32.xlu1 %v8087_v56, %s7633_s27  ;;  %v809_v14 = vpop.f32.mrf.mxu1  ;;  %6737 = vmatpush3.msra.mxu0 %v7838_v58 }
 0x20b   : > { %11986 = vst [vmem:[#allocation35_spill] sm:$0xff] %v8109_v33  ;;  %v1073_v28 = vmul.f32 %v8109_v33, %v8106_v32  ;;  %v8119_v40 = vadd.f32 %v809_v14, %v8066_v20  ;;  %v922_v24 = vpop.f32.mrf.mxu0  ;;  %6738 = vmatprep.subr.mxu0 %v7842_v60 }
 0x20c   : > { %1595 = vrot.lane.b32.xlu0 %v8078_v34, %s7633_s27  ;;  %v8125_v41 = vadd.f32 %v922_v24, %v8062_v18  ;;  %v811_v12 = vpop.f32.mrf.mxu1  ;;  %6739 = vmatpush3.msra.mxu0 %v7855_v5 }
 0x20d   : > { %1155 = vmatprep.mubr.f32.mxu0 %v1073_v28  ;;  %v8129_v58 = vadd.f32 %v811_v12, %v8070_v22  ;;  %v924_v25 = vpop.f32.mrf.mxu0  ;;  %6740 = vmatprep.subr.mxu0 %v7920_v51 }
 0x20e   : > { %1156 = vmatmul.mubr.f32.gmra.mxu0 %v1072_v57  ;;  %1211 = vrot.lane.b32.xlu1 %v8099_v6, %s7631_s18  ;;  %v8135_v60 = vadd.f32 %v924_v25, %v8075_v26  ;;  %v815_v14 = vpop.f32.mrf.mxu1  ;;  %v1074_v24 = vmul.f32 %v8125_v41, %v8119_v40 }
 0x20f   : > { %v8140_v16 = vadd.f32 %v815_v14, %v8066_v20  ;;  %v928_v28 = vpop.f32.mrf.mxu0  ;;  %6741 = vmatpush3.msra.mxu0 %v7923_v4 }
 0x210   : > { %1209 = vrot.lane.b32.xlu0 %v8087_v56, %s7631_s18  ;;  %v1075_v57 = vmul.f32 %v8135_v60, %v8129_v58  ;;  %v8148_v12 = vadd.f32 %v928_v28, %v8062_v18  ;;  %v817_v25 = vpop.f32.mrf.mxu1  ;;  %6742 = vmatprep.subr.mxu0 %v7926_v7 }
 0x211   : > { %11987 = vst [vmem:[#allocation36_spill] sm:$0xff] %v8140_v16  ;;  %v8152_v17 = vadd.f32 %v817_v25, %v8070_v22  ;;  %v930_v14 = vpop.f32.mrf.mxu0  ;;  %6743 = vmatpush3.msra.mxu0 %v7929_v11 }
 0x212   : > { %1213 = vrot.lane.b32.xlu1 %v8109_v33, %s7631_s18  ;;  %1160 = vmatprep.mubr.f32.mxu0 %v1075_v57  ;;  %v8158_v8 = vadd.f32 %v930_v14, %v8075_v26  ;;  %v821_v9 = vpop.f32.mrf.mxu1  ;;  %v1076_v28 = vmul.f32 %v8148_v12, %v8140_v16 }
 0x213   : > { %1161 = vmatmul.mubr.f32.gmra.mxu0 %v1074_v24  ;;  %v8163_v63 = vadd.f32 %v821_v9, %v8066_v20  ;;  %v934_v25 = vpop.f32.mrf.mxu0  ;;  %6744 = vmatprep.subr.mxu0 %v7932_v13 }
 0x214   : > { %1405 = vrot.lane.b32.xlu0 %v8099_v6, %s7632_s20  ;;  %v1077_v57 = vmul.f32 %v8158_v8, %v8152_v17  ;;  %v8171_v14 = vadd.f32 %v934_v25, %v8062_v18  ;;  %v823_v1 = vpop.f32.mrf.mxu1  ;;  %6745 = vmatpush3.msra.mxu0 %v7935_v15 }
 0x215   : > { %11988 = vst [vmem:[#allocation37_spill] sm:$0xff] %v8163_v63  ;;  %v8175_v24 = vadd.f32 %v823_v1, %v8070_v22  ;;  %v936_v9 = vpop.f32.mrf.mxu0  ;;  %6746 = vmatprep.subr.mxu0 %v7938_v19 }
 0x216   : > { %1407 = vrot.lane.b32.xlu1 %v8109_v33, %s7632_s20  ;;  %1165 = vmatprep.mubr.f32.mxu0 %v1077_v57  ;;  %v8181_v55 = vadd.f32 %v936_v9, %v8075_v26  ;;  %v827_v54 = vpop.f32.mrf.mxu1  ;;  %v1078_v1 = vmul.f32 %v8171_v14, %v8163_v63 }
 0x217   : > { %11989 = vst [vmem:[#allocation38_spill] sm:$0xff] %v8175_v24  ;;  %1166 = vmatmul.mubr.f32.gmra.mxu0 %v1076_v28  ;;  %v8184_v25 = vadd.f32 %v827_v54, %v8066_v20  ;;  %v940_v47 = vpop.f32.mrf.mxu0 }
 0x218   : > { %1599 = vrot.lane.b32.xlu0 %v8099_v6, %s7633_s27  ;;  %v8191_v48 = vadd.f32 %v940_v47, %v8062_v18  ;;  %v829_v56 = vpop.f32.mrf.mxu1  ;;  %v1079_v57 = vmul.f32 %v8181_v55, %v8175_v24  ;;  %6747 = vmatpush3.msra.mxu0 %v7941_v21 }
 0x219   : > { %11990 = vst [vmem:[#allocation39_spill] sm:$0xff] %v8184_v25  ;;  %v8197_v28 = vadd.f32 %v829_v56, %v8070_v22  ;;  %v942_v54 = vpop.f32.mrf.mxu0  ;;  %6748 = vmatprep.subr.mxu0 %v7944_v23 }
 0x21a   : > { %1601 = vrot.lane.b32.xlu1 %v8109_v33, %s7633_s27  ;;  %v8203_v9 = vadd.f32 %v942_v54, %v8075_v26  ;;  %1170 = vmatprep.mubr.f32.mxu0 %v1079_v57  ;;  %v833_v47 = vpop.f32.mrf.mxu1  ;;  %v1080_v56 = vmul.f32 %v8191_v48, %v8184_v25 }
 0x21b   : > { %11991 = vst [vmem:[#allocation40_spill] sm:$0xff] %v8197_v28  ;;  %v8206_v6 = vadd.f32 %v833_v47, %v8066_v20  ;;  %v946_v34 = vpop.f32.mrf.mxu0  ;;  %1171 = vmatmul.mubr.f32.gmra.mxu0 %v1078_v1 }
 0x21c   : > { %11992 = vst [vmem:[#allocation41_spill] sm:$0xff] %v8203_v9  ;;  %1215 = vrot.lane.b32.xlu0 %v8125_v41, %s7631_s18  ;;  %v8213_v63 = vadd.f32 %v946_v34, %v8062_v18  ;;  %v835_v33 = vpop.f32.mrf.mxu1  ;;  %v1081_v54 = vmul.f32 %v8203_v9, %v8197_v28  ;;  %6749 = vmatpush3.msra.mxu0 %v7947_v27 }
 0x21d   : > { %v8219_v57 = vadd.f32 %v835_v33, %v8070_v22  ;;  %v948_v47 = vpop.f32.mrf.mxu0  ;;  %6750 = vmatprep.subr.mxu0 %v7950_v29 }
 0x21e   : > { %11993 = vst [vmem:[#allocation42_spill] sm:$0xff] %v8213_v63  ;;  %1217 = vrot.lane.b32.xlu1 %v8135_v60, %s7631_s18  ;;  %v8225_v1 = vadd.f32 %v948_v47, %v8075_v26  ;;  %1175 = vmatprep.mubr.f32.mxu0 %v1081_v54  ;;  %v839_v34 = vpop.f32.mrf.mxu1  ;;  %v1082_v25 = vmul.f32 %v8213_v63, %v8206_v6 }
 0x21f   : > { %11994 = vst [vmem:[#allocation43_spill] sm:$0xff] %v8219_v57  ;;  %1176 = vmatmul.mubr.f32.gmra.mxu0 %v1080_v56  ;;  %v8232_v33 = vadd.f32 %v839_v34, %v8066_v20 }
 0x220   : > { %11995 = vst [vmem:[#allocation44_spill] sm:$0xff] %v8225_v1  ;;  %1409 = vrot.lane.b32.xlu0 %v8125_v41, %s7632_s20  ;;  %v952_v28 = vpop.f32.mrf.mxu0  ;;  %v841_v24 = vpop.f32.mrf.mxu1  ;;  %v1083_v16 = vmul.f32 %v8225_v1, %v8219_v57  ;;  %6751 = vmatpush3.msra.mxu0 %v7953_v31 }
 0x221   : > { %v8238_v54 = vadd.f32 %v952_v28, %v8062_v18  ;;  %v8241_v56 = vadd.f32 %v841_v24, %v8070_v22  ;;  %6752 = vmatprep.subr.mxu0 %v7956_v35 }
 0x222   : > { %1411 = vrot.lane.b32.xlu1 %v8135_v60, %s7632_s20  ;;  %v954_v20 = vpop.f32.mrf.mxu0  ;;  %1180 = vmatprep.mubr.f32.mxu0 %v1083_v16 }
 0x223   : > { %11996 = vst [vmem:[#allocation45_spill] sm:$0xff] %v8238_v54  ;;  %v8247_v47 = vadd.f32 %v954_v20, %v8075_v26  ;;  %1181 = vmatmul.mubr.f32.gmra.mxu0 %v1082_v25  ;;  %v1084_v18 = vmul.f32 %v8238_v54, %v8232_v33 }
 0x224   : > { %1603 = vrot.lane.b32.xlu0 %v8125_v41, %s7633_s27  ;;  %6753 = vmatpush3.msra.mxu0 %v7959_v37 }
 0x225   : > { %11997 = vst [vmem:[#allocation46_spill] sm:$0xff] %v8247_v47  ;;  %v1085_v22 = vmul.f32 %v8247_v47, %v8241_v56  ;;  %6754 = vmatprep.subr.mxu0 %v7962_v39 }
 0x226   : > { %1605 = vrot.lane.b32.xlu1 %v8135_v60, %s7633_s27  ;;  %6755 = vmatpush3.msra.mxu0 %v7965_v43 }
 0x227   : > { %1185 = vmatprep.mubr.f32.mxu0 %v1085_v22  ;;  %6756 = vmatprep.subr.mxu0 %v7968_v49 }
 0x228   : > { %1219 = vrot.lane.b32.xlu0 %v8148_v12, %s7631_s18  ;;  %1186 = vmatmul.mubr.f32.gmra.mxu0 %v1084_v18 }
 0x229   : > { %6757 = vmatpush3.msra.mxu0 %v7971_v53 }
 0x22a   : > { %1221 = vrot.lane.b32.xlu1 %v8158_v8, %s7631_s18  ;;  %6758 = vmatprep.subr.mxu0 %v7974_v61 }
 0x22b   : > { %6759 = vmatpush3.msra.mxu0 %v7977_v2 }
 0x22c   : > { %1413 = vrot.lane.b32.xlu0 %v8148_v12, %s7632_s20  ;;  %6760 = vmatprep.subr.mxu0 %v7983_v36 }
 0x22d   : > { %6761 = vmatpush3.msra.mxu0 %v7985_v38 }
 0x22e   : > { %1415 = vrot.lane.b32.xlu1 %v8158_v8, %s7632_s20  ;;  %6762 = vmatprep.subr.mxu0 %v7991_v42 }
 0x22f   : > { %6763 = vmatpush3.msra.mxu0 %v7993_v45 }
 0x230   : > { %1607 = vrot.lane.b32.xlu0 %v8148_v12, %s7633_s27  ;;  %6764 = vmatprep.subr.mxu0 %v8000_v52 }
 0x231   : > { %6765 = vmatpush3.msra.mxu0 %v8004_v59 }
 0x232   : > { %1609 = vrot.lane.b32.xlu1 %v8158_v8, %s7633_s27  ;;  %6766 = vmatprep.subr.mxu0 %v8007_v62 }
 0x233   : > { %6767 = vmatpush3.msra.mxu0 %v8011_v50 }
 0x234   : > { %1223 = vrot.lane.b32.xlu0 %v8171_v14, %s7631_s18  ;;  %6848 = vmatprep.subr.mxu0 %v7815_v44 }
 0x236   : > { %1225 = vrot.lane.b32.xlu1 %v8181_v55, %s7631_s18 }
 0x238   : > { %1227 = vrot.lane.b32.xlu0 %v8191_v48, %s7631_s18 }
 0x23a   : > { %1229 = vrot.lane.b32.xlu1 %v8203_v9, %s7631_s18 }
 0x23c   : > { %1231 = vrot.lane.b32.xlu0 %v8213_v63, %s7631_s18 }
 0x23e   : > { %1233 = vrot.lane.b32.xlu1 %v8225_v1, %s7631_s18 }
 0x240   : > { %1235 = vrot.lane.b32.xlu0 %v8238_v54, %s7631_s18 }
 0x242   : > { %v8299_v16 = vpop.f32.mrf.mxu1  ;;  %1237 = vrot.lane.b32.xlu1 %v8247_v47, %s7631_s18 }
 0x243   : > { %11998 = vst [vmem:[#allocation47_spill] sm:$0xff] %v8299_v16 }
 0x244   : > { %v8303_v44 = vpop.f32.mrf.mxu1  ;;  %1417 = vrot.lane.b32.xlu0 %v8171_v14, %s7632_s20 }
 0x245   : > { %11999 = vst [vmem:[#allocation48_spill] sm:$0xff] %v8303_v44 }
 0x246   : > { %v8307_v26 = vpop.f32.mrf.mxu1  ;;  %1419 = vrot.lane.b32.xlu1 %v8181_v55, %s7632_s20 }
 0x247   : > { %12000 = vst [vmem:[#allocation49_spill] sm:$0xff] %v8307_v26 }
 0x248   : > { %v8311_v24 = vpop.f32.mrf.mxu1  ;;  %1611 = vrot.lane.b32.xlu0 %v8171_v14, %s7633_s27 }
 0x249   : > { %12001 = vst [vmem:[#allocation50_spill] sm:$0xff] %v8311_v24 }
 0x24a   : > { %v8315_v25 = vpop.f32.mrf.mxu1  ;;  %1613 = vrot.lane.b32.xlu1 %v8181_v55, %s7633_s27 }
 0x24b   : > { %12002 = vst [vmem:[#allocation51_spill] sm:$0xff] %v8315_v25 }
 0x24c   : > { %v8319_v28 = vpop.f32.mrf.mxu1  ;;  %1421 = vrot.lane.b32.xlu0 %v8191_v48, %s7632_s20 }
 0x24d   : > { %12003 = vst [vmem:[#allocation52_spill] sm:$0xff] %v8319_v28 }
 0x24e   : > { %v8323_v34 = vpop.f32.mrf.mxu1  ;;  %1423 = vrot.lane.b32.xlu1 %v8203_v9, %s7632_s20 }
 0x24f   : > { %12004 = vst [vmem:[#allocation53_spill] sm:$0xff] %v8323_v34  ;;  %v719_v34 = vsub.s32 4, %v7818_v46 }
 0x250   : > { %v8327_v20 = vpop.f32.mrf.mxu1  ;;  %1615 = vrot.lane.b32.xlu0 %v8191_v48, %s7633_s27 }
 0x251   : > { %12005 = vst [vmem:[#allocation54_spill] sm:$0xff] %v8327_v20 }
 0x252   : > { %v8331_v18 = vpop.f32.mrf.mxu1  ;;  %1617 = vrot.lane.b32.xlu1 %v8203_v9, %s7633_s27  ;;  %v8748_v9 = vld [vmem:[#allocation5 + $0x1068] sm:$0xff] }
 0x253   : > { %12006 = vst [vmem:[#allocation55_spill] sm:$0xff] %v8331_v18  ;;  %v8349_v18 = vrot.slane %v8055_v10, %v719_v34 }
 0x254   : > { %v8335_v22 = vpop.f32.mrf.mxu1  ;;  %1425 = vrot.lane.b32.xlu0 %v8213_v63, %s7632_s20 }
 0x255   : > { %12007 = vst [vmem:[#allocation56_spill] sm:$0xff] %v8335_v22  ;;  %12010 = vst [vmem:[#allocation59_spill] sm:$0xff] %v8349_v18 }
 0x256   : > { %v8340_v28 = vpop.f32.mrf.mxu1  ;;  %1427 = vrot.lane.b32.xlu1 %v8225_v1, %s7632_s20 }
 0x257   : > { %12008 = vst [vmem:[#allocation57_spill] sm:$0xff] %v8340_v28 }
 0x258   : > { %v8344_v20 = vpop.f32.mrf.mxu1  ;;  %1619 = vrot.lane.b32.xlu0 %v8213_v63, %s7633_s27  ;;  %v8430_v63 = vld [vmem:[#allocation5 + $0xb28] sm:$0xff] }
 0x259   : > { %12009 = vst [vmem:[#allocation58_spill] sm:$0xff] %v8344_v20 }
 0x25a   : > { %v1059_v25 = vpop.f32.mrf.mxu1  ;;  %1621 = vrot.lane.b32.xlu1 %v8225_v1, %s7633_s27 }
 0x25b   : > { %v8354_v22 = vadd.f32 %v1059_v25, %v8349_v18 }
 0x25c   : > { %v8356_v24 = vpop.f32.mrf.mxu1  ;;  %1429 = vrot.lane.b32.xlu0 %v8238_v54, %s7632_s20 }
 0x25d   : > { %12011 = vst [vmem:[#allocation60_spill] sm:$0xff] %v8354_v22  ;;  %12012 = vst [vmem:[#allocation61_spill] sm:$0xff] %v8356_v24 }
 0x25e   : > { %v1065_v28 = vpop.f32.mrf.mxu1  ;;  %1431 = vrot.lane.b32.xlu1 %v8247_v47, %s7632_s20 }
 0x25f   : > { %v8363_v20 = vadd.f32 %v1065_v28, %v8349_v18  ;;  %v8383_v18 = vld [vmem:[#allocation5 + $0xbe8] sm:$0xff] }
 0x260   : > { %1623 = vrot.lane.b32.xlu0 %v8238_v54, %s7633_s27 }
 0x261   : > { %12013 = vst [vmem:[#allocation62_spill] sm:$0xff] %v8363_v20 }
 0x262   : > { %1625 = vrot.lane.b32.xlu1 %v8247_v47, %s7633_s27 }
 0x276   : > { %v1208_v25 = vpop.permute.xlu0 %1207 }
 0x278   : > { %v1404_v34 = vpop.permute.xlu1 %1403 }
 0x27a   : > { %v1402_v24 = vpop.permute.xlu0 %1401 }
 0x27b   : > { %v8370_v22 = vsel %vm1433_vm0, %v1402_v24, %v1404_v34  ;;  %v8373_v26 = vsel %vm1433_vm0, %v1404_v34, %v1402_v24  ;;  %v8386_v24 = vld [vmem:[#allocation5 + $0x1728] sm:$0xff] }
 0x27c   : > { %12014 = vst [vmem:[#allocation63_spill] sm:$0xff] %v8370_v22  ;;  %12015 = vst [vmem:[#allocation64_spill] sm:$0xff] %v8373_v26  ;;  %v1474_v28 = vmul.f32 %v8370_v22, %v8081_v3  ;;  %v8377_v20 = vpop.permute.xlu1 %1597  ;;  %v1475_v44 = vmul.f32 %v8373_v26, %v8084_v0 }
 0x27e   : > { %v8381_v10 = vpop.permute.xlu0 %1595  ;;  %1554 = vmatprep.mubr.f32.mxu1 %v1475_v44 }
 0x27f   : > { %1555 = vmatmul.mubr.f32.vlgmr.msra.gmra.mxu1 %v1474_v28 }
 0x280   : > { %v1212_v16 = vpop.permute.xlu1 %1211  ;;  %6905 = vmatpush3.msra.mxu1 %v8383_v18 }
 0x281   : > { %6906 = vmatprep.subr.mxu1 %v8386_v24 }
 0x282   : > { %v1210_v34 = vpop.permute.xlu0 %1209  ;;  %6907 = vmatpush3.msra.mxu1 %v7855_v5 }
 0x283   : > { %v8391_v46 = vsel %vm1239_vm1, %v1208_v25, %v1210_v34  ;;  %v8394_v26 = vsel %vm1239_vm1, %v1210_v34, %v1208_v25  ;;  %6908 = vmatprep.subr.mxu1 %v7920_v51 }
 0x284   : > { %v1280_v44 = vmul.f32 %v8391_v46, %v8081_v3  ;;  %v1214_v28 = vpop.permute.xlu1 %1213  ;;  %v1281_v22 = vmul.f32 %v8394_v26, %v8084_v0  ;;  %6909 = vmatpush3.msra.mxu1 %v7923_v4 }
 0x285   : > { %v8403_v47 = vsel %vm1239_vm1, %v1214_v28, %v1212_v16  ;;  %6910 = vmatprep.subr.mxu1 %v7926_v7  ;;  %v8407_v5 = vsel %vm1239_vm1, %v1212_v16, %v1214_v28 }
 0x286   : > { %v1406_v25 = vpop.permute.xlu0 %1405  ;;  %1360 = vmatprep.mubr.f32.mxu0 %v1281_v22  ;;  %v1283_v34 = vmul.f32 %v8403_v47, %v8106_v32  ;;  %6911 = vmatpush3.msra.mxu1 %v7929_v11  ;;  %v1282_v22 = vmul.f32 %v8407_v5, %v8096_v30 }
 0x287   : > { %1361 = vmatmul.mubr.f32.vlgmr.msra.gmra.mxu0 %v1280_v44  ;;  %6912 = vmatprep.subr.mxu1 %v7932_v13 }
 0x288   : > { %v1408_v54 = vpop.permute.xlu1 %1407  ;;  %1365 = vmatprep.mubr.f32.mxu0 %v1283_v34  ;;  %6849 = vmatpush3.msra.mxu0 %v8383_v18 }
 0x289   : > { %v8415_v1 = vsel %vm1433_vm0, %v1406_v25, %v1408_v54  ;;  %v8418_v16 = vsel %vm1433_vm0, %v1408_v54, %v1406_v25  ;;  %6850 = vmatprep.subr.mxu0 %v8386_v24  ;;  %6913 = vmatpush3.msra.mxu1 %v7935_v15 }
 0x28a   : > { %12016 = vst [vmem:[#allocation65_spill] sm:$0xff] %v8415_v1  ;;  %12017 = vst [vmem:[#allocation66_spill] sm:$0xff] %v8418_v16  ;;  %v8424_v44 = vpop.permute.xlu0 %1599  ;;  %v1477_v28 = vmul.f32 %v8418_v16, %v8106_v32  ;;  %v1476_v34 = vmul.f32 %v8415_v1, %v8096_v30  ;;  %6851 = vmatpush3.msra.mxu0 %v8430_v63  ;;  %6914 = vmatprep.subr.mxu1 %v7938_v19 }
 0x28b   : > { %1366 = vmatmul.mubr.f32.gmra.mxu0 %v1282_v22  ;;  %6852 = vmatprep.subr.mxu0 %v7920_v51 }
 0x28c   : > { %v8435_v54 = vpop.permute.xlu1 %1601  ;;  %1559 = vmatprep.mubr.f32.mxu1 %v1477_v28  ;;  %6853 = vmatpush3.msra.mxu0 %v7923_v4 }
 0x28d   : > { %1560 = vmatmul.mubr.f32.gmra.mxu1 %v1476_v34  ;;  %6854 = vmatprep.subr.mxu0 %v7926_v7 }
 0x28e   : > { %v1216_v25 = vpop.permute.xlu0 %1215  ;;  %6855 = vmatpush3.msra.mxu0 %v7929_v11  ;;  %6915 = vmatpush3.msra.mxu1 %v7941_v21 }
 0x28f   : > { %6856 = vmatprep.subr.mxu0 %v7932_v13  ;;  %6916 = vmatprep.subr.mxu1 %v7944_v23 }
 0x290   : > { %v1218_v22 = vpop.permute.xlu1 %1217  ;;  %6857 = vmatpush3.msra.mxu0 %v7935_v15  ;;  %6917 = vmatpush3.msra.mxu1 %v7947_v27 }
 0x291   : > { %v8446_v51 = vsel %vm1239_vm1, %v1216_v25, %v1218_v22  ;;  %v8449_v4 = vsel %vm1239_vm1, %v1218_v22, %v1216_v25  ;;  %6858 = vmatprep.subr.mxu0 %v7938_v19  ;;  %6918 = vmatprep.subr.mxu1 %v7950_v29 }
 0x292   : > { %v1410_v7 = vpop.permute.xlu0 %1409  ;;  %v1285_v11 = vmul.f32 %v8449_v4, %v8129_v58  ;;  %v1284_v13 = vmul.f32 %v8446_v51, %v8119_v40  ;;  %6859 = vmatpush3.msra.mxu0 %v7941_v21  ;;  %6919 = vmatpush3.msra.mxu1 %v7953_v31 }
 0x293   : > { %6860 = vmatprep.subr.mxu0 %v7944_v23  ;;  %6920 = vmatprep.subr.mxu1 %v7956_v35 }
 0x294   : > { %v1412_v15 = vpop.permute.xlu1 %1411  ;;  %1370 = vmatprep.mubr.f32.mxu0 %v1285_v11  ;;  %6861 = vmatpush3.msra.mxu0 %v7947_v27 }
 0x295   : > { %v8463_v19 = vsel %vm1433_vm0, %v1410_v7, %v1412_v15  ;;  %v8466_v28 = vsel %vm1433_vm0, %v1412_v15, %v1410_v7  ;;  %1371 = vmatmul.mubr.f32.gmra.mxu0 %v1284_v13  ;;  %6862 = vmatprep.subr.mxu0 %v7950_v29  ;;  %v8529_v15 = vld [vmem:[#allocation5 + $0x17e8] sm:$0xff] }
 0x296   : > { %12018 = vst [vmem:[#allocation67_spill] sm:$0xff] %v8463_v19  ;;  %12019 = vst [vmem:[#allocation68_spill] sm:$0xff] %v8466_v28  ;;  %v8469_v21 = vpop.permute.xlu0 %1603  ;;  %v1479_v23 = vmul.f32 %v8466_v28, %v8129_v58  ;;  %v1478_v34 = vmul.f32 %v8463_v19, %v8119_v40  ;;  %6863 = vmatpush3.msra.mxu0 %v7953_v31  ;;  %6921 = vmatpush3.msra.mxu1 %v7959_v37 }
 0x297   : > { %6864 = vmatprep.subr.mxu0 %v7956_v35  ;;  %6922 = vmatprep.subr.mxu1 %v7962_v39 }
 0x298   : > { %v8479_v27 = vpop.permute.xlu1 %1605  ;;  %1564 = vmatprep.mubr.f32.mxu1 %v1479_v23  ;;  %6865 = vmatpush3.msra.mxu0 %v7959_v37 }
 0x299   : > { %1565 = vmatmul.mubr.f32.gmra.mxu1 %v1478_v34  ;;  %6866 = vmatprep.subr.mxu0 %v7962_v39 }
 0x29a   : > { %v1220_v29 = vpop.permute.xlu0 %1219  ;;  %6867 = vmatpush3.msra.mxu0 %v7965_v43  ;;  %6923 = vmatpush3.msra.mxu1 %v7965_v43 }
 0x29b   : > { %6868 = vmatprep.subr.mxu0 %v7968_v49  ;;  %6924 = vmatprep.subr.mxu1 %v7968_v49  ;;  %v12020_v49 = vld [vmem:[#allocation36_spill] sm:$0xff] }
 0x29c   : > { %v1222_v31 = vpop.permute.xlu1 %1221  ;;  %6869 = vmatpush3.msra.mxu0 %v7971_v53  ;;  %6925 = vmatpush3.msra.mxu1 %v7971_v53 }
 0x29d   : > { %v8490_v35 = vsel %vm1239_vm1, %v1220_v29, %v1222_v31  ;;  %v8493_v37 = vsel %vm1239_vm1, %v1222_v31, %v1220_v29  ;;  %6870 = vmatprep.subr.mxu0 %v7974_v61  ;;  %6926 = vmatprep.subr.mxu1 %v7974_v61  ;;  %v12024_v29 = vld [vmem:[#allocation38_spill] sm:$0xff]  ;;  %v12025_v31 = vld [vmem:[#allocation37_spill] sm:$0xff] }
 0x29e   : > { %v1414_v39 = vpop.permute.xlu0 %1413  ;;  %v1287_v43 = vmul.f32 %v8493_v37, %v8152_v17  ;;  %v1286_v25 = vmul.f32 %v8490_v35, %v12020_v49  ;;  %6871 = vmatpush3.msra.mxu0 %v7977_v2  ;;  %6927 = vmatpush3.msra.mxu1 %v7977_v2 }
 0x29f   : > { %6872 = vmatprep.subr.mxu0 %v7983_v36  ;;  %6928 = vmatprep.subr.mxu1 %v7983_v36 }
 0x2a0   : > { %v1416_v53 = vpop.permute.xlu1 %1415  ;;  %1375 = vmatprep.mubr.f32.mxu0 %v1287_v43  ;;  %6873 = vmatpush3.msra.mxu0 %v7985_v38 }
 0x2a1   : > { %v8507_v61 = vsel %vm1433_vm0, %v1414_v39, %v1416_v53  ;;  %v8510_v22 = vsel %vm1433_vm0, %v1416_v53, %v1414_v39  ;;  %1376 = vmatmul.mubr.f32.gmra.mxu0 %v1286_v25  ;;  %6874 = vmatprep.subr.mxu0 %v7991_v42  ;;  %v12028_v25 = vld [vmem:[#allocation40_spill] sm:$0xff] }
 0x2a2   : > { %12021 = vst [vmem:[#allocation36_spill] sm:$0xff] %v8507_v61  ;;  %12022 = vst [vmem:[#allocation69_spill] sm:$0xff] %v8510_v22  ;;  %v8513_v7 = vpop.permute.xlu0 %1607  ;;  %v1481_v2 = vmul.f32 %v8510_v22, %v8152_v17  ;;  %v1480_v36 = vmul.f32 %v8507_v61, %v12020_v49  ;;  %6875 = vmatpush3.msra.mxu0 %v7993_v45  ;;  %6929 = vmatpush3.msra.mxu1 %v7985_v38 }
 0x2a3   : > { %6876 = vmatprep.subr.mxu0 %v8000_v52  ;;  %6930 = vmatprep.subr.mxu1 %v7991_v42 }
 0x2a4   : > { %v8523_v11 = vpop.permute.xlu1 %1609  ;;  %1569 = vmatprep.mubr.f32.mxu1 %v1481_v2  ;;  %6877 = vmatpush3.msra.mxu0 %v8004_v59  ;;  %v12029_v2 = vld [vmem:[#allocation39_spill] sm:$0xff] }
 0x2a5   : > { %1570 = vmatmul.mubr.f32.gmra.mxu1 %v1480_v36  ;;  %6878 = vmatprep.subr.mxu0 %v8007_v62 }
 0x2a6   : > { %v1224_v13 = vpop.permute.xlu0 %1223  ;;  %6879 = vmatpush3.msra.mxu0 %v8011_v50  ;;  %6931 = vmatpush3.msra.mxu1 %v7993_v45 }
 0x2a7   : > { %6960 = vmatprep.subr.mxu0 %v8529_v15  ;;  %6932 = vmatprep.subr.mxu1 %v8000_v52 }
 0x2a8   : > { %v1226_v38 = vpop.permute.xlu1 %1225  ;;  %6933 = vmatpush3.msra.mxu1 %v8004_v59 }
 0x2a9   : > { %v8535_v42 = vsel %vm1239_vm1, %v1224_v13, %v1226_v38  ;;  %v8538_v23 = vsel %vm1239_vm1, %v1226_v38, %v1224_v13  ;;  %6934 = vmatprep.subr.mxu1 %v8007_v62 }
 0x2aa   : > { %12023 = vst [vmem:[#allocation70_spill] sm:$0xff] %v8538_v23  ;;  %v1228_v34 = vpop.permute.xlu0 %1227  ;;  %v1289_v45 = vmul.f32 %v8538_v23, %v12024_v29  ;;  %v1288_v39 = vmul.f32 %v8535_v42, %v12025_v31  ;;  %6935 = vmatpush3.msra.mxu1 %v8011_v50 }
 0x2ab   : > { %7016 = vmatprep.subr.mxu1 %v8529_v15 }
 0x2ac   : > { %v1230_v52 = vpop.permute.xlu1 %1229  ;;  %1380 = vmatprep.mubr.f32.mxu0 %v1289_v45 }
 0x2ad   : > { %v8548_v59 = vsel %vm1239_vm1, %v1228_v34, %v1230_v52  ;;  %v8551_v43 = vsel %vm1239_vm1, %v1230_v52, %v1228_v34  ;;  %1381 = vmatmul.mubr.f32.gmra.mxu0 %v1288_v39 }
 0x2ae   : > { %12026 = vst [vmem:[#allocation38_spill] sm:$0xff] %v8548_v59  ;;  %12027 = vst [vmem:[#allocation37_spill] sm:$0xff] %v8551_v43  ;;  %v1232_v62 = vpop.permute.xlu0 %1231  ;;  %v1291_v53 = vmul.f32 %v8551_v43, %v12028_v25  ;;  %v1290_v36 = vmul.f32 %v8548_v59, %v12029_v2  ;;  %v8723_v43 = vld [vmem:[#allocation5 + $0x11e8] sm:$0xff] }
 0x2af   : > { %v8743_v59 = vld [vmem:[#allocation5 + $0x528] sm:$0xff] }
 0x2b0   : > { %v1234_v13 = vpop.permute.xlu1 %1233  ;;  %1385 = vmatprep.mubr.f32.mxu0 %v1291_v53  ;;  %v8570_v53 = vsel %vm1627_vm2, %v8377_v20, %v8381_v10 }
 0x2b1   : > { %v8558_v50 = vsel %vm1239_vm1, %v1232_v62, %v1234_v13  ;;  %v8561_v38 = vsel %vm1239_vm1, %v1234_v13, %v1232_v62  ;;  %1386 = vmatmul.mubr.f32.gmra.mxu0 %v1290_v36  ;;  %12032 = vst [vmem:[#allocation71_spill] sm:$0xff] %v8570_v53  ;;  %v1669_v19 = vmul.f32 %v8570_v53, %v8084_v0 }
 0x2b2   : > { %12030 = vst [vmem:[#allocation40_spill] sm:$0xff] %v8558_v50  ;;  %12031 = vst [vmem:[#allocation39_spill] sm:$0xff] %v8561_v38  ;;  %v1236_v34 = vpop.permute.xlu0 %1235  ;;  %v1293_v45 = vmul.f32 %v8561_v38, %v8219_v57  ;;  %v1292_v39 = vmul.f32 %v8558_v50, %v8206_v6  ;;  %v8609_v53 = vsel %vm1627_vm2, %v8424_v44, %v8435_v54 }
 0x2b3   : > { %12039 = vst [vmem:[#allocation78_spill] sm:$0xff] %v8609_v53 }
 0x2b4   : > { %v1238_v52 = vpop.permute.xlu1 %1237  ;;  %1390 = vmatprep.mubr.f32.mxu0 %v1293_v45  ;;  %v8585_v45 = vsel %vm1627_vm2, %v8381_v10, %v8377_v20 }
 0x2b5   : > { %v8573_v22 = vsel %vm1239_vm1, %v1236_v34, %v1238_v52  ;;  %v8576_v62 = vsel %vm1239_vm1, %v1238_v52, %v1236_v34  ;;  %1391 = vmatmul.mubr.f32.gmra.mxu0 %v1292_v39  ;;  %12035 = vst [vmem:[#allocation74_spill] sm:$0xff] %v8585_v45  ;;  %v8592_v34 = vsel %vm1627_vm2, %v8435_v54, %v8424_v44 }
 0x2b6   : > { %12033 = vst [vmem:[#allocation72_spill] sm:$0xff] %v8573_v22  ;;  %12034 = vst [vmem:[#allocation73_spill] sm:$0xff] %v8576_v62  ;;  %v1418_v36 = vpop.permute.xlu0 %1417  ;;  %v1295_v13 = vmul.f32 %v8576_v62, %v8241_v56  ;;  %v1294_v61 = vmul.f32 %v8573_v22, %v8232_v33  ;;  %v1670_v44 = vmul.f32 %v8609_v53, %v8096_v30  ;;  %v8672_v53 = vld [vmem:[#allocation5 + $0x8e8] sm:$0xff] }
 0x2b7   : > { %12036 = vst [vmem:[#allocation75_spill] sm:$0xff] %v8592_v34  ;;  %v8625_v54 = vsel %vm1627_vm2, %v8469_v21, %v8479_v27 }
 0x2b8   : > { %v1420_v28 = vpop.permute.xlu1 %1419  ;;  %1395 = vmatprep.mubr.f32.mxu0 %v1295_v13  ;;  %v1668_v13 = vmul.f32 %v8585_v45, %v8081_v3  ;;  %12041 = vst [vmem:[#allocation80_spill] sm:$0xff] %v8625_v54  ;;  %v8689_v45 = vld [vmem:[#allocation5 + $0x828] sm:$0xff] }
 0x2b9   : > { %v8595_v39 = vsel %vm1433_vm0, %v1418_v36, %v1420_v28  ;;  %v8598_v52 = vsel %vm1433_vm0, %v1420_v28, %v1418_v36  ;;  %1396 = vmatmul.mubr.f32.gmra.mxu0 %v1294_v61  ;;  %v1671_v28 = vmul.f32 %v8592_v34, %v8106_v32  ;;  %v8651_v34 = vld [vmem:[#allocation5 + $0x15a8] sm:$0xff] }
 0x2ba   : > { %12037 = vst [vmem:[#allocation76_spill] sm:$0xff] %v8595_v39  ;;  %12038 = vst [vmem:[#allocation77_spill] sm:$0xff] %v8598_v52  ;;  %v1612_v16 = vpop.permute.xlu0 %1611  ;;  %1748 = vmatprep.mubr.f32.mxu0 %v1669_v19  ;;  %v1483_v10 = vmul.f32 %v8598_v52, %v12024_v29  ;;  %v1482_v20 = vmul.f32 %v8595_v39, %v12025_v31  ;;  %v8616_v19 = vsel %vm1627_vm2, %v8479_v27, %v8469_v21  ;;  %v8641_v21 = vld [vmem:[#allocation5 + $0x1668] sm:$0xff] }
 0x2bb   : > { %12040 = vst [vmem:[#allocation79_spill] sm:$0xff] %v8616_v19  ;;  %v8644_v52 = vld [vmem:[#allocation5 + $0xa68] sm:$0xff] }
 0x2bc   : > { %v1614_v1 = vpop.permute.xlu1 %1613  ;;  %1574 = vmatprep.mubr.f32.mxu1 %v1483_v10  ;;  %v1673_v10 = vmul.f32 %v8616_v19, %v8129_v58 }
 0x2bd   : > { %1575 = vmatmul.mubr.f32.gmra.mxu1 %v1482_v20  ;;  %1749 = vmatmul.mubr.f32.vlgmr.msra.gmra.mxu0 %v1668_v13  ;;  %v8633_v20 = vsel %vm1627_vm2, %v8523_v11, %v8513_v7 }
 0x2be   : > { %v1422_v61 = vpop.permute.xlu0 %1421  ;;  %1753 = vmatprep.mubr.f32.mxu0 %v1671_v28  ;;  %6961 = vmatpush3.msra.mxu0 %v8383_v18  ;;  %12042 = vst [vmem:[#allocation81_spill] sm:$0xff] %v8633_v20 }
 0x2bf   : > { %6962 = vmatprep.subr.mxu0 %v8386_v24 }
 0x2c0   : > { %v1424_v36 = vpop.permute.xlu1 %1423  ;;  %6963 = vmatpush3.msra.mxu0 %v8430_v63 }
 0x2c1   : > { %v8636_v13 = vsel %vm1433_vm0, %v1422_v61, %v1424_v36  ;;  %v8639_v28 = vsel %vm1433_vm0, %v1424_v36, %v1422_v61  ;;  %1754 = vmatmul.mubr.f32.gmra.mxu0 %v1670_v44  ;;  %6964 = vmatprep.subr.mxu0 %v8641_v21  ;;  %v1672_v61 = vmul.f32 %v8625_v54, %v8119_v40  ;;  %v8656_v36 = vld [vmem:[#allocation5 + $0x9a8] sm:$0xff] }
 0x2c2   : > { %12043 = vst [vmem:[#allocation82_spill] sm:$0xff] %v8636_v13  ;;  %12044 = vst [vmem:[#allocation83_spill] sm:$0xff] %v8639_v28  ;;  %v1616_v27 = vpop.permute.xlu0 %1615  ;;  %1758 = vmatprep.mubr.f32.mxu0 %v1673_v10  ;;  %6965 = vmatpush3.msra.mxu0 %v8644_v52  ;;  %v1485_v39 = vmul.f32 %v8639_v28, %v12028_v25  ;;  %v1484_v19 = vmul.f32 %v8636_v13, %v12029_v2  ;;  %v8669_v54 = vld [vmem:[#allocation5 + $0x14e8] sm:$0xff] }
 0x2c3   : > { %6966 = vmatprep.subr.mxu0 %v8651_v34  ;;  %v1675_v10 = vmul.f32 %v8633_v20, %v8152_v17  ;;  %v8664_v28 = vsel %vm1627_vm2, %v8513_v7, %v8523_v11  ;;  %v8667_v13 = vsel %vm1627_vm2, %v1614_v1, %v1612_v16  ;;  %v8675_v20 = vld [vmem:[#allocation5 + $0x1428] sm:$0xff] }
 0x2c4   : > { %v1618_v44 = vpop.permute.xlu1 %1617  ;;  %1579 = vmatprep.mubr.f32.mxu1 %v1485_v39  ;;  %6967 = vmatpush3.msra.mxu0 %v8656_v36  ;;  %12045 = vst [vmem:[#allocation84_spill] sm:$0xff] %v8664_v28  ;;  %12046 = vst [vmem:[#allocation85_spill] sm:$0xff] %v8667_v13  ;;  %v1674_v11 = vmul.f32 %v8664_v28, %v12020_v49  ;;  %v1677_v62 = vmul.f32 %v8667_v13, %v12024_v29  ;;  %v8697_v28 = vld [vmem:[#allocation5 + $0x1368] sm:$0xff] }
 0x2c5   : > { %1580 = vmatmul.mubr.f32.gmra.mxu1 %v1484_v19  ;;  %1759 = vmatmul.mubr.f32.gmra.mxu0 %v1672_v61  ;;  %v8681_v19 = vsel %vm1627_vm2, %v1612_v16, %v1614_v1  ;;  %v8695_v22 = vsel %vm1627_vm2, %v1618_v44, %v1616_v27  ;;  %v8707_v13 = vld [vmem:[#allocation5 + $0x12a8] sm:$0xff]  ;;  %v8713_v50 = vsel %vm1627_vm2, %v1616_v27, %v1618_v44 }
 0x2c6   : > { %6968 = vmatprep.subr.mxu0 %v8669_v54  ;;  %v1426_v39 = vpop.permute.xlu0 %1425  ;;  %1763 = vmatprep.mubr.f32.mxu0 %v1675_v10  ;;  %12047 = vst [vmem:[#allocation86_spill] sm:$0xff] %v8681_v19  ;;  %12050 = vst [vmem:[#allocation89_spill] sm:$0xff] %v8695_v22  ;;  %v1676_v38 = vmul.f32 %v8681_v19, %v12025_v31  ;;  %v8726_v27 = vld [vmem:[#allocation5 + $0x5e8] sm:$0xff] }
 0x2c7   : > { %6969 = vmatpush3.msra.mxu0 %v8672_v53  ;;  %12051 = vst [vmem:[#allocation90_spill] sm:$0xff] %v8713_v50  ;;  %v8729_v44 = vld [vmem:[#allocation5 + $0x1128] sm:$0xff] }
 0x2c8   : > { %6970 = vmatprep.subr.mxu0 %v8675_v20  ;;  %v1428_v7 = vpop.permute.xlu1 %1427 }
 0x2c9   : > { %v8684_v61 = vsel %vm1433_vm0, %v1426_v39, %v1428_v7  ;;  %v8687_v10 = vsel %vm1433_vm0, %v1428_v7, %v1426_v39  ;;  %6971 = vmatpush3.msra.mxu0 %v8689_v45  ;;  %v8704_v7 = vld [vmem:[#allocation5 + $0x768] sm:$0xff] }
 0x2ca   : > { %12048 = vst [vmem:[#allocation87_spill] sm:$0xff] %v8684_v61  ;;  %12049 = vst [vmem:[#allocation88_spill] sm:$0xff] %v8687_v10  ;;  %1764 = vmatmul.mubr.f32.gmra.mxu0 %v1674_v11  ;;  %6972 = vmatprep.subr.mxu0 %v8697_v28  ;;  %v1620_v1 = vpop.permute.xlu0 %1619  ;;  %v1487_v16 = vmul.f32 %v8687_v10, %v8219_v57  ;;  %v1486_v39 = vmul.f32 %v8684_v61, %v8206_v6  ;;  %v8715_v10 = vld [vmem:[#allocation5 + $0x6a8] sm:$0xff] }
 0x2cb   : > { %1768 = vmatprep.mubr.f32.mxu0 %v1677_v62  ;;  %6973 = vmatpush3.msra.mxu0 %v8704_v7  ;;  %v1679_v62 = vmul.f32 %v8695_v22, %v12028_v25  ;;  %v1678_v22 = vmul.f32 %v8713_v50, %v12029_v2  ;;  %v8758_v50 = vld [vmem:[#allocation5 + $0xfa8] sm:$0xff] }
 0x2cc   : > { %6974 = vmatprep.subr.mxu0 %v8707_v13  ;;  %v1622_v11 = vpop.permute.xlu1 %1621  ;;  %1584 = vmatprep.mubr.f32.mxu1 %v1487_v16  ;;  %12057 = vst [vmem:[#allocation96_spill] sm:$0xff] %v8758_v50 }
 0x2cd   : > { %6975 = vmatpush3.msra.mxu0 %v8715_v10  ;;  %1585 = vmatmul.mubr.f32.gmra.mxu1 %v1486_v39  ;;  %v8721_v61 = vsel %vm1627_vm2, %v1622_v11, %v1620_v1 }
 0x2ce   : > { %12052 = vst [vmem:[#allocation91_spill] sm:$0xff] %v8721_v61  ;;  %1769 = vmatmul.mubr.f32.gmra.mxu0 %v1676_v38  ;;  %6976 = vmatprep.subr.mxu0 %v8723_v43  ;;  %v1430_v16 = vpop.permute.xlu0 %1429  ;;  %v8735_v38 = vsel %vm1627_vm2, %v1620_v1, %v1622_v11  ;;  %v1681_v23 = vmul.f32 %v8721_v61, %v8219_v57 }
 0x2cf   : > { %1773 = vmatprep.mubr.f32.mxu0 %v1679_v62  ;;  %6977 = vmatpush3.msra.mxu0 %v8726_v27  ;;  %12053 = vst [vmem:[#allocation92_spill] sm:$0xff] %v8735_v38  ;;  %v1680_v61 = vmul.f32 %v8735_v38, %v8206_v6 }
 0x2d0   : > { %6978 = vmatprep.subr.mxu0 %v8729_v44  ;;  %v1432_v39 = vpop.permute.xlu1 %1431 }
 0x2d1   : > { %v8738_v19 = vsel %vm1433_vm0, %v1430_v16, %v1432_v39  ;;  %v8741_v62 = vsel %vm1433_vm0, %v1432_v39, %v1430_v16  ;;  %6979 = vmatpush3.msra.mxu0 %v8743_v59  ;;  %v8755_v16 = vld [vmem:[#allocation5 + $0x468] sm:$0xff] }
 0x2d2   : > { %12054 = vst [vmem:[#allocation93_spill] sm:$0xff] %v8738_v19  ;;  %12055 = vst [vmem:[#allocation94_spill] sm:$0xff] %v8741_v62  ;;  %1774 = vmatmul.mubr.f32.gmra.mxu0 %v1678_v22  ;;  %6980 = vmatprep.subr.mxu0 %v8748_v9  ;;  %v1489_v1 = vmul.f32 %v8741_v62, %v8241_v56  ;;  %v1488_v11 = vmul.f32 %v8738_v19, %v8232_v33  ;;  %v1624_v39 = vpop.permute.xlu0 %1623 }
 0x2d3   : > { %1778 = vmatprep.mubr.f32.mxu0 %v1681_v23  ;;  %12056 = vst [vmem:[#allocation95_spill] sm:$0xff] %v8755_v16  ;;  %6981 = vmatpush3.msra.mxu0 %v8755_v16  ;;  %v8769_v23 = vld [vmem:[#allocation5 + $0x3a8] sm:$0xff]  ;;  %v12060_v16 = vld [vmem:[#allocation32_spill] sm:$0xff] }
 0x2d4   : > { %6982 = vmatprep.subr.mxu0 %v8758_v50  ;;  %v1626_v22 = vpop.permute.xlu1 %1625  ;;  %1589 = vmatprep.mubr.f32.mxu1 %v1489_v1  ;;  %v1790_v57 = vmul.f32 %v12060_v16, %v8084_v0  ;;  %v8774_v50 = vld [vmem:[#allocation5 + $0xee8] sm:$0xff] }
 0x2d5   : > { %v8764_v62 = vsel %vm1627_vm2, %v1624_v39, %v1626_v22  ;;  %v8767_v19 = vsel %vm1627_vm2, %v1626_v22, %v1624_v39  ;;  %6983 = vmatpush3.msra.mxu0 %v8769_v23  ;;  %1590 = vmatmul.mubr.f32.gmra.mxu1 %v1488_v11  ;;  %v8781_v22 = vld [vmem:[#allocation5 + $0x2e8] sm:$0xff] }
 0x2d6   : > { %12058 = vst [vmem:[#allocation97_spill] sm:$0xff] %v8764_v62  ;;  %12059 = vst [vmem:[#allocation98_spill] sm:$0xff] %v8767_v19  ;;  %1779 = vmatmul.mubr.f32.gmra.mxu0 %v1680_v61  ;;  %6984 = vmatprep.subr.mxu0 %v8774_v50  ;;  %v1683_v1 = vmul.f32 %v8767_v19, %v8241_v56  ;;  %v1682_v39 = vmul.f32 %v8764_v62, %v8232_v33  ;;  %v12061_v11 = vld [vmem:[#allocation33_spill] sm:$0xff]  ;;  %v12062_v19 = vld [vmem:[#allocation34_spill] sm:$0xff] }
 0x2d7   : > { %1869 = vmatprep.mubr.f32.mxu1 %v1790_v57  ;;  %6985 = vmatpush3.msra.mxu0 %v8781_v22  ;;  %v1789_v38 = vmul.f32 %v12061_v11, %v8081_v3  ;;  %v8786_v16 = vld [vmem:[#allocation5 + $0xe28] sm:$0xff]  ;;  %v1792_v57 = vmul.f32 %v12062_v19, %v8106_v32  ;;  %v1911_v11 = vmul.f32 %v8391_v46, %v8084_v0  ;;  %v12063_v19 = vld [vmem:[#allocation35_spill] sm:$0xff] }
 0x2d8   : > { %6986 = vmatprep.subr.mxu0 %v8786_v16  ;;  %1783 = vmatprep.mubr.f32.mxu0 %v1683_v1  ;;  %v8789_v61 = vld [vmem:[#allocation5 + $0x228] sm:$0xff]  ;;  %v1910_v46 = vmul.f32 %v8394_v26, %v8081_v3  ;;  %v1793_v26 = vmul.f32 %v8135_v60, %v8119_v40  ;;  %v1914_v60 = vmul.f32 %v8449_v4, %v8119_v40 }
 0x2d9   : > { %6987 = vmatpush3.msra.mxu0 %v8789_v61  ;;  %1870 = vmatmul.mubr.f32.vlgmr.msra.gmra.mxu1 %v1789_v38  ;;  %v8794_v62 = vld [vmem:[#allocation5 + $0xd68] sm:$0xff] }
 0x2da   : > { %1784 = vmatmul.mubr.f32.gmra.mxu0 %v1682_v39  ;;  %6988 = vmatprep.subr.mxu0 %v8794_v62  ;;  %v8800_v1 = vld [vmem:[#allocation5 + $0x168] sm:$0xff]  ;;  %v1791_v39 = vmul.f32 %v12063_v19, %v8096_v30  ;;  %v1913_v19 = vmul.f32 %v8407_v5, %v8106_v32  ;;  %v1796_v5 = vmul.f32 %v8148_v12, %v8152_v17 }
 0x2db   : > { %7017 = vmatpush3.msra.mxu1 %v8383_v18  ;;  %1874 = vmatprep.mubr.f32.mxu1 %v1792_v57  ;;  %v8804_v38 = vld [vmem:[#allocation5 + $0xca8] sm:$0xff]  ;;  %v1798_v12 = vmul.f32 %v8171_v14, %v12024_v29  ;;  %v1916_v14 = vmul.f32 %v8493_v37, %v12020_v49  ;;  %v12066_v37 = vld [vmem:[#allocation43_spill] sm:$0xff] }
 0x2dc   : > { %6989 = vmatpush3.msra.mxu0 %v8800_v1  ;;  %1990 = vmatprep.mubr.f32.mxu0 %v1911_v11  ;;  %v8812_v57 = vld [vmem:[#allocation5 + $0xa8] sm:$0xff]  ;;  %v1794_v11 = vmul.f32 %v8125_v41, %v8129_v58  ;;  %v1912_v41 = vmul.f32 %v8403_v47, %v8096_v30  ;;  %v1917_v47 = vmul.f32 %v8490_v35, %v8152_v17 }
 0x2dd   : > { %7018 = vmatprep.subr.mxu1 %v8386_v24  ;;  %6990 = vmatprep.subr.mxu0 %v8804_v38 }
 0x2de   : > { %7019 = vmatpush3.msra.mxu1 %v8430_v63  ;;  %6991 = vmatpush3.msra.mxu0 %v8812_v57 }
 0x2df   : > { %7020 = vmatprep.subr.mxu1 %v8641_v21  ;;  %1875 = vmatmul.mubr.f32.gmra.mxu1 %v1791_v39 }
 0x2e0   : > { %1991 = vmatmul.mubr.f32.vlgmr.msra.gmra.mxu0 %v1910_v46  ;;  %7021 = vmatpush3.msra.mxu1 %v8644_v52  ;;  %v12078_v46 = vld [vmem:[#allocation63_spill] sm:$0xff] }
 0x2e1   : > { %7072 = vmatprep.subr.mxu0 %v8529_v15  ;;  %1879 = vmatprep.mubr.f32.mxu1 %v1794_v11  ;;  %v12067_v15 = vld [vmem:[#allocation42_spill] sm:$0xff]  ;;  %v2032_v11 = vmul.f32 %v12078_v46, %v8084_v0  ;;  %v12104_v46 = vld [vmem:[#allocation89_spill] sm:$0xff] }
 0x2e2   : > { %1995 = vmatprep.mubr.f32.mxu0 %v1913_v19  ;;  %7022 = vmatprep.subr.mxu1 %v8651_v34  ;;  %v12079_v19 = vld [vmem:[#allocation73_spill] sm:$0xff] }
 0x2e3   : > { %7073 = vmatpush3.msra.mxu0 %v8383_v18  ;;  %7023 = vmatpush3.msra.mxu1 %v8656_v36  ;;  %v1915_v18 = vmul.f32 %v8446_v51, %v8129_v58  ;;  %v1919_v51 = vmul.f32 %v8535_v42, %v12024_v29  ;;  %v1802_v42 = vmul.f32 %v12067_v15, %v12066_v37 }
 0x2e4   : > { %7074 = vmatprep.subr.mxu0 %v8386_v24  ;;  %7024 = vmatprep.subr.mxu1 %v8669_v54  ;;  %v1800_v24 = vmul.f32 %v8191_v48, %v12028_v25  ;;  %v12065_v48 = vld [vmem:[#allocation70_spill] sm:$0xff] }
 0x2e5   : > { %7075 = vmatpush3.msra.mxu0 %v8430_v63  ;;  %1880 = vmatmul.mubr.f32.gmra.mxu1 %v1793_v26  ;;  %v1795_v63 = vmul.f32 %v8158_v8, %v12020_v49  ;;  %v1797_v8 = vmul.f32 %v8181_v55, %v12025_v31  ;;  %v12064_v55 = vld [vmem:[#allocation41_spill] sm:$0xff]  ;;  %v1918_v35 = vmul.f32 %v12065_v48, %v12025_v31 }
 0x2e6   : > { %1996 = vmatmul.mubr.f32.gmra.mxu0 %v1912_v41  ;;  %7025 = vmatpush3.msra.mxu1 %v8672_v53  ;;  %v1799_v4 = vmul.f32 %v12064_v55, %v12029_v2  ;;  %v1924_v26 = vmul.f32 %v12079_v19, %v8232_v33 }
 0x2e7   : > { %7076 = vmatprep.subr.mxu0 %v8641_v21  ;;  %1884 = vmatprep.mubr.f32.mxu1 %v1796_v5  ;;  %v12081_v5 = vld [vmem:[#allocation65_spill] sm:$0xff] }
 0x2e8   : > { %2000 = vmatprep.mubr.f32.mxu0 %v1915_v18  ;;  %7026 = vmatprep.subr.mxu1 %v8675_v20  ;;  %v12082_v18 = vld [vmem:[#allocation74_spill] sm:$0xff] }
 0x2e9   : > { %7077 = vmatpush3.msra.mxu0 %v8644_v52  ;;  %7027 = vmatpush3.msra.mxu1 %v8689_v45  ;;  %v12070_v52 = vld [vmem:[#allocation96_spill] sm:$0xff] }
 0x2ea   : > { %7078 = vmatprep.subr.mxu0 %v8651_v34  ;;  %7028 = vmatprep.subr.mxu1 %v8697_v28 }
 0x2eb   : > { %7079 = vmatpush3.msra.mxu0 %v8656_v36  ;;  %1885 = vmatmul.mubr.f32.gmra.mxu1 %v1795_v63  ;;  %v12074_v36 = vld [vmem:[#allocation40_spill] sm:$0xff]  ;;  %v2153_v63 = vmul.f32 %v12082_v18, %v8084_v0  ;;  %v12086_v0 = vld [vmem:[#allocation78_spill] sm:$0xff]  ;;  %v12108_v18 = vld [vmem:[#allocation91_spill] sm:$0xff] }
 0x2ec   : > { %2001 = vmatmul.mubr.f32.gmra.mxu0 %v1914_v60  ;;  %7029 = vmatpush3.msra.mxu1 %v8704_v7 }
 0x2ed   : > { %7080 = vmatprep.subr.mxu0 %v8669_v54  ;;  %1889 = vmatprep.mubr.f32.mxu1 %v1798_v12  ;;  %v12071_v54 = vld [vmem:[#allocation44_spill] sm:$0xff] }
 0x2ee   : > { %2005 = vmatprep.mubr.f32.mxu0 %v1917_v47  ;;  %7030 = vmatprep.subr.mxu1 %v8707_v13 }
 0x2ef   : > { %7081 = vmatpush3.msra.mxu0 %v8672_v53  ;;  %7031 = vmatpush3.msra.mxu1 %v8715_v10  ;;  %v12068_v53 = vld [vmem:[#allocation95_spill] sm:$0xff] }
 0x2f0   : > { %7082 = vmatprep.subr.mxu0 %v8675_v20  ;;  %7032 = vmatprep.subr.mxu1 %v8723_v43  ;;  %v1801_v20 = vmul.f32 %v12071_v54, %v8206_v6  ;;  %v12096_v54 = vld [vmem:[#allocation81_spill] sm:$0xff] }
 0x2f1   : > { %7083 = vmatpush3.msra.mxu0 %v8689_v45  ;;  %1890 = vmatmul.mubr.f32.gmra.mxu1 %v1797_v8  ;;  %v12069_v45 = vld [vmem:[#allocation38_spill] sm:$0xff]  ;;  %v12087_v8 = vld [vmem:[#allocation68_spill] sm:$0xff] }
 0x2f2   : > { %2006 = vmatmul.mubr.f32.gmra.mxu0 %v1916_v14  ;;  %7033 = vmatpush3.msra.mxu1 %v8726_v27  ;;  %v1921_v34 = vmul.f32 %v12069_v45, %v12028_v25  ;;  %v2035_v14 = vmul.f32 %v12087_v8, %v8119_v40 }
 0x2f3   : > { %7084 = vmatprep.subr.mxu0 %v8697_v28  ;;  %1894 = vmatprep.mubr.f32.mxu1 %v1800_v24  ;;  %v12089_v24 = vld [vmem:[#allocation36_spill] sm:$0xff] }
 0x2f4   : > { %2010 = vmatprep.mubr.f32.mxu0 %v1919_v51  ;;  %7034 = vmatprep.subr.mxu1 %v8729_v44  ;;  %v2038_v51 = vmul.f32 %v12089_v24, %v8152_v17 }
 0x2f5   : > { %7085 = vmatpush3.msra.mxu0 %v8704_v7  ;;  %7035 = vmatpush3.msra.mxu1 %v8743_v59 }
 0x2f6   : > { %7086 = vmatprep.subr.mxu0 %v8707_v13  ;;  %7036 = vmatprep.subr.mxu1 %v8748_v9  ;;  %v12072_v13 = vld [vmem:[#allocation37_spill] sm:$0xff] }
 0x2f7   : > { %7087 = vmatpush3.msra.mxu0 %v8715_v10  ;;  %1895 = vmatmul.mubr.f32.gmra.mxu1 %v1799_v4  ;;  %v1920_v28 = vmul.f32 %v12072_v13, %v12029_v2  ;;  %v1923_v10 = vmul.f32 %v12074_v36, %v12066_v37  ;;  %v12091_v4 = vld [vmem:[#allocation69_spill] sm:$0xff] }
 0x2f8   : > { %2011 = vmatmul.mubr.f32.gmra.mxu0 %v1918_v35  ;;  %7037 = vmatpush3.msra.mxu1 %v12068_v53  ;;  %v2037_v48 = vmul.f32 %v12091_v4, %v12020_v49  ;;  %v12092_v35 = vld [vmem:[#allocation79_spill] sm:$0xff] }
 0x2f9   : > { %7088 = vmatprep.subr.mxu0 %v8723_v43  ;;  %1899 = vmatprep.mubr.f32.mxu1 %v1802_v42  ;;  %v12073_v43 = vld [vmem:[#allocation45_spill] sm:$0xff]  ;;  %v2156_v15 = vmul.f32 %v12092_v35, %v8119_v40  ;;  %v12097_v40 = vld [vmem:[#allocation82_spill] sm:$0xff] }
 0x2fa   : > { %2015 = vmatprep.mubr.f32.mxu0 %v1921_v34  ;;  %7038 = vmatprep.subr.mxu1 %v12070_v52  ;;  %v1804_v21 = vmul.f32 %v12073_v43, %v8241_v56  ;;  %v12095_v34 = vld [vmem:[#allocation77_spill] sm:$0xff]  ;;  %v2042_v13 = vmul.f32 %v12097_v40, %v12028_v25 }
 0x2fb   : > { %7089 = vmatpush3.msra.mxu0 %v8726_v27  ;;  %7039 = vmatpush3.msra.mxu1 %v8769_v23  ;;  %v12076_v27 = vld [vmem:[#allocation39_spill] sm:$0xff] }
 0x2fc   : > { %7090 = vmatprep.subr.mxu0 %v8729_v44  ;;  %7040 = vmatprep.subr.mxu1 %v8774_v50  ;;  %v1922_v44 = vmul.f32 %v12076_v27, %v8206_v6 }
 0x2fd   : > { %7091 = vmatpush3.msra.mxu0 %v8743_v59  ;;  %1900 = vmatmul.mubr.f32.gmra.mxu1 %v1801_v20  ;;  %v12075_v59 = vld [vmem:[#allocation46_spill] sm:$0xff]  ;;  %v2158_v20 = vmul.f32 %v12096_v54, %v12020_v49  ;;  %v12101_v49 = vld [vmem:[#allocation87_spill] sm:$0xff] }
 0x2fe   : > { %2016 = vmatmul.mubr.f32.gmra.mxu0 %v1920_v28  ;;  %7041 = vmatpush3.msra.mxu1 %v8781_v22  ;;  %v1803_v7 = vmul.f32 %v12075_v59, %v8232_v33  ;;  %v12098_v28 = vld [vmem:[#allocation86_spill] sm:$0xff] }
 0x2ff   : > { %7092 = vmatprep.subr.mxu0 %v8748_v9  ;;  %1904 = vmatprep.mubr.f32.mxu1 %v1804_v21  ;;  %v12077_v9 = vld [vmem:[#allocation72_spill] sm:$0xff]  ;;  %v2161_v43 = vmul.f32 %v12098_v28, %v12024_v29  ;;  %v12099_v21 = vld [vmem:[#allocation83_spill] sm:$0xff] }
 0x300   : > { %2020 = vmatprep.mubr.f32.mxu0 %v1923_v10  ;;  %7042 = vmatprep.subr.mxu1 %v8786_v16  ;;  %v1925_v39 = vmul.f32 %v12077_v9, %v8241_v56  ;;  %v2041_v36 = vmul.f32 %v12099_v21, %v12029_v2  ;;  %v12100_v10 = vld [vmem:[#allocation85_spill] sm:$0xff]  ;;  %v12103_v9 = vld [vmem:[#allocation88_spill] sm:$0xff] }
 0x301   : > { %7093 = vmatpush3.msra.mxu0 %v12068_v53  ;;  %7043 = vmatpush3.msra.mxu1 %v8789_v61  ;;  %v12094_v53 = vld [vmem:[#allocation84_spill] sm:$0xff]  ;;  %v2160_v59 = vmul.f32 %v12100_v10, %v12025_v31 }
 0x302   : > { %7094 = vmatprep.subr.mxu0 %v12070_v52  ;;  %7044 = vmatprep.subr.mxu1 %v8794_v62  ;;  %v2159_v45 = vmul.f32 %v12094_v53, %v8152_v17  ;;  %v2039_v52 = vmul.f32 %v12095_v34, %v12025_v31  ;;  %v12105_v31 = vld [vmem:[#allocation93_spill] sm:$0xff] }
 0x303   : > { %7095 = vmatpush3.msra.mxu0 %v8769_v23  ;;  %1905 = vmatmul.mubr.f32.gmra.mxu1 %v1803_v7  ;;  %v12080_v23 = vld [vmem:[#allocation64_spill] sm:$0xff]  ;;  %v2044_v7 = vmul.f32 %v12101_v49, %v12066_v37  ;;  %v2046_v19 = vmul.f32 %v12105_v31, %v8241_v56 }
 0x304   : > { %2021 = vmatmul.mubr.f32.gmra.mxu0 %v1922_v44  ;;  %7045 = vmatpush3.msra.mxu1 %v8800_v1  ;;  %v2031_v41 = vmul.f32 %v12080_v23, %v8081_v3  ;;  %v12102_v44 = vld [vmem:[#allocation90_spill] sm:$0xff]  ;;  %v12106_v23 = vld [vmem:[#allocation92_spill] sm:$0xff] }
 0x305   : > { %7096 = vmatprep.subr.mxu0 %v8774_v50  ;;  %2025 = vmatprep.mubr.f32.mxu0 %v1925_v39  ;;  %v2034_v50 = vmul.f32 %v12081_v5, %v8106_v32  ;;  %v2043_v39 = vmul.f32 %v12103_v9, %v8206_v6  ;;  %v12107_v5 = vld [vmem:[#allocation94_spill] sm:$0xff] }
 0x306   : > { %7046 = vmatprep.subr.mxu1 %v8804_v38  ;;  %2111 = vmatprep.mubr.f32.mxu1 %v2032_v11  ;;  %v2162_v11 = vmul.f32 %v12104_v46, %v12029_v2  ;;  %v2164_v2 = vmul.f32 %v12108_v18, %v8206_v6 }
 0x307   : > { %7097 = vmatpush3.msra.mxu0 %v8781_v22  ;;  %7047 = vmatpush3.msra.mxu1 %v8812_v57  ;;  %v12083_v22 = vld [vmem:[#allocation66_spill] sm:$0xff] }
 0x308   : > { %7098 = vmatprep.subr.mxu0 %v8786_v16  ;;  %2026 = vmatmul.mubr.f32.gmra.mxu0 %v1924_v26  ;;  %v2033_v60 = vmul.f32 %v12083_v22, %v8096_v30  ;;  %v12084_v16 = vld [vmem:[#allocation71_spill] sm:$0xff] }
 0x309   : > { %7099 = vmatpush3.msra.mxu0 %v8789_v61  ;;  %2112 = vmatmul.mubr.f32.vlgmr.msra.gmra.mxu1 %v2031_v41  ;;  %v2152_v12 = vmul.f32 %v12084_v16, %v8081_v3  ;;  %v12085_v61 = vld [vmem:[#allocation67_spill] sm:$0xff]  ;;  %v2165_v41 = vmul.f32 %v12106_v23, %v12066_v37  ;;  %v12111_v37 = vld [vmem:[#allocation98_spill] sm:$0xff] }
 0x30a   : > { %7100 = vmatprep.subr.mxu0 %v8794_v62  ;;  %2116 = vmatprep.mubr.f32.mxu1 %v2034_v50  ;;  %v2036_v47 = vmul.f32 %v12085_v61, %v8129_v58  ;;  %v2155_v62 = vmul.f32 %v12086_v0, %v8106_v32  ;;  %v12088_v3 = vld [vmem:[#allocation75_spill] sm:$0xff]  ;;  %v2045_v50 = vmul.f32 %v12107_v5, %v8232_v33 }
 0x30b   : > { %7101 = vmatpush3.msra.mxu0 %v8800_v1  ;;  %2232 = vmatprep.mubr.f32.mxu0 %v2153_v63  ;;  %v8943_v1 = vpop.f32.mrf.mxu0  ;;  %v12109_v63 = vld [vmem:[#allocation97_spill] sm:$0xff] }
 0x30c   : > { %7102 = vmatprep.subr.mxu0 %v8804_v38  ;;  %v2154_v38 = vmul.f32 %v12088_v3, %v8096_v30  ;;  %v12093_v30 = vld [vmem:[#allocation76_spill] sm:$0xff]  ;;  %v2167_v22 = vmul.f32 %v12109_v63, %v8241_v56 }
 0x30d   : > { %7103 = vmatpush3.msra.mxu0 %v8812_v57  ;;  %2117 = vmatmul.mubr.f32.gmra.mxu1 %v2033_v60  ;;  %v12090_v57 = vld [vmem:[#allocation80_spill] sm:$0xff]  ;;  %v8953_v32 = vpop.f32.mrf.mxu0  ;;  %v2040_v42 = vmul.f32 %v12093_v30, %v12024_v29  ;;  %v2163_v29 = vmul.f32 %v12102_v44, %v12028_v25  ;;  %v12110_v60 = vmov 0.0  }
 0x30e   : > { %2233 = vmatmul.mubr.f32.vlgmr.msra.gmra.mxu0 %v2152_v12  ;;  %2121 = vmatprep.mubr.f32.mxu1 %v2036_v47  ;;  %v2157_v55 = vmul.f32 %v12090_v57, %v8129_v58  ;;  %v2166_v12 = vmul.f32 %v12111_v37, %v8232_v33 }
 0x30f   : > { %2237 = vmatprep.mubr.f32.mxu0 %v2155_v62  ;;  %v8963_v58 = vpop.f32.mrf.mxu0 }
 0x311   : > { %2122 = vmatmul.mubr.f32.gmra.mxu1 %v2035_v14  ;;  %v8973_v17 = vpop.f32.mrf.mxu0  ;;  %v9023_v14 = vpop.f32.mrf.mxu1 }
 0x312   : > { %2238 = vmatmul.mubr.f32.gmra.mxu0 %v2154_v38  ;;  %2126 = vmatprep.mubr.f32.mxu1 %v2038_v51  ;;  %12112 = vst [vmem:[#allocation32_spill] sm:$0xff] %v9023_v14 }
 0x313   : > { %2242 = vmatprep.mubr.f32.mxu0 %v2157_v55  ;;  %v8981_v27 = vpop.f32.mrf.mxu0 }
 0x315   : > { %2127 = vmatmul.mubr.f32.gmra.mxu1 %v2037_v48  ;;  %v8991_v26 = vpop.f32.mrf.mxu0 }
 0x316   : > { %2243 = vmatmul.mubr.f32.gmra.mxu0 %v2156_v15  ;;  %2131 = vmatprep.mubr.f32.mxu1 %v2040_v42 }
 0x317   : > { %2247 = vmatprep.mubr.f32.mxu0 %v2159_v45  ;;  %v8995_v25 = vpop.f32.mrf.mxu0 }
 0x319   : > { %2132 = vmatmul.mubr.f32.gmra.mxu1 %v2039_v52  ;;  %v9004_v16 = vpop.f32.mrf.mxu0 }
 0x31a   : > { %2248 = vmatmul.mubr.f32.gmra.mxu0 %v2158_v20  ;;  %2136 = vmatprep.mubr.f32.mxu1 %v2042_v13 }
 0x31b   : > { %2252 = vmatprep.mubr.f32.mxu0 %v2161_v43  ;;  %v9008_v61 = vpop.f32.mrf.mxu0 }
 0x31d   : > { %2137 = vmatmul.mubr.f32.gmra.mxu1 %v2041_v36  ;;  %v9011_v47 = vpop.f32.mrf.mxu0 }
 0x31e   : > { %2253 = vmatmul.mubr.f32.gmra.mxu0 %v2160_v59  ;;  %2141 = vmatprep.mubr.f32.mxu1 %v2044_v7 }
 0x31f   : > { %2257 = vmatprep.mubr.f32.mxu0 %v2163_v29  ;;  %v9013_v6 = vpop.f32.mrf.mxu0 }
 0x321   : > { %2142 = vmatmul.mubr.f32.gmra.mxu1 %v2043_v39  ;;  %v9015_v0 = vpop.f32.mrf.mxu0 }
 0x322   : > { %2258 = vmatmul.mubr.f32.gmra.mxu0 %v2162_v11  ;;  %2146 = vmatprep.mubr.f32.mxu1 %v2046_v19 }
 0x323   : > { %2262 = vmatprep.mubr.f32.mxu0 %v2165_v41  ;;  %v9017_v56 = vpop.f32.mrf.mxu0 }
 0x325   : > { %2147 = vmatmul.mubr.f32.gmra.mxu1 %v2045_v50  ;;  %v9019_v62 = vpop.f32.mrf.mxu0 }
 0x326   : > { %2263 = vmatmul.mubr.f32.gmra.mxu0 %v2164_v2  ;;  %3105 = vmatprep.mubr.f32.mxu1 %v12110_v60 }
 0x327   : > { %2267 = vmatprep.mubr.f32.mxu0 %v2167_v22  ;;  %v9021_v8 = vpop.f32.mrf.mxu0 }
 0x329   : > { %v9025_v33 = vpop.f32.mrf.mxu0 }
 0x32a   : > { %2268 = vmatmul.mubr.f32.gmra.mxu0 %v2166_v12 }
 0x32b   : > { %3282 = vmatprep.mubr.f32.mxu0 %v12110_v60 }
 0x33f   : > { %v6824_v3 = vpop.f32.mrf.mxu1 }
 0x341   : > { %v6825_v57 = vpop.f32.mrf.mxu1 }
 0x342   : > { %v6826_v4 = vadd.f32 %v6825_v57, %v6824_v3 }
 0x347   : > { %v6768_v38 = vpop.f32.mrf.mxu0 }
 0x349   : > { %v6769_v24 = vpop.f32.mrf.mxu0 }
 0x34a   : > { %v6770_v51 = vadd.f32 %v6769_v24, %v6768_v38 }
 0x34b   : > { %v6771_v55 = vpop.f32.mrf.mxu0 }
 0x34c   : > { %2281 = vrot.lane.b32.xlu0 %v6770_v51, %s7633_s27 }
 0x34d   : > { %v6772_v48 = vpop.f32.mrf.mxu0  ;;  %v6827_v35 = vpop.f32.mrf.mxu1 }
 0x34e   : > { %v6773_v15 = vadd.f32 %v6772_v48, %v6771_v55 }
 0x34f   : > { %v6828_v30 = vpop.f32.mrf.mxu1 }
 0x350   : > { %2313 = vrot.lane.b32.xlu0 %v6826_v4, %s7632_s20  ;;  %v6829_v53 = vadd.f32 %v6828_v30, %v6827_v35 }
 0x354   : > { %2283 = vrot.lane.b32.xlu0 %v6773_v15, %s7633_s27 }
 0x355   : > { %v6774_v42 = vpop.f32.mrf.mxu0 }
 0x357   : > { %v6775_v45 = vpop.f32.mrf.mxu0 }
 0x358   : > { %2315 = vrot.lane.b32.xlu0 %v6829_v53, %s7632_s20  ;;  %v6776_v52 = vadd.f32 %v6775_v45, %v6774_v42 }
 0x359   : > { %v6830_v34 = vpop.f32.mrf.mxu1 }
 0x35b   : > { %v6831_v54 = vpop.f32.mrf.mxu1 }
 0x35c   : > { %2285 = vrot.lane.b32.xlu0 %v6776_v52, %s7633_s27  ;;  %v6832_v20 = vadd.f32 %v6831_v54, %v6830_v34 }
 0x360   : > { %2317 = vrot.lane.b32.xlu0 %v6832_v20, %s7632_s20 }
 0x361   : > { %v6777_v40 = vpop.f32.mrf.mxu0 }
 0x363   : > { %v6778_v13 = vpop.f32.mrf.mxu0 }
 0x364   : > { %v6779_v28 = vadd.f32 %v6778_v13, %v6777_v40 }
 0x365   : > { %v6833_v43 = vpop.f32.mrf.mxu1 }
 0x366   : > { %2287 = vrot.lane.b32.xlu0 %v6779_v28, %s7633_s27 }
 0x367   : > { %v6834_v21 = vpop.f32.mrf.mxu1 }
 0x368   : > { %v6835_v36 = vadd.f32 %v6834_v21, %v6833_v43 }
 0x36a   : > { %2319 = vrot.lane.b32.xlu0 %v6835_v36, %s7632_s20 }
 0x36d   : > { %v6780_v10 = vpop.f32.mrf.mxu0 }
 0x36f   : > { %v6781_v59 = vpop.f32.mrf.mxu0 }
 0x370   : > { %v6782_v49 = vadd.f32 %v6781_v59, %v6780_v10 }
 0x371   : > { %v6783_v7 = vpop.f32.mrf.mxu0 }
 0x372   : > { %2289 = vrot.lane.b32.xlu0 %v6782_v49, %s7633_s27 }
 0x373   : > { %v6784_v44 = vpop.f32.mrf.mxu0 }
 0x374   : > { %v6785_v18 = vadd.f32 %v6784_v44, %v6783_v7 }
 0x375   : > { %v6786_v29 = vpop.f32.mrf.mxu0 }
 0x377   : > { %v6787_v9 = vpop.f32.mrf.mxu0 }
 0x378   : > { %v6788_v38 = vadd.f32 %v6787_v9, %v6786_v29 }
 0x379   : > { %v6789_v39 = vpop.f32.mrf.mxu0 }
 0x37b   : > { %v6790_v46 = vpop.f32.mrf.mxu0 }
 0x37c   : > { %v6791_v15 = vadd.f32 %v6790_v46, %v6789_v39 }
 0x37d   : > { %v6836_v11 = vpop.f32.mrf.mxu1  ;;  %v6880_v31 = vpop.f32.mrf.mxu0 }
 0x37f   : > { %v6837_v19 = vpop.f32.mrf.mxu1  ;;  %v6881_v23 = vpop.f32.mrf.mxu0 }
 0x380   : > { %v6838_v41 = vadd.f32 %v6837_v19, %v6836_v11  ;;  %v6882_v13 = vadd.f32 %v6881_v23, %v6880_v31 }
 0x381   : > { %v6883_v5 = vpop.f32.mrf.mxu0 }
 0x382   : > { %2321 = vrot.lane.b32.xlu0 %v6838_v41, %s7632_s20 }
 0x383   : > { %v6884_v50 = vpop.f32.mrf.mxu0 }
 0x384   : > { %v6885_v21 = vadd.f32 %v6884_v50, %v6883_v5 }
 0x385   : > { %v6839_v2 = vpop.f32.mrf.mxu1  ;;  %v6886_v63 = vpop.f32.mrf.mxu0 }
 0x386   : > { %2291 = vrot.lane.b32.xlu0 %v6785_v18, %s7633_s27 }
 0x387   : > { %v6840_v22 = vpop.f32.mrf.mxu1  ;;  %v6887_v37 = vpop.f32.mrf.mxu0 }
 0x388   : > { %v6841_v12 = vadd.f32 %v6840_v22, %v6839_v2  ;;  %v6888_v7 = vadd.f32 %v6887_v37, %v6886_v63 }
 0x38a   : > { %v6889_v3 = vpop.f32.mrf.mxu0  ;;  %2323 = vrot.lane.b32.xlu0 %v6841_v12, %s7632_s20 }
 0x38c   : > { %v6890_v24 = vpop.f32.mrf.mxu0 }
 0x38d   : > { %v6842_v51 = vpop.f32.mrf.mxu1  ;;  %v6891_v9 = vadd.f32 %v6890_v24, %v6889_v3 }
 0x38e   : > { %v6892_v57 = vpop.f32.mrf.mxu0  ;;  %2293 = vrot.lane.b32.xlu0 %v6788_v38, %s7633_s27 }
 0x38f   : > { %v6843_v55 = vpop.f32.mrf.mxu1 }
 0x390   : > { %v6844_v4 = vadd.f32 %v6843_v55, %v6842_v51  ;;  %v6893_v48 = vpop.f32.mrf.mxu0 }
 0x391   : > { %v6894_v46 = vadd.f32 %v6893_v48, %v6892_v57 }
 0x392   : > { %v6895_v35 = vpop.f32.mrf.mxu0  ;;  %2325 = vrot.lane.b32.xlu0 %v6844_v4, %s7632_s20 }
 0x394   : > { %v6896_v30 = vpop.f32.mrf.mxu0 }
 0x395   : > { %v6845_v42 = vpop.f32.mrf.mxu1  ;;  %v6897_v19 = vadd.f32 %v6896_v30, %v6895_v35 }
 0x396   : > { %v6898_v53 = vpop.f32.mrf.mxu0  ;;  %2295 = vrot.lane.b32.xlu0 %v6791_v15, %s7633_s27 }
 0x397   : > { %v6846_v45 = vpop.f32.mrf.mxu1 }
 0x398   : > { %v6847_v34 = vadd.f32 %v6846_v45, %v6845_v42  ;;  %v6899_v52 = vpop.f32.mrf.mxu0 }
 0x399   : > { %v9042_v54 = vpop.f32.mrf.mxu1  ;;  %v6900_v50 = vadd.f32 %v6899_v52, %v6898_v53 }
 0x39a   : > { %v6901_v20 = vpop.f32.mrf.mxu0  ;;  %2327 = vrot.lane.b32.xlu0 %v6847_v34, %s7632_s20 }
 0x39b   : > { %v9045_v40 = vpop.f32.mrf.mxu1 }
 0x39c   : > { %v6902_v28 = vpop.f32.mrf.mxu0 }
 0x39d   : > { %v6903_v63 = vadd.f32 %v6902_v28, %v6901_v20 }
 0x39e   : > { %2345 = vrot.lane.b32.xlu0 %v6882_v13, %s7631_s18 }
 0x39f   : > { %v9048_v43 = vpop.f32.mrf.mxu1 }
 0x3a0   : > { %v6992_v36 = vpop.f32.mrf.mxu0 }
 0x3a1   : > { %v9050_v10 = vpop.f32.mrf.mxu1 }
 0x3a2   : > { %v6993_v59 = vpop.f32.mrf.mxu0  ;;  %2347 = vrot.lane.b32.xlu0 %v6885_v21, %s7631_s18 }
 0x3a3   : > { %v6994_v49 = vadd.f32 %v6993_v59, %v6992_v36 }
 0x3a5   : > { %v9053_v44 = vpop.f32.mrf.mxu1  ;;  %2377 = vrot.lane.b32.xlu1 %v6994_v49, %s7633_s27 }
 0x3a6   : > { %2349 = vrot.lane.b32.xlu0 %v6888_v7, %s7631_s18  ;;  %v6995_v11 = vpop.f32.mrf.mxu0 }
 0x3a7   : > { %v9057_v29 = vpop.f32.mrf.mxu1 }
 0x3a8   : > { %v6996_v23 = vpop.f32.mrf.mxu0 }
 0x3a9   : > { %v6997_v34 = vadd.f32 %v6996_v23, %v6995_v11 }
 0x3aa   : > { %2351 = vrot.lane.b32.xlu0 %v6891_v9, %s7631_s18 }
 0x3ab   : > { %v9060_v39 = vpop.f32.mrf.mxu1 }
 0x3ac   : > { %v6998_v18 = vpop.f32.mrf.mxu0 }
 0x3ad   : > { %v9062_v31 = vpop.f32.mrf.mxu1 }
 0x3ae   : > { %2353 = vrot.lane.b32.xlu0 %v6894_v46, %s7631_s18  ;;  %v6999_v22 = vpop.f32.mrf.mxu0 }
 0x3af   : > { %v7000_v49 = vadd.f32 %v6999_v22, %v6998_v18 }
 0x3b1   : > { %v9065_v41 = vpop.f32.mrf.mxu1 }
 0x3b2   : > { %2355 = vrot.lane.b32.xlu0 %v6897_v19, %s7631_s18  ;;  %v7001_v12 = vpop.f32.mrf.mxu0 }
 0x3b3   : > { %v9068_v5 = vpop.f32.mrf.mxu1 }
 0x3b4   : > { %v7002_v24 = vpop.f32.mrf.mxu0 }
 0x3b6   : > { %2357 = vrot.lane.b32.xlu0 %v6900_v50, %s7631_s18  ;;  %v7003_v50 = vadd.f32 %v7002_v24, %v7001_v12 }
 0x3b7   : > { %v9071_v2 = vpop.f32.mrf.mxu1 }
 0x3b8   : > { %v7004_v55 = vpop.f32.mrf.mxu0 }
 0x3b9   : > { %v9073_v37 = vpop.f32.mrf.mxu1 }
 0x3ba   : > { %2359 = vrot.lane.b32.xlu0 %v6903_v63, %s7631_s18  ;;  %v7005_v48 = vpop.f32.mrf.mxu0 }
 0x3bd   : > { %v9076_v3 = vpop.f32.mrf.mxu1 }
 0x3be   : > { %v9082_v57 = vpop.permute.xlu0 %2281  ;;  %v7007_v53 = vpop.f32.mrf.mxu0 }
 0x3bf   : > { %v9078_v38 = vpop.f32.mrf.mxu1 }
 0x3c0   : > { %v7008_v20 = vpop.f32.mrf.mxu0 }
 0x3c2   : > { %v9086_v15 = vpop.permute.xlu0 %2313 }
 0x3c3   : > { %v9080_v51 = vpop.f32.mrf.mxu1 }
 0x3c4   : > { %12113 = vst [vmem:[#allocation33_spill] sm:$0xff] %v9080_v51  ;;  %v7010_v21 = vpop.f32.mrf.mxu0 }
 0x3c5   : > { %v9084_v4 = vpop.f32.mrf.mxu1 }
 0x3c6   : > { %12114 = vst [vmem:[#allocation34_spill] sm:$0xff] %v9084_v4  ;;  %v9089_v52 = vpop.permute.xlu0 %2283  ;;  %v7011_v7 = vpop.f32.mrf.mxu0 }
 0x3c8   : > { %v7013_v19 = vpop.f32.mrf.mxu0 }
 0x3c9   : > { %v7048_v35 = vpop.f32.mrf.mxu1 }
 0x3ca   : > { %v9093_v59 = vpop.permute.xlu0 %2315  ;;  %v7014_v63 = vpop.f32.mrf.mxu0 }
 0x3cb   : > { %v7049_v30 = vpop.f32.mrf.mxu1 }
 0x3cc   : > { %v7050_v42 = vadd.f32 %v7049_v30, %v7048_v35 }
 0x3cd   : > { %v7051_v45 = vpop.f32.mrf.mxu1 }
 0x3ce   : > { %2409 = vrot.lane.b32.xlu1 %v7050_v42, %s7632_s20  ;;  %v9096_v11 = vpop.permute.xlu0 %2285  ;;  %v7104_v18 = vpop.f32.mrf.mxu0 }
 0x3cf   : > { %v7052_v13 = vpop.f32.mrf.mxu1 }
 0x3d0   : > { %v7053_v28 = vadd.f32 %v7052_v13, %v7051_v45  ;;  %v7105_v13 = vpop.f32.mrf.mxu0 }
 0x3d1   : > { %v7054_v36 = vpop.f32.mrf.mxu1 }
 0x3d2   : > { %2379 = vrot.lane.b32.xlu1 %v6997_v34, %s7633_s27  ;;  %v9100_v30 = vpop.permute.xlu0 %2317  ;;  %v7006_v34 = vadd.f32 %v7005_v48, %v7004_v55  ;;  %v7107_v24 = vpop.f32.mrf.mxu0 }
 0x3d3   : > { %v7055_v9 = vpop.f32.mrf.mxu1 }
 0x3d4   : > { %v7056_v46 = vadd.f32 %v7055_v9, %v7054_v36  ;;  %v7009_v9 = vadd.f32 %v7008_v20, %v7007_v53 }
 0x3d5   : > { %v7057_v23 = vpop.f32.mrf.mxu1 }
 0x3d6   : > { %2411 = vrot.lane.b32.xlu1 %v7053_v28, %s7632_s20 }
 0x3d7   : > { %v7058_v35 = vpop.f32.mrf.mxu1 }
 0x3d8   : > { %v7059_v42 = vadd.f32 %v7058_v35, %v7057_v23  ;;  %v9103_v45 = vpop.permute.xlu0 %2287  ;;  %v7108_v23 = vpop.f32.mrf.mxu0 }
 0x3d9   : > { %v7060_v22 = vpop.f32.mrf.mxu1 }
 0x3da   : > { %2381 = vrot.lane.b32.xlu1 %v7000_v49, %s7633_s27  ;;  %v7110_v48 = vpop.f32.mrf.mxu0 }
 0x3db   : > { %v7061_v28 = vpop.f32.mrf.mxu1 }
 0x3dc   : > { %v7062_v36 = vadd.f32 %v7061_v28, %v7060_v22  ;;  %v9106_v12 = vpop.permute.xlu0 %2319  ;;  %v7012_v22 = vadd.f32 %v7011_v7, %v7010_v21  ;;  %v7111_v28 = vpop.f32.mrf.mxu0 }
 0x3dd   : > { %v7063_v49 = vpop.f32.mrf.mxu1 }
 0x3de   : > { %2413 = vrot.lane.b32.xlu1 %v7056_v46, %s7632_s20 }
 0x3e2   : > { %2383 = vrot.lane.b32.xlu1 %v7003_v50, %s7633_s27  ;;  %v7064_v50 = vpop.f32.mrf.mxu1 }
 0x3e3   : > { %v7065_v35 = vadd.f32 %v7064_v50, %v7063_v49  ;;  %v7015_v49 = vadd.f32 %v7014_v63, %v7013_v19  ;;  %v6714_v63 = vadd.f32 %v8953_v32, %v8943_v1 }
 0x3e4   : > { %v9109_v46 = vpop.permute.xlu0 %2289 }
 0x3e6   : > { %2415 = vrot.lane.b32.xlu1 %v7059_v42, %s7632_s20  ;;  %v7066_v42 = vpop.f32.mrf.mxu1 }
 0x3e8   : > { %v7067_v14 = vpop.f32.mrf.mxu1 }
 0x3e9   : > { %v7068_v53 = vadd.f32 %v7067_v14, %v7066_v42  ;;  %v7106_v14 = vadd.f32 %v7105_v13, %v7104_v18  ;;  %v7112_v18 = vadd.f32 %v7111_v28, %v7110_v48 }
 0x3ea   : > { %2385 = vrot.lane.b32.xlu1 %v7006_v34, %s7633_s27  ;;  %v7069_v60 = vpop.f32.mrf.mxu1 }
 0x3ec   : > { %v7070_v4 = vpop.f32.mrf.mxu1 }
 0x3ed   : > { %v7071_v21 = vadd.f32 %v7070_v4, %v7069_v60  ;;  %v2465_v60 = vsel %vm1627_vm2, %v6714_v63, %v9082_v57 }
 0x3ee   : > { %2417 = vrot.lane.b32.xlu1 %v7062_v36, %s7632_s20  ;;  %v7113_v36 = vpop.f32.mrf.mxu0  ;;  %v2473_v4 = vsel %vm1433_vm0, %v2465_v60, %v9086_v15 }
 0x3f0   : > { %v7114_v50 = vpop.f32.mrf.mxu0 }
 0x3f1   : > { %v7115_v57 = vadd.f32 %v7114_v50, %v7113_v36 }
 0x3f2   : > { %2387 = vrot.lane.b32.xlu1 %v7009_v9, %s7633_s27 }
 0x3f4   : > { %v9112_v55 = vpop.permute.xlu0 %2321 }
 0x3f6   : > { %2419 = vrot.lane.b32.xlu1 %v7065_v35, %s7632_s20  ;;  %v7116_v35 = vpop.f32.mrf.mxu0 }
 0x3f8   : > { %v9115_v34 = vpop.permute.xlu0 %2291 }
 0x3fa   : > { %2389 = vrot.lane.b32.xlu1 %v7012_v22, %s7633_s27  ;;  %v7117_v22 = vpop.f32.mrf.mxu0 }
 0x3fb   : > { %v7118_v28 = vadd.f32 %v7117_v22, %v7116_v35 }
 0x3fc   : > { %v9118_v20 = vpop.permute.xlu0 %2323  ;;  %v7119_v51 = vpop.f32.mrf.mxu0 }
 0x3fe   : > { %2421 = vrot.lane.b32.xlu1 %v7068_v53, %s7632_s20  ;;  %v7109_v53 = vadd.f32 %v7108_v23, %v7107_v24  ;;  %v7120_v24 = vpop.f32.mrf.mxu0 }
 0x400   : > { %v9121_v9 = vpop.permute.xlu0 %2293 }
 0x402   : > { %2391 = vrot.lane.b32.xlu1 %v7015_v49, %s7633_s27  ;;  %v6717_v49 = vadd.f32 %v8973_v17, %v8963_v58  ;;  %v6720_v58 = vadd.f32 %v8991_v26, %v8981_v27  ;;  %v7122_v17 = vpop.f32.mrf.mxu0  ;;  %v6723_v27 = vadd.f32 %v9004_v16, %v8995_v25  ;;  %v6726_v25 = vadd.f32 %v9011_v47, %v9008_v61 }
 0x403   : > { %v6729_v61 = vadd.f32 %v9015_v0, %v9013_v6  ;;  %v6732_v6 = vadd.f32 %v9019_v62, %v9017_v56 }
 0x404   : > { %v9124_v7 = vpop.permute.xlu0 %2325  ;;  %v2466_v1 = vsel %vm1627_vm2, %v6717_v49, %v9089_v52  ;;  %v2467_v52 = vsel %vm1627_vm2, %v6720_v58, %v9096_v11  ;;  %v7123_v26 = vpop.f32.mrf.mxu0  ;;  %v2468_v11 = vsel %vm1627_vm2, %v6723_v27, %v9103_v45  ;;  %v2469_v45 = vsel %vm1627_vm2, %v6726_v25, %v9109_v46 }
 0x405   : > { %v2474_v32 = vsel %vm1433_vm0, %v2466_v1, %v9093_v59  ;;  %v2475_v59 = vsel %vm1433_vm0, %v2467_v52, %v9100_v30  ;;  %v2476_v30 = vsel %vm1433_vm0, %v2468_v11, %v9106_v12  ;;  %v2477_v12 = vsel %vm1433_vm0, %v2469_v45, %v9112_v55 }
 0x406   : > { %2423 = vrot.lane.b32.xlu1 %v7071_v21, %s7632_s20  ;;  %v7121_v21 = vadd.f32 %v7120_v24, %v7119_v51  ;;  %v7125_v16 = vpop.f32.mrf.mxu0  ;;  %v7124_v51 = vadd.f32 %v7123_v26, %v7122_v17  ;;  %v2470_v46 = vsel %vm1627_vm2, %v6729_v61, %v9115_v34  ;;  %v6938_v27 = vadd.f32 %v9045_v40, %v9042_v54 }
 0x407   : > { %v2478_v55 = vsel %vm1433_vm0, %v2470_v46, %v9118_v20  ;;  %v6735_v20 = vadd.f32 %v9025_v33, %v9021_v8  ;;  %v6944_v54 = vadd.f32 %v9057_v29, %v9053_v44 }
 0x408   : > { %v9127_v42 = vpop.permute.xlu0 %2295  ;;  %v7126_v47 = vpop.f32.mrf.mxu0 }
 0x409   : > { %v7127_v63 = vadd.f32 %v7126_v47, %v7125_v16  ;;  %v2472_v62 = vsel %vm1627_vm2, %v6735_v20, %v9127_v42  ;;  %v6950_v47 = vadd.f32 %v9068_v5, %v9065_v41  ;;  %v12115_v20 = vld [vmem:[#allocation33_spill] sm:$0xff] }
 0x40a   : > { %2441 = vrot.lane.b32.xlu1 %v7106_v14, %s7631_s18 }
 0x40c   : > { %v9130_v19 = vpop.permute.xlu0 %2327 }
 0x40e   : > { %2443 = vrot.lane.b32.xlu1 %v7109_v53, %s7631_s18 }
 0x410   : > { %v2346_v13 = vpop.permute.xlu0 %2345 }
 0x411   : > { %v9142_v23 = vsel %vm1239_vm1, %v2473_v4, %v2346_v13  ;;  %v2471_v4 = vsel %vm1627_vm2, %v6732_v6, %v9121_v9  ;;  %v2480_v13 = vsel %vm1433_vm0, %v2472_v62, %v9130_v19  ;;  %v12116_v62 = vld [vmem:[#allocation34_spill] sm:$0xff] }
 0x412   : > { %2445 = vrot.lane.b32.xlu1 %v7112_v18, %s7631_s18  ;;  %2529 = vrot.lane.b32.xlu0 %v9142_v23, %s7631_s18  ;;  %v2479_v34 = vsel %vm1433_vm0, %v2471_v4, %v9124_v7  ;;  %v6956_v4 = vadd.f32 %v9078_v38, %v9076_v3 }
 0x414   : > { %v2348_v15 = vpop.permute.xlu0 %2347 }
 0x415   : > { %v9154_v48 = vsel %vm1239_vm1, %v2474_v32, %v2348_v15 }
 0x416   : > { %2447 = vrot.lane.b32.xlu1 %v7115_v57, %s7631_s18  ;;  %2533 = vrot.lane.b32.xlu0 %v9154_v48, %s7631_s18 }
 0x417   : > { %v2378_v8 = vpop.permute.xlu1 %2377 }
 0x418   : > { %v2350_v36 = vpop.permute.xlu0 %2349  ;;  %v2489_v26 = vsel %vm1627_vm2, %v6938_v27, %v2378_v8 }
 0x419   : > { %v9166_v50 = vsel %vm1239_vm1, %v2475_v59, %v2350_v36 }
 0x41a   : > { %2449 = vrot.lane.b32.xlu1 %v7118_v28, %s7631_s18  ;;  %2537 = vrot.lane.b32.xlu0 %v9166_v50, %s7631_s18 }
 0x41c   : > { %v2352_v35 = vpop.permute.xlu0 %2351 }
 0x41d   : > { %v9178_v14 = vsel %vm1239_vm1, %v2476_v30, %v2352_v35  ;;  %v6941_v30 = vadd.f32 %v9050_v10, %v9048_v43 }
 0x41e   : > { %2451 = vrot.lane.b32.xlu1 %v7121_v21, %s7631_s18  ;;  %2541 = vrot.lane.b32.xlu0 %v9178_v14, %s7631_s18 }
 0x420   : > { %v2354_v22 = vpop.permute.xlu0 %2353 }
 0x421   : > { %v9190_v53 = vsel %vm1239_vm1, %v2477_v12, %v2354_v22  ;;  %v6947_v12 = vadd.f32 %v9062_v31, %v9060_v39 }
 0x422   : > { %2453 = vrot.lane.b32.xlu1 %v7124_v51, %s7631_s18  ;;  %2545 = vrot.lane.b32.xlu0 %v9190_v53, %s7631_s18 }
 0x424   : > { %v2356_v60 = vpop.permute.xlu0 %2355 }
 0x425   : > { %v9202_v0 = vsel %vm1239_vm1, %v2478_v55, %v2356_v60  ;;  %v6953_v55 = vadd.f32 %v9073_v37, %v9071_v2 }
 0x426   : > { %2455 = vrot.lane.b32.xlu1 %v7127_v63, %s7631_s18  ;;  %2549 = vrot.lane.b32.xlu0 %v9202_v0, %s7631_s18 }
 0x428   : > { %v2358_v18 = vpop.permute.xlu0 %2357 }
 0x429   : > { %v9214_v56 = vsel %vm1239_vm1, %v2479_v34, %v2358_v18 }
 0x42a   : > { %2553 = vrot.lane.b32.xlu0 %v9214_v56, %s7631_s18 }
 0x42c   : > { %v2360_v9 = vpop.permute.xlu0 %2359 }
 0x42d   : > { %v9223_v49 = vsel %vm1239_vm1, %v2480_v13, %v2360_v9  ;;  %v6959_v13 = vadd.f32 %v12116_v62, %v12115_v20 }
 0x42e   : > { %2557 = vrot.lane.b32.xlu0 %v9223_v49, %s7631_s18 }
 0x440   : > { %v2410_v33 = vpop.permute.xlu1 %2409 }
 0x441   : > { %v2497_v11 = vsel %vm1433_vm0, %v2489_v26, %v2410_v33 }
 0x444   : > { %v2380_v7 = vpop.permute.xlu1 %2379 }
 0x445   : > { %v2490_v25 = vsel %vm1627_vm2, %v6941_v30, %v2380_v7 }
 0x448   : > { %v2412_v24 = vpop.permute.xlu1 %2411 }
 0x449   : > { %v2498_v16 = vsel %vm1433_vm0, %v2490_v25, %v2412_v24 }
 0x44c   : > { %v2382_v1 = vpop.permute.xlu1 %2381 }
 0x44d   : > { %v2491_v43 = vsel %vm1627_vm2, %v6944_v54, %v2382_v1 }
 0x450   : > { %v2414_v32 = vpop.permute.xlu1 %2413 }
 0x451   : > { %v2499_v10 = vsel %vm1433_vm0, %v2491_v43, %v2414_v32 }
 0x454   : > { %v2384_v57 = vpop.permute.xlu1 %2383 }
 0x455   : > { %v2492_v44 = vsel %vm1627_vm2, %v6947_v12, %v2384_v57 }
 0x458   : > { %v2416_v15 = vpop.permute.xlu1 %2415 }
 0x459   : > { %v2500_v29 = vsel %vm1433_vm0, %v2492_v44, %v2416_v15 }
 0x45c   : > { %v2386_v58 = vpop.permute.xlu1 %2385 }
 0x45d   : > { %v2493_v39 = vsel %vm1627_vm2, %v6950_v47, %v2386_v58 }
 0x460   : > { %v2418_v42 = vpop.permute.xlu1 %2417 }
 0x461   : > { %v2501_v31 = vsel %vm1433_vm0, %v2493_v39, %v2418_v42 }
 0x464   : > { %v2388_v17 = vpop.permute.xlu1 %2387 }
 0x465   : > { %v2494_v41 = vsel %vm1627_vm2, %v6953_v55, %v2388_v17 }
 0x468   : > { %v2420_v52 = vpop.permute.xlu1 %2419 }
 0x469   : > { %v2502_v5 = vsel %vm1433_vm0, %v2494_v41, %v2420_v52 }
 0x46c   : > { %v2390_v19 = vpop.permute.xlu1 %2389 }
 0x46d   : > { %v2495_v2 = vsel %vm1627_vm2, %v6956_v4, %v2390_v19 }
 0x470   : > { %v2422_v28 = vpop.permute.xlu1 %2421 }
 0x471   : > { %v2503_v37 = vsel %vm1433_vm0, %v2495_v2, %v2422_v28 }
 0x474   : > { %v2392_v59 = vpop.permute.xlu1 %2391 }
 0x475   : > { %v2496_v3 = vsel %vm1627_vm2, %v6959_v13, %v2392_v59 }
 0x478   : > { %v2424_v36 = vpop.permute.xlu1 %2423 }
 0x479   : > { %v2504_v38 = vsel %vm1433_vm0, %v2496_v3, %v2424_v36 }
 0x47c   : > { %v2442_v21 = vpop.permute.xlu1 %2441 }
 0x47d   : > { %v9234_v35 = vsel %vm1239_vm1, %v2497_v11, %v2442_v21 }
 0x47e   : > { %2531 = vrot.lane.b32.xlu1 %v9234_v35, %s7631_s18 }
 0x480   : > { %v2444_v45 = vpop.permute.xlu1 %2443 }
 0x481   : > { %v9243_v40 = vsel %vm1239_vm1, %v2498_v16, %v2444_v45 }
 0x482   : > { %2535 = vrot.lane.b32.xlu1 %v9243_v40, %s7631_s18 }
 0x484   : > { %v2446_v51 = vpop.permute.xlu1 %2445  ;;  %v2530_v7 = vpop.permute.xlu0 %2529 }
 0x485   : > { %v9252_v22 = vsel %vm1239_vm1, %v2499_v10, %v2446_v51 }
 0x486   : > { %2539 = vrot.lane.b32.xlu1 %v9252_v22, %s7631_s18 }
 0x488   : > { %v2448_v61 = vpop.permute.xlu1 %2447  ;;  %v2534_v24 = vpop.permute.xlu0 %2533 }
 0x489   : > { %v9261_v46 = vsel %vm1239_vm1, %v2500_v29, %v2448_v61 }
 0x48a   : > { %2543 = vrot.lane.b32.xlu1 %v9261_v46, %s7631_s18 }
 0x48c   : > { %v2450_v63 = vpop.permute.xlu1 %2449  ;;  %v2538_v1 = vpop.permute.xlu0 %2537 }
 0x48d   : > { %v9270_v60 = vsel %vm1239_vm1, %v2501_v31, %v2450_v63 }
 0x48e   : > { %2547 = vrot.lane.b32.xlu1 %v9270_v60, %s7631_s18 }
 0x490   : > { %v2452_v6 = vpop.permute.xlu1 %2451  ;;  %v2542_v17 = vpop.permute.xlu0 %2541 }
 0x491   : > { %v9279_v34 = vsel %vm1239_vm1, %v2502_v5, %v2452_v6 }
 0x492   : > { %2551 = vrot.lane.b32.xlu1 %v9279_v34, %s7631_s18 }
 0x494   : > { %v2454_v18 = vpop.permute.xlu1 %2453  ;;  %v2546_v21 = vpop.permute.xlu0 %2545 }
 0x495   : > { %v9288_v9 = vsel %vm1239_vm1, %v2503_v37, %v2454_v18 }
 0x496   : > { %2555 = vrot.lane.b32.xlu1 %v9288_v9, %s7631_s18 }
 0x498   : > { %v2456_v8 = vpop.permute.xlu1 %2455  ;;  %v2550_v51 = vpop.permute.xlu0 %2549 }
 0x499   : > { %v9295_v33 = vsel %vm1239_vm1, %v2504_v38, %v2456_v8 }
 0x49a   : > { %2559 = vrot.lane.b32.xlu1 %v9295_v33, %s7631_s18 }
 0x49c   : > { %v2554_v55 = vpop.permute.xlu0 %2553 }
 0x4a0   : > { %v2558_v20 = vpop.permute.xlu0 %2557 }
 0x4f0   : > { %v2532_v32 = vpop.permute.xlu1 %2531 }
 0x4f1   : > { %v2561_v57 = vsel %vm1239_vm1, %v2530_v7, %v2532_v32  ;;  %v2593_v15 = vsel %vm1239_vm1, %v2532_v32, %v2530_v7 }
 0x4f2   : > { %v9302_v58 = vmax.f32 %v9142_v23, %v2561_v57  ;;  %v9305_v42 = vmax.f32 %v9234_v35, %v2593_v15 }
 0x4f4   : > { %v2536_v52 = vpop.permute.xlu1 %2535  ;;  %2635 = vrot.lane.b32.xlu1 %v9305_v42, %s7632_s20  ;;  %2633 = vrot.lane.b32.xlu0 %v9302_v58, %s7632_s20 }
 0x4f5   : > { %v2562_v19 = vsel %vm1239_vm1, %v2534_v24, %v2536_v52  ;;  %v2594_v28 = vsel %vm1239_vm1, %v2536_v52, %v2534_v24 }
 0x4f6   : > { %v9314_v59 = vmax.f32 %v9154_v48, %v2562_v19  ;;  %v9317_v36 = vmax.f32 %v9243_v40, %v2594_v28 }
 0x4f8   : > { %v2540_v27 = vpop.permute.xlu1 %2539  ;;  %2639 = vrot.lane.b32.xlu1 %v9317_v36, %s7632_s20  ;;  %2637 = vrot.lane.b32.xlu0 %v9314_v59, %s7632_s20 }
 0x4f9   : > { %v2563_v26 = vsel %vm1239_vm1, %v2538_v1, %v2540_v27  ;;  %v2595_v11 = vsel %vm1239_vm1, %v2540_v27, %v2538_v1 }
 0x4fa   : > { %v9326_v30 = vmax.f32 %v9166_v50, %v2563_v26  ;;  %v9329_v25 = vmax.f32 %v9252_v22, %v2595_v11 }
 0x4fc   : > { %v2544_v16 = vpop.permute.xlu1 %2543  ;;  %2643 = vrot.lane.b32.xlu1 %v9329_v25, %s7632_s20  ;;  %2641 = vrot.lane.b32.xlu0 %v9326_v30, %s7632_s20 }
 0x4fd   : > { %v2564_v45 = vsel %vm1239_vm1, %v2542_v17, %v2544_v16  ;;  %v2596_v54 = vsel %vm1239_vm1, %v2544_v16, %v2542_v17 }
 0x4fe   : > { %v9338_v43 = vmax.f32 %v9178_v14, %v2564_v45  ;;  %v9341_v10 = vmax.f32 %v9261_v46, %v2596_v54 }
 0x500   : > { %v2548_v12 = vpop.permute.xlu1 %2547  ;;  %2647 = vrot.lane.b32.xlu1 %v9341_v10, %s7632_s20  ;;  %2645 = vrot.lane.b32.xlu0 %v9338_v43, %s7632_s20 }
 0x501   : > { %v2565_v44 = vsel %vm1239_vm1, %v2546_v21, %v2548_v12  ;;  %v2597_v29 = vsel %vm1239_vm1, %v2548_v12, %v2546_v21 }
 0x502   : > { %v9350_v61 = vmax.f32 %v9190_v53, %v2565_v44  ;;  %v9353_v47 = vmax.f32 %v9270_v60, %v2597_v29 }
 0x504   : > { %v2552_v39 = vpop.permute.xlu1 %2551  ;;  %2651 = vrot.lane.b32.xlu1 %v9353_v47, %s7632_s20  ;;  %2649 = vrot.lane.b32.xlu0 %v9350_v61, %s7632_s20 }
 0x505   : > { %v2566_v31 = vsel %vm1239_vm1, %v2550_v51, %v2552_v39  ;;  %v2598_v63 = vsel %vm1239_vm1, %v2552_v39, %v2550_v51 }
 0x506   : > { %v9362_v41 = vmax.f32 %v9202_v0, %v2566_v31  ;;  %v9365_v5 = vmax.f32 %v9279_v34, %v2598_v63 }
 0x508   : > { %v2556_v6 = vpop.permute.xlu1 %2555  ;;  %2655 = vrot.lane.b32.xlu1 %v9365_v5, %s7632_s20  ;;  %2653 = vrot.lane.b32.xlu0 %v9362_v41, %s7632_s20 }
 0x509   : > { %v2567_v4 = vsel %vm1239_vm1, %v2554_v55, %v2556_v6  ;;  %v2599_v2 = vsel %vm1239_vm1, %v2556_v6, %v2554_v55 }
 0x50a   : > { %v9374_v37 = vmax.f32 %v9214_v56, %v2567_v4  ;;  %v9377_v18 = vmax.f32 %v9288_v9, %v2599_v2 }
 0x50c   : > { %v2560_v62 = vpop.permute.xlu1 %2559  ;;  %2659 = vrot.lane.b32.xlu1 %v9377_v18, %s7632_s20  ;;  %2657 = vrot.lane.b32.xlu0 %v9374_v37, %s7632_s20 }
 0x50d   : > { %v2568_v13 = vsel %vm1239_vm1, %v2558_v20, %v2560_v62  ;;  %v2600_v3 = vsel %vm1239_vm1, %v2560_v62, %v2558_v20 }
 0x50e   : > { %v9386_v38 = vmax.f32 %v9223_v49, %v2568_v13  ;;  %v9389_v8 = vmax.f32 %v9295_v33, %v2600_v3 }
 0x510   : > { %2663 = vrot.lane.b32.xlu1 %v9389_v8, %s7632_s20  ;;  %2661 = vrot.lane.b32.xlu0 %v9386_v38, %s7632_s20 }
 0x566   : > { %v2636_v7 = vpop.permute.xlu1 %2635  ;;  %v2634_v24 = vpop.permute.xlu0 %2633 }
 0x567   : > { %v2665_v1 = vsel %vm1433_vm0, %v2634_v24, %v2636_v7  ;;  %v2697_v32 = vsel %vm1433_vm0, %v2636_v7, %v2634_v24 }
 0x568   : > { %v2705_v57 = vmax.f32 %v9302_v58, %v2665_v1  ;;  %v2706_v15 = vmax.f32 %v9305_v42, %v2697_v32 }
 0x56a   : > { %v2721_v17 = vmax.f32 %v2705_v57, %v2706_v15  ;;  %v2640_v52 = vpop.permute.xlu1 %2639  ;;  %v2638_v19 = vpop.permute.xlu0 %2637 }
 0x56b   : > { %v2666_v28 = vsel %vm1433_vm0, %v2638_v19, %v2640_v52  ;;  %v2698_v27 = vsel %vm1433_vm0, %v2640_v52, %v2638_v19 }
 0x56c   : > { %v2729_v26 = vsub.f32 %v9142_v23, %v2721_v17  ;;  %v2730_v11 = vsub.f32 %v9234_v35, %v2721_v17  ;;  %v2707_v21 = vmax.f32 %v9314_v59, %v2666_v28  ;;  %v2708_v16 = vmax.f32 %v9317_v36, %v2698_v27 }
 0x56e   : > { %v2745_v45 = vmul.f32 1.442695, %v2729_v26  ;;  %v2747_v54 = vmul.f32 1.442695, %v2730_v11  ;;  %v2722_v58 = vmax.f32 %v2707_v21, %v2708_v16  ;;  %v2644_v51 = vpop.permute.xlu1 %2643  ;;  %v2642_v42 = vpop.permute.xlu0 %2641 }
 0x56f   : > { %v2667_v12 = vsel %vm1433_vm0, %v2642_v42, %v2644_v51  ;;  %v2699_v44 = vsel %vm1433_vm0, %v2644_v51, %v2642_v42 }
 0x570   : > { %7263 = vpow2.f32 %v2745_v45  ;;  %v2731_v29 = vsub.f32 %v9154_v48, %v2722_v58  ;;  %v2732_v23 = vsub.f32 %v9243_v40, %v2722_v58  ;;  %v2709_v35 = vmax.f32 %v9326_v30, %v2667_v12 }
 0x571   : > { %7265 = vpow2.f32 %v2747_v54  ;;  %v2710_v59 = vmax.f32 %v9329_v25, %v2699_v44 }
 0x572   : > { %v2749_v36 = vmul.f32 1.442695, %v2731_v29  ;;  %v2751_v39 = vmul.f32 1.442695, %v2732_v23  ;;  %v2648_v31 = vpop.permute.xlu1 %2647  ;;  %v2646_v63 = vpop.permute.xlu0 %2645 }
 0x573   : > { %v2723_v55 = vmax.f32 %v2709_v35, %v2710_v59  ;;  %v2668_v6 = vsel %vm1433_vm0, %v2646_v63, %v2648_v31  ;;  %v2700_v4 = vsel %vm1433_vm0, %v2648_v31, %v2646_v63 }
 0x574   : > { %7267 = vpow2.f32 %v2749_v36  ;;  %v2711_v2 = vmax.f32 %v9338_v43, %v2668_v6  ;;  %v2712_v48 = vmax.f32 %v9341_v10, %v2700_v4 }
 0x575   : > { %7269 = vpow2.f32 %v2751_v39  ;;  %v2733_v40 = vsub.f32 %v9166_v50, %v2723_v55  ;;  %v2734_v30 = vsub.f32 %v9252_v22, %v2723_v55 }
 0x576   : > { %v2724_v25 = vmax.f32 %v2711_v2, %v2712_v48  ;;  %v2652_v20 = vpop.permute.xlu1 %2651  ;;  %v2650_v62 = vpop.permute.xlu0 %2649 }
 0x577   : > { %v2753_v13 = vmul.f32 1.442695, %v2733_v40  ;;  %v2755_v3 = vmul.f32 1.442695, %v2734_v30  ;;  %v2669_v7 = vsel %vm1433_vm0, %v2650_v62, %v2652_v20  ;;  %v2701_v24 = vsel %vm1433_vm0, %v2652_v20, %v2650_v62 }
 0x578   : > { %v2735_v1 = vsub.f32 %v9178_v14, %v2724_v25  ;;  %v2736_v43 = vsub.f32 %v9261_v46, %v2724_v25  ;;  %v2713_v10 = vmax.f32 %v9350_v61, %v2669_v7  ;;  %v2714_v32 = vmax.f32 %v9353_v47, %v2701_v24 }
 0x579   : > { %7271 = vpow2.f32 %v2753_v13 }
 0x57a   : > { %7273 = vpow2.f32 %v2755_v3  ;;  %v2757_v50 = vmul.f32 1.442695, %v2735_v1  ;;  %v2759_v22 = vmul.f32 1.442695, %v2736_v43  ;;  %v2725_v57 = vmax.f32 %v2713_v10, %v2714_v32  ;;  %v2656_v15 = vpop.permute.xlu1 %2655  ;;  %v2654_v17 = vpop.permute.xlu0 %2653 }
 0x57b   : > { %v2670_v52 = vsel %vm1433_vm0, %v2654_v17, %v2656_v15  ;;  %v2702_v19 = vsel %vm1433_vm0, %v2656_v15, %v2654_v17  ;;  %v9524_v15 = vld [vmem:[#allocation5 + $0x2f0] sm:$0xff] }
 0x57c   : > { %7275 = vpow2.f32 %v2757_v50  ;;  %v2737_v14 = vsub.f32 %v9190_v53, %v2725_v57  ;;  %v2738_v46 = vsub.f32 %v9270_v60, %v2725_v57  ;;  %v2715_v61 = vmax.f32 %v9362_v41, %v2670_v52  ;;  %v9519_v50 = vld [vmem:[#allocation5 + $0x2f8] sm:$0xff] }
 0x57d   : > { %v9428_v28 = vpop.eup %7263  ;;  %7277 = vpow2.f32 %v2759_v22  ;;  %v2716_v47 = vmax.f32 %v9365_v5, %v2702_v19  ;;  %3065 = vmatprep.subr.mxu1 %v9519_v50  ;;  %3242 = vmatprep.subr.mxu0 %v9519_v50  ;;  %v9534_v19 = vld [vmem:[#allocation5 + $0x238] sm:$0xff] }
 0x57e   : > { %v9431_v27 = vpop.eup %7265  ;;  %v2761_v26 = vmul.f32 1.442695, %v2737_v14  ;;  %v2763_v11 = vmul.f32 1.442695, %v2738_v46  ;;  %v2660_v21 = vpop.permute.xlu1 %2659  ;;  %2793 = vrot.lane.b32.xlu0 %v9428_v28, %s7631_s18  ;;  %3066 = vmatpush1.msra.mxu1 %v9524_v15  ;;  %v9538_v14 = vld [vmem:[#allocation5 + $0x230] sm:$0xff] }
 0x57f   : > { %v2658_v16 = vpop.permute.xlu0 %2657  ;;  %v2726_v45 = vmax.f32 %v2715_v61, %v2716_v47  ;;  %2795 = vrot.lane.b32.xlu1 %v9431_v27, %s7631_s18  ;;  %3243 = vmatpush1.msra.mxu0 %v9524_v15  ;;  %v9545_v61 = vld [vmem:[#allocation5 + $0x178] sm:$0xff] }
 0x580   : > { %v2671_v53 = vsel %vm1433_vm0, %v2658_v16, %v2660_v21  ;;  %v2703_v60 = vsel %vm1433_vm0, %v2660_v21, %v2658_v16  ;;  %7279 = vpow2.f32 %v2761_v26  ;;  %3067 = vmatprep.subr.mxu1 %v9534_v19  ;;  %3244 = vmatprep.subr.mxu0 %v9534_v19  ;;  %v9548_v26 = vld [vmem:[#allocation5 + $0x170] sm:$0xff]  ;;  %v9554_v16 = vld [vmem:[#allocation5 + $0xb8] sm:$0xff] }
 0x581   : > { %v2717_v41 = vmax.f32 %v9374_v37, %v2671_v53  ;;  %v2718_v5 = vmax.f32 %v9377_v18, %v2703_v60  ;;  %v9441_v54 = vpop.eup %7267  ;;  %7281 = vpow2.f32 %v2763_v11  ;;  %v2739_v58 = vsub.f32 %v9202_v0, %v2726_v45  ;;  %3068 = vmatpush1.msra.mxu1 %v9538_v14  ;;  %3245 = vmatpush1.msra.mxu0 %v9538_v14  ;;  %v9564_v60 = vld [vmem:[#allocation5 + $0xb0] sm:$0xff] }
 0x582   : > { %v2740_v51 = vsub.f32 %v9279_v34, %v2726_v45  ;;  %v9445_v42 = vpop.eup %7269  ;;  %v2664_v44 = vpop.permute.xlu1 %2663  ;;  %2797 = vrot.lane.b32.xlu0 %v9441_v54, %s7631_s18  ;;  %3069 = vmatprep.subr.mxu1 %v9545_v61 }
 0x583   : > { %v2727_v12 = vmax.f32 %v2717_v41, %v2718_v5  ;;  %v2662_v29 = vpop.permute.xlu0 %2661  ;;  %v2765_v23 = vmul.f32 1.442695, %v2739_v58  ;;  %2799 = vrot.lane.b32.xlu1 %v9445_v42, %s7631_s18  ;;  %3246 = vmatprep.subr.mxu0 %v9545_v61 }
 0x584   : > { %v2767_v35 = vmul.f32 1.442695, %v2740_v51  ;;  %v2672_v37 = vsel %vm1433_vm0, %v2662_v29, %v2664_v44  ;;  %v2704_v18 = vsel %vm1433_vm0, %v2664_v44, %v2662_v29  ;;  %3070 = vmatpush1.msra.mxu1 %v9548_v26  ;;  %3247 = vmatpush1.msra.mxu0 %v9548_v26 }
 0x585   : > { %v2741_v0 = vsub.f32 %v9214_v56, %v2727_v12  ;;  %v2742_v34 = vsub.f32 %v9288_v9, %v2727_v12  ;;  %v2719_v59 = vmax.f32 %v9386_v38, %v2672_v37  ;;  %v2720_v36 = vmax.f32 %v9389_v8, %v2704_v18  ;;  %3071 = vmatprep.subr.mxu1 %v9554_v16 }
 0x586   : > { %7283 = vpow2.f32 %v2765_v23  ;;  %v9457_v39 = vpop.eup %7271  ;;  %3248 = vmatprep.subr.mxu0 %v9554_v16  ;;  %3072 = vmatpush1.msra.mxu1 %v9564_v60 }
 0x587   : > { %7285 = vpow2.f32 %v2767_v35  ;;  %v2769_v31 = vmul.f32 1.442695, %v2741_v0  ;;  %v2771_v63 = vmul.f32 1.442695, %v2742_v34  ;;  %v2728_v55 = vmax.f32 %v2719_v59, %v2720_v36  ;;  %v9459_v6 = vpop.eup %7273  ;;  %2801 = vrot.lane.b32.xlu0 %v9457_v39, %s7631_s18  ;;  %3249 = vmatpush1.msra.mxu0 %v9564_v60 }
 0x588   : > { %2803 = vrot.lane.b32.xlu1 %v9459_v6, %s7631_s18  ;;  %3507 = vmatprep.subr.mxu1 %v9519_v50 }
 0x589   : > { %7287 = vpow2.f32 %v2769_v31  ;;  %v2743_v56 = vsub.f32 %v9223_v49, %v2728_v55  ;;  %v2744_v9 = vsub.f32 %v9295_v33, %v2728_v55  ;;  %v9467_v38 = vpop.eup %7275  ;;  %3756 = vmatprep.subr.mxu0 %v9519_v50 }
 0x58a   : > { %7289 = vpow2.f32 %v2771_v63  ;;  %v9469_v8 = vpop.eup %7277 }
 0x58b   : > { %v2773_v4 = vmul.f32 1.442695, %v2743_v56  ;;  %v2775_v2 = vmul.f32 1.442695, %v2744_v9  ;;  %2805 = vrot.lane.b32.xlu0 %v9467_v38, %s7631_s18 }
 0x58c   : > { %2807 = vrot.lane.b32.xlu1 %v9469_v8, %s7631_s18 }
 0x58d   : > { %7291 = vpow2.f32 %v2773_v4  ;;  %v9475_v49 = vpop.eup %7279 }
 0x58e   : > { %7293 = vpow2.f32 %v2775_v2  ;;  %v9477_v33 = vpop.eup %7281 }
 0x58f   : > { %2809 = vrot.lane.b32.xlu0 %v9475_v49, %s7631_s18 }
 0x590   : > { %2811 = vrot.lane.b32.xlu1 %v9477_v33, %s7631_s18 }
 0x593   : > { %v9483_v48 = vpop.eup %7283 }
 0x594   : > { %v9485_v40 = vpop.eup %7285  ;;  %2813 = vrot.lane.b32.xlu0 %v9483_v48, %s7631_s18 }
 0x595   : > { %2815 = vrot.lane.b32.xlu1 %v9485_v40, %s7631_s18 }
 0x596   : > { %v9491_v30 = vpop.eup %7287 }
 0x597   : > { %v9493_v25 = vpop.eup %7289 }
 0x598   : > { %2817 = vrot.lane.b32.xlu0 %v9491_v30, %s7631_s18 }
 0x599   : > { %2819 = vrot.lane.b32.xlu1 %v9493_v25, %s7631_s18 }
 0x59a   : > { %v9499_v20 = vpop.eup %7291 }
 0x59b   : > { %v9501_v62 = vpop.eup %7293 }
 0x59c   : > { %2821 = vrot.lane.b32.xlu0 %v9499_v20, %s7631_s18 }
 0x59d   : > { %2823 = vrot.lane.b32.xlu1 %v9501_v62, %s7631_s18 }
 0x5f0   : > { %v2794_v13 = vpop.permute.xlu0 %2793 }
 0x5f1   : > { %v2796_v3 = vpop.permute.xlu1 %2795 }
 0x5f2   : > { %v2825_v7 = vsel %vm1239_vm1, %v2794_v13, %v2796_v3  ;;  %v2857_v24 = vsel %vm1239_vm1, %v2796_v3, %v2794_v13 }
 0x5f3   : > { %v9510_v1 = vadd.f32 %v9428_v28, %v2825_v7  ;;  %v9513_v43 = vadd.f32 %v9431_v27, %v2857_v24 }
 0x5f4   : > { %v2798_v10 = vpop.permute.xlu0 %2797 }
 0x5f5   : > { %v2800_v32 = vpop.permute.xlu1 %2799  ;;  %2899 = vrot.lane.b32.xlu1 %v9513_v43, %s7632_s20  ;;  %2897 = vrot.lane.b32.xlu0 %v9510_v1, %s7632_s20 }
 0x5f6   : > { %v2826_v22 = vsel %vm1239_vm1, %v2798_v10, %v2800_v32  ;;  %v2858_v57 = vsel %vm1239_vm1, %v2800_v32, %v2798_v10 }
 0x5f7   : > { %v9528_v17 = vadd.f32 %v9441_v54, %v2826_v22  ;;  %v9531_v52 = vadd.f32 %v9445_v42, %v2858_v57 }
 0x5f9   : > { %2903 = vrot.lane.b32.xlu1 %v9531_v52, %s7632_s20  ;;  %2901 = vrot.lane.b32.xlu0 %v9528_v17, %s7632_s20  ;;  %v2802_v46 = vpop.permute.xlu0 %2801 }
 0x5fa   : > { %v2804_v47 = vpop.permute.xlu1 %2803 }
 0x5fb   : > { %v2827_v11 = vsel %vm1239_vm1, %v2802_v46, %v2804_v47  ;;  %v2859_v21 = vsel %vm1239_vm1, %v2804_v47, %v2802_v46 }
 0x5fc   : > { %v9558_v45 = vadd.f32 %v9457_v39, %v2827_v11  ;;  %v9561_v53 = vadd.f32 %v9459_v6, %v2859_v21 }
 0x5fd   : > { %v2806_v41 = vpop.permute.xlu0 %2805 }
 0x5fe   : > { %v2808_v5 = vpop.permute.xlu1 %2807  ;;  %2907 = vrot.lane.b32.xlu1 %v9561_v53, %s7632_s20  ;;  %2905 = vrot.lane.b32.xlu0 %v9558_v45, %s7632_s20 }
 0x5ff   : > { %v2828_v58 = vsel %vm1239_vm1, %v2806_v41, %v2808_v5  ;;  %v2860_v51 = vsel %vm1239_vm1, %v2808_v5, %v2806_v41 }
 0x600   : > { %v9578_v12 = vadd.f32 %v9467_v38, %v2828_v58  ;;  %v9581_v44 = vadd.f32 %v9469_v8, %v2860_v51 }
 0x601   : > { %v2810_v29 = vpop.permute.xlu0 %2809 }
 0x602   : > { %v2812_v23 = vpop.permute.xlu1 %2811  ;;  %2911 = vrot.lane.b32.xlu1 %v9581_v44, %s7632_s20  ;;  %2909 = vrot.lane.b32.xlu0 %v9578_v12, %s7632_s20 }
 0x603   : > { %v2829_v35 = vsel %vm1239_vm1, %v2810_v29, %v2812_v23  ;;  %v2861_v37 = vsel %vm1239_vm1, %v2812_v23, %v2810_v29 }
 0x604   : > { %v9592_v18 = vadd.f32 %v9475_v49, %v2829_v35  ;;  %v9595_v0 = vadd.f32 %v9477_v33, %v2861_v37 }
 0x606   : > { %v2814_v34 = vpop.permute.xlu0 %2813  ;;  %2915 = vrot.lane.b32.xlu1 %v9595_v0, %s7632_s20  ;;  %2913 = vrot.lane.b32.xlu0 %v9592_v18, %s7632_s20 }
 0x607   : > { %v2816_v59 = vpop.permute.xlu1 %2815 }
 0x608   : > { %v2830_v36 = vsel %vm1239_vm1, %v2814_v34, %v2816_v59  ;;  %v2862_v31 = vsel %vm1239_vm1, %v2816_v59, %v2814_v34 }
 0x609   : > { %v9604_v63 = vadd.f32 %v9483_v48, %v2830_v36  ;;  %v9607_v55 = vadd.f32 %v9485_v40, %v2862_v31 }
 0x60a   : > { %v2818_v56 = vpop.permute.xlu0 %2817 }
 0x60b   : > { %v2820_v9 = vpop.permute.xlu1 %2819  ;;  %2919 = vrot.lane.b32.xlu1 %v9607_v55, %s7632_s20  ;;  %2917 = vrot.lane.b32.xlu0 %v9604_v63, %s7632_s20 }
 0x60c   : > { %v2831_v4 = vsel %vm1239_vm1, %v2818_v56, %v2820_v9  ;;  %v2863_v2 = vsel %vm1239_vm1, %v2820_v9, %v2818_v56 }
 0x60d   : > { %v9616_v13 = vadd.f32 %v9491_v30, %v2831_v4  ;;  %v9619_v3 = vadd.f32 %v9493_v25, %v2863_v2 }
 0x60e   : > { %v2822_v7 = vpop.permute.xlu0 %2821 }
 0x60f   : > { %v2824_v24 = vpop.permute.xlu1 %2823  ;;  %2923 = vrot.lane.b32.xlu1 %v9619_v3, %s7632_s20  ;;  %2921 = vrot.lane.b32.xlu0 %v9616_v13, %s7632_s20 }
 0x610   : > { %v2832_v10 = vsel %vm1239_vm1, %v2822_v7, %v2824_v24  ;;  %v2864_v32 = vsel %vm1239_vm1, %v2824_v24, %v2822_v7 }
 0x611   : > { %v9628_v22 = vadd.f32 %v9499_v20, %v2832_v10  ;;  %v9631_v57 = vadd.f32 %v9501_v62, %v2864_v32 }
 0x613   : > { %2927 = vrot.lane.b32.xlu1 %v9631_v57, %s7632_s20  ;;  %2925 = vrot.lane.b32.xlu0 %v9628_v22, %s7632_s20 }
 0x667   : > { %v2900_v46 = vpop.permute.xlu1 %2899  ;;  %v2898_v47 = vpop.permute.xlu0 %2897 }
 0x668   : > { %v2929_v11 = vsel %vm1433_vm0, %v2898_v47, %v2900_v46  ;;  %v2961_v21 = vsel %vm1433_vm0, %v2900_v46, %v2898_v47 }
 0x669   : > { %v2969_v41 = vadd.f32 %v2929_v11, %v9510_v1  ;;  %v2970_v5 = vadd.f32 %v2961_v21, %v9513_v43 }
 0x66b   : > { %v2985_v58 = vadd.f32 %v2970_v5, %v2969_v41  ;;  %v2904_v51 = vpop.permute.xlu1 %2903  ;;  %v2902_v29 = vpop.permute.xlu0 %2901 }
 0x66c   : > { %v2930_v23 = vsel %vm1433_vm0, %v2902_v29, %v2904_v51  ;;  %v2962_v35 = vsel %vm1433_vm0, %v2904_v51, %v2902_v29 }
 0x66d   : > { %7295 = vrcp.f32 %v2985_v58  ;;  %v2971_v37 = vadd.f32 %v2930_v23, %v9528_v17  ;;  %v2972_v34 = vadd.f32 %v2962_v35, %v9531_v52  ;;  %v12117_v23 = vmov 0.0  }
 0x66f   : > { %v2986_v59 = vadd.f32 %v2972_v34, %v2971_v37 }
 0x670   : > { %v2908_v36 = vpop.permute.xlu1 %2907  ;;  %v2906_v31 = vpop.permute.xlu0 %2905 }
 0x671   : > { %7297 = vrcp.f32 %v2986_v59  ;;  %v2931_v1 = vsel %vm1433_vm0, %v2906_v31, %v2908_v36  ;;  %v2963_v43 = vsel %vm1433_vm0, %v2908_v36, %v2906_v31 }
 0x672   : > { %v2973_v56 = vadd.f32 %v2931_v1, %v9558_v45  ;;  %v2974_v9 = vadd.f32 %v2963_v43, %v9561_v53 }
 0x674   : > { %v2987_v4 = vadd.f32 %v2974_v9, %v2973_v56  ;;  %v2912_v2 = vpop.permute.xlu1 %2911  ;;  %v2910_v7 = vpop.permute.xlu0 %2909 }
 0x675   : > { %v2932_v24 = vsel %vm1433_vm0, %v2910_v7, %v2912_v2  ;;  %v2964_v17 = vsel %vm1433_vm0, %v2912_v2, %v2910_v7 }
 0x676   : > { %7299 = vrcp.f32 %v2987_v4  ;;  %v2975_v52 = vadd.f32 %v2932_v24, %v9578_v12  ;;  %v2976_v10 = vadd.f32 %v2964_v17, %v9581_v44 }
 0x678   : > { %v2988_v32 = vadd.f32 %v2976_v10, %v2975_v52  ;;  %v2916_v46 = vpop.permute.xlu1 %2915  ;;  %v2914_v47 = vpop.permute.xlu0 %2913 }
 0x679   : > { %v2933_v11 = vsel %vm1433_vm0, %v2914_v47, %v2916_v46  ;;  %v2965_v45 = vsel %vm1433_vm0, %v2916_v46, %v2914_v47 }
 0x67a   : > { %v9655_v53 = vpop.eup %7295  ;;  %7301 = vrcp.f32 %v2988_v32  ;;  %v2977_v21 = vadd.f32 %v2933_v11, %v9592_v18  ;;  %v2978_v41 = vadd.f32 %v2965_v45, %v9595_v0  ;;  %v12122_v11 = vld [vmem:[#allocation31_spill] sm:$0xff] }
 0x67b   : > { %v9661_v5 = vmul.f32 %v9655_v53, %v9428_v28 }
 0x67c   : > { %v2989_v12 = vadd.f32 %v2978_v41, %v2977_v21 }
 0x67d   : > { %v2920_v44 = vpop.permute.xlu1 %2919  ;;  %v2918_v58 = vpop.permute.xlu0 %2917  ;;  %3186 = vrot.lane.b32.xlu0 %v9661_v5, %s7631_s18  ;;  %6609 = vmatmul.mubr.msk.f32.vlgmr.msra.gmra.mxu1 %vm1627_vm2, %v9661_v5 }
 0x67e   : > { %v2934_v51 = vsel %vm1433_vm0, %v2918_v58, %v2920_v44  ;;  %v2966_v29 = vsel %vm1433_vm0, %v2920_v44, %v2918_v58  ;;  %v9669_v18 = vpop.eup %7297  ;;  %7303 = vrcp.f32 %v2989_v12  ;;  %3111 = vmatprep.mubr.f32.mxu1 %v12117_v23  ;;  %3508 = vmatpush1.msra.mxu1 %v9524_v15  ;;  %v12127_v58 = vld [vmem:[#allocation50_spill] sm:$0xff] }
 0x67f   : > { %v2979_v0 = vadd.f32 %v2934_v51, %v9604_v63  ;;  %v2980_v28 = vadd.f32 %v2966_v29, %v9607_v55  ;;  %v2997_v35 = vmul.f32 %v9669_v18, %v9441_v54  ;;  %3509 = vmatprep.subr.mxu1 %v9534_v19 }
 0x680   : > { %3510 = vmatpush1.msra.mxu1 %v9538_v14 }
 0x681   : > { %v2990_v37 = vadd.f32 %v2980_v28, %v2979_v0  ;;  %v2924_v34 = vpop.permute.xlu1 %2923  ;;  %v2922_v59 = vpop.permute.xlu0 %2921  ;;  %3188 = vrot.lane.b32.xlu1 %v2997_v35, %s7631_s18  ;;  %6610 = vmatmul.mubr.msk.f32.gmra.mxu1 %vm1627_vm2, %v2997_v35 }
 0x682   : > { %v2935_v36 = vsel %vm1433_vm0, %v2922_v59, %v2924_v34  ;;  %v2967_v63 = vsel %vm1433_vm0, %v2924_v34, %v2922_v59  ;;  %3117 = vmatprep.mubr.f32.mxu1 %v12117_v23  ;;  %3511 = vmatprep.subr.mxu1 %v9545_v61 }
 0x683   : > { %7305 = vrcp.f32 %v2990_v37  ;;  %v2981_v55 = vadd.f32 %v2935_v36, %v9616_v13  ;;  %v2982_v54 = vadd.f32 %v2967_v63, %v9619_v3  ;;  %v7300_v31 = vpop.eup %7299  ;;  %3512 = vmatpush1.msra.mxu1 %v9548_v26  ;;  %v12133_v36 = vld [vmem:[#allocation53_spill] sm:$0xff] }
 0x684   : > { %v3000_v9 = vmul.f32 %v7300_v31, %v9457_v39  ;;  %3513 = vmatprep.subr.mxu1 %v9554_v16 }
 0x685   : > { %v2991_v1 = vadd.f32 %v2982_v54, %v2981_v55  ;;  %v2928_v43 = vpop.permute.xlu1 %2927  ;;  %v2926_v56 = vpop.permute.xlu0 %2925  ;;  %3514 = vmatpush1.msra.mxu1 %v9564_v60  ;;  %v12135_v54 = vld [vmem:[#allocation54_spill] sm:$0xff] }
 0x686   : > { %v2936_v4 = vsel %vm1433_vm0, %v2926_v56, %v2928_v43  ;;  %v2968_v13 = vsel %vm1433_vm0, %v2928_v43, %v2926_v56  ;;  %3190 = vrot.lane.b32.xlu0 %v3000_v9, %s7631_s18  ;;  %6611 = vmatmul.mubr.msk.f32.gmra.mxu1 %vm1627_vm2, %v3000_v9 }
 0x687   : > { %7307 = vrcp.f32 %v2991_v1  ;;  %v2983_v3 = vadd.f32 %v2936_v4, %v9628_v22  ;;  %v2984_v2 = vadd.f32 %v2968_v13, %v9631_v57  ;;  %v7302_v7 = vpop.eup %7301  ;;  %3123 = vmatprep.mubr.f32.mxu1 %v12117_v23  ;;  %3997 = vmatprep.subr.mxu1 %v9519_v50  ;;  %v12137_v4 = vld [vmem:[#allocation55_spill] sm:$0xff] }
 0x688   : > { %v3003_v24 = vmul.f32 %v7302_v7, %v9467_v38  ;;  %v9758_v46 = vmul.f32 %v7302_v7, %v9469_v8 }
 0x689   : > { %v2992_v39 = vadd.f32 %v2984_v2, %v2983_v3 }
 0x68a   : > { %3192 = vrot.lane.b32.xlu1 %v3003_v24, %s7631_s18  ;;  %6612 = vmatmul.mubr.msk.f32.gmra.mxu1 %vm1627_vm2, %v3003_v24 }
 0x68b   : > { %7309 = vrcp.f32 %v2992_v39  ;;  %v7304_v22 = vpop.eup %7303  ;;  %3129 = vmatprep.mubr.f32.mxu1 %v12117_v23 }
 0x68c   : > { %v3006_v57 = vmul.f32 %v7304_v22, %v9475_v49 }
 0x68e   : > { %3194 = vrot.lane.b32.xlu0 %v3006_v57, %s7631_s18  ;;  %6613 = vmatmul.mubr.msk.f32.gmra.mxu1 %vm1627_vm2, %v3006_v57 }
 0x68f   : > { %3135 = vmatprep.mubr.f32.mxu1 %v12117_v23 }
 0x690   : > { %v7306_v17 = vpop.eup %7305 }
 0x691   : > { %v3009_v52 = vmul.f32 %v7306_v17, %v9483_v48  ;;  %v9738_v48 = vmul.f32 %v9655_v53, %v9431_v27  ;;  %v9755_v27 = vmul.f32 %v7304_v22, %v9477_v33  ;;  %v12118_v33 = vld [vmem:[#allocation12_spill] sm:$0xff] }
 0x692   : > { %v12123_v53 = vld [vmem:[#allocation48_spill] sm:$0xff] }
 0x693   : > { %3196 = vrot.lane.b32.xlu1 %v3009_v52, %s7631_s18  ;;  %6614 = vmatmul.mubr.msk.f32.gmra.mxu1 %vm1627_vm2, %v3009_v52 }
 0x694   : > { %v7308_v38 = vpop.eup %7307  ;;  %3141 = vmatprep.mubr.f32.mxu1 %v12117_v23 }
 0x695   : > { %v3012_v10 = vmul.f32 %v7308_v38, %v9491_v30  ;;  %v9744_v30 = vmul.f32 %v7300_v31, %v9459_v6  ;;  %v9768_v6 = vmul.f32 %v7306_v17, %v9485_v40  ;;  %v723_v40 = vsub.s32 5, %v12118_v33 }
 0x697   : > { %3198 = vrot.lane.b32.xlu0 %v3012_v10, %s7631_s18  ;;  %6615 = vmatmul.mubr.msk.f32.gmra.mxu1 %vm1627_vm2, %v3012_v10  ;;  %v9815_v45 = vrot.slane %v12122_v11, %v723_v40 }
 0x698   : > { %v7310_v49 = vpop.eup %7309  ;;  %3147 = vmatprep.mubr.f32.mxu1 %v12117_v23 }
 0x699   : > { %v3015_v32 = vmul.f32 %v7310_v49, %v9499_v20  ;;  %v9748_v20 = vmul.f32 %v9669_v18, %v9445_v42  ;;  %v9765_v42 = vmul.f32 %v7308_v38, %v9493_v25  ;;  %v9775_v8 = vmul.f32 %v7310_v49, %v9501_v62  ;;  %v12119_v25 = vld [vmem:[#allocation59_spill] sm:$0xff] }
 0x69a   : > { %v12120_v62 = vld [vmem:[#allocation47_spill] sm:$0xff]  ;;  %v9823_v21 = vadd.f32 %v12123_v53, %v9815_v45  ;;  %v9843_v51 = vadd.f32 %v12127_v58, %v9815_v45  ;;  %v9891_v63 = vadd.f32 %v12133_v36, %v12119_v25  ;;  %v9901_v31 = vadd.f32 %v12135_v54, %v9815_v45 }
 0x69b   : > { %3451 = vrot.lane.b32.xlu0 %v9661_v5, %s7632_s20  ;;  %3200 = vrot.lane.b32.xlu1 %v3015_v32, %s7631_s18  ;;  %v9812_v47 = vadd.f32 %v12120_v62, %v12119_v25  ;;  %v12129_v18 = vld [vmem:[#allocation51_spill] sm:$0xff]  ;;  %v9923_v13 = vadd.f32 %v12137_v4, %v12119_v25 }
 0x69c   : > { %6616 = vmatmul.mubr.msk.f32.gmra.mxu1 %vm1627_vm2, %v3015_v32  ;;  %12124 = vst [vmem:[#allocation41_spill] sm:$0xff] %v9823_v21  ;;  %12128 = vst [vmem:[#allocation43_spill] sm:$0xff] %v9843_v51  ;;  %v9864_v0 = vadd.f32 %v12129_v18, %v12119_v25 }
 0x69d   : > { %3547 = vmatprep.mubr.f32.mxu1 %v12117_v23  ;;  %12121 = vst [vmem:[#allocation35_spill] sm:$0xff] %v9812_v47  ;;  %12134 = vst [vmem:[#allocation38_spill] sm:$0xff] %v9891_v63 }
 0x69e   : > { %12130 = vst [vmem:[#allocation42_spill] sm:$0xff] %v9864_v0  ;;  %12136 = vst [vmem:[#allocation96_spill] sm:$0xff] %v9901_v31 }
 0x69f   : > { %3453 = vrot.lane.b32.xlu0 %v2997_v35, %s7632_s20  ;;  %3700 = vrot.lane.b32.xlu1 %v9661_v5, %s7633_s27  ;;  %v12125_v5 = vld [vmem:[#allocation49_spill] sm:$0xff]  ;;  %12138 = vst [vmem:[#allocation44_spill] sm:$0xff] %v9923_v13 }
 0x6a0   : > { %v9831_v12 = vadd.f32 %v12125_v5, %v12119_v25 }
 0x6a2   : > { %12126 = vst [vmem:[#allocation70_spill] sm:$0xff] %v9831_v12 }
 0x6a3   : > { %3455 = vrot.lane.b32.xlu0 %v3000_v9, %s7632_s20  ;;  %3702 = vrot.lane.b32.xlu1 %v2997_v35, %s7633_s27  ;;  %v12131_v35 = vld [vmem:[#allocation52_spill] sm:$0xff] }
 0x6a4   : > { %v9875_v37 = vadd.f32 %v12131_v35, %v9815_v45 }
 0x6a6   : > { %12132 = vst [vmem:[#allocation95_spill] sm:$0xff] %v9875_v37 }
 0x6a7   : > { %3457 = vrot.lane.b32.xlu0 %v3003_v24, %s7632_s20  ;;  %3704 = vrot.lane.b32.xlu1 %v3000_v9, %s7633_s27 }
 0x6ab   : > { %3459 = vrot.lane.b32.xlu0 %v3006_v57, %s7632_s20  ;;  %3706 = vrot.lane.b32.xlu1 %v3003_v24, %s7633_s27  ;;  %v12139_v24 = vld [vmem:[#allocation56_spill] sm:$0xff] }
 0x6ac   : > { %v9939_v22 = vadd.f32 %v12139_v24, %v9815_v45  ;;  %v4675_v24 = vld [vmem:[#allocation5 + $0xa00] sm:$0xff] }
 0x6ae   : > { %12140 = vst [vmem:[#allocation37_spill] sm:$0xff] %v9939_v22 }
 0x6af   : > { %3461 = vrot.lane.b32.xlu0 %v3009_v52, %s7632_s20  ;;  %3708 = vrot.lane.b32.xlu1 %v3006_v57, %s7633_s27 }
 0x6b3   : > { %3463 = vrot.lane.b32.xlu0 %v3012_v10, %s7632_s20  ;;  %3710 = vrot.lane.b32.xlu1 %v3009_v52, %s7633_s27  ;;  %v12141_v52 = vld [vmem:[#allocation57_spill] sm:$0xff] }
 0x6b4   : > { %v9961_v38 = vadd.f32 %v12141_v52, %v12119_v25  ;;  %v12143_v25 = vld [vmem:[#allocation58_spill] sm:$0xff] }
 0x6b5   : > { %v9977_v62 = vadd.f32 %v12143_v25, %v9815_v45 }
 0x6b6   : > { %12142 = vst [vmem:[#allocation45_spill] sm:$0xff] %v9961_v38 }
 0x6b7   : > { %3465 = vrot.lane.b32.xlu0 %v3015_v32, %s7632_s20  ;;  %3712 = vrot.lane.b32.xlu1 %v3012_v10, %s7633_s27  ;;  %12144 = vst [vmem:[#allocation40_spill] sm:$0xff] %v9977_v62 }
 0x6bb   : > { %4118 = vrot.lane.b32.xlu0 %v9738_v48, %s7631_s18  ;;  %3714 = vrot.lane.b32.xlu1 %v3015_v32, %s7633_s27 }
 0x6bf   : > { %4122 = vrot.lane.b32.xlu0 %v9744_v30, %s7631_s18  ;;  %4120 = vrot.lane.b32.xlu1 %v9748_v20, %s7631_s18 }
 0x6c3   : > { %4126 = vrot.lane.b32.xlu0 %v9755_v27, %s7631_s18  ;;  %4124 = vrot.lane.b32.xlu1 %v9758_v46, %s7631_s18 }
 0x6c7   : > { %4130 = vrot.lane.b32.xlu0 %v9765_v42, %s7631_s18  ;;  %4128 = vrot.lane.b32.xlu1 %v9768_v6, %s7631_s18 }
 0x6cb   : > { %4295 = vrot.lane.b32.xlu0 %v9738_v48, %s7632_s20  ;;  %4132 = vrot.lane.b32.xlu1 %v9775_v8, %s7631_s18 }
 0x6cf   : > { %4297 = vrot.lane.b32.xlu0 %v9748_v20, %s7632_s20  ;;  %4472 = vrot.lane.b32.xlu1 %v9738_v48, %s7633_s27 }
 0x6d3   : > { %4299 = vrot.lane.b32.xlu0 %v9744_v30, %s7632_s20  ;;  %4474 = vrot.lane.b32.xlu1 %v9748_v20, %s7633_s27 }
 0x6d7   : > { %4301 = vrot.lane.b32.xlu0 %v9758_v46, %s7632_s20  ;;  %4476 = vrot.lane.b32.xlu1 %v9744_v30, %s7633_s27 }
 0x6db   : > { %4303 = vrot.lane.b32.xlu0 %v9755_v27, %s7632_s20  ;;  %4478 = vrot.lane.b32.xlu1 %v9758_v46, %s7633_s27 }
 0x6df   : > { %4305 = vrot.lane.b32.xlu0 %v9768_v6, %s7632_s20  ;;  %4480 = vrot.lane.b32.xlu1 %v9755_v27, %s7633_s27 }
 0x6e3   : > { %4307 = vrot.lane.b32.xlu0 %v9765_v42, %s7632_s20  ;;  %4482 = vrot.lane.b32.xlu1 %v9768_v6, %s7633_s27 }
 0x6e7   : > { %4309 = vrot.lane.b32.xlu0 %v9775_v8, %s7632_s20  ;;  %4484 = vrot.lane.b32.xlu1 %v9765_v42, %s7633_s27 }
 0x6eb   : > { %3347 = vrot.lane.b32.xlu0 %v9812_v47, %s7631_s18  ;;  %4486 = vrot.lane.b32.xlu1 %v9775_v8, %s7633_s27 }
 0x6ef   : > { %3596 = vrot.lane.b32.xlu0 %v9812_v47, %s7632_s20  ;;  %3349 = vrot.lane.b32.xlu1 %v9823_v21, %s7631_s18  ;;  %v3187_v41 = vpop.permute.xlu0 %3186 }
 0x6f0   : > { %6617 = vmatmul.mubr.msk.f32.vlgmr.msra.gmra.mxu0 %vm1627_vm2, %v3187_v41 }
 0x6f1   : > { %3757 = vmatpush1.msra.mxu0 %v9524_v15  ;;  %3288 = vmatprep.mubr.f32.mxu0 %v12117_v23 }
 0x6f2   : > { %3758 = vmatprep.subr.mxu0 %v9534_v19 }
 0x6f3   : > { %3351 = vrot.lane.b32.xlu0 %v9831_v12, %s7631_s18  ;;  %3598 = vrot.lane.b32.xlu1 %v9823_v21, %s7632_s20  ;;  %v3189_v44 = vpop.permute.xlu1 %3188 }
 0x6f4   : > { %6618 = vmatmul.mubr.msk.f32.gmra.mxu0 %vm1627_vm2, %v3189_v44  ;;  %v12145_v44 = vld [vmem:[#allocation60_spill] sm:$0xff] }
 0x6f5   : > { %3294 = vmatprep.mubr.f32.mxu0 %v12117_v23  ;;  %3759 = vmatpush1.msra.mxu0 %v9538_v14 }
 0x6f6   : > { %3760 = vmatprep.subr.mxu0 %v9545_v61 }
 0x6f7   : > { %3845 = vrot.lane.b32.xlu0 %v9812_v47, %s7633_s27  ;;  %3353 = vrot.lane.b32.xlu1 %v9843_v51, %s7631_s18 }
 0x6f8   : > { %v3191_v29 = vpop.permute.xlu0 %3190  ;;  %3761 = vmatpush1.msra.mxu0 %v9548_v26 }
 0x6f9   : > { %6619 = vmatmul.mubr.msk.f32.gmra.mxu0 %vm1627_vm2, %v3191_v29  ;;  %3762 = vmatprep.subr.mxu0 %v9554_v16 }
 0x6fa   : > { %3300 = vmatprep.mubr.f32.mxu0 %v12117_v23  ;;  %3763 = vmatpush1.msra.mxu0 %v9564_v60 }
 0x6fb   : > { %3600 = vrot.lane.b32.xlu0 %v9831_v12, %s7632_s20  ;;  %3847 = vrot.lane.b32.xlu1 %v9823_v21, %s7633_s27 }
 0x6fc   : > { %v3193_v28 = vpop.permute.xlu1 %3192  ;;  %4174 = vmatprep.subr.mxu0 %v9519_v50 }
 0x6fd   : > { %6620 = vmatmul.mubr.msk.f32.gmra.mxu0 %vm1627_vm2, %v3193_v28 }
 0x6fe   : > { %3306 = vmatprep.mubr.f32.mxu0 %v12117_v23 }
 0x6ff   : > { %3355 = vrot.lane.b32.xlu0 %v9864_v0, %s7631_s18  ;;  %3602 = vrot.lane.b32.xlu1 %v9843_v51, %s7632_s20 }
 0x700   : > { %v3195_v34 = vpop.permute.xlu0 %3194 }
 0x701   : > { %6621 = vmatmul.mubr.msk.f32.gmra.mxu0 %vm1627_vm2, %v3195_v34 }
 0x702   : > { %3312 = vmatprep.mubr.f32.mxu0 %v12117_v23 }
 0x703   : > { %3849 = vrot.lane.b32.xlu0 %v9831_v12, %s7633_s27  ;;  %3357 = vrot.lane.b32.xlu1 %v9875_v37, %s7631_s18 }
 0x705   : > { %v3197_v59 = vpop.permute.xlu1 %3196 }
 0x706   : > { %6622 = vmatmul.mubr.msk.f32.gmra.mxu0 %vm1627_vm2, %v3197_v59 }
 0x707   : > { %3604 = vrot.lane.b32.xlu0 %v9864_v0, %s7632_s20  ;;  %3851 = vrot.lane.b32.xlu1 %v9843_v51, %s7633_s27 }
 0x708   : > { %3318 = vmatprep.mubr.f32.mxu0 %v12117_v23 }
 0x709   : > { %v3199_v55 = vpop.permute.xlu0 %3198 }
 0x70a   : > { %6623 = vmatmul.mubr.msk.f32.gmra.mxu0 %vm1627_vm2, %v3199_v55 }
 0x70b   : > { %3359 = vrot.lane.b32.xlu0 %v9891_v63, %s7631_s18  ;;  %3606 = vrot.lane.b32.xlu1 %v9875_v37, %s7632_s20 }
 0x70c   : > { %3324 = vmatprep.mubr.f32.mxu0 %v12117_v23 }
 0x70d   : > { %v3201_v1 = vpop.permute.xlu1 %3200  ;;  %v3452_v43 = vpop.permute.xlu0 %3451 }
 0x70e   : > { %6624 = vmatmul.mubr.msk.f32.gmra.mxu0 %vm1627_vm2, %v3201_v1  ;;  %6625 = vmatmul.mubr.msk.f32.vlgmr.msra.gmra.mxu1 %vm1627_vm2, %v3452_v43  ;;  %v4680_v1 = vld [vmem:[#allocation5 + $0xb88] sm:$0xff]  ;;  %v4679_v43 = vld [vmem:[#allocation5 + $0xb80] sm:$0xff] }
 0x70f   : > { %3853 = vrot.lane.b32.xlu0 %v9864_v0, %s7633_s27  ;;  %3361 = vrot.lane.b32.xlu1 %v9901_v31, %s7631_s18 }
 0x710   : > { %3998 = vmatpush1.msra.mxu1 %v9524_v15  ;;  %3553 = vmatprep.mubr.f32.mxu1 %v12117_v23 }
 0x711   : > { %v3701_v56 = vpop.permute.xlu1 %3700  ;;  %3796 = vmatprep.mubr.f32.mxu0 %v12117_v23  ;;  %v3454_v9 = vpop.permute.xlu0 %3453  ;;  %3999 = vmatprep.subr.mxu1 %v9534_v19 }
 0x712   : > { %6626 = vmatmul.mubr.msk.f32.gmra.mxu1 %vm1627_vm2, %v3454_v9  ;;  %6633 = vmatmul.mubr.msk.f32.vlgmr.msra.gmra.mxu0 %vm1627_vm2, %v3701_v56  ;;  %v4678_v9 = vld [vmem:[#allocation5 + $0xac8] sm:$0xff] }
 0x713   : > { %4175 = vmatpush1.msra.mxu0 %v9524_v15  ;;  %3608 = vrot.lane.b32.xlu0 %v9891_v63, %s7632_s20 }
 0x714   : > { %3855 = vrot.lane.b32.xlu1 %v9875_v37, %s7633_s27  ;;  %3559 = vmatprep.mubr.f32.mxu1 %v12117_v23 }
 0x715   : > { %v3703_v3 = vpop.permute.xlu1 %3702  ;;  %3802 = vmatprep.mubr.f32.mxu0 %v12117_v23  ;;  %v3456_v2 = vpop.permute.xlu0 %3455  ;;  %4000 = vmatpush1.msra.mxu1 %v9538_v14 }
 0x716   : > { %6627 = vmatmul.mubr.msk.f32.gmra.mxu1 %vm1627_vm2, %v3456_v2  ;;  %6634 = vmatmul.mubr.msk.f32.gmra.mxu0 %vm1627_vm2, %v3703_v3  ;;  %v4677_v3 = vld [vmem:[#allocation5 + $0xac0] sm:$0xff] }
 0x717   : > { %3363 = vrot.lane.b32.xlu0 %v9923_v13, %s7631_s18  ;;  %3565 = vmatprep.mubr.f32.mxu1 %v12117_v23 }
 0x718   : > { %3610 = vrot.lane.b32.xlu1 %v9901_v31, %s7632_s20  ;;  %3808 = vmatprep.mubr.f32.mxu0 %v12117_v23 }
 0x719   : > { %v3705_v7 = vpop.permute.xlu1 %3704  ;;  %4176 = vmatprep.subr.mxu0 %v9534_v19  ;;  %v3458_v39 = vpop.permute.xlu0 %3457  ;;  %4001 = vmatprep.subr.mxu1 %v9545_v61 }
 0x71a   : > { %6628 = vmatmul.mubr.msk.f32.gmra.mxu1 %vm1627_vm2, %v3458_v39  ;;  %6635 = vmatmul.mubr.msk.f32.gmra.mxu0 %vm1627_vm2, %v3705_v7  ;;  %v4676_v7 = vld [vmem:[#allocation5 + $0xa08] sm:$0xff] }
 0x71b   : > { %4177 = vmatpush1.msra.mxu0 %v9538_v14  ;;  %3857 = vrot.lane.b32.xlu0 %v9891_v63, %s7633_s27 }
 0x71c   : > { %3365 = vrot.lane.b32.xlu1 %v9939_v22, %s7631_s18  ;;  %3571 = vmatprep.mubr.f32.mxu1 %v12117_v23 }
 0x71d   : > { %v3707_v57 = vpop.permute.xlu1 %3706  ;;  %3814 = vmatprep.mubr.f32.mxu0 %v12117_v23  ;;  %v3460_v17 = vpop.permute.xlu0 %3459  ;;  %4002 = vmatpush1.msra.mxu1 %v9548_v26 }
 0x71e   : > { %6629 = vmatmul.mubr.msk.f32.gmra.mxu1 %vm1627_vm2, %v3460_v17  ;;  %6636 = vmatmul.mubr.msk.f32.gmra.mxu0 %vm1627_vm2, %v3707_v57  ;;  %v4674_v17 = vld [vmem:[#allocation5 + $0x948] sm:$0xff] }
 0x71f   : > { %3612 = vrot.lane.b32.xlu0 %v9923_v13, %s7632_s20  ;;  %3577 = vmatprep.mubr.f32.mxu1 %v12117_v23 }
 0x720   : > { %3859 = vrot.lane.b32.xlu1 %v9901_v31, %s7633_s27  ;;  %3820 = vmatprep.mubr.f32.mxu0 %v12117_v23 }
 0x721   : > { %v3709_v10 = vpop.permute.xlu1 %3708  ;;  %4178 = vmatprep.subr.mxu0 %v9545_v61  ;;  %v3462_v49 = vpop.permute.xlu0 %3461  ;;  %4003 = vmatprep.subr.mxu1 %v9554_v16 }
 0x722   : > { %6630 = vmatmul.mubr.msk.f32.gmra.mxu1 %vm1627_vm2, %v3462_v49  ;;  %6637 = vmatmul.mubr.msk.f32.gmra.mxu0 %vm1627_vm2, %v3709_v10  ;;  %v4673_v10 = vld [vmem:[#allocation5 + $0x940] sm:$0xff]  ;;  %v4672_v49 = vld [vmem:[#allocation5 + $0x888] sm:$0xff] }
 0x723   : > { %4179 = vmatpush1.msra.mxu0 %v9548_v26  ;;  %3367 = vrot.lane.b32.xlu0 %v9961_v38, %s7631_s18 }
 0x724   : > { %3614 = vrot.lane.b32.xlu1 %v9939_v22, %s7632_s20  ;;  %3583 = vmatprep.mubr.f32.mxu1 %v12117_v23 }
 0x725   : > { %v3711_v32 = vpop.permute.xlu1 %3710  ;;  %3826 = vmatprep.mubr.f32.mxu0 %v12117_v23  ;;  %v3464_v40 = vpop.permute.xlu0 %3463  ;;  %4004 = vmatpush1.msra.mxu1 %v9564_v60 }
 0x726   : > { %6631 = vmatmul.mubr.msk.f32.gmra.mxu1 %vm1627_vm2, %v3464_v40  ;;  %6638 = vmatmul.mubr.msk.f32.gmra.mxu0 %vm1627_vm2, %v3711_v32  ;;  %v4671_v40 = vld [vmem:[#allocation5 + $0x880] sm:$0xff] }
 0x727   : > { %3861 = vrot.lane.b32.xlu0 %v9923_v13, %s7633_s27  ;;  %3589 = vmatprep.mubr.f32.mxu1 %v12117_v23 }
 0x728   : > { %3369 = vrot.lane.b32.xlu1 %v9977_v62, %s7631_s18  ;;  %3832 = vmatprep.mubr.f32.mxu0 %v12117_v23 }
 0x729   : > { %v3713_v11 = vpop.permute.xlu1 %3712  ;;  %4180 = vmatprep.subr.mxu0 %v9554_v16  ;;  %v3466_v53 = vpop.permute.xlu0 %3465  ;;  %4351 = vmatprep.subr.mxu1 %v9519_v50 }
 0x72a   : > { %6632 = vmatmul.mubr.msk.f32.gmra.mxu1 %vm1627_vm2, %v3466_v53  ;;  %6639 = vmatmul.mubr.msk.f32.gmra.mxu0 %vm1627_vm2, %v3713_v11  ;;  %v4670_v11 = vld [vmem:[#allocation5 + $0x7c8] sm:$0xff]  ;;  %v4669_v53 = vld [vmem:[#allocation5 + $0x7c0] sm:$0xff] }
 0x72b   : > { %4181 = vmatpush1.msra.mxu0 %v9564_v60  ;;  %3616 = vrot.lane.b32.xlu0 %v9961_v38, %s7632_s20 }
 0x72c   : > { %3863 = vrot.lane.b32.xlu1 %v9939_v22, %s7633_s27  ;;  %3838 = vmatprep.mubr.f32.mxu0 %v12117_v23 }
 0x72d   : > { %v3715_v41 = vpop.permute.xlu1 %3714  ;;  %4037 = vmatprep.mubr.f32.mxu1 %v12117_v23  ;;  %v4119_v5 = vpop.permute.xlu0 %4118  ;;  %4528 = vmatprep.subr.mxu0 %v9519_v50  ;;  %v12146_v50 = vld [vmem:[#allocation61_spill] sm:$0xff] }
 0x72e   : > { %6640 = vmatmul.mubr.msk.f32.gmra.mxu0 %vm1627_vm2, %v3715_v41  ;;  %6641 = vmatmul.mubr.msk.f32.vlgmr.msra.gmra.mxu1 %vm1627_vm2, %v9738_v48  ;;  %v10012_v18 = vadd.f32 %v12146_v50, %v9815_v45  ;;  %v4668_v41 = vld [vmem:[#allocation5 + $0x708] sm:$0xff] }
 0x72f   : > { %3371 = vrot.lane.b32.xlu0 %v12145_v44, %s7631_s18  ;;  %4352 = vmatpush1.msra.mxu1 %v9524_v15  ;;  %v4666_v50 = vld [vmem:[#allocation5 + $0x648] sm:$0xff] }
 0x730   : > { %3618 = vrot.lane.b32.xlu1 %v9977_v62, %s7632_s20  ;;  %4043 = vmatprep.mubr.f32.mxu1 %v12117_v23  ;;  %12147 = vst [vmem:[#allocation46_spill] sm:$0xff] %v10012_v18 }
 0x731   : > { %v4121_v58 = vpop.permute.xlu1 %4120  ;;  %4214 = vmatprep.mubr.f32.mxu0 %v12117_v23  ;;  %v4123_v29 = vpop.permute.xlu0 %4122  ;;  %4353 = vmatprep.subr.mxu1 %v9534_v19 }
 0x732   : > { %6642 = vmatmul.mubr.msk.f32.gmra.mxu1 %vm1627_vm2, %v9748_v20  ;;  %6649 = vmatmul.mubr.msk.f32.vlgmr.msra.gmra.mxu0 %vm1627_vm2, %v4119_v5 }
 0x733   : > { %4529 = vmatpush1.msra.mxu0 %v9524_v15  ;;  %3865 = vrot.lane.b32.xlu0 %v9961_v38, %s7633_s27 }
 0x734   : > { %3373 = vrot.lane.b32.xlu1 %v10012_v18, %s7631_s18  ;;  %4049 = vmatprep.mubr.f32.mxu1 %v12117_v23 }
 0x735   : > { %v4125_v48 = vpop.permute.xlu1 %4124  ;;  %4220 = vmatprep.mubr.f32.mxu0 %v12117_v23  ;;  %v4127_v28 = vpop.permute.xlu0 %4126  ;;  %4354 = vmatpush1.msra.mxu1 %v9538_v14 }
 0x736   : > { %6643 = vmatmul.mubr.msk.f32.gmra.mxu1 %vm1627_vm2, %v9744_v30  ;;  %6650 = vmatmul.mubr.msk.f32.gmra.mxu0 %vm1627_vm2, %v4121_v58  ;;  %v12148_v30 = vld [vmem:[#allocation62_spill] sm:$0xff]  ;;  %v4667_v58 = vld [vmem:[#allocation5 + $0x700] sm:$0xff] }
 0x737   : > { %3620 = vrot.lane.b32.xlu0 %v12145_v44, %s7632_s20  ;;  %4055 = vmatprep.mubr.f32.mxu1 %v12117_v23 }
 0x738   : > { %3867 = vrot.lane.b32.xlu1 %v9977_v62, %s7633_s27  ;;  %4226 = vmatprep.mubr.f32.mxu0 %v12117_v23 }
 0x739   : > { %v4129_v15 = vpop.permute.xlu1 %4128  ;;  %4530 = vmatprep.subr.mxu0 %v9534_v19  ;;  %v4131_v20 = vpop.permute.xlu0 %4130  ;;  %4355 = vmatprep.subr.mxu1 %v9545_v61 }
 0x73a   : > { %6644 = vmatmul.mubr.msk.f32.gmra.mxu1 %vm1627_vm2, %v9758_v46  ;;  %6651 = vmatmul.mubr.msk.f32.gmra.mxu0 %vm1627_vm2, %v4123_v29  ;;  %v12149_v46 = vld [vmem:[#allocation32_spill] sm:$0xff] }
 0x73b   : > { %4531 = vmatpush1.msra.mxu0 %v9538_v14  ;;  %3375 = vrot.lane.b32.xlu0 %v12148_v30, %s7631_s18  ;;  %v10049_v34 = vadd.f32 %v12149_v46, %v9815_v45  ;;  %v4660_v46 = vld [vmem:[#allocation5 + $0x408] sm:$0xff] }
 0x73c   : > { %3622 = vrot.lane.b32.xlu1 %v10012_v18, %s7632_s20  ;;  %4061 = vmatprep.mubr.f32.mxu1 %v12117_v23 }
 0x73d   : > { %v4133_v35 = vpop.permute.xlu1 %4132  ;;  %4232 = vmatprep.mubr.f32.mxu0 %v12117_v23  ;;  %v4296_v19 = vpop.permute.xlu0 %4295  ;;  %4356 = vmatpush1.msra.mxu1 %v9548_v26  ;;  %12150 = vst [vmem:[#allocation39_spill] sm:$0xff] %v10049_v34 }
 0x73e   : > { %6645 = vmatmul.mubr.msk.f32.gmra.mxu1 %vm1627_vm2, %v9755_v27  ;;  %6652 = vmatmul.mubr.msk.f32.gmra.mxu0 %vm1627_vm2, %v4125_v48  ;;  %v4665_v48 = vld [vmem:[#allocation5 + $0x640] sm:$0xff] }
 0x73f   : > { %3869 = vrot.lane.b32.xlu0 %v12145_v44, %s7633_s27  ;;  %4067 = vmatprep.mubr.f32.mxu1 %v12117_v23 }
 0x740   : > { %3377 = vrot.lane.b32.xlu1 %v10049_v34, %s7631_s18  ;;  %4238 = vmatprep.mubr.f32.mxu0 %v12117_v23 }
 0x741   : > { %v4473_v14 = vpop.permute.xlu1 %4472  ;;  %4532 = vmatprep.subr.mxu0 %v9545_v61  ;;  %v4298_v45 = vpop.permute.xlu0 %4297  ;;  %4357 = vmatprep.subr.mxu1 %v9554_v16 }
 0x742   : > { %6646 = vmatmul.mubr.msk.f32.gmra.mxu1 %vm1627_vm2, %v9768_v6  ;;  %6653 = vmatmul.mubr.msk.f32.gmra.mxu0 %vm1627_vm2, %v4127_v28  ;;  %v4664_v28 = vld [vmem:[#allocation5 + $0x588] sm:$0xff] }
 0x743   : > { %4533 = vmatpush1.msra.mxu0 %v9548_v26  ;;  %3624 = vrot.lane.b32.xlu0 %v12148_v30, %s7632_s20 }
 0x744   : > { %3871 = vrot.lane.b32.xlu1 %v10012_v18, %s7633_s27  ;;  %4073 = vmatprep.mubr.f32.mxu1 %v12117_v23 }
 0x745   : > { %v4475_v27 = vpop.permute.xlu1 %4474  ;;  %4244 = vmatprep.mubr.f32.mxu0 %v12117_v23  ;;  %v4300_v61 = vpop.permute.xlu0 %4299  ;;  %4358 = vmatpush1.msra.mxu1 %v9564_v60 }
 0x746   : > { %6647 = vmatmul.mubr.msk.f32.gmra.mxu1 %vm1627_vm2, %v9765_v42  ;;  %6654 = vmatmul.mubr.msk.f32.gmra.mxu0 %vm1627_vm2, %v4129_v15 }
 0x747   : > { %3873 = vrot.lane.b32.xlu0 %v12148_v30, %s7633_s27  ;;  %4079 = vmatprep.mubr.f32.mxu1 %v12117_v23 }
 0x748   : > { %3626 = vrot.lane.b32.xlu1 %v10049_v34, %s7632_s20  ;;  %4250 = vmatprep.mubr.f32.mxu0 %v12117_v23 }
 0x749   : > { %v4477_v26 = vpop.permute.xlu1 %4476  ;;  %4534 = vmatprep.subr.mxu0 %v9554_v16  ;;  %v4302_v6 = vpop.permute.xlu0 %4301  ;;  %4724 = vmatprep.subr.mxu1 %v4680_v1  ;;  %v4649_v1 = vld [vmem:[#allocation5 + $0x40] sm:$0xff] }
 0x74a   : > { %6648 = vmatmul.mubr.msk.f32.gmra.mxu1 %vm1627_vm2, %v9775_v8  ;;  %6655 = vmatmul.mubr.msk.f32.gmra.mxu0 %vm1627_vm2, %v4131_v20  ;;  %v4662_v20 = vld [vmem:[#allocation5 + $0x4c8] sm:$0xff] }
 0x74b   : > { %4535 = vmatpush1.msra.mxu0 %v9564_v60  ;;  %4256 = vmatprep.mubr.f32.mxu0 %v12117_v23 }
 0x74c   : > { %3875 = vrot.lane.b32.xlu1 %v10049_v34, %s7633_s27  ;;  %4391 = vmatprep.mubr.f32.mxu1 %v12117_v23 }
 0x74d   : > { %v4479_v42 = vpop.permute.xlu1 %4478  ;;  %v4304_v59 = vpop.permute.xlu0 %4303 }
 0x74e   : > { %6656 = vmatmul.mubr.msk.f32.gmra.mxu0 %vm1627_vm2, %v4133_v35  ;;  %6657 = vmatmul.mubr.msk.f32.vlgmr.msra.gmra.mxu1 %vm1627_vm2, %v4296_v19  ;;  %v4661_v35 = vld [vmem:[#allocation5 + $0x4c0] sm:$0xff] }
 0x74f   : > { %4397 = vmatprep.mubr.f32.mxu1 %v12117_v23  ;;  %4568 = vmatprep.mubr.f32.mxu0 %v12117_v23 }
 0x750   : > { %4725 = vmatpush1.msra.mxu1 %v4679_v43 }
 0x751   : > { %v4481_v16 = vpop.permute.xlu1 %4480  ;;  %v4306_v8 = vpop.permute.xlu0 %4305  ;;  %4726 = vmatprep.subr.mxu1 %v4678_v9  ;;  %v4711_v9 = vld [vmem:[#allocation5 + $0x1780] sm:$0xff] }
 0x752   : > { %6658 = vmatmul.mubr.msk.f32.gmra.mxu1 %vm1627_vm2, %v4298_v45  ;;  %6665 = vmatmul.mubr.msk.f32.vlgmr.msra.gmra.mxu0 %vm1627_vm2, %v4473_v14  ;;  %v4659_v45 = vld [vmem:[#allocation5 + $0x400] sm:$0xff] }
 0x753   : > { %4403 = vmatprep.mubr.f32.mxu1 %v12117_v23  ;;  %4574 = vmatprep.mubr.f32.mxu0 %v12117_v23 }
 0x754   : > { %4727 = vmatpush1.msra.mxu1 %v4677_v3  ;;  %v4710_v3 = vld [vmem:[#allocation5 + $0x16c8] sm:$0xff] }
 0x755   : > { %v4483_v60 = vpop.permute.xlu1 %4482  ;;  %v4308_v36 = vpop.permute.xlu0 %4307  ;;  %4728 = vmatprep.subr.mxu1 %v4676_v7  ;;  %v4709_v7 = vld [vmem:[#allocation5 + $0x16c0] sm:$0xff] }
 0x756   : > { %6659 = vmatmul.mubr.msk.f32.gmra.mxu1 %vm1627_vm2, %v4300_v61  ;;  %6666 = vmatmul.mubr.msk.f32.gmra.mxu0 %vm1627_vm2, %v4475_v27  ;;  %v4658_v27 = vld [vmem:[#allocation5 + $0x348] sm:$0xff]  ;;  %v4657_v61 = vld [vmem:[#allocation5 + $0x340] sm:$0xff] }
 0x757   : > { %4409 = vmatprep.mubr.f32.mxu1 %v12117_v23  ;;  %4580 = vmatprep.mubr.f32.mxu0 %v12117_v23 }
 0x758   : > { %4729 = vmatpush1.msra.mxu1 %v4675_v24 }
 0x759   : > { %v4485_v55 = vpop.permute.xlu1 %4484  ;;  %v4310_v54 = vpop.permute.xlu0 %4309  ;;  %4730 = vmatprep.subr.mxu1 %v4674_v17  ;;  %v4708_v17 = vld [vmem:[#allocation5 + $0x1608] sm:$0xff] }
 0x75a   : > { %6660 = vmatmul.mubr.msk.f32.gmra.mxu1 %vm1627_vm2, %v4302_v6  ;;  %6667 = vmatmul.mubr.msk.f32.gmra.mxu0 %vm1627_vm2, %v4477_v26  ;;  %v4656_v26 = vld [vmem:[#allocation5 + $0x288] sm:$0xff] }
 0x75b   : > { %4415 = vmatprep.mubr.f32.mxu1 %v12117_v23  ;;  %4586 = vmatprep.mubr.f32.mxu0 %v12117_v23 }
 0x75c   : > { %4731 = vmatpush1.msra.mxu1 %v4673_v10  ;;  %v4707_v10 = vld [vmem:[#allocation5 + $0x1600] sm:$0xff] }
 0x75d   : > { %v4487_v56 = vpop.permute.xlu1 %4486  ;;  %v10107_v4 = vpop.permute.xlu0 %3347  ;;  %4732 = vmatprep.subr.mxu1 %v4672_v49 }
 0x75e   : > { %6661 = vmatmul.mubr.msk.f32.gmra.mxu1 %vm1627_vm2, %v4304_v59  ;;  %6668 = vmatmul.mubr.msk.f32.gmra.mxu0 %vm1627_vm2, %v4479_v42  ;;  %v4655_v42 = vld [vmem:[#allocation5 + $0x280] sm:$0xff] }
 0x75f   : > { %4421 = vmatprep.mubr.f32.mxu1 %v12117_v23  ;;  %4592 = vmatprep.mubr.f32.mxu0 %v12117_v23 }
 0x760   : > { %4733 = vmatpush1.msra.mxu1 %v4671_v40  ;;  %v4706_v40 = vld [vmem:[#allocation5 + $0x1548] sm:$0xff] }
 0x761   : > { %v10113_v2 = vpop.permute.xlu1 %3349  ;;  %v10115_v39 = vpop.permute.xlu0 %3596  ;;  %4734 = vmatprep.subr.mxu1 %v4670_v11  ;;  %v4705_v11 = vld [vmem:[#allocation5 + $0x1540] sm:$0xff] }
 0x762   : > { %6662 = vmatmul.mubr.msk.f32.gmra.mxu1 %vm1627_vm2, %v4306_v8  ;;  %6669 = vmatmul.mubr.msk.f32.gmra.mxu0 %vm1627_vm2, %v4481_v16  ;;  %v4654_v16 = vld [vmem:[#allocation5 + $0x1c8] sm:$0xff]  ;;  %v4653_v8 = vld [vmem:[#allocation5 + $0x1c0] sm:$0xff] }
 0x763   : > { %4427 = vmatprep.mubr.f32.mxu1 %v12117_v23  ;;  %4598 = vmatprep.mubr.f32.mxu0 %v12117_v23 }
 0x764   : > { %4735 = vmatpush1.msra.mxu1 %v4669_v53  ;;  %v4704_v53 = vld [vmem:[#allocation5 + $0x1488] sm:$0xff] }
 0x765   : > { %v10121_v57 = vpop.permute.xlu1 %3598  ;;  %v10123_v52 = vpop.permute.xlu0 %3351  ;;  %4736 = vmatprep.subr.mxu1 %v4668_v41  ;;  %v4703_v41 = vld [vmem:[#allocation5 + $0x1480] sm:$0xff] }
 0x766   : > { %6663 = vmatmul.mubr.msk.f32.gmra.mxu1 %vm1627_vm2, %v4308_v36  ;;  %6670 = vmatmul.mubr.msk.f32.gmra.mxu0 %vm1627_vm2, %v4483_v60  ;;  %v4652_v60 = vld [vmem:[#allocation5 + $0x108] sm:$0xff]  ;;  %v4651_v36 = vld [vmem:[#allocation5 + $0x100] sm:$0xff] }
 0x767   : > { %4433 = vmatprep.mubr.f32.mxu1 %v12117_v23  ;;  %4604 = vmatprep.mubr.f32.mxu0 %v12117_v23 }
 0x768   : > { %4737 = vmatpush1.msra.mxu1 %v4667_v58 }
 0x769   : > { %v10129_v32 = vpop.permute.xlu1 %3353  ;;  %v10131_v25 = vpop.permute.xlu0 %3845  ;;  %4738 = vmatprep.subr.mxu1 %v4666_v50  ;;  %v4702_v50 = vld [vmem:[#allocation5 + $0x13c8] sm:$0xff] }
 0x76a   : > { %6664 = vmatmul.mubr.msk.f32.gmra.mxu1 %vm1627_vm2, %v4310_v54  ;;  %6671 = vmatmul.mubr.msk.f32.gmra.mxu0 %vm1627_vm2, %v4485_v55  ;;  %v4650_v54 = vld [vmem:[#allocation5 + $0x48] sm:$0xff] }
 0x76b   : > { %4610 = vmatprep.mubr.f32.mxu0 %v12117_v23  ;;  %v4663_v23 = vld [vmem:[#allocation5 + $0x580] sm:$0xff]  ;;  %4739 = vmatpush1.msra.mxu1 %v4665_v48 }
 0x76c   : > { %4740 = vmatprep.subr.mxu1 %v4664_v28  ;;  %v4701_v48 = vld [vmem:[#allocation5 + $0x13c0] sm:$0xff] }
 0x76d   : > { %v10136_v5 = vpop.permute.xlu1 %3847  ;;  %v10138_v29 = vpop.permute.xlu0 %3600  ;;  %4741 = vmatpush1.msra.mxu1 %v4663_v23  ;;  %v4700_v23 = vld [vmem:[#allocation5 + $0x1308] sm:$0xff] }
 0x76e   : > { %6672 = vmatmul.mubr.msk.f32.gmra.mxu0 %vm1627_vm2, %v4487_v56  ;;  %4742 = vmatprep.subr.mxu1 %v4662_v20  ;;  %v4712_v56 = vld [vmem:[#allocation5 + $0x1788] sm:$0xff]  ;;  %v4699_v20 = vld [vmem:[#allocation5 + $0x1300] sm:$0xff] }
 0x76f   : > { %4743 = vmatpush1.msra.mxu1 %v4661_v35  ;;  %v4698_v35 = vld [vmem:[#allocation5 + $0x1248] sm:$0xff] }
 0x770   : > { %4744 = vmatprep.subr.mxu1 %v4660_v46  ;;  %v4697_v46 = vld [vmem:[#allocation5 + $0x1240] sm:$0xff] }
 0x771   : > { %v10141_v15 = vpop.permute.xlu1 %3602  ;;  %v10143_v19 = vpop.permute.xlu0 %3355  ;;  %4745 = vmatpush1.msra.mxu1 %v4659_v45 }
 0x772   : > { %4746 = vmatprep.subr.mxu1 %v4658_v27  ;;  %v3107_v45 = vpop.f32.mrf.mxu1 }
 0x773   : > { %4747 = vmatpush1.msra.mxu1 %v4657_v61  ;;  %v4696_v61 = vld [vmem:[#allocation5 + $0x1188] sm:$0xff] }
 0x774   : > { %4748 = vmatprep.subr.mxu1 %v4656_v26  ;;  %v4695_v26 = vld [vmem:[#allocation5 + $0x1180] sm:$0xff] }
 0x775   : > { %v10145_v14 = vpop.permute.xlu1 %3357  ;;  %v10149_v59 = vpop.permute.xlu0 %3849  ;;  %4749 = vmatpush1.msra.mxu1 %v4655_v42 }
 0x776   : > { %4750 = vmatprep.subr.mxu1 %v4654_v16  ;;  %v4694_v16 = vld [vmem:[#allocation5 + $0x10c8] sm:$0xff] }
 0x777   : > { %4751 = vmatpush1.msra.mxu1 %v4653_v8  ;;  %v4693_v8 = vld [vmem:[#allocation5 + $0x10c0] sm:$0xff] }
 0x778   : > { %4752 = vmatprep.subr.mxu1 %v4652_v60  ;;  %v10167_v60 = vpop.f32.mrf.mxu1 }
 0x779   : > { %v10147_v6 = vpop.permute.xlu1 %3851  ;;  %v10153_v43 = vpop.permute.xlu0 %3604  ;;  %4753 = vmatpush1.msra.mxu1 %v4651_v36  ;;  %v4692_v36 = vld [vmem:[#allocation5 + $0x1008] sm:$0xff] }
 0x77a   : > { %4754 = vmatprep.subr.mxu1 %v4650_v54  ;;  %v4691_v54 = vld [vmem:[#allocation5 + $0x1000] sm:$0xff] }
 0x77b   : > { %4755 = vmatpush1.msra.mxu1 %v4649_v1 }
 0x77c   : > { %4756 = vmatprep.subr.mxu1 %v4712_v56  ;;  %v4690_v56 = vld [vmem:[#allocation5 + $0xf48] sm:$0xff] }
 0x77d   : > { %v10151_v55 = vpop.permute.xlu1 %3606  ;;  %4757 = vmatpush2.msra.mxu1 %v4711_v9  ;;  %v10157_v49 = vpop.permute.xlu0 %3359  ;;  %v4689_v9 = vld [vmem:[#allocation5 + $0xf40] sm:$0xff] }
 0x77e   : > { %4758 = vmatprep.subr.mxu1 %v4710_v3  ;;  %v3113_v3 = vpop.f32.mrf.mxu1 }
 0x77f   : > { %4759 = vmatpush2.msra.mxu1 %v4709_v7 }
 0x780   : > { %4760 = vmatprep.subr.mxu1 %v4708_v17  ;;  %v4688_v17 = vld [vmem:[#allocation5 + $0xe88] sm:$0xff] }
 0x781   : > { %v10155_v24 = vpop.permute.xlu1 %3361  ;;  %4761 = vmatpush2.msra.mxu1 %v4707_v10  ;;  %v10161_v28 = vpop.permute.xlu0 %3853  ;;  %v4687_v10 = vld [vmem:[#allocation5 + $0xe80] sm:$0xff] }
 0x782   : > { %4762 = vmatprep.subr.mxu1 %v4706_v40  ;;  %v4686_v40 = vld [vmem:[#allocation5 + $0xdc8] sm:$0xff] }
 0x783   : > { %4763 = vmatpush2.msra.mxu1 %v4705_v11  ;;  %v4685_v11 = vld [vmem:[#allocation5 + $0xdc0] sm:$0xff] }
 0x784   : > { %4764 = vmatprep.subr.mxu1 %v4704_v53  ;;  %v10173_v53 = vpop.f32.mrf.mxu1 }
 0x785   : > { %4765 = vmatpush2.msra.mxu1 %v4703_v41  ;;  %v10165_v42 = vpop.permute.xlu0 %3608 }
 0x786   : > { %v10159_v58 = vpop.permute.xlu1 %3855  ;;  %4766 = vmatprep.subr.mxu1 %v4702_v50  ;;  %v4684_v50 = vld [vmem:[#allocation5 + $0xd08] sm:$0xff] }
 0x787   : > { %4767 = vmatpush2.msra.mxu1 %v4701_v48  ;;  %v4683_v48 = vld [vmem:[#allocation5 + $0xd00] sm:$0xff] }
 0x788   : > { %4768 = vmatprep.subr.mxu1 %v4700_v23 }
 0x789   : > { %4769 = vmatpush2.msra.mxu1 %v4699_v20  ;;  %v10171_v7 = vpop.permute.xlu0 %3363  ;;  %v4682_v20 = vld [vmem:[#allocation5 + $0xc48] sm:$0xff] }
 0x78a   : > { %v10163_v27 = vpop.permute.xlu1 %3610  ;;  %4770 = vmatprep.subr.mxu1 %v4698_v35  ;;  %v4681_v35 = vld [vmem:[#allocation5 + $0xc40] sm:$0xff] }
 0x78b   : > { %4771 = vmatpush2.msra.mxu1 %v4697_v46  ;;  %v3119_v46 = vpop.f32.mrf.mxu1 }
 0x78c   : > { %4772 = vmatprep.subr.mxu1 %v4696_v61 }
 0x78d   : > { %4773 = vmatpush2.msra.mxu1 %v4695_v26  ;;  %v10177_v23 = vpop.permute.xlu0 %3857  ;;  %v10181_v26 = vpop.f32.mrf.mxu1 }
 0x78e   : > { %4774 = vmatprep.subr.mxu1 %v4694_v16  ;;  %v10169_v1 = vpop.permute.xlu1 %3365  ;;  %12152 = vst [vmem:[#allocation63_spill] sm:$0xff] %v10177_v23 }
 0x78f   : > { %4775 = vmatpush2.msra.mxu1 %v4693_v8  ;;  %v3125_v8 = vpop.f32.mrf.mxu1 }
 0x790   : > { %4776 = vmatprep.subr.mxu1 %v4692_v36 }
 0x791   : > { %4777 = vmatpush2.msra.mxu1 %v4691_v54  ;;  %v10183_v16 = vpop.permute.xlu0 %3612 }
 0x792   : > { %4778 = vmatprep.subr.mxu1 %v4690_v56  ;;  %v10175_v41 = vpop.permute.xlu1 %3859  ;;  %12154 = vst [vmem:[#allocation64_spill] sm:$0xff] %v10183_v16  ;;  %v10189_v56 = vpop.f32.mrf.mxu1 }
 0x793   : > { %4779 = vmatpush2.msra.mxu1 %v4689_v9  ;;  %12151 = vst [vmem:[#allocation72_spill] sm:$0xff] %v10175_v41 }
 0x794   : > { %4780 = vmatprep.subr.mxu1 %v4688_v17  ;;  %v10193_v17 = vpop.f32.mrf.mxu1 }
 0x795   : > { %4781 = vmatpush2.msra.mxu1 %v4687_v10  ;;  %v10187_v54 = vpop.permute.xlu0 %3367 }
 0x796   : > { %4782 = vmatprep.subr.mxu1 %v4686_v40  ;;  %v10179_v61 = vpop.permute.xlu1 %3614 }
 0x797   : > { %4783 = vmatpush2.msra.mxu1 %v4685_v11  ;;  %12153 = vst [vmem:[#allocation73_spill] sm:$0xff] %v10179_v61  ;;  %v10200_v11 = vsel %vm1239_vm1, %v10107_v4, %v10113_v2  ;;  %v3156_v61 = vmul.f32 %v3113_v3, %v9831_v12  ;;  %v10234_v3 = vld [vmem:[#allocation5 + $0xa60] sm:$0xff] }
 0x798   : > { %4784 = vmatprep.subr.mxu1 %v4684_v50  ;;  %12157 = vst [vmem:[#allocation66_spill] sm:$0xff] %v10200_v11  ;;  %v3154_v50 = vmul.f32 %v3107_v45, %v9812_v47  ;;  %v10223_v47 = vld [vmem:[#allocation5 + $0xbd8] sm:$0xff]  ;;  %12168 = vst [vmem:[#allocation84_spill] sm:$0xff] %v10234_v3 }
 0x799   : > { %4785 = vmatpush2.msra.mxu1 %v4683_v48  ;;  %v10195_v10 = vpop.permute.xlu0 %3861  ;;  %12164 = vst [vmem:[#allocation80_spill] sm:$0xff] %v10223_v47 }
 0x79a   : > { %4786 = vmatprep.subr.mxu1 %v4682_v20  ;;  %v10185_v36 = vpop.permute.xlu1 %3369  ;;  %12156 = vst [vmem:[#allocation74_spill] sm:$0xff] %v10195_v10  ;;  %v10215_v10 = vsel %vm1239_vm1, %v10123_v52, %v10129_v32 }
 0x79b   : > { %4787 = vmatpush2.msra.mxu1 %v4681_v35  ;;  %v10206_v35 = vpop.f32.mrf.mxu1  ;;  %12161 = vst [vmem:[#allocation68_spill] sm:$0xff] %v10215_v10 }
 0x79d   : > { %v10218_v23 = vpop.permute.xlu0 %3616 }
 0x79e   : > { %v10191_v9 = vpop.permute.xlu1 %3863  ;;  %12162 = vst [vmem:[#allocation75_spill] sm:$0xff] %v10218_v23  ;;  %v10256_v23 = vld [vmem:[#allocation5 + $0x998] sm:$0xff] }
 0x79f   : > { %12155 = vst [vmem:[#allocation65_spill] sm:$0xff] %v10191_v9  ;;  %12172 = vst [vmem:[#allocation86_spill] sm:$0xff] %v10256_v23 }
 0x7a2   : > { %v10208_v33 = vpop.permute.xlu1 %3618 }
 0x7a3   : > { %12159 = vst [vmem:[#allocation67_spill] sm:$0xff] %v10208_v33  ;;  %v10225_v33 = vld [vmem:[#allocation5 + $0xb20] sm:$0xff] }
 0x7a4   : > { %12165 = vst [vmem:[#allocation69_spill] sm:$0xff] %v10225_v33 }
 0x7b0   : > { %v3284_v40 = vpop.f32.mrf.mxu0 }
 0x7b1   : > { %v3419_v48 = vmul.f32 %v10200_v11, %v3284_v40  ;;  %v271_v11 = vld [vmem:[#allocation5 + $0xbe0] sm:$0xff] }
 0x7b2   : > { %v10204_v20 = vpop.f32.mrf.mxu0  ;;  %4853 = vmatprep.subr.mxu0 %v271_v11  ;;  %4998 = vmatprep.subr.mxu1 %v271_v11  ;;  %v3158_v11 = vmul.f32 %v3119_v46, %v9864_v0  ;;  %v10266_v46 = vld [vmem:[#allocation5 + $0x8d8] sm:$0xff] }
 0x7b3   : > { %12158 = vst [vmem:[#allocation71_spill] sm:$0xff] %v10204_v20  ;;  %v10210_v9 = vadd.f32 %v3419_v48, %v3154_v50  ;;  %v10227_v50 = vpop.f32.mrf.mxu1  ;;  %4854 = vmatpush1.msra.mxu0 %v10223_v47  ;;  %v10261_v20 = vld [vmem:[#allocation5 + $0x8e0] sm:$0xff]  ;;  %12176 = vst [vmem:[#allocation90_spill] sm:$0xff] %v10266_v46 }
 0x7b4   : > { %v3290_v16 = vpop.f32.mrf.mxu0  ;;  %4855 = vmatprep.subr.mxu0 %v10225_v33  ;;  %12174 = vst [vmem:[#allocation85_spill] sm:$0xff] %v10261_v20 }
 0x7b5   : > { %12160 = vst [vmem:[#allocation78_spill] sm:$0xff] %v10210_v9  ;;  %v3421_v45 = vmul.f32 %v10215_v10, %v3290_v16  ;;  %v10231_v9 = vld [vmem:[#allocation5 + $0xb18] sm:$0xff]  ;;  %v10236_v16 = vpop.permute.xlu1 %3373  ;;  %v10250_v47 = vpop.f32.mrf.mxu1 }
 0x7b6   : > { %v10221_v40 = vpop.f32.mrf.mxu0  ;;  %12167 = vst [vmem:[#allocation76_spill] sm:$0xff] %v10231_v9  ;;  %v10239_v10 = vld [vmem:[#allocation5 + $0xa58] sm:$0xff]  ;;  %4856 = vmatpush1.msra.mxu0 %v10231_v9 }
 0x7b7   : > { %12163 = vst [vmem:[#allocation36_spill] sm:$0xff] %v10221_v40  ;;  %v10229_v48 = vadd.f32 %v3421_v45, %v3156_v61  ;;  %12169 = vst [vmem:[#allocation77_spill] sm:$0xff] %v10239_v10  ;;  %v10244_v61 = vsel %vm1239_vm1, %v10143_v19, %v10145_v14  ;;  %v10247_v45 = vld [vmem:[#allocation5 + $0x9a0] sm:$0xff]  ;;  %4857 = vmatprep.subr.mxu0 %v10234_v3 }
 0x7b8   : > { %12170 = vst [vmem:[#allocation81_spill] sm:$0xff] %v10244_v61  ;;  %12171 = vst [vmem:[#allocation82_spill] sm:$0xff] %v10247_v45  ;;  %4858 = vmatpush1.msra.mxu0 %v10239_v10  ;;  %v10274_v3 = vld [vmem:[#allocation5 + $0x820] sm:$0xff]  ;;  %v3160_v10 = vmul.f32 %v3125_v8, %v9891_v63  ;;  %v10293_v8 = vld [vmem:[#allocation5 + $0x758] sm:$0xff] }
 0x7b9   : > { %12166 = vst [vmem:[#allocation79_spill] sm:$0xff] %v10229_v48  ;;  %v3296_v12 = vpop.f32.mrf.mxu0  ;;  %v10252_v48 = vpop.permute.xlu0 %3371  ;;  %4859 = vmatprep.subr.mxu0 %v10247_v45  ;;  %12178 = vst [vmem:[#allocation89_spill] sm:$0xff] %v10274_v3 }
 0x7ba   : > { %v3423_v33 = vmul.f32 %v10244_v61, %v3296_v12  ;;  %v10271_v12 = vsel %vm1239_vm1, %v10157_v49, %v10155_v24  ;;  %4860 = vmatpush1.msra.mxu0 %v10256_v23  ;;  %v3143_v61 = vpop.f32.mrf.mxu1  ;;  %12183 = vst [vmem:[#allocation97_spill] sm:$0xff] %v10293_v8 }
 0x7bb   : > { %v10258_v40 = vpop.f32.mrf.mxu0  ;;  %12177 = vst [vmem:[#allocation88_spill] sm:$0xff] %v10271_v12  ;;  %4861 = vmatprep.subr.mxu0 %v10261_v20  ;;  %v10301_v20 = vld [vmem:[#allocation5 + $0x6a0] sm:$0xff] }
 0x7bc   : > { %12173 = vst [vmem:[#allocation83_spill] sm:$0xff] %v10258_v40  ;;  %v10263_v9 = vadd.f32 %v3423_v33, %v3158_v11  ;;  %v10277_v40 = vpop.permute.xlu1 %3867  ;;  %v10281_v11 = vld [vmem:[#allocation5 + $0x818] sm:$0xff]  ;;  %4862 = vmatpush1.msra.mxu0 %v10266_v46  ;;  %12185 = vst [vmem:[#allocation33_spill] sm:$0xff] %v10301_v20  ;;  %v3162_v46 = vmul.f32 %v10193_v17, %v9923_v13 }
 0x7bd   : > { %v3302_v0 = vpop.f32.mrf.mxu0  ;;  %12179 = vst [vmem:[#allocation93_spill] sm:$0xff] %v10281_v11  ;;  %v10288_v23 = vpop.permute.xlu0 %3865  ;;  %4863 = vmatprep.subr.mxu0 %v10274_v3  ;;  %v10321_v17 = vld [vmem:[#allocation5 + $0x5d8] sm:$0xff] }
 0x7be   : > { %12175 = vst [vmem:[#allocation87_spill] sm:$0xff] %v10263_v9  ;;  %v3425_v33 = vmul.f32 %v10271_v12, %v3302_v0  ;;  %v10286_v9 = vld [vmem:[#allocation5 + $0x760] sm:$0xff]  ;;  %v10298_v0 = vsel %vm1239_vm1, %v10171_v7, %v10169_v1  ;;  %4864 = vmatpush1.msra.mxu0 %v10281_v11  ;;  %v10305_v12 = vpop.f32.mrf.mxu1  ;;  %12190 = vst [vmem:[#allocation48_spill] sm:$0xff] %v10321_v17 }
 0x7bf   : > { %v10283_v45 = vpop.f32.mrf.mxu0  ;;  %12181 = vst [vmem:[#allocation94_spill] sm:$0xff] %v10286_v9  ;;  %12184 = vst [vmem:[#allocation98_spill] sm:$0xff] %v10298_v0  ;;  %4865 = vmatprep.subr.mxu0 %v10286_v9  ;;  %v10329_v9 = vld [vmem:[#allocation5 + $0x520] sm:$0xff] }
 0x7c0   : > { %12180 = vst [vmem:[#allocation92_spill] sm:$0xff] %v10283_v45  ;;  %v10290_v41 = vadd.f32 %v3425_v33, %v3160_v10  ;;  %v10309_v33 = vld [vmem:[#allocation5 + $0x698] sm:$0xff]  ;;  %4866 = vmatpush1.msra.mxu0 %v10293_v8  ;;  %v10316_v11 = vpop.permute.xlu1 %3622  ;;  %12192 = vst [vmem:[#allocation50_spill] sm:$0xff] %v10329_v9  ;;  %v3164_v8 = vmul.f32 %v10227_v50, %v9961_v38 }
 0x7c1   : > { %v3308_v63 = vpop.f32.mrf.mxu0  ;;  %12186 = vst [vmem:[#allocation34_spill] sm:$0xff] %v10309_v33  ;;  %4867 = vmatprep.subr.mxu0 %v10301_v20  ;;  %v10337_v20 = vld [vmem:[#allocation5 + $0x518] sm:$0xff] }
 0x7c2   : > { %12182 = vst [vmem:[#allocation91_spill] sm:$0xff] %v10290_v41  ;;  %v3427_v10 = vmul.f32 %v10298_v0, %v3308_v63  ;;  %v10314_v41 = vld [vmem:[#allocation5 + $0x5e0] sm:$0xff]  ;;  %v10326_v63 = vsel %vm1239_vm1, %v10187_v54, %v10185_v36  ;;  %4868 = vmatpush1.msra.mxu0 %v10309_v33  ;;  %v3149_v0 = vpop.f32.mrf.mxu1  ;;  %12194 = vst [vmem:[#allocation52_spill] sm:$0xff] %v10337_v20  ;;  %v10347_v50 = vld [vmem:[#allocation5 + $0x458] sm:$0xff] }
 0x7c3   : > { %v10311_v3 = vpop.f32.mrf.mxu0  ;;  %12188 = vst [vmem:[#allocation47_spill] sm:$0xff] %v10314_v41  ;;  %12191 = vst [vmem:[#allocation49_spill] sm:$0xff] %v10326_v63  ;;  %4869 = vmatprep.subr.mxu0 %v10314_v41  ;;  %v10355_v41 = vld [vmem:[#allocation5 + $0x3a0] sm:$0xff] }
 0x7c4   : > { %12187 = vst [vmem:[#allocation59_spill] sm:$0xff] %v10311_v3  ;;  %v10318_v45 = vadd.f32 %v3427_v10, %v3162_v46  ;;  %v10333_v46 = vpop.permute.xlu0 %3620  ;;  %4870 = vmatpush1.msra.mxu0 %v10321_v17  ;;  %v10342_v3 = vld [vmem:[#allocation5 + $0x460] sm:$0xff]  ;;  %12198 = vst [vmem:[#allocation56_spill] sm:$0xff] %v10347_v50  ;;  %v3166_v17 = vmul.f32 %v3143_v61, %v12145_v44  ;;  %v10378_v44 = vld [vmem:[#allocation5 + $0x2d8] sm:$0xff] }
 0x7c5   : > { %12193 = vst [vmem:[#allocation51_spill] sm:$0xff] %v10333_v46  ;;  %12196 = vst [vmem:[#allocation54_spill] sm:$0xff] %v10342_v3  ;;  %4871 = vmatprep.subr.mxu0 %v10329_v9  ;;  %v10364_v9 = vld [vmem:[#allocation5 + $0x398] sm:$0xff] }
 0x7c6   : > { %12189 = vst [vmem:[#allocation31_spill] sm:$0xff] %v10318_v45  ;;  %v3314_v13 = vpop.f32.mrf.mxu0  ;;  %4872 = vmatpush1.msra.mxu0 %v10337_v20  ;;  %12200 = vst [vmem:[#allocation58_spill] sm:$0xff] %v10355_v41 }
 0x7c7   : > { %v3429_v10 = vmul.f32 %v10326_v63, %v3314_v13  ;;  %v10352_v13 = vsel %vm1239_vm1, %v10252_v48, %v10236_v16  ;;  %v10358_v63 = vpop.f32.mrf.mxu1  ;;  %4873 = vmatprep.subr.mxu0 %v10342_v3  ;;  %12201 = vst [vmem:[#allocation61_spill] sm:$0xff] %v10364_v9  ;;  %12206 = vst [vmem:[#allocation102_spill] sm:$0xff] %v10378_v44 }
 0x7c8   : > { %v10339_v45 = vpop.f32.mrf.mxu0  ;;  %12199 = vst [vmem:[#allocation57_spill] sm:$0xff] %v10352_v13  ;;  %4874 = vmatpush1.msra.mxu0 %v10347_v50  ;;  %v10371_v20 = vpop.permute.xlu0 %3375  ;;  %v10386_v50 = vld [vmem:[#allocation5 + $0x220] sm:$0xff] }
 0x7c9   : > { %12195 = vst [vmem:[#allocation53_spill] sm:$0xff] %v10339_v45  ;;  %v10344_v33 = vadd.f32 %v3429_v10, %v3164_v8  ;;  %v10360_v8 = vpop.permute.xlu1 %3377  ;;  %v10369_v45 = vld [vmem:[#allocation5 + $0x2e0] sm:$0xff]  ;;  %4875 = vmatprep.subr.mxu0 %v10355_v41  ;;  %12208 = vst [vmem:[#allocation104_spill] sm:$0xff] %v10386_v50  ;;  %v10393_v41 = vld [vmem:[#allocation5 + $0x218] sm:$0xff] }
 0x7ca   : > { %v3320_v38 = vpop.f32.mrf.mxu0  ;;  %12203 = vst [vmem:[#allocation99_spill] sm:$0xff] %v10369_v45  ;;  %v10383_v3 = vsel %vm1239_vm1, %v10371_v20, %v10360_v8  ;;  %4876 = vmatpush1.msra.mxu0 %v10364_v9  ;;  %12209 = vst [vmem:[#allocation105_spill] sm:$0xff] %v10393_v41 }
 0x7cb   : > { %12197 = vst [vmem:[#allocation55_spill] sm:$0xff] %v10344_v33  ;;  %v3431_v10 = vmul.f32 %v10352_v13, %v3320_v38  ;;  %12207 = vst [vmem:[#allocation103_spill] sm:$0xff] %v10383_v3  ;;  %v3168_v13 = vmul.f32 %v3149_v0, %v12148_v30  ;;  %4877 = vmatprep.subr.mxu0 %v10369_v45  ;;  %v10405_v0 = vld [vmem:[#allocation5 + $0x158] sm:$0xff]  ;;  %v10410_v45 = vld [vmem:[#allocation5 + $0xa0] sm:$0xff] }
 0x7cc   : > { %v10366_v33 = vpop.f32.mrf.mxu0  ;;  %4878 = vmatpush1.msra.mxu0 %v10378_v44  ;;  %12212 = vst [vmem:[#allocation108_spill] sm:$0xff] %v10405_v0  ;;  %12213 = vst [vmem:[#allocation109_spill] sm:$0xff] %v10410_v45  ;;  %v10415_v44 = vld [vmem:[#allocation5 + $0x98] sm:$0xff] }
 0x7cd   : > { %12202 = vst [vmem:[#allocation32_spill] sm:$0xff] %v10366_v33  ;;  %v10373_v46 = vadd.f32 %v3431_v10, %v3166_v17  ;;  %v10398_v33 = vld [vmem:[#allocation5 + $0x160] sm:$0xff]  ;;  %4879 = vmatprep.subr.mxu0 %v10386_v50  ;;  %12215 = vst [vmem:[#allocation111_spill] sm:$0xff] %v10415_v44  ;;  %v10425_v30 = vld [vmem:[#allocation5 + $0x17d8] sm:$0xff] }
 0x7ce   : > { %v10375_v61 = vpop.f32.mrf.mxu1  ;;  %v3326_v38 = vpop.f32.mrf.mxu0  ;;  %12210 = vst [vmem:[#allocation106_spill] sm:$0xff] %v10398_v33  ;;  %4880 = vmatpush1.msra.mxu0 %v10393_v41  ;;  %12218 = vst [vmem:[#allocation114_spill] sm:$0xff] %v10425_v30 }
 0x7cf   : > { %12204 = vst [vmem:[#allocation100_spill] sm:$0xff] %v10373_v46  ;;  %12205 = vst [vmem:[#allocation101_spill] sm:$0xff] %v10375_v61  ;;  %v3433_v17 = vmul.f32 %v10383_v3, %v3326_v38  ;;  %4881 = vmatprep.subr.mxu0 %v10398_v33 }
 0x7d0   : > { %v10390_v10 = vpop.f32.mrf.mxu1  ;;  %v10395_v46 = vpop.f32.mrf.mxu0  ;;  %4882 = vmatpush1.msra.mxu0 %v10405_v0 }
 0x7d1   : > { %v10400_v61 = vadd.f32 %v3433_v17, %v3168_v13  ;;  %v10420_v17 = vld [vmem:[#allocation5 + $0x17e0] sm:$0xff]  ;;  %4883 = vmatprep.subr.mxu0 %v10410_v45 }
 0x7d2   : > { %v10402_v9 = vpop.f32.mrf.mxu1  ;;  %v10407_v38 = vpop.f32.mrf.mxu0  ;;  %12217 = vst [vmem:[#allocation113_spill] sm:$0xff] %v10420_v17  ;;  %4884 = vmatpush1.msra.mxu0 %v10415_v44 }
 0x7d3   : > { %12211 = vst [vmem:[#allocation107_spill] sm:$0xff] %v10400_v61  ;;  %v10430_v61 = vld [vmem:[#allocation5 + $0x1720] sm:$0xff]  ;;  %4885 = vmatprep.subr.mxu0 %v10420_v17 }
 0x7d4   : > { %v10412_v3 = vpop.f32.mrf.mxu1  ;;  %v10417_v13 = vpop.f32.mrf.mxu0  ;;  %12220 = vst [vmem:[#allocation116_spill] sm:$0xff] %v10430_v61  ;;  %4886 = vmatpush2.msra.mxu0 %v10425_v30 }
 0x7d5   : > { %12214 = vst [vmem:[#allocation110_spill] sm:$0xff] %v10412_v3  ;;  %12216 = vst [vmem:[#allocation112_spill] sm:$0xff] %v10417_v13  ;;  %v10435_v13 = vld [vmem:[#allocation5 + $0x1718] sm:$0xff]  ;;  %v10440_v3 = vld [vmem:[#allocation5 + $0x1660] sm:$0xff]  ;;  %4887 = vmatprep.subr.mxu0 %v10430_v61 }
 0x7d6   : > { %v10422_v50 = vpop.f32.mrf.mxu1  ;;  %v10427_v41 = vpop.f32.mrf.mxu0  ;;  %12222 = vst [vmem:[#allocation118_spill] sm:$0xff] %v10435_v13  ;;  %12224 = vst [vmem:[#allocation120_spill] sm:$0xff] %v10440_v3  ;;  %4888 = vmatpush2.msra.mxu0 %v10435_v13 }
 0x7d7   : > { %12219 = vst [vmem:[#allocation115_spill] sm:$0xff] %v10427_v41  ;;  %v10445_v41 = vld [vmem:[#allocation5 + $0x1658] sm:$0xff]  ;;  %4889 = vmatprep.subr.mxu0 %v10440_v3 }
 0x7d8   : > { %v10432_v33 = vpop.f32.mrf.mxu1  ;;  %v10437_v0 = vpop.f32.mrf.mxu0  ;;  %12226 = vst [vmem:[#allocation122_spill] sm:$0xff] %v10445_v41  ;;  %4890 = vmatpush2.msra.mxu0 %v10445_v41 }
 0x7d9   : > { %12221 = vst [vmem:[#allocation117_spill] sm:$0xff] %v10432_v33  ;;  %12223 = vst [vmem:[#allocation119_spill] sm:$0xff] %v10437_v0  ;;  %v10450_v33 = vld [vmem:[#allocation5 + $0x15a0] sm:$0xff]  ;;  %v10455_v0 = vld [vmem:[#allocation5 + $0x1598] sm:$0xff] }
 0x7da   : > { %v10442_v45 = vpop.f32.mrf.mxu1  ;;  %v10447_v44 = vpop.f32.mrf.mxu0  ;;  %12228 = vst [vmem:[#allocation124_spill] sm:$0xff] %v10450_v33  ;;  %12230 = vst [vmem:[#allocation126_spill] sm:$0xff] %v10455_v0  ;;  %4891 = vmatprep.subr.mxu0 %v10450_v33 }
 0x7db   : > { %12225 = vst [vmem:[#allocation121_spill] sm:$0xff] %v10442_v45  ;;  %12227 = vst [vmem:[#allocation123_spill] sm:$0xff] %v10447_v44  ;;  %v10460_v45 = vld [vmem:[#allocation5 + $0x14e0] sm:$0xff]  ;;  %v10465_v44 = vld [vmem:[#allocation5 + $0x14d8] sm:$0xff]  ;;  %4892 = vmatpush2.msra.mxu0 %v10455_v0 }
 0x7dc   : > { %v10452_v17 = vpop.f32.mrf.mxu1  ;;  %v10457_v30 = vpop.f32.mrf.mxu0  ;;  %12232 = vst [vmem:[#allocation128_spill] sm:$0xff] %v10460_v45  ;;  %12234 = vst [vmem:[#allocation130_spill] sm:$0xff] %v10465_v44  ;;  %4893 = vmatprep.subr.mxu0 %v10460_v45 }
 0x7dd   : > { %12229 = vst [vmem:[#allocation125_spill] sm:$0xff] %v10452_v17  ;;  %12231 = vst [vmem:[#allocation127_spill] sm:$0xff] %v10457_v30  ;;  %v10470_v17 = vld [vmem:[#allocation5 + $0x1420] sm:$0xff]  ;;  %v10475_v30 = vld [vmem:[#allocation5 + $0x1418] sm:$0xff]  ;;  %4894 = vmatpush2.msra.mxu0 %v10465_v44 }
 0x7de   : > { %v10462_v61 = vpop.f32.mrf.mxu1  ;;  %v10467_v13 = vpop.f32.mrf.mxu0  ;;  %12236 = vst [vmem:[#allocation132_spill] sm:$0xff] %v10470_v17  ;;  %12238 = vst [vmem:[#allocation134_spill] sm:$0xff] %v10475_v30  ;;  %4895 = vmatprep.subr.mxu0 %v10470_v17 }
 0x7df   : > { %12233 = vst [vmem:[#allocation129_spill] sm:$0xff] %v10462_v61  ;;  %12235 = vst [vmem:[#allocation131_spill] sm:$0xff] %v10467_v13  ;;  %v10480_v61 = vld [vmem:[#allocation5 + $0x1360] sm:$0xff]  ;;  %v10485_v13 = vld [vmem:[#allocation5 + $0x1358] sm:$0xff]  ;;  %4896 = vmatpush2.msra.mxu0 %v10475_v30 }
 0x7e0   : > { %v10472_v3 = vpop.f32.mrf.mxu1  ;;  %v10477_v41 = vpop.f32.mrf.mxu0  ;;  %12240 = vst [vmem:[#allocation136_spill] sm:$0xff] %v10480_v61  ;;  %12242 = vst [vmem:[#allocation138_spill] sm:$0xff] %v10485_v13  ;;  %4897 = vmatprep.subr.mxu0 %v10480_v61 }
 0x7e1   : > { %12237 = vst [vmem:[#allocation133_spill] sm:$0xff] %v10472_v3  ;;  %12239 = vst [vmem:[#allocation135_spill] sm:$0xff] %v10477_v41  ;;  %v10490_v3 = vld [vmem:[#allocation5 + $0x12a0] sm:$0xff]  ;;  %v10495_v41 = vld [vmem:[#allocation5 + $0x1298] sm:$0xff]  ;;  %4898 = vmatpush2.msra.mxu0 %v10485_v13 }
 0x7e2   : > { %v10482_v33 = vpop.f32.mrf.mxu1  ;;  %v10487_v0 = vpop.f32.mrf.mxu0  ;;  %12244 = vst [vmem:[#allocation140_spill] sm:$0xff] %v10490_v3  ;;  %12246 = vst [vmem:[#allocation142_spill] sm:$0xff] %v10495_v41  ;;  %4899 = vmatprep.subr.mxu0 %v10490_v3 }
 0x7e3   : > { %12241 = vst [vmem:[#allocation137_spill] sm:$0xff] %v10482_v33  ;;  %12243 = vst [vmem:[#allocation139_spill] sm:$0xff] %v10487_v0  ;;  %v10500_v33 = vld [vmem:[#allocation5 + $0x11e0] sm:$0xff]  ;;  %v10505_v0 = vld [vmem:[#allocation5 + $0x11d8] sm:$0xff]  ;;  %4900 = vmatpush2.msra.mxu0 %v10495_v41 }
 0x7e4   : > { %v10492_v45 = vpop.f32.mrf.mxu1  ;;  %v10497_v44 = vpop.f32.mrf.mxu0  ;;  %12248 = vst [vmem:[#allocation144_spill] sm:$0xff] %v10500_v33  ;;  %12250 = vst [vmem:[#allocation146_spill] sm:$0xff] %v10505_v0  ;;  %4901 = vmatprep.subr.mxu0 %v10500_v33 }
 0x7e5   : > { %12245 = vst [vmem:[#allocation141_spill] sm:$0xff] %v10492_v45  ;;  %12247 = vst [vmem:[#allocation143_spill] sm:$0xff] %v10497_v44  ;;  %v10510_v45 = vld [vmem:[#allocation5 + $0x1120] sm:$0xff]  ;;  %v10515_v44 = vld [vmem:[#allocation5 + $0x1118] sm:$0xff]  ;;  %4902 = vmatpush2.msra.mxu0 %v10505_v0 }
 0x7e6   : > { %v10502_v17 = vpop.f32.mrf.mxu1  ;;  %v10507_v30 = vpop.f32.mrf.mxu0  ;;  %12252 = vst [vmem:[#allocation148_spill] sm:$0xff] %v10510_v45  ;;  %12254 = vst [vmem:[#allocation150_spill] sm:$0xff] %v10515_v44  ;;  %4903 = vmatprep.subr.mxu0 %v10510_v45 }
 0x7e7   : > { %12249 = vst [vmem:[#allocation145_spill] sm:$0xff] %v10502_v17  ;;  %12251 = vst [vmem:[#allocation147_spill] sm:$0xff] %v10507_v30  ;;  %v10520_v17 = vld [vmem:[#allocation5 + $0x1060] sm:$0xff]  ;;  %v10525_v30 = vld [vmem:[#allocation5 + $0x1058] sm:$0xff]  ;;  %4904 = vmatpush2.msra.mxu0 %v10515_v44  ;;  %v3155_v44 = vmul.f32 %v10167_v60, %v9823_v21  ;;  %v10572_v60 = vmul.f32 %v10250_v47, %v9977_v62  ;;  %v10594_v47 = vsel %vm1239_vm1, %v10113_v2, %v10107_v4 }
 0x7e8   : > { %v10512_v61 = vpop.f32.mrf.mxu1  ;;  %v10517_v13 = vpop.f32.mrf.mxu0  ;;  %12256 = vst [vmem:[#allocation152_spill] sm:$0xff] %v10520_v17  ;;  %12258 = vst [vmem:[#allocation154_spill] sm:$0xff] %v10525_v30  ;;  %4905 = vmatprep.subr.mxu0 %v10520_v17  ;;  %v10552_v17 = vmul.f32 %v10173_v53, %v9843_v51  ;;  %v10576_v53 = vmul.f32 %v10305_v12, %v10012_v18  ;;  %v10599_v12 = vsel %vm1239_vm1, %v10129_v32, %v10123_v52 }
 0x7e9   : > { %12253 = vst [vmem:[#allocation149_spill] sm:$0xff] %v10512_v61  ;;  %12255 = vst [vmem:[#allocation151_spill] sm:$0xff] %v10517_v13  ;;  %v10530_v61 = vld [vmem:[#allocation5 + $0xfa0] sm:$0xff]  ;;  %v10535_v13 = vld [vmem:[#allocation5 + $0xf98] sm:$0xff]  ;;  %4906 = vmatpush2.msra.mxu0 %v10525_v30  ;;  %v10556_v30 = vmul.f32 %v10181_v26, %v9875_v37  ;;  %v10580_v26 = vmul.f32 %v10358_v63, %v10049_v34  ;;  %v10604_v63 = vsel %vm1433_vm0, %v10121_v57, %v10115_v39 }
 0x7ea   : > { %v10522_v3 = vpop.f32.mrf.mxu1  ;;  %v10527_v41 = vpop.f32.mrf.mxu0  ;;  %12260 = vst [vmem:[#allocation156_spill] sm:$0xff] %v10530_v61  ;;  %12262 = vst [vmem:[#allocation158_spill] sm:$0xff] %v10535_v13  ;;  %4907 = vmatprep.subr.mxu0 %v10530_v61  ;;  %v10609_v34 = vsel %vm1433_vm0, %v10138_v29, %v10141_v15  ;;  %v10614_v4 = vsel %vm1627_vm2, %v10131_v25, %v10136_v5  ;;  %v10621_v52 = vsel %vm1433_vm0, %v10141_v15, %v10138_v29  ;;  %v12278_v37 = vld [vmem:[#allocation72_spill] sm:$0xff] }
 0x7eb   : > { %12257 = vst [vmem:[#allocation153_spill] sm:$0xff] %v10522_v3  ;;  %12259 = vst [vmem:[#allocation155_spill] sm:$0xff] %v10527_v41  ;;  %v10540_v3 = vpop.permute.xlu1 %3871  ;;  %4908 = vmatpush2.msra.mxu0 %v10535_v13  ;;  %v10562_v61 = vpop.permute.xlu0 %3869  ;;  %v10568_v13 = vmul.f32 %v10206_v35, %v9939_v22  ;;  %v10631_v32 = vsel %vm1433_vm0, %v10153_v43, %v10151_v55  ;;  %v10636_v18 = vsel %vm1627_vm2, %v10149_v59, %v10147_v6 }
 0x7ec   : > { %v10532_v33 = vpop.f32.mrf.mxu1  ;;  %v10537_v0 = vpop.f32.mrf.mxu0  ;;  %12269 = vst [vmem:[#allocation165_spill] sm:$0xff] %v10594_v47  ;;  %12270 = vst [vmem:[#allocation166_spill] sm:$0xff] %v10599_v12  ;;  %v10643_v29 = vsel %vm1239_vm1, %v10145_v14, %v10143_v19  ;;  %v10660_v22 = vsel %vm1239_vm1, %v10155_v24, %v10157_v49  ;;  %v10665_v19 = vsel %vm1433_vm0, %v10151_v55, %v10153_v43 }
 0x7ed   : > { %12261 = vst [vmem:[#allocation157_spill] sm:$0xff] %v10532_v33  ;;  %12263 = vst [vmem:[#allocation159_spill] sm:$0xff] %v10537_v0  ;;  %v10560_v0 = vmul.f32 %v10189_v56, %v9901_v31  ;;  %v10587_v31 = vsel %vm1433_vm0, %v10115_v39, %v10121_v57  ;;  %v10626_v39 = vsel %vm1627_vm2, %v10136_v5, %v10131_v25  ;;  %v12315_v33 = vld [vmem:[#allocation59_spill] sm:$0xff] }
 0x7ee   : > { %v10542_v45 = vpop.f32.mrf.mxu1  ;;  %v10545_v41 = vpop.f32.mrf.mxu0  ;;  %12272 = vst [vmem:[#allocation168_spill] sm:$0xff] %v10631_v32  ;;  %12273 = vst [vmem:[#allocation169_spill] sm:$0xff] %v10636_v18  ;;  %v10648_v25 = vsel %vm1627_vm2, %v10147_v6, %v10149_v59  ;;  %v10653_v5 = vsel %vm1627_vm2, %v10161_v28, %v10159_v58  ;;  %v10670_v14 = vsel %vm1627_vm2, %v10159_v58, %v10161_v28  ;;  %v12283_v58 = vld [vmem:[#allocation73_spill] sm:$0xff]  ;;  %v12284_v28 = vld [vmem:[#allocation64_spill] sm:$0xff] }
 0x7ef   : > { %12264 = vst [vmem:[#allocation160_spill] sm:$0xff] %v10542_v45  ;;  %12265 = vst [vmem:[#allocation161_spill] sm:$0xff] %v10545_v41  ;;  %v3627_v57 = vpop.permute.xlu1 %3626  ;;  %v3625_v6 = vpop.permute.xlu0 %3624  ;;  %v10675_v59 = vsel %vm1433_vm0, %v10165_v42, %v10163_v27  ;;  %v10687_v55 = vsel %vm1239_vm1, %v10169_v1, %v10171_v7  ;;  %v10692_v43 = vsel %vm1433_vm0, %v10163_v27, %v10165_v42  ;;  %v12289_v42 = vld [vmem:[#allocation65_spill] sm:$0xff]  ;;  %v12290_v7 = vld [vmem:[#allocation74_spill] sm:$0xff] }
 0x7f0   : > { %v10564_v41 = vpop.f32.mrf.mxu1  ;;  %v10582_v56 = vpop.f32.mrf.mxu0  ;;  %12275 = vst [vmem:[#allocation171_spill] sm:$0xff] %v10653_v5  ;;  %12277 = vst [vmem:[#allocation173_spill] sm:$0xff] %v10660_v22  ;;  %v10706_v1 = vsel %vm1433_vm0, %v12283_v58, %v12284_v28  ;;  %v12312_v45 = vld [vmem:[#allocation92_spill] sm:$0xff]  ;;  %v10788_v21 = vsel %vm1433_vm0, %v3625_v6, %v3627_v57 }
 0x7f1   : > { %12266 = vst [vmem:[#allocation162_spill] sm:$0xff] %v10564_v41  ;;  %12267 = vst [vmem:[#allocation163_spill] sm:$0xff] %v10582_v56  ;;  %v12292_v56 = vld [vmem:[#allocation36_spill] sm:$0xff] }
 0x7f2   : > { %v10589_v35 = vpop.f32.mrf.mxu1  ;;  %v10616_v2 = vpop.f32.mrf.mxu0  ;;  %12282 = vst [vmem:[#allocation174_spill] sm:$0xff] %v10687_v55  ;;  %12313 = vst [vmem:[#allocation92_spill] sm:$0xff] %v10788_v21 }
 0x7f3   : > { %12268 = vst [vmem:[#allocation164_spill] sm:$0xff] %v10589_v35  ;;  %12271 = vst [vmem:[#allocation167_spill] sm:$0xff] %v10616_v2  ;;  %v12286_v2 = vld [vmem:[#allocation71_spill] sm:$0xff] }
 0x7f4   : > { %v10638_v62 = vpop.f32.mrf.mxu1  ;;  %v10655_v15 = vpop.f32.mrf.mxu0  ;;  %v3420_v35 = vmul.f32 %v10594_v47, %v12286_v2  ;;  %12288 = vst [vmem:[#allocation71_spill] sm:$0xff] %v10706_v1  ;;  %v3422_v2 = vmul.f32 %v10599_v12, %v12292_v56  ;;  %v10740_v56 = vsel %vm1627_vm2, %v10288_v23, %v10277_v40 }
 0x7f5   : > { %12274 = vst [vmem:[#allocation170_spill] sm:$0xff] %v10638_v62  ;;  %12276 = vst [vmem:[#allocation172_spill] sm:$0xff] %v10655_v15  ;;  %v12279_v15 = vld [vmem:[#allocation63_spill] sm:$0xff]  ;;  %v10697_v62 = vsel %vm1433_vm0, %v12284_v28, %v12283_v58  ;;  %v10725_v58 = vsel %vm1239_vm1, %v10185_v36, %v10187_v54  ;;  %v10747_v36 = vsel %vm1239_vm1, %v10236_v16, %v10252_v48 }
 0x7f6   : > { %v10680_v24 = vsel %vm1627_vm2, %v12279_v15, %v12278_v37  ;;  %v10682_v49 = vpop.f32.mrf.mxu1  ;;  %12285 = vst [vmem:[#allocation73_spill] sm:$0xff] %v10697_v62  ;;  %v10701_v51 = vpop.f32.mrf.mxu0  ;;  %v10711_v27 = vsel %vm1627_vm2, %v12278_v37, %v12279_v15  ;;  %12294 = vst [vmem:[#allocation36_spill] sm:$0xff] %v10725_v58  ;;  %v10730_v37 = vsel %vm1627_vm2, %v12289_v42, %v12290_v7  ;;  %v12296_v15 = vld [vmem:[#allocation67_spill] sm:$0xff] }
 0x7f7   : > { %12280 = vst [vmem:[#allocation72_spill] sm:$0xff] %v10680_v24  ;;  %12281 = vst [vmem:[#allocation63_spill] sm:$0xff] %v10682_v49  ;;  %v10716_v49 = vsel %vm1627_vm2, %v12290_v7, %v12289_v42  ;;  %v12297_v28 = vld [vmem:[#allocation75_spill] sm:$0xff]  ;;  %v3876_v42 = vpop.permute.xlu1 %3875  ;;  %v10774_v16 = vsel %vm1627_vm2, %v10277_v40, %v10288_v23  ;;  %v3438_v23 = vadd.f32 %v3422_v2, %v10552_v17 }
 0x7f8   : > { %12287 = vst [vmem:[#allocation64_spill] sm:$0xff] %v10701_v51  ;;  %12291 = vst [vmem:[#allocation65_spill] sm:$0xff] %v10716_v49  ;;  %v10720_v47 = vpop.f32.mrf.mxu1  ;;  %v10735_v51 = vsel %vm1433_vm0, %v12297_v28, %v12296_v15  ;;  %v10752_v54 = vsel %vm1433_vm0, %v12296_v15, %v12297_v28  ;;  %v12303_v7 = vld [vmem:[#allocation51_spill] sm:$0xff]  ;;  %v10779_v15 = vsel %vm1627_vm2, %v10562_v61, %v10540_v3 }
 0x7f9   : > { %12293 = vst [vmem:[#allocation74_spill] sm:$0xff] %v10720_v47  ;;  %12295 = vst [vmem:[#allocation175_spill] sm:$0xff] %v10730_v37  ;;  %v10742_v47 = vpop.f32.mrf.mxu0  ;;  %v10757_v12 = vsel %vm1433_vm0, %v12303_v7, %v10316_v11  ;;  %v10769_v48 = vsel %vm1433_vm0, %v10316_v11, %v12303_v7  ;;  %v3436_v28 = vadd.f32 %v3420_v35, %v3155_v44  ;;  %v3874_v7 = vpop.permute.xlu0 %3873 }
 0x7fa   : > { %12298 = vst [vmem:[#allocation67_spill] sm:$0xff] %v10735_v51  ;;  %12299 = vst [vmem:[#allocation75_spill] sm:$0xff] %v10740_v56  ;;  %v10759_v41 = vpop.f32.mrf.mxu1  ;;  %v3426_v11 = vmul.f32 %v10660_v22, %v12312_v45  ;;  %v10798_v44 = vsel %vm1627_vm2, %v10540_v3, %v10562_v61  ;;  %v10803_v45 = vsel %vm1627_vm2, %v3874_v7, %v3876_v42 }
 0x7fb   : > { %12300 = vst [vmem:[#allocation176_spill] sm:$0xff] %v10742_v47  ;;  %12301 = vst [vmem:[#allocation177_spill] sm:$0xff] %v10747_v36  ;;  %v10764_v47 = vsel %vm1239_vm1, %v10360_v8, %v10371_v20  ;;  %v10783_v8 = vpop.f32.mrf.mxu0  ;;  %v10810_v2 = vsel %vm1433_vm0, %v3627_v57, %v3625_v6  ;;  %v3917_v57 = vmul.f32 %v10614_v4, %v10407_v38  ;;  %v12327_v38 = vld [vmem:[#allocation78_spill] sm:$0xff] }
 0x7fc   : > { %12302 = vst [vmem:[#allocation178_spill] sm:$0xff] %v10752_v54  ;;  %12304 = vst [vmem:[#allocation51_spill] sm:$0xff] %v10757_v12  ;;  %v10791_v40 = vpop.f32.mrf.mxu1  ;;  %v3434_v61 = vmul.f32 %v10764_v47, %v10395_v46  ;;  %v3672_v46 = vmul.f32 %v10631_v32, %v10422_v50  ;;  %v12330_v50 = vld [vmem:[#allocation117_spill] sm:$0xff] }
 0x7fd   : > { %12305 = vst [vmem:[#allocation179_spill] sm:$0xff] %v10759_v41  ;;  %12306 = vst [vmem:[#allocation180_spill] sm:$0xff] %v10764_v47  ;;  %v12310_v41 = vld [vmem:[#allocation83_spill] sm:$0xff]  ;;  %v10805_v22 = vpop.f32.mrf.mxu0  ;;  %v3673_v32 = vmul.f32 %v10665_v19, %v12330_v50 }
 0x7fe   : > { %12307 = vst [vmem:[#allocation181_spill] sm:$0xff] %v10769_v48  ;;  %12308 = vst [vmem:[#allocation182_spill] sm:$0xff] %v10774_v16  ;;  %v3424_v20 = vmul.f32 %v10643_v29, %v12310_v41  ;;  %v12317_v41 = vld [vmem:[#allocation101_spill] sm:$0xff] }
 0x7ff   : > { %12309 = vst [vmem:[#allocation183_spill] sm:$0xff] %v10779_v15  ;;  %12311 = vst [vmem:[#allocation83_spill] sm:$0xff] %v10783_v8  ;;  %v3428_v15 = vmul.f32 %v10687_v55, %v12315_v33  ;;  %v3668_v35 = vmul.f32 %v10587_v31, %v12317_v41  ;;  %v12319_v8 = vld [vmem:[#allocation53_spill] sm:$0xff]  ;;  %v10812_v33 = vpop.f32.mrf.mxu1  ;;  %v12322_v55 = vld [vmem:[#allocation32_spill] sm:$0xff]  ;;  %v3669_v41 = vmul.f32 %v10604_v63, %v10390_v10 }
 0x800   : > { %12314 = vst [vmem:[#allocation184_spill] sm:$0xff] %v10791_v40  ;;  %12316 = vst [vmem:[#allocation59_spill] sm:$0xff] %v10798_v44  ;;  %v3430_v17 = vmul.f32 %v10725_v58, %v12319_v8  ;;  %v3432_v3 = vmul.f32 %v10747_v36, %v12322_v55  ;;  %v10821_v40 = vsel %vm1627_vm2, %v3876_v42, %v3874_v7  ;;  %v10829_v55 = vpop.f32.mrf.mxu0  ;;  %v12325_v42 = vld [vmem:[#allocation110_spill] sm:$0xff] }
 0x801   : > { %12318 = vst [vmem:[#allocation101_spill] sm:$0xff] %v10803_v45  ;;  %12320 = vst [vmem:[#allocation53_spill] sm:$0xff] %v10810_v2  ;;  %v3670_v8 = vmul.f32 %v10609_v34, %v10402_v9  ;;  %v3440_v6 = vadd.f32 %v3424_v20, %v10556_v30  ;;  %v3442_v58 = vadd.f32 %v3426_v11, %v10560_v0  ;;  %v10833_v47 = vpop.f32.mrf.mxu1  ;;  %v12326_v9 = vld [vmem:[#allocation112_spill] sm:$0xff]  ;;  %v12328_v30 = vld [vmem:[#allocation115_spill] sm:$0xff] }
 0x802   : > { %12321 = vst [vmem:[#allocation185_spill] sm:$0xff] %v10812_v33  ;;  %12323 = vst [vmem:[#allocation32_spill] sm:$0xff] %v10821_v40  ;;  %v3444_v10 = vadd.f32 %v3428_v15, %v10568_v13  ;;  %v3671_v7 = vmul.f32 %v10621_v52, %v12325_v42  ;;  %v3918_v36 = vmul.f32 %v10626_v39, %v12326_v9  ;;  %v10843_v20 = vpop.f32.mrf.mxu0  ;;  %v12332_v9 = vld [vmem:[#allocation119_spill] sm:$0xff] }
 0x803   : > { %12324 = vst [vmem:[#allocation186_spill] sm:$0xff] %v10833_v47  ;;  %v3684_v33 = vadd.f32 %v3668_v35, %v12327_v38  ;;  %v3919_v0 = vmul.f32 %v10636_v18, %v12328_v30  ;;  %12329 = vst [vmem:[#allocation110_spill] sm:$0xff] %v10843_v20  ;;  %v3446_v11 = vadd.f32 %v3430_v17, %v10572_v60  ;;  %v10848_v47 = vpop.f32.mrf.mxu1  ;;  %v12333_v38 = vld [vmem:[#allocation79_spill] sm:$0xff]  ;;  %v12334_v20 = vld [vmem:[#allocation121_spill] sm:$0xff] }
 0x804   : > { %12331 = vst [vmem:[#allocation112_spill] sm:$0xff] %v10848_v47  ;;  %v3448_v13 = vadd.f32 %v3432_v3, %v10576_v53  ;;  %v10852_v15 = vadd.f32 %v3434_v61, %v10580_v26  ;;  %v3685_v42 = vadd.f32 %v3669_v41, %v3436_v28  ;;  %v3920_v35 = vmul.f32 %v10648_v25, %v12332_v9  ;;  %v12335_v17 = vld [vmem:[#allocation123_spill] sm:$0xff]  ;;  %v10863_v47 = vpop.f32.mrf.mxu0  ;;  %v12337_v41 = vld [vmem:[#allocation125_spill] sm:$0xff] }
 0x805   : > { %v3686_v30 = vadd.f32 %v3670_v8, %v12333_v38  ;;  %v10857_v18 = vadd.f32 %v3917_v57, %v3684_v33  ;;  %v3674_v60 = vmul.f32 %v10675_v59, %v12334_v20  ;;  %v3921_v50 = vmul.f32 %v10653_v5, %v12335_v17  ;;  %v12336_v53 = vld [vmem:[#allocation87_spill] sm:$0xff]  ;;  %v10866_v26 = vpop.f32.mrf.mxu1  ;;  %v12338_v57 = vld [vmem:[#allocation129_spill] sm:$0xff] }
 0x806   : > { %v3688_v3 = vadd.f32 %v3672_v46, %v12336_v53  ;;  %v3687_v28 = vadd.f32 %v3671_v7, %v3438_v23  ;;  %v10868_v61 = vadd.f32 %v3918_v36, %v3685_v42  ;;  %v3675_v8 = vmul.f32 %v10692_v43, %v12337_v41  ;;  %v10876_v9 = vpop.f32.mrf.mxu0  ;;  %v12339_v17 = vld [vmem:[#allocation127_spill] sm:$0xff]  ;;  %v12342_v7 = vld [vmem:[#allocation133_spill] sm:$0xff] }
 0x807   : > { %v10872_v33 = vadd.f32 %v3919_v0, %v3686_v30  ;;  %v3676_v20 = vmul.f32 %v10697_v62, %v12338_v57  ;;  %v3689_v38 = vadd.f32 %v3673_v32, %v3440_v6  ;;  %v3922_v5 = vmul.f32 %v10670_v14, %v12339_v17  ;;  %v12340_v46 = vld [vmem:[#allocation131_spill] sm:$0xff]  ;;  %v10882_v23 = vpop.f32.mrf.mxu1  ;;  %v12345_v32 = vld [vmem:[#allocation137_spill] sm:$0xff] }
 0x808   : > { %v3923_v53 = vmul.f32 %v10680_v24, %v12340_v46  ;;  %12341 = vst [vmem:[#allocation78_spill] sm:$0xff] %v10882_v23  ;;  %v10884_v36 = vadd.f32 %v3920_v35, %v3687_v28  ;;  %v3677_v0 = vmul.f32 %v10706_v1, %v12342_v7  ;;  %v12343_v42 = vld [vmem:[#allocation135_spill] sm:$0xff]  ;;  %v10891_v62 = vadd.f32 %v3921_v50, %v3688_v3  ;;  %v10897_v24 = vpop.f32.mrf.mxu0  ;;  %v12348_v35 = vld [vmem:[#allocation145_spill] sm:$0xff] }
 0x809   : > { %v3924_v30 = vmul.f32 %v10711_v27, %v12343_v42  ;;  %v12344_v41 = vld [vmem:[#allocation91_spill] sm:$0xff]  ;;  %v3678_v6 = vmul.f32 %v10735_v51, %v12345_v32  ;;  %12347 = vst [vmem:[#allocation115_spill] sm:$0xff] %v10897_v24  ;;  %v3680_v28 = vmul.f32 %v10757_v12, %v12348_v35  ;;  %v10901_v23 = vpop.f32.mrf.mxu1  ;;  %v3691_v7 = vadd.f32 %v3675_v8, %v3442_v58  ;;  %v12349_v1 = vld [vmem:[#allocation141_spill] sm:$0xff] }
 0x80a   : > { %v3690_v57 = vadd.f32 %v3674_v60, %v12344_v41  ;;  %v12346_v17 = vld [vmem:[#allocation139_spill] sm:$0xff]  ;;  %v3679_v42 = vmul.f32 %v10752_v54, %v12349_v1  ;;  %v12353_v24 = vld [vmem:[#allocation149_spill] sm:$0xff]  ;;  %v3693_v8 = vadd.f32 %v3677_v0, %v3444_v10 }
 0x80b   : > { %v3925_v46 = vmul.f32 %v10716_v49, %v12346_v17  ;;  %v12350_v60 = vld [vmem:[#allocation143_spill] sm:$0xff]  ;;  %v10910_v17 = vpop.f32.mrf.mxu0  ;;  %v3938_v49 = vadd.f32 %v3922_v5, %v3689_v38  ;;  %v3681_v35 = vmul.f32 %v10769_v48, %v12353_v24  ;;  %v10916_v58 = vpop.f32.mrf.mxu1  ;;  %v10918_v1 = vadd.f32 %v3924_v30, %v3691_v7  ;;  %v12364_v7 = vld [vmem:[#allocation41_spill] sm:$0xff] }
 0x80c   : > { %v3926_v50 = vmul.f32 %v10730_v37, %v12350_v60  ;;  %v12351_v3 = vld [vmem:[#allocation31_spill] sm:$0xff]  ;;  %v10914_v12 = vadd.f32 %v3923_v53, %v3690_v57  ;;  %12354 = vst [vmem:[#allocation117_spill] sm:$0xff] %v10916_v58  ;;  %v12361_v57 = vld [vmem:[#allocation100_spill] sm:$0xff]  ;;  %v3695_v0 = vadd.f32 %v3679_v42, %v3446_v11  ;;  %v12370_v42 = vld [vmem:[#allocation162_spill] sm:$0xff] }
 0x80d   : > { %v3692_v41 = vadd.f32 %v3676_v20, %v12351_v3  ;;  %v12352_v32 = vld [vmem:[#allocation147_spill] sm:$0xff]  ;;  %v10929_v53 = vpop.f32.mrf.mxu0  ;;  %v3696_v48 = vadd.f32 %v3680_v28, %v12361_v57  ;;  %v10932_v10 = vpop.f32.mrf.mxu1  ;;  %v12368_v28 = vld [vmem:[#allocation161_spill] sm:$0xff] }
 0x80e   : > { %v3927_v51 = vmul.f32 %v10740_v56, %v12352_v32  ;;  %v12355_v54 = vld [vmem:[#allocation151_spill] sm:$0xff]  ;;  %v12357_v32 = vld [vmem:[#allocation153_spill] sm:$0xff]  ;;  %12360 = vst [vmem:[#allocation119_spill] sm:$0xff] %v10929_v53  ;;  %12362 = vst [vmem:[#allocation79_spill] sm:$0xff] %v10932_v10  ;;  %v10934_v30 = vadd.f32 %v3926_v50, %v3693_v8  ;;  %v3931_v57 = vmul.f32 %v10803_v45, %v12368_v28 }
 0x80f   : > { %v3928_v60 = vmul.f32 %v10774_v16, %v12355_v54  ;;  %v12356_v20 = vld [vmem:[#allocation55_spill] sm:$0xff]  ;;  %v10923_v37 = vadd.f32 %v3925_v46, %v3692_v41  ;;  %v3682_v5 = vmul.f32 %v10788_v21, %v12357_v32  ;;  %v12363_v54 = vld [vmem:[#allocation157_spill] sm:$0xff]  ;;  %v12365_v41 = vld [vmem:[#allocation160_spill] sm:$0xff]  ;;  %v10942_v32 = vpop.f32.mrf.mxu0  ;;  %v4393_v8 = vpop.f32.mrf.mxu1 }
 0x810   : > { %v3694_v3 = vadd.f32 %v3678_v6, %v12356_v20  ;;  %v12358_v38 = vld [vmem:[#allocation155_spill] sm:$0xff]  ;;  %v3683_v6 = vmul.f32 %v10810_v2, %v12363_v54  ;;  %v4086_v20 = vmul.f32 %v12365_v41, %v12364_v7  ;;  %12366 = vst [vmem:[#allocation121_spill] sm:$0xff] %v10942_v32  ;;  %v12378_v45 = vld [vmem:[#allocation70_spill] sm:$0xff] }
 0x811   : > { %v12359_v56 = vld [vmem:[#allocation183_spill] sm:$0xff]  ;;  %v10950_v58 = vadd.f32 %v3928_v60, %v3695_v0  ;;  %v10961_v28 = vpop.f32.mrf.mxu0  ;;  %v12380_v60 = vld [vmem:[#allocation66_spill] sm:$0xff]  ;;  %v12381_v0 = vld [vmem:[#allocation172_spill] sm:$0xff] }
 0x812   : > { %v3929_v24 = vmul.f32 %v12359_v56, %v12358_v38  ;;  %v10938_v46 = vadd.f32 %v3927_v51, %v3694_v3  ;;  %v3697_v38 = vadd.f32 %v3681_v35, %v3448_v13  ;;  %v12367_v56 = vld [vmem:[#allocation159_spill] sm:$0xff]  ;;  %v12374_v35 = vld [vmem:[#allocation164_spill] sm:$0xff]  ;;  %12377 = vst [vmem:[#allocation123_spill] sm:$0xff] %v10961_v28  ;;  %v4264_v10 = vmul.f32 %v12381_v0, %v12380_v60 }
 0x813   : > { %v3930_v21 = vmul.f32 %v10798_v44, %v12367_v56  ;;  %v12369_v11 = vld [vmem:[#allocation35_spill] sm:$0xff]  ;;  %v12375_v56 = vld [vmem:[#allocation165_spill] sm:$0xff]  ;;  %v10975_v53 = vpop.f32.mrf.mxu0 }
 0x814   : > { %v4087_v50 = vmul.f32 %v12370_v42, %v12369_v11  ;;  %v12371_v51 = vld [vmem:[#allocation163_spill] sm:$0xff]  ;;  %v10955_v41 = vadd.f32 %v3929_v24, %v3696_v48  ;;  %v12379_v11 = vld [vmem:[#allocation170_spill] sm:$0xff]  ;;  %v3699_v48 = vadd.f32 %v3683_v6, %v10852_v15  ;;  %v4102_v24 = vadd.f32 %v4086_v20, %v10857_v18  ;;  %v12388_v20 = vld [vmem:[#allocation68_spill] sm:$0xff] }
 0x815   : > { %v3932_v3 = vmul.f32 %v10821_v40, %v12371_v51  ;;  %v12372_v54 = vld [vmem:[#allocation107_spill] sm:$0xff]  ;;  %v4089_v42 = vmul.f32 %v12379_v11, %v12378_v45  ;;  %v10977_v45 = vadd.f32 %v3930_v21, %v3697_v38  ;;  %v12390_v38 = vld [vmem:[#allocation96_spill] sm:$0xff] }
 0x816   : > { %v3698_v7 = vadd.f32 %v3682_v5, %v12372_v54  ;;  %v12373_v13 = vld [vmem:[#allocation43_spill] sm:$0xff]  ;;  %v4395_v5 = vpop.f32.mrf.mxu1  ;;  %v12384_v54 = vld [vmem:[#allocation166_spill] sm:$0xff]  ;;  %v4103_v0 = vadd.f32 %v4087_v50, %v10868_v61 }
 0x817   : > { %v4088_v2 = vmul.f32 %v12374_v35, %v12373_v13  ;;  %v12376_v44 = vld [vmem:[#allocation167_spill] sm:$0xff]  ;;  %v12385_v13 = vld [vmem:[#allocation64_spill] sm:$0xff]  ;;  %v4441_v60 = vmul.f32 %v4395_v5, %v10587_v31  ;;  %v10983_v15 = vadd.f32 %v3932_v3, %v3699_v48  ;;  %v4105_v61 = vadd.f32 %v4089_v42, %v10884_v36 }
 0x818   : > { %v4263_v16 = vmul.f32 %v12376_v44, %v12375_v56  ;;  %v12382_v32 = vld [vmem:[#allocation95_spill] sm:$0xff]  ;;  %v4265_v35 = vmul.f32 %v12385_v13, %v12384_v54  ;;  %v12386_v44 = vld [vmem:[#allocation42_spill] sm:$0xff]  ;;  %v10979_v11 = vadd.f32 %v3931_v57, %v3698_v7  ;;  %v4440_v13 = vmul.f32 %v4393_v8, %v10604_v63  ;;  %v12394_v63 = vld [vmem:[#allocation184_spill] sm:$0xff] }
 0x819   : > { %v12383_v51 = vld [vmem:[#allocation63_spill] sm:$0xff]  ;;  %v12387_v56 = vld [vmem:[#allocation74_spill] sm:$0xff]  ;;  %v4104_v18 = vadd.f32 %v4088_v2, %v10872_v33  ;;  %v4280_v5 = vadd.f32 %v4264_v10, %v4103_v0  ;;  %v12395_v10 = vld [vmem:[#allocation81_spill] sm:$0xff] }
 0x81a   : > { %v4090_v40 = vmul.f32 %v12383_v51, %v12382_v32  ;;  %v4091_v28 = vmul.f32 %v12387_v56, %v12386_v44  ;;  %v4399_v32 = vpop.f32.mrf.mxu1  ;;  %v4279_v6 = vadd.f32 %v4263_v16, %v4102_v24  ;;  %v12389_v51 = vld [vmem:[#allocation176_spill] sm:$0xff]  ;;  %v4570_v44 = vpop.f32.mrf.mxu0  ;;  %v12391_v57 = vld [vmem:[#allocation179_spill] sm:$0xff]  ;;  %v12393_v24 = vld [vmem:[#allocation38_spill] sm:$0xff]  ;;  %v4268_v36 = vmul.f32 %v10805_v22, %v12395_v10 }
 0x81b   : > { %v4266_v54 = vmul.f32 %v12389_v51, %v12388_v20  ;;  %v4092_v7 = vmul.f32 %v12391_v57, %v12390_v38  ;;  %v4281_v50 = vadd.f32 %v4265_v35, %v4104_v18  ;;  %v12392_v3 = vld [vmem:[#allocation83_spill] sm:$0xff]  ;;  %v4617_v16 = vmul.f32 %v4570_v44, %v10626_v39  ;;  %v12398_v51 = vld [vmem:[#allocation173_spill] sm:$0xff]  ;;  %v12399_v38 = vld [vmem:[#allocation44_spill] sm:$0xff] }
 0x81c   : > { %v4106_v21 = vadd.f32 %v4090_v40, %v10891_v62  ;;  %v4401_v31 = vpop.f32.mrf.mxu1  ;;  %v4267_v2 = vmul.f32 %v12392_v3, %v10643_v29  ;;  %v4572_v33 = vpop.f32.mrf.mxu0  ;;  %v4107_v48 = vadd.f32 %v4091_v28, %v3938_v49  ;;  %v4093_v8 = vmul.f32 %v12394_v63, %v12393_v24  ;;  %v12396_v49 = vld [vmem:[#allocation37_spill] sm:$0xff]  ;;  %v12400_v57 = vld [vmem:[#allocation186_spill] sm:$0xff] }
 0x81d   : > { %v4443_v62 = vmul.f32 %v4401_v31, %v10609_v34  ;;  %v4457_v40 = vadd.f32 %v4441_v60, %v4280_v5  ;;  %v4618_v56 = vmul.f32 %v4572_v33, %v10614_v4  ;;  %v4456_v42 = vadd.f32 %v4440_v13, %v4279_v6  ;;  %v12397_v28 = vld [vmem:[#allocation185_spill] sm:$0xff]  ;;  %v12404_v3 = vld [vmem:[#allocation110_spill] sm:$0xff] }
 0x81e   : > { %v4405_v20 = vpop.f32.mrf.mxu1  ;;  %v4442_v35 = vmul.f32 %v4399_v32, %v10621_v52  ;;  %v4576_v29 = vpop.f32.mrf.mxu0  ;;  %v4282_v0 = vadd.f32 %v4266_v54, %v4105_v61  ;;  %v4108_v39 = vadd.f32 %v4092_v7, %v10914_v12  ;;  %v4094_v18 = vmul.f32 %v12397_v28, %v12396_v49  ;;  %v12401_v32 = vld [vmem:[#allocation168_spill] sm:$0xff]  ;;  %v12402_v12 = vld [vmem:[#allocation169_spill] sm:$0xff] }
 0x81f   : > { %v4269_v34 = vmul.f32 %v10829_v55, %v12398_v51  ;;  %v4634_v60 = vadd.f32 %v4618_v56, %v4457_v40  ;;  %v4283_v4 = vadd.f32 %v4267_v2, %v4106_v21  ;;  %v4095_v31 = vmul.f32 %v12400_v57, %v12399_v38  ;;  %v12403_v55 = vld [vmem:[#allocation88_spill] sm:$0xff] }
 0x820   : > { %v4407_v44 = vpop.f32.mrf.mxu1  ;;  %v4633_v22 = vadd.f32 %v4617_v16, %v4456_v42  ;;  %v4619_v6 = vmul.f32 %v4576_v29, %v10648_v25  ;;  %v4578_v52 = vpop.f32.mrf.mxu0  ;;  %v4459_v13 = vadd.f32 %v4443_v62, %v4282_v0  ;;  %v4109_v61 = vadd.f32 %v4093_v8, %v10918_v1  ;;  %v12405_v40 = vld [vmem:[#allocation40_spill] sm:$0xff]  ;;  %v12408_v1 = vld [vmem:[#allocation174_spill] sm:$0xff] }
 0x821   : > { %v4445_v54 = vmul.f32 %v4407_v44, %v12401_v32  ;;  %v4620_v7 = vmul.f32 %v4578_v52, %v12402_v12  ;;  %4788 = vmatprep.mubr.f32.mxu1 %v4634_v60  ;;  %v4270_v33 = vmul.f32 %v12404_v3, %v12403_v55  ;;  %v4458_v21 = vadd.f32 %v4442_v35, %v4281_v50  ;;  %v12406_v62 = vld [vmem:[#allocation112_spill] sm:$0xff]  ;;  %v12410_v35 = vld [vmem:[#allocation171_spill] sm:$0xff]  ;;  %v12413_v60 = vld [vmem:[#allocation45_spill] sm:$0xff] }
 0x822   : > { %v4411_v5 = vpop.f32.mrf.mxu1  ;;  %v4444_v2 = vmul.f32 %v4405_v20, %v10665_v19  ;;  %v4582_v24 = vpop.f32.mrf.mxu0  ;;  %4789 = vmatmul.mubr.f32.vlgmr.msra.gmra.mxu1 %v4633_v22  ;;  %v4284_v16 = vadd.f32 %v4268_v36, %v4107_v48  ;;  %v4110_v25 = vadd.f32 %v4094_v18, %v10923_v37  ;;  %v4285_v63 = vadd.f32 %v4269_v34, %v4108_v39  ;;  %v12407_v29 = vld [vmem:[#allocation80_spill] sm:$0xff]  ;;  %v12409_v48 = vld [vmem:[#allocation69_spill] sm:$0xff]  ;;  %v12414_v44 = vld [vmem:[#allocation98_spill] sm:$0xff] }
 0x823   : > { %v4096_v56 = vmul.f32 %v12406_v62, %v12405_v40  ;;  %v4636_v10 = vadd.f32 %v4620_v7, %v4459_v13  ;;  %4999 = vmatpush1.msra.mxu1 %v12407_v29  ;;  %v4271_v8 = vmul.f32 %v10863_v47, %v12408_v1  ;;  %v4635_v0 = vadd.f32 %v4619_v6, %v4458_v21  ;;  %v12411_v28 = vld [vmem:[#allocation76_spill] sm:$0xff]  ;;  %v12415_v22 = vld [vmem:[#allocation77_spill] sm:$0xff]  ;;  %v12416_v6 = vld [vmem:[#allocation46_spill] sm:$0xff] }
 0x824   : > { %v4413_v42 = vpop.f32.mrf.mxu1  ;;  %v4621_v50 = vmul.f32 %v4582_v24, %v10670_v14  ;;  %v4584_v19 = vpop.f32.mrf.mxu0  ;;  %v4111_v20 = vadd.f32 %v4095_v31, %v10934_v30  ;;  %5000 = vmatprep.subr.mxu1 %v12409_v48  ;;  %v4461_v36 = vadd.f32 %v4445_v54, %v4284_v16  ;;  %v4460_v18 = vadd.f32 %v4444_v2, %v4283_v4  ;;  %v12412_v34 = vld [vmem:[#allocation84_spill] sm:$0xff]  ;;  %v12418_v12 = vld [vmem:[#allocation82_spill] sm:$0xff]  ;;  %v12424_v24 = vld [vmem:[#allocation71_spill] sm:$0xff] }
 0x825   : > { %v4447_v37 = vmul.f32 %v4413_v42, %v10675_v59  ;;  %v4622_v39 = vmul.f32 %v4584_v19, %v12410_v35  ;;  %4794 = vmatprep.mubr.f32.mxu1 %v4636_v10  ;;  %5001 = vmatpush1.msra.mxu1 %v12411_v28  ;;  %v4446_v47 = vmul.f32 %v4411_v5, %v10692_v43  ;;  %v12417_v43 = vld [vmem:[#allocation78_spill] sm:$0xff]  ;;  %v12420_v5 = vld [vmem:[#allocation72_spill] sm:$0xff]  ;;  %v12426_v40 = vld [vmem:[#allocation49_spill] sm:$0xff] }
 0x826   : > { %v4417_v49 = vpop.f32.mrf.mxu1  ;;  %v4588_v51 = vpop.f32.mrf.mxu0  ;;  %4795 = vmatmul.mubr.f32.gmra.mxu1 %v4635_v0  ;;  %v4286_v14 = vadd.f32 %v4270_v33, %v4109_v61  ;;  %5002 = vmatprep.subr.mxu1 %v12412_v34  ;;  %v4112_v30 = vadd.f32 %v4096_v56, %v10938_v46  ;;  %v4097_v59 = vmul.f32 %v10866_v26, %v12413_v60  ;;  %v12419_v46 = vld [vmem:[#allocation73_spill] sm:$0xff]  ;;  %v12421_v55 = vld [vmem:[#allocation86_spill] sm:$0xff]  ;;  %v12422_v3 = vld [vmem:[#allocation36_spill] sm:$0xff] }
 0x827   : > { %v4272_v38 = vmul.f32 %v10876_v9, %v12414_v44  ;;  %v4638_v57 = vadd.f32 %v4622_v39, %v4461_v36  ;;  %5003 = vmatpush1.msra.mxu1 %v12415_v22  ;;  %v4287_v4 = vadd.f32 %v4271_v8, %v4110_v25  ;;  %v4098_v52 = vmul.f32 %v12417_v43, %v12416_v6  ;;  %v12423_v33 = vld [vmem:[#allocation115_spill] sm:$0xff]  ;;  %v12427_v1 = vld [vmem:[#allocation90_spill] sm:$0xff]  ;;  %v12428_v0 = vld [vmem:[#allocation60_spill] sm:$0xff] }
 0x828   : > { %v4419_v31 = vpop.f32.mrf.mxu1  ;;  %v4637_v32 = vadd.f32 %v4621_v50, %v4460_v18  ;;  %v4623_v54 = vmul.f32 %v4588_v51, %v10711_v27  ;;  %v4590_v13 = vpop.f32.mrf.mxu0  ;;  %5004 = vmatprep.subr.mxu1 %v12418_v12  ;;  %v4463_v26 = vadd.f32 %v4447_v37, %v4286_v14  ;;  %v4273_v21 = vmul.f32 %v12423_v33, %v12422_v3  ;;  %v12425_v27 = vld [vmem:[#allocation85_spill] sm:$0xff]  ;;  %v12429_v19 = vld [vmem:[#allocation175_spill] sm:$0xff]  ;;  %v12435_v14 = vld [vmem:[#allocation94_spill] sm:$0xff] }
 0x829   : > { %v4449_v7 = vmul.f32 %v4419_v31, %v12419_v46  ;;  %v4624_v61 = vmul.f32 %v4590_v13, %v12420_v5  ;;  %4800 = vmatprep.mubr.f32.mxu1 %v4638_v57  ;;  %5005 = vmatpush1.msra.mxu1 %v12421_v55  ;;  %v4462_v2 = vadd.f32 %v4446_v47, %v4285_v63  ;;  %v12430_v36 = vld [vmem:[#allocation89_spill] sm:$0xff]  ;;  %v12431_v35 = vld [vmem:[#allocation67_spill] sm:$0xff]  ;;  %v12434_v47 = vld [vmem:[#allocation178_spill] sm:$0xff] }
 0x82a   : > { %v4423_v9 = vpop.f32.mrf.mxu1  ;;  %v4448_v16 = vmul.f32 %v4417_v49, %v12424_v24  ;;  %v4594_v25 = vpop.f32.mrf.mxu0  ;;  %4801 = vmatmul.mubr.f32.gmra.mxu1 %v4637_v32  ;;  %5006 = vmatprep.subr.mxu1 %v12425_v27  ;;  %v4274_v62 = vmul.f32 %v10910_v17, %v12426_v40  ;;  %v4288_v42 = vadd.f32 %v4272_v38, %v4111_v20  ;;  %v12432_v49 = vld [vmem:[#allocation65_spill] sm:$0xff]  ;;  %v12437_v60 = vld [vmem:[#allocation119_spill] sm:$0xff]  ;;  %v12447_v33 = vld [vmem:[#allocation34_spill] sm:$0xff] }
 0x82b   : > { %v4640_v56 = vadd.f32 %v4624_v61, %v4463_v26  ;;  %v4113_v29 = vadd.f32 %v4097_v59, %v10950_v58  ;;  %5007 = vmatpush1.msra.mxu1 %v12427_v1  ;;  %v4114_v8 = vadd.f32 %v4098_v52, %v10955_v41  ;;  %v4099_v63 = vmul.f32 %v10901_v23, %v12428_v0  ;;  %v12433_v28 = vld [vmem:[#allocation93_spill] sm:$0xff]  ;;  %v12441_v52 = vld [vmem:[#allocation62_spill] sm:$0xff]  ;;  %v12445_v26 = vld [vmem:[#allocation51_spill] sm:$0xff] }
 0x82c   : > { %v4425_v10 = vpop.f32.mrf.mxu1  ;;  %v4639_v50 = vadd.f32 %v4623_v54, %v4462_v2  ;;  %v4625_v48 = vmul.f32 %v4594_v25, %v12429_v19  ;;  %v4596_v37 = vpop.f32.mrf.mxu0  ;;  %5008 = vmatprep.subr.mxu1 %v12430_v36  ;;  %v4465_v39 = vadd.f32 %v4449_v7, %v4288_v42  ;;  %v4289_v18 = vadd.f32 %v4273_v21, %v4112_v30  ;;  %v12436_v34 = vld [vmem:[#allocation177_spill] sm:$0xff]  ;;  %v12442_v30 = vld [vmem:[#allocation79_spill] sm:$0xff]  ;;  %v12443_v54 = vld [vmem:[#allocation182_spill] sm:$0xff] }
 0x82d   : > { %v4451_v17 = vmul.f32 %v4425_v10, %v12431_v35  ;;  %v4626_v20 = vmul.f32 %v4596_v37, %v12432_v49  ;;  %4806 = vmatprep.mubr.f32.mxu1 %v4640_v56  ;;  %5009 = vmatpush1.msra.mxu1 %v12433_v28  ;;  %v4464_v41 = vadd.f32 %v4448_v16, %v4287_v4  ;;  %v12438_v44 = vld [vmem:[#allocation57_spill] sm:$0xff]  ;;  %v12448_v21 = vld [vmem:[#allocation39_spill] sm:$0xff]  ;;  %v12453_v0 = vld [vmem:[#allocation48_spill] sm:$0xff] }
 0x82e   : > { %v4429_v58 = vpop.f32.mrf.mxu1  ;;  %v4450_v51 = vmul.f32 %v4423_v9, %v12434_v47  ;;  %v4600_v23 = vpop.f32.mrf.mxu0  ;;  %4807 = vmatmul.mubr.f32.gmra.mxu1 %v4639_v50  ;;  %5010 = vmatprep.subr.mxu1 %v12435_v14  ;;  %v4275_v59 = vmul.f32 %v12437_v60, %v12436_v34  ;;  %v12439_v38 = vld [vmem:[#allocation121_spill] sm:$0xff]  ;;  %v4290_v6 = vadd.f32 %v4274_v62, %v4113_v29  ;;  %v12446_v9 = vld [vmem:[#allocation75_spill] sm:$0xff]  ;;  %v12460_v28 = vld [vmem:[#allocation52_spill] sm:$0xff] }
 0x82f   : > { %v4276_v57 = vmul.f32 %v12439_v38, %v12438_v44  ;;  %v4642_v31 = vadd.f32 %v4626_v20, %v4465_v39  ;;  %v12440_v43 = vld [vmem:[#allocation97_spill] sm:$0xff]  ;;  %v4101_v4 = vmul.f32 %v12442_v30, %v12441_v52  ;;  %v4641_v32 = vadd.f32 %v4625_v48, %v4464_v41  ;;  %v12452_v56 = vld [vmem:[#allocation103_spill] sm:$0xff]  ;;  %v12457_v39 = vld [vmem:[#allocation50_spill] sm:$0xff] }
 0x830   : > { %v4431_v22 = vpop.f32.mrf.mxu1  ;;  %5011 = vmatpush1.msra.mxu1 %v12440_v43  ;;  %v4627_v13 = vmul.f32 %v4600_v23, %v12443_v54  ;;  %v4602_v12 = vpop.f32.mrf.mxu0  ;;  %v4115_v46 = vadd.f32 %v4099_v63, %v10977_v45  ;;  %v12444_v7 = vld [vmem:[#allocation33_spill] sm:$0xff]  ;;  %v4467_v61 = vadd.f32 %v4451_v17, %v4290_v6  ;;  %v4466_v16 = vadd.f32 %v4450_v51, %v4289_v18  ;;  %v12451_v45 = vld [vmem:[#allocation47_spill] sm:$0xff]  ;;  %v12454_v63 = vld [vmem:[#allocation180_spill] sm:$0xff] }
 0x831   : > { %5012 = vmatprep.subr.mxu1 %v12444_v7  ;;  %v4453_v5 = vmul.f32 %v4431_v22, %v12445_v26  ;;  %v4628_v55 = vmul.f32 %v4602_v12, %v12446_v9  ;;  %4812 = vmatprep.mubr.f32.mxu1 %v4642_v31  ;;  %v12449_v2 = vld [vmem:[#allocation117_spill] sm:$0xff]  ;;  %v4291_v62 = vadd.f32 %v4275_v59, %v4114_v8  ;;  %v12455_v50 = vld [vmem:[#allocation123_spill] sm:$0xff]  ;;  %v12458_v8 = vld [vmem:[#allocation92_spill] sm:$0xff] }
 0x832   : > { %v4435_v3 = vpop.f32.mrf.mxu1  ;;  %5013 = vmatpush1.msra.mxu1 %v12447_v33  ;;  %v4100_v24 = vmul.f32 %v12449_v2, %v12448_v21  ;;  %v12450_v25 = vld [vmem:[#allocation181_spill] sm:$0xff]  ;;  %v4606_v40 = vpop.f32.mrf.mxu0  ;;  %v4278_v10 = vmul.f32 %v10975_v53, %v12452_v56  ;;  %v4292_v1 = vadd.f32 %v4276_v57, %v4115_v46  ;;  %v4277_v19 = vmul.f32 %v12455_v50, %v12454_v63  ;;  %v12456_v37 = vld [vmem:[#allocation59_spill] sm:$0xff]  ;;  %v12462_v14 = vld [vmem:[#allocation54_spill] sm:$0xff] }
 0x833   : > { %v4452_v27 = vmul.f32 %v4429_v58, %v12450_v25  ;;  %4813 = vmatmul.mubr.f32.gmra.mxu1 %v4641_v32  ;;  %5014 = vmatprep.subr.mxu1 %v12451_v45  ;;  %v4644_v42 = vadd.f32 %v4628_v55, %v4467_v61  ;;  %v4643_v48 = vadd.f32 %v4627_v13, %v4466_v16  ;;  %v12459_v53 = vld [vmem:[#allocation183_spill] sm:$0xff]  ;;  %v12461_v47 = vld [vmem:[#allocation53_spill] sm:$0xff]  ;;  %v12463_v60 = vld [vmem:[#allocation56_spill] sm:$0xff] }
 0x834   : > { %v4437_v29 = vpop.f32.mrf.mxu1  ;;  %5015 = vmatpush1.msra.mxu1 %v12453_v0  ;;  %v4629_v36 = vmul.f32 %v4606_v40, %v12456_v37  ;;  %v4608_v35 = vpop.f32.mrf.mxu0  ;;  %v4117_v17 = vadd.f32 %v4101_v4, %v10983_v15  ;;  %v4469_v20 = vadd.f32 %v4453_v5, %v4292_v1  ;;  %v4116_v18 = vadd.f32 %v4100_v24, %v10979_v11  ;;  %v12464_v38 = vld [vmem:[#allocation32_spill] sm:$0xff]  ;;  %v12465_v22 = vld [vmem:[#allocation58_spill] sm:$0xff]  ;;  %v12466_v11 = vld [vmem:[#allocation101_spill] sm:$0xff] }
 0x835   : > { %5016 = vmatprep.subr.mxu1 %v12457_v39  ;;  %v4455_v49 = vmul.f32 %v4437_v29, %v12458_v8  ;;  %v4630_v58 = vmul.f32 %v4608_v35, %v12459_v53  ;;  %4818 = vmatprep.mubr.f32.mxu1 %v4644_v42  ;;  %v4468_v41 = vadd.f32 %v4452_v27, %v4291_v62  ;;  %v12467_v52 = vld [vmem:[#allocation61_spill] sm:$0xff]  ;;  %v12468_v4 = vld [vmem:[#allocation99_spill] sm:$0xff]  ;;  %v12469_v54 = vld [vmem:[#allocation102_spill] sm:$0xff] }
 0x836   : > { %5017 = vmatpush1.msra.mxu1 %v12460_v28  ;;  %v4454_v51 = vmul.f32 %v4435_v3, %v12461_v47  ;;  %v4612_v23 = vpop.f32.mrf.mxu0  ;;  %v4294_v34 = vadd.f32 %v4278_v10, %v4117_v17  ;;  %v4293_v59 = vadd.f32 %v4277_v19, %v4116_v18  ;;  %v12470_v12 = vld [vmem:[#allocation104_spill] sm:$0xff]  ;;  %v12471_v46 = vld [vmem:[#allocation105_spill] sm:$0xff]  ;;  %v12472_v7 = vld [vmem:[#allocation106_spill] sm:$0xff] }
 0x837   : > { %4819 = vmatmul.mubr.f32.gmra.mxu1 %v4643_v48  ;;  %5018 = vmatprep.subr.mxu1 %v12462_v14  ;;  %v4646_v15 = vadd.f32 %v4630_v58, %v4469_v20  ;;  %v4645_v44 = vadd.f32 %v4629_v36, %v4468_v41  ;;  %v4631_v57 = vmul.f32 %v4612_v23, %v12464_v38  ;;  %v12473_v26 = vld [vmem:[#allocation108_spill] sm:$0xff]  ;;  %v12474_v5 = vld [vmem:[#allocation109_spill] sm:$0xff]  ;;  %v12475_v61 = vld [vmem:[#allocation111_spill] sm:$0xff] }
 0x838   : > { %5019 = vmatpush1.msra.mxu1 %v12463_v60  ;;  %v4614_v31 = vpop.f32.mrf.mxu0  ;;  %v4471_v6 = vadd.f32 %v4455_v49, %v4294_v34  ;;  %v4470_v30 = vadd.f32 %v4454_v51, %v4293_v59  ;;  %v12476_v9 = vld [vmem:[#allocation113_spill] sm:$0xff]  ;;  %v12477_v55 = vld [vmem:[#allocation114_spill] sm:$0xff]  ;;  %v12478_v3 = vld [vmem:[#allocation116_spill] sm:$0xff] }
 0x839   : > { %5020 = vmatprep.subr.mxu1 %v12465_v22  ;;  %v4632_v43 = vmul.f32 %v4614_v31, %v12466_v11  ;;  %4824 = vmatprep.mubr.f32.mxu1 %v4646_v15  ;;  %v12479_v33 = vld [vmem:[#allocation118_spill] sm:$0xff]  ;;  %v12480_v21 = vld [vmem:[#allocation120_spill] sm:$0xff]  ;;  %v278_v35 = vld [vmem:[#allocation5 + $0xed8] sm:$0xff] }
 0x83a   : > { %5021 = vmatpush1.msra.mxu1 %v12467_v52  ;;  %v4647_v13 = vadd.f32 %v4631_v57, %v4470_v30  ;;  %v12481_v2 = vld [vmem:[#allocation122_spill] sm:$0xff]  ;;  %v12482_v24 = vld [vmem:[#allocation124_spill] sm:$0xff]  ;;  %v276_v39 = vld [vmem:[#allocation5 + $0xe18] sm:$0xff] }
 0x83b   : > { %4825 = vmatmul.mubr.f32.gmra.mxu1 %v4645_v44  ;;  %5022 = vmatprep.subr.mxu1 %v12468_v4  ;;  %v4648_v32 = vadd.f32 %v4632_v43, %v4471_v6  ;;  %v12483_v16 = vld [vmem:[#allocation126_spill] sm:$0xff]  ;;  %v12484_v25 = vld [vmem:[#allocation128_spill] sm:$0xff]  ;;  %v274_v49 = vld [vmem:[#allocation5 + $0xd58] sm:$0xff] }
 0x83c   : > { %5023 = vmatpush1.msra.mxu1 %v12469_v54  ;;  %v12485_v27 = vld [vmem:[#allocation130_spill] sm:$0xff]  ;;  %v12486_v40 = vld [vmem:[#allocation132_spill] sm:$0xff]  ;;  %v272_v53 = vld [vmem:[#allocation5 + $0xc98] sm:$0xff] }
 0x83d   : > { %5024 = vmatprep.subr.mxu1 %v12470_v12  ;;  %4830 = vmatprep.mubr.f32.mxu1 %v4648_v32  ;;  %v12487_v45 = vld [vmem:[#allocation134_spill] sm:$0xff]  ;;  %v12488_v62 = vld [vmem:[#allocation136_spill] sm:$0xff]  ;;  %v12501_v41 = vld [vmem:[#allocation13_spill] sm:$0xff] }
 0x83e   : > { %5025 = vmatpush1.msra.mxu1 %v12471_v46  ;;  %v12489_v56 = vld [vmem:[#allocation138_spill] sm:$0xff]  ;;  %v12490_v10 = vld [vmem:[#allocation140_spill] sm:$0xff]  ;;  %v12502_v60 = vld [vmem:[#allocation15_spill] sm:$0xff] }
 0x83f   : > { %4831 = vmatmul.mubr.f32.gmra.mxu1 %v4647_v13  ;;  %5026 = vmatprep.subr.mxu1 %v12472_v7  ;;  %v12491_v42 = vld [vmem:[#allocation142_spill] sm:$0xff]  ;;  %v12492_v29 = vld [vmem:[#allocation144_spill] sm:$0xff]  ;;  %v12505_v52 = vld [vmem:[#allocation17_spill] sm:$0xff] }
 0x840   : > { %5027 = vmatpush1.msra.mxu1 %v12473_v26  ;;  %v12493_v1 = vld [vmem:[#allocation146_spill] sm:$0xff]  ;;  %v12494_v0 = vld [vmem:[#allocation148_spill] sm:$0xff]  ;;  %v12507_v7 = vld [vmem:[#allocation19_spill] sm:$0xff] }
 0x841   : > { %5028 = vmatprep.subr.mxu1 %v12474_v5  ;;  %v12495_v63 = vld [vmem:[#allocation150_spill] sm:$0xff]  ;;  %v12496_v50 = vld [vmem:[#allocation152_spill] sm:$0xff] }
 0x842   : > { %5029 = vmatpush1.msra.mxu1 %v12475_v61  ;;  %v12497_v19 = vld [vmem:[#allocation154_spill] sm:$0xff]  ;;  %v12498_v48 = vld [vmem:[#allocation156_spill] sm:$0xff] }
 0x843   : > { %5030 = vmatprep.subr.mxu1 %v12476_v9  ;;  %v12499_v37 = vld [vmem:[#allocation158_spill] sm:$0xff]  ;;  %v279_v36 = vld [vmem:[#allocation5 + $0xee0] sm:$0xff] }
 0x844   : > { %5031 = vmatpush2.msra.mxu1 %v12477_v55  ;;  %4909 = vmatprep.subr.mxu0 %v279_v36  ;;  %v277_v17 = vld [vmem:[#allocation5 + $0xe20] sm:$0xff]  ;;  %v12500_v28 = vld [vmem:[#allocation14_spill] sm:$0xff] }
 0x845   : > { %5032 = vmatprep.subr.mxu1 %v12478_v3  ;;  %4910 = vmatpush2.msra.mxu0 %v278_v35  ;;  %v275_v8 = vld [vmem:[#allocation5 + $0xd60] sm:$0xff]  ;;  %v12504_v11 = vld [vmem:[#allocation18_spill] sm:$0xff] }
 0x846   : > { %5033 = vmatpush2.msra.mxu1 %v12479_v33  ;;  %4911 = vmatprep.subr.mxu0 %v277_v17  ;;  %v273_v20 = vld [vmem:[#allocation5 + $0xca0] sm:$0xff]  ;;  %v12508_v3 = vld [vmem:[#allocation22_spill] sm:$0xff] }
 0x847   : > { %5034 = vmatprep.subr.mxu1 %v12480_v21  ;;  %4912 = vmatpush2.msra.mxu0 %v276_v39  ;;  %v226_v58 = vld [vmem:[#allocation7 + $0x2] ss:$8 sm:$0x3] }
 0x848   : > { %5035 = vmatpush2.msra.mxu1 %v12481_v2  ;;  %4913 = vmatprep.subr.mxu0 %v275_v8  ;;  %v4717_v18 = vrot.slane %v226_v58, %v12500_v28  ;;  %v4721_v47 = vrot.slane %v226_v58, %v12501_v41  ;;  %v12503_v44 = vld [vmem:[#allocation16_spill] sm:$0xff]  ;;  %v12509_v21 = vld [vmem:[#allocation21_spill] sm:$0xff] }
 0x849   : > { %5036 = vmatprep.subr.mxu1 %v12482_v24  ;;  %4914 = vmatpush2.msra.mxu0 %v274_v49  ;;  %v12506_v12 = vld [vmem:[#allocation20_spill] sm:$0xff] }
 0x84a   : > { %5037 = vmatpush2.msra.mxu1 %v12483_v16  ;;  %4915 = vmatprep.subr.mxu0 %v273_v20 }
 0x84b   : > { %5038 = vmatprep.subr.mxu1 %v12484_v25  ;;  %4916 = vmatpush2.msra.mxu0 %v272_v53 }
 0x84c   : > { %5039 = vmatpush2.msra.mxu1 %v12485_v27 }
 0x84d   : > { %5040 = vmatprep.subr.mxu1 %v12486_v40  ;;  %v12510_v40 = vld [vmem:[#allocation24_spill] sm:$0xff] }
 0x84e   : > { %5041 = vmatpush2.msra.mxu1 %v12487_v45 }
 0x84f   : > { %5042 = vmatprep.subr.mxu1 %v12488_v62  ;;  %v12511_v62 = vld [vmem:[#allocation23_spill] sm:$0xff] }
 0x850   : > { %5043 = vmatpush2.msra.mxu1 %v12489_v56 }
 0x851   : > { %5044 = vmatprep.subr.mxu1 %v12490_v10 }
 0x852   : > { %5045 = vmatpush2.msra.mxu1 %v12491_v42 }
 0x853   : > { %5046 = vmatprep.subr.mxu1 %v12492_v29 }
 0x854   : > { %5047 = vmatpush2.msra.mxu1 %v12493_v1 }
 0x855   : > { %5048 = vmatprep.subr.mxu1 %v12494_v0  ;;  %v12512_v0 = vld [vmem:[#allocation26_spill] sm:$0xff] }
 0x856   : > { %5049 = vmatpush2.msra.mxu1 %v12495_v63 }
 0x857   : > { %5050 = vmatprep.subr.mxu1 %v12496_v50  ;;  %v12513_v50 = vld [vmem:[#allocation25_spill] sm:$0xff] }
 0x858   : > { %5051 = vmatpush2.msra.mxu1 %v12497_v19 }
 0x859   : > { %5052 = vmatprep.subr.mxu1 %v12498_v48 }
 0x85a   : > { %5053 = vmatpush2.msra.mxu1 %v12499_v37 }
 0x85b   : > { %5054 = vmatprep.subr.mxu1 %v279_v36 }
 0x85c   : > { %5055 = vmatpush2.msra.mxu1 %v278_v35 }
 0x85d   : > { %5056 = vmatprep.subr.mxu1 %v277_v17  ;;  %v12514_v17 = vld [vmem:[#allocation28_spill] sm:$0xff] }
 0x85e   : > { %5057 = vmatpush2.msra.mxu1 %v276_v39 }
 0x85f   : > { %5058 = vmatprep.subr.mxu1 %v275_v8  ;;  %v12515_v8 = vld [vmem:[#allocation27_spill] sm:$0xff] }
 0x860   : > { %5059 = vmatpush2.msra.mxu1 %v274_v49 }
 0x861   : > { %5060 = vmatprep.subr.mxu1 %v273_v20 }
 0x862   : > { %5061 = vmatpush2.msra.mxu1 %v272_v53 }
 0x8e2   : > { %v4790_v51 = vpop.f32.mrf.mxu1 }
 0x8e3   : > { %v4791_v23 = vadd.f32 %v4790_v51, %v4717_v18  ;;  %v12516_v51 = vld [vmem:[#allocation30_spill] sm:$0xff] }
 0x8e4   : > { %v4792_v14 = vpop.f32.mrf.mxu1 }
 0x8e5   : > { %v4793_v15 = vadd.f32 %v4792_v14, %v4721_v47  ;;  %v11136_v38 = vadd.f32 %v4791_v23, %v12503_v44  ;;  %v12517_v14 = vld [vmem:[#allocation29_spill] sm:$0xff]  ;;  %v5257_v44 = vld [vmem:[#allocation5 + $0xb90] sm:$0xff] }
 0x8e6   : > { %v4796_v34 = vpop.f32.mrf.mxu1 }
 0x8e7   : > { %v11133_v59 = vadd.f32 %v4793_v15, %v12502_v60  ;;  %v4797_v57 = vadd.f32 %v4796_v34, %v4717_v18  ;;  %v5258_v34 = vld [vmem:[#allocation5 + $0xb98] sm:$0xff]  ;;  %v5260_v60 = vld [vmem:[#allocation5 + $0xba8] sm:$0xff] }
 0x8e8   : > { %v4798_v31 = vpop.f32.mrf.mxu1  ;;  %5346 = vmatprep.subr.mxu0 %v5258_v34  ;;  %5459 = vmatprep.subr.mxu1 %v5260_v60 }
 0x8e9   : > { %v4799_v22 = vadd.f32 %v4798_v31, %v4721_v47  ;;  %4917 = vmatprep.mubr.f32.mxu0 %v11133_v59  ;;  %v11144_v30 = vadd.f32 %v4797_v57, %v12505_v52  ;;  %v5250_v57 = vld [vmem:[#allocation5 + $0xa18] sm:$0xff]  ;;  %v5249_v31 = vld [vmem:[#allocation5 + $0xa10] sm:$0xff] }
 0x8ea   : > { %v4802_v6 = vpop.f32.mrf.mxu1  ;;  %4918 = vmatmul.mubr.f32.vlgmr.msra.gmra.mxu0 %v11136_v38  ;;  %v5241_v52 = vld [vmem:[#allocation5 + $0x890] sm:$0xff] }
 0x8eb   : > { %v11141_v43 = vadd.f32 %v4799_v22, %v12504_v11  ;;  %v4803_v4 = vadd.f32 %v4802_v6, %v4717_v18  ;;  %5347 = vmatpush1.msra.mxu0 %v5257_v44  ;;  %v5246_v22 = vld [vmem:[#allocation5 + $0x958] sm:$0xff]  ;;  %v5245_v6 = vld [vmem:[#allocation5 + $0x950] sm:$0xff]  ;;  %v5259_v44 = vld [vmem:[#allocation5 + $0xba0] sm:$0xff] }
 0x8ec   : > { %v4804_v32 = vpop.f32.mrf.mxu1  ;;  %v5242_v11 = vld [vmem:[#allocation5 + $0x898] sm:$0xff] }
 0x8ed   : > { %v4805_v54 = vadd.f32 %v4804_v32, %v4721_v47  ;;  %4923 = vmatprep.mubr.f32.mxu0 %v11141_v43  ;;  %v11152_v26 = vadd.f32 %v4803_v4, %v12507_v7  ;;  %v5238_v4 = vld [vmem:[#allocation5 + $0x7d8] sm:$0xff]  ;;  %v5237_v32 = vld [vmem:[#allocation5 + $0x7d0] sm:$0xff] }
 0x8ee   : > { %v4808_v13 = vpop.f32.mrf.mxu1  ;;  %4924 = vmatmul.mubr.f32.gmra.mxu0 %v11144_v30  ;;  %v5229_v7 = vld [vmem:[#allocation5 + $0x650] sm:$0xff] }
 0x8ef   : > { %v11149_v46 = vadd.f32 %v4805_v54, %v12506_v12  ;;  %v4809_v5 = vadd.f32 %v4808_v13, %v4717_v18  ;;  %v5234_v54 = vld [vmem:[#allocation5 + $0x718] sm:$0xff]  ;;  %v5233_v13 = vld [vmem:[#allocation5 + $0x710] sm:$0xff] }
 0x8f0   : > { %v4810_v61 = vpop.f32.mrf.mxu1  ;;  %v5230_v12 = vld [vmem:[#allocation5 + $0x658] sm:$0xff] }
 0x8f1   : > { %v4811_v9 = vadd.f32 %v4810_v61, %v4721_v47  ;;  %4929 = vmatprep.mubr.f32.mxu0 %v11149_v46  ;;  %v11160_v2 = vadd.f32 %v4809_v5, %v12509_v21  ;;  %v5226_v5 = vld [vmem:[#allocation5 + $0x598] sm:$0xff]  ;;  %v5225_v61 = vld [vmem:[#allocation5 + $0x590] sm:$0xff] }
 0x8f2   : > { %4930 = vmatmul.mubr.f32.gmra.mxu0 %v11152_v26  ;;  %v5217_v21 = vld [vmem:[#allocation5 + $0x410] sm:$0xff] }
 0x8f3   : > { %v4814_v55 = vpop.f32.mrf.mxu1  ;;  %v11157_v33 = vadd.f32 %v4811_v9, %v12508_v3  ;;  %v5222_v9 = vld [vmem:[#allocation5 + $0x4d8] sm:$0xff] }
 0x8f4   : > { %v4815_v24 = vadd.f32 %v4814_v55, %v4717_v18  ;;  %v5221_v55 = vld [vmem:[#allocation5 + $0x4d0] sm:$0xff]  ;;  %v5218_v3 = vld [vmem:[#allocation5 + $0x418] sm:$0xff] }
 0x8f5   : > { %v4816_v16 = vpop.f32.mrf.mxu1  ;;  %4935 = vmatprep.mubr.f32.mxu0 %v11157_v33 }
 0x8f6   : > { %v4817_v25 = vadd.f32 %v4816_v16, %v4721_v47  ;;  %4936 = vmatmul.mubr.f32.gmra.mxu0 %v11160_v2  ;;  %v11168_v56 = vadd.f32 %v4815_v24, %v12511_v62  ;;  %v5214_v24 = vld [vmem:[#allocation5 + $0x358] sm:$0xff]  ;;  %v5213_v16 = vld [vmem:[#allocation5 + $0x350] sm:$0xff] }
 0x8f7   : > { %v4820_v27 = vpop.f32.mrf.mxu1  ;;  %v5205_v62 = vld [vmem:[#allocation5 + $0x1d0] sm:$0xff] }
 0x8f8   : > { %v11165_v45 = vadd.f32 %v4817_v25, %v12510_v40  ;;  %v4821_v10 = vadd.f32 %v4820_v27, %v4717_v18  ;;  %v5210_v25 = vld [vmem:[#allocation5 + $0x298] sm:$0xff]  ;;  %v5209_v27 = vld [vmem:[#allocation5 + $0x290] sm:$0xff] }
 0x8f9   : > { %v4822_v42 = vpop.f32.mrf.mxu1  ;;  %v5206_v40 = vld [vmem:[#allocation5 + $0x1d8] sm:$0xff] }
 0x8fa   : > { %v4823_v29 = vadd.f32 %v4822_v42, %v4721_v47  ;;  %4941 = vmatprep.mubr.f32.mxu0 %v11165_v45  ;;  %v11176_v19 = vadd.f32 %v4821_v10, %v12513_v50  ;;  %v5202_v10 = vld [vmem:[#allocation5 + $0x118] sm:$0xff]  ;;  %v5201_v42 = vld [vmem:[#allocation5 + $0x110] sm:$0xff] }
 0x8fb   : > { %v4826_v1 = vpop.f32.mrf.mxu1  ;;  %4942 = vmatmul.mubr.f32.gmra.mxu0 %v11168_v56  ;;  %v5321_v50 = vld [vmem:[#allocation5 + $0x1790] sm:$0xff] }
 0x8fc   : > { %v11173_v63 = vadd.f32 %v4823_v29, %v12512_v0  ;;  %v4827_v48 = vadd.f32 %v4826_v1, %v4717_v18  ;;  %v5198_v29 = vld [vmem:[#allocation5 + $0x58] sm:$0xff]  ;;  %v5197_v1 = vld [vmem:[#allocation5 + $0x50] sm:$0xff] }
 0x8fd   : > { %v4828_v37 = vpop.f32.mrf.mxu1  ;;  %v5322_v0 = vld [vmem:[#allocation5 + $0x1798] sm:$0xff] }
 0x8fe   : > { %v4829_v36 = vadd.f32 %v4828_v37, %v4721_v47  ;;  %4947 = vmatprep.mubr.f32.mxu0 %v11173_v63  ;;  %v11184_v49 = vadd.f32 %v4827_v48, %v12515_v8  ;;  %v5318_v48 = vld [vmem:[#allocation5 + $0x16d8] sm:$0xff]  ;;  %v5317_v37 = vld [vmem:[#allocation5 + $0x16d0] sm:$0xff] }
 0x8ff   : > { %v4832_v35 = vpop.f32.mrf.mxu1  ;;  %4948 = vmatmul.mubr.f32.gmra.mxu0 %v11176_v19 }
 0x900   : > { %v11181_v39 = vadd.f32 %v4829_v36, %v12514_v17  ;;  %v4833_v20 = vadd.f32 %v4832_v35, %v4717_v18  ;;  %v5254_v18 = vld [vmem:[#allocation5 + $0xad8] sm:$0xff]  ;;  %v5313_v35 = vld [vmem:[#allocation5 + $0x1610] sm:$0xff] }
 0x901   : > { %v4834_v53 = vpop.f32.mrf.mxu1  ;;  %5348 = vmatprep.subr.mxu0 %v5254_v18  ;;  %v5314_v36 = vld [vmem:[#allocation5 + $0x1618] sm:$0xff] }
 0x902   : > { %v4835_v58 = vadd.f32 %v4834_v53, %v4721_v47  ;;  %4953 = vmatprep.mubr.f32.mxu0 %v11181_v39  ;;  %v11192_v15 = vadd.f32 %v4833_v20, %v12517_v14  ;;  %v5253_v47 = vld [vmem:[#allocation5 + $0xad0] sm:$0xff] }
 0x903   : > { %4954 = vmatmul.mubr.f32.gmra.mxu0 %v11184_v49 }
 0x904   : > { %v11189_v23 = vadd.f32 %v4835_v58, %v12516_v51  ;;  %5349 = vmatpush1.msra.mxu0 %v5253_v47 }
 0x905   : > { %5350 = vmatprep.subr.mxu0 %v5250_v57 }
 0x906   : > { %4959 = vmatprep.mubr.f32.mxu0 %v11189_v23  ;;  %5351 = vmatpush1.msra.mxu0 %v5249_v31  ;;  %v5252_v31 = vld [vmem:[#allocation5 + $0xa28] sm:$0xff] }
 0x907   : > { %4960 = vmatmul.mubr.f32.gmra.mxu0 %v11192_v15  ;;  %5352 = vmatprep.subr.mxu0 %v5246_v22 }
 0x908   : > { %5353 = vmatpush1.msra.mxu0 %v5245_v6 }
 0x909   : > { %5354 = vmatprep.subr.mxu0 %v5242_v11 }
 0x90a   : > { %5355 = vmatpush1.msra.mxu0 %v5241_v52  ;;  %v5248_v52 = vld [vmem:[#allocation5 + $0x968] sm:$0xff] }
 0x90b   : > { %5356 = vmatprep.subr.mxu0 %v5238_v4 }
 0x90c   : > { %5357 = vmatpush1.msra.mxu0 %v5237_v32  ;;  %v5247_v32 = vld [vmem:[#allocation5 + $0x960] sm:$0xff] }
 0x90d   : > { %5358 = vmatprep.subr.mxu0 %v5234_v54 }
 0x90e   : > { %5359 = vmatpush1.msra.mxu0 %v5233_v13  ;;  %v5244_v13 = vld [vmem:[#allocation5 + $0x8a8] sm:$0xff] }
 0x90f   : > { %5360 = vmatprep.subr.mxu0 %v5230_v12 }
 0x910   : > { %5361 = vmatpush1.msra.mxu0 %v5229_v7  ;;  %v5243_v7 = vld [vmem:[#allocation5 + $0x8a0] sm:$0xff] }
 0x911   : > { %5362 = vmatprep.subr.mxu0 %v5226_v5 }
 0x912   : > { %5363 = vmatpush1.msra.mxu0 %v5225_v61  ;;  %v5240_v61 = vld [vmem:[#allocation5 + $0x7e8] sm:$0xff] }
 0x913   : > { %5364 = vmatprep.subr.mxu0 %v5222_v9 }
 0x914   : > { %5365 = vmatpush1.msra.mxu0 %v5221_v55  ;;  %v5239_v55 = vld [vmem:[#allocation5 + $0x7e0] sm:$0xff] }
 0x915   : > { %5366 = vmatprep.subr.mxu0 %v5218_v3 }
 0x916   : > { %5367 = vmatpush1.msra.mxu0 %v5217_v21  ;;  %v5236_v21 = vld [vmem:[#allocation5 + $0x728] sm:$0xff] }
 0x917   : > { %5368 = vmatprep.subr.mxu0 %v5214_v24 }
 0x918   : > { %5369 = vmatpush1.msra.mxu0 %v5213_v16  ;;  %v5235_v16 = vld [vmem:[#allocation5 + $0x720] sm:$0xff] }
 0x919   : > { %5370 = vmatprep.subr.mxu0 %v5210_v25 }
 0x91a   : > { %5371 = vmatpush1.msra.mxu0 %v5209_v27  ;;  %v5232_v27 = vld [vmem:[#allocation5 + $0x668] sm:$0xff] }
 0x91b   : > { %5372 = vmatprep.subr.mxu0 %v5206_v40 }
 0x91c   : > { %5373 = vmatpush1.msra.mxu0 %v5205_v62  ;;  %v5231_v62 = vld [vmem:[#allocation5 + $0x660] sm:$0xff] }
 0x91d   : > { %5374 = vmatprep.subr.mxu0 %v5202_v10 }
 0x91e   : > { %5375 = vmatpush1.msra.mxu0 %v5201_v42  ;;  %v5228_v42 = vld [vmem:[#allocation5 + $0x5a8] sm:$0xff] }
 0x91f   : > { %5376 = vmatprep.subr.mxu0 %v5198_v29 }
 0x920   : > { %5377 = vmatpush1.msra.mxu0 %v5197_v1  ;;  %v5227_v1 = vld [vmem:[#allocation5 + $0x5a0] sm:$0xff] }
 0x921   : > { %5378 = vmatprep.subr.mxu0 %v5322_v0 }
 0x922   : > { %5379 = vmatpush2.msra.mxu0 %v5321_v50  ;;  %v5224_v50 = vld [vmem:[#allocation5 + $0x4e8] sm:$0xff] }
 0x923   : > { %5380 = vmatprep.subr.mxu0 %v5318_v48 }
 0x924   : > { %5381 = vmatpush2.msra.mxu0 %v5317_v37  ;;  %v5223_v37 = vld [vmem:[#allocation5 + $0x4e0] sm:$0xff] }
 0x925   : > { %5382 = vmatprep.subr.mxu0 %v5314_v36 }
 0x926   : > { %5383 = vmatpush2.msra.mxu0 %v5313_v35  ;;  %v5220_v35 = vld [vmem:[#allocation5 + $0x428] sm:$0xff] }
 0x9aa   : > { %v4919_v17 = vpop.f32.mrf.mxu0 }
 0x9ab   : > { %v11197_v8 = vsub.f32 %v11136_v38, %v4919_v17  ;;  %v5256_v38 = vld [vmem:[#allocation5 + $0xae8] sm:$0xff] }
 0x9ac   : > { %v4921_v20 = vpop.f32.mrf.mxu0 }
 0x9ad   : > { %v11200_v53 = vsub.f32 %v11133_v59, %v4921_v20  ;;  %v4982_v14 = vmul.f32 %v11197_v8, %v11197_v8  ;;  %v5255_v59 = vld [vmem:[#allocation5 + $0xae0] sm:$0xff] }
 0x9ae   : > { %v4925_v58 = vpop.f32.mrf.mxu0  ;;  %v5219_v20 = vld [vmem:[#allocation5 + $0x420] sm:$0xff] }
 0x9af   : > { %v4983_v51 = vmul.f32 %v11200_v53, %v11200_v53  ;;  %v11207_v34 = vsub.f32 %v11144_v30, %v4925_v58 }
 0x9b0   : > { %v4927_v60 = vpop.f32.mrf.mxu0 }
 0x9b1   : > { %v11210_v18 = vsub.f32 %v11141_v43, %v4927_v60  ;;  %5062 = vmatprep.mubr.f32.mxu1 %v4983_v51  ;;  %v4984_v22 = vmul.f32 %v11207_v34, %v11207_v34  ;;  %v5251_v43 = vld [vmem:[#allocation5 + $0xa20] sm:$0xff]  ;;  %v5216_v51 = vld [vmem:[#allocation5 + $0x368] sm:$0xff] }
 0x9b2   : > { %v4931_v47 = vpop.f32.mrf.mxu0  ;;  %5063 = vmatmul.mubr.f32.vlgmr.msra.gmra.mxu1 %v4982_v14  ;;  %v5215_v60 = vld [vmem:[#allocation5 + $0x360] sm:$0xff] }
 0x9b3   : > { %v4985_v57 = vmul.f32 %v11210_v18, %v11210_v18  ;;  %5460 = vmatpush1.msra.mxu1 %v5259_v44  ;;  %v11217_v30 = vsub.f32 %v11152_v26, %v4931_v47 }
 0x9b4   : > { %v4933_v6 = vpop.f32.mrf.mxu0  ;;  %5461 = vmatprep.subr.mxu1 %v5256_v38  ;;  %v5212_v38 = vld [vmem:[#allocation5 + $0x2a8] sm:$0xff] }
 0x9b5   : > { %v11220_v11 = vsub.f32 %v11149_v46, %v4933_v6  ;;  %5068 = vmatprep.mubr.f32.mxu1 %v4985_v57  ;;  %5462 = vmatpush1.msra.mxu1 %v5255_v59  ;;  %v4986_v26 = vmul.f32 %v11217_v30, %v11217_v30  ;;  %v5211_v59 = vld [vmem:[#allocation5 + $0x2a0] sm:$0xff] }
 0x9b6   : > { %v4937_v4 = vpop.f32.mrf.mxu0  ;;  %5069 = vmatmul.mubr.f32.gmra.mxu1 %v4984_v22  ;;  %5463 = vmatprep.subr.mxu1 %v5252_v31  ;;  %v5208_v31 = vld [vmem:[#allocation5 + $0x1e8] sm:$0xff]  ;;  %v5207_v22 = vld [vmem:[#allocation5 + $0x1e0] sm:$0xff] }
 0x9b7   : > { %v4987_v54 = vmul.f32 %v11220_v11, %v11220_v11  ;;  %5464 = vmatpush1.msra.mxu1 %v5251_v43  ;;  %v11227_v12 = vsub.f32 %v11160_v2, %v4937_v4  ;;  %v5204_v43 = vld [vmem:[#allocation5 + $0x128] sm:$0xff]  ;;  %v5199_v4 = vld [vmem:[#allocation5 + $0x60] sm:$0xff] }
 0x9b8   : > { %v4939_v46 = vpop.f32.mrf.mxu0  ;;  %5465 = vmatprep.subr.mxu1 %v5248_v52  ;;  %v5203_v52 = vld [vmem:[#allocation5 + $0x120] sm:$0xff] }
 0x9b9   : > { %v11230_v5 = vsub.f32 %v11157_v33, %v4939_v46  ;;  %5074 = vmatprep.mubr.f32.mxu1 %v4987_v54  ;;  %5466 = vmatpush1.msra.mxu1 %v5247_v32  ;;  %v4988_v2 = vmul.f32 %v11227_v12, %v11227_v12  ;;  %v5324_v32 = vld [vmem:[#allocation5 + $0x17a8] sm:$0xff]  ;;  %v5323_v54 = vld [vmem:[#allocation5 + $0x17a0] sm:$0xff] }
 0x9ba   : > { %5075 = vmatmul.mubr.f32.gmra.mxu1 %v4986_v26  ;;  %5467 = vmatprep.subr.mxu1 %v5244_v13  ;;  %v5320_v13 = vld [vmem:[#allocation5 + $0x16e8] sm:$0xff]  ;;  %v5319_v26 = vld [vmem:[#allocation5 + $0x16e0] sm:$0xff] }
 0x9bb   : > { %v4943_v9 = vpop.f32.mrf.mxu0  ;;  %v4989_v3 = vmul.f32 %v11230_v5, %v11230_v5  ;;  %5468 = vmatpush1.msra.mxu1 %v5243_v7  ;;  %v5316_v46 = vld [vmem:[#allocation5 + $0x1628] sm:$0xff]  ;;  %v5315_v7 = vld [vmem:[#allocation5 + $0x1620] sm:$0xff] }
 0x9bc   : > { %v11237_v24 = vsub.f32 %v11168_v56, %v4943_v9  ;;  %5469 = vmatprep.subr.mxu1 %v5240_v61  ;;  %v5310_v61 = vld [vmem:[#allocation5 + $0x1558] sm:$0xff]  ;;  %v5312_v9 = vld [vmem:[#allocation5 + $0x1568] sm:$0xff] }
 0x9bd   : > { %v4945_v33 = vpop.f32.mrf.mxu0  ;;  %5080 = vmatprep.mubr.f32.mxu1 %v4989_v3  ;;  %5470 = vmatpush1.msra.mxu1 %v5239_v55  ;;  %v5309_v55 = vld [vmem:[#allocation5 + $0x1550] sm:$0xff]  ;;  %v5311_v3 = vld [vmem:[#allocation5 + $0x1560] sm:$0xff] }
 0x9be   : > { %v11240_v25 = vsub.f32 %v11165_v45, %v4945_v33  ;;  %5081 = vmatmul.mubr.f32.gmra.mxu1 %v4988_v2  ;;  %5471 = vmatprep.subr.mxu1 %v5236_v21  ;;  %v4990_v56 = vmul.f32 %v11237_v24, %v11237_v24  ;;  %v5306_v21 = vld [vmem:[#allocation5 + $0x1498] sm:$0xff]  ;;  %v5308_v2 = vld [vmem:[#allocation5 + $0x14a8] sm:$0xff]  ;;  %v5305_v33 = vld [vmem:[#allocation5 + $0x1490] sm:$0xff] }
 0x9bf   : > { %v4949_v40 = vpop.f32.mrf.mxu0  ;;  %5472 = vmatpush1.msra.mxu1 %v5235_v16  ;;  %5384 = vmatprep.subr.mxu0 %v5310_v61  ;;  %v5307_v16 = vld [vmem:[#allocation5 + $0x14a0] sm:$0xff]  ;;  %v5265_v61 = vld [vmem:[#allocation5 + $0xd10] sm:$0xff] }
 0x9c0   : > { %v4991_v10 = vmul.f32 %v11240_v25, %v11240_v25  ;;  %v11247_v29 = vsub.f32 %v11176_v19, %v4949_v40  ;;  %5473 = vmatprep.subr.mxu1 %v5232_v27  ;;  %5385 = vmatpush2.msra.mxu0 %v5309_v55  ;;  %v5302_v27 = vld [vmem:[#allocation5 + $0x13d8] sm:$0xff]  ;;  %v5304_v40 = vld [vmem:[#allocation5 + $0x13e8] sm:$0xff] }
 0x9c1   : > { %v4951_v45 = vpop.f32.mrf.mxu0  ;;  %5474 = vmatpush1.msra.mxu1 %v5231_v62  ;;  %5386 = vmatprep.subr.mxu0 %v5306_v21  ;;  %v5301_v62 = vld [vmem:[#allocation5 + $0x13d0] sm:$0xff]  ;;  %v5262_v55 = vld [vmem:[#allocation5 + $0xc58] sm:$0xff] }
 0x9c2   : > { %v11250_v0 = vsub.f32 %v11173_v63, %v4951_v45  ;;  %5086 = vmatprep.mubr.f32.mxu1 %v4991_v10  ;;  %5475 = vmatprep.subr.mxu1 %v5228_v42  ;;  %v4992_v19 = vmul.f32 %v11247_v29, %v11247_v29  ;;  %v5303_v10 = vld [vmem:[#allocation5 + $0x13e0] sm:$0xff]  ;;  %v5298_v42 = vld [vmem:[#allocation5 + $0x1318] sm:$0xff]  ;;  %v5297_v45 = vld [vmem:[#allocation5 + $0x1310] sm:$0xff] }
 0x9c3   : > { %v4955_v48 = vpop.f32.mrf.mxu0  ;;  %5087 = vmatmul.mubr.f32.gmra.mxu1 %v4990_v56  ;;  %5387 = vmatpush2.msra.mxu0 %v5305_v33  ;;  %v5300_v56 = vld [vmem:[#allocation5 + $0x1328] sm:$0xff]  ;;  %v5261_v21 = vld [vmem:[#allocation5 + $0xc50] sm:$0xff] }
 0x9c4   : > { %v4993_v36 = vmul.f32 %v11250_v0, %v11250_v0  ;;  %5476 = vmatpush1.msra.mxu1 %v5227_v1  ;;  %v11257_v17 = vsub.f32 %v11184_v49, %v4955_v48  ;;  %5388 = vmatprep.subr.mxu0 %v5302_v27  ;;  %v5299_v1 = vld [vmem:[#allocation5 + $0x1320] sm:$0xff]  ;;  %v5296_v48 = vld [vmem:[#allocation5 + $0x1268] sm:$0xff] }
 0x9c5   : > { %v4957_v63 = vpop.f32.mrf.mxu0  ;;  %5477 = vmatprep.subr.mxu1 %v5224_v50  ;;  %5389 = vmatpush2.msra.mxu0 %v5301_v62  ;;  %v5294_v50 = vld [vmem:[#allocation5 + $0x1258] sm:$0xff]  ;;  %v5699_v33 = vld [vmem:[#allocation5 + $0xbc8] sm:$0xff] }
 0x9c6   : > { %v11260_v58 = vsub.f32 %v11181_v39, %v4957_v63  ;;  %5092 = vmatprep.mubr.f32.mxu1 %v4993_v36  ;;  %5478 = vmatpush1.msra.mxu1 %v5223_v37  ;;  %v4994_v49 = vmul.f32 %v11257_v17, %v11257_v17  ;;  %v5293_v37 = vld [vmem:[#allocation5 + $0x1250] sm:$0xff]  ;;  %v5295_v36 = vld [vmem:[#allocation5 + $0x1260] sm:$0xff] }
 0x9c7   : > { %v4961_v14 = vpop.f32.mrf.mxu0  ;;  %5093 = vmatmul.mubr.f32.gmra.mxu1 %v4992_v19  ;;  %5479 = vmatprep.subr.mxu1 %v5220_v35  ;;  %v5290_v35 = vld [vmem:[#allocation5 + $0x1198] sm:$0xff]  ;;  %v5292_v19 = vld [vmem:[#allocation5 + $0x11a8] sm:$0xff]  ;;  %v5289_v63 = vld [vmem:[#allocation5 + $0x1190] sm:$0xff] }
 0x9c8   : > { %v4995_v44 = vmul.f32 %v11260_v58, %v11260_v58  ;;  %5480 = vmatpush1.msra.mxu1 %v5219_v20  ;;  %v11267_v47 = vsub.f32 %v11192_v15, %v4961_v14  ;;  %5390 = vmatprep.subr.mxu0 %v5298_v42  ;;  %v5291_v20 = vld [vmem:[#allocation5 + $0x11a0] sm:$0xff]  ;;  %v5288_v14 = vld [vmem:[#allocation5 + $0x10e8] sm:$0xff] }
 0x9c9   : > { %v4963_v39 = vpop.f32.mrf.mxu0  ;;  %5481 = vmatprep.subr.mxu1 %v5216_v51  ;;  %5391 = vmatpush2.msra.mxu0 %v5297_v45  ;;  %v5286_v51 = vld [vmem:[#allocation5 + $0x10d8] sm:$0xff] }
 0x9ca   : > { %v11270_v57 = vsub.f32 %v11189_v23, %v4963_v39  ;;  %5098 = vmatprep.mubr.f32.mxu1 %v4995_v44  ;;  %5482 = vmatpush1.msra.mxu1 %v5215_v60  ;;  %v4996_v15 = vmul.f32 %v11267_v47, %v11267_v47  ;;  %v5200_v23 = vld [vmem:[#allocation5 + $0x68] sm:$0xff]  ;;  %v5285_v60 = vld [vmem:[#allocation5 + $0x10d0] sm:$0xff]  ;;  %v5287_v44 = vld [vmem:[#allocation5 + $0x10e0] sm:$0xff] }
 0x9cb   : > { %5099 = vmatmul.mubr.f32.gmra.mxu1 %v4994_v49  ;;  %5483 = vmatprep.subr.mxu1 %v5212_v38  ;;  %v5282_v38 = vld [vmem:[#allocation5 + $0x1018] sm:$0xff]  ;;  %v5284_v49 = vld [vmem:[#allocation5 + $0x1028] sm:$0xff]  ;;  %v5281_v39 = vld [vmem:[#allocation5 + $0x1010] sm:$0xff] }
 0x9cc   : > { %v4997_v6 = vmul.f32 %v11270_v57, %v11270_v57  ;;  %5484 = vmatpush1.msra.mxu1 %v5211_v59  ;;  %5392 = vmatprep.subr.mxu0 %v5294_v50  ;;  %v5283_v59 = vld [vmem:[#allocation5 + $0x1020] sm:$0xff] }
 0x9cd   : > { %5485 = vmatprep.subr.mxu1 %v5208_v31  ;;  %5393 = vmatpush2.msra.mxu0 %v5293_v37  ;;  %v5278_v31 = vld [vmem:[#allocation5 + $0xf58] sm:$0xff] }
 0x9ce   : > { %5104 = vmatprep.mubr.f32.mxu1 %v4997_v6  ;;  %5486 = vmatpush1.msra.mxu1 %v5207_v22  ;;  %v5280_v22 = vld [vmem:[#allocation5 + $0xf68] sm:$0xff]  ;;  %v5277_v6 = vld [vmem:[#allocation5 + $0xf50] sm:$0xff] }
 0x9cf   : > { %5105 = vmatmul.mubr.f32.gmra.mxu1 %v4996_v15  ;;  %5487 = vmatprep.subr.mxu1 %v5204_v43  ;;  %v5279_v43 = vld [vmem:[#allocation5 + $0xf60] sm:$0xff]  ;;  %v5274_v15 = vld [vmem:[#allocation5 + $0xe98] sm:$0xff] }
 0x9d0   : > { %5488 = vmatpush1.msra.mxu1 %v5203_v52  ;;  %5394 = vmatprep.subr.mxu0 %v5290_v35  ;;  %v5276_v52 = vld [vmem:[#allocation5 + $0xea8] sm:$0xff] }
 0x9d1   : > { %5489 = vmatprep.subr.mxu1 %v5200_v23  ;;  %5395 = vmatpush2.msra.mxu0 %v5289_v63  ;;  %v5273_v23 = vld [vmem:[#allocation5 + $0xe90] sm:$0xff] }
 0x9d2   : > { %5490 = vmatpush1.msra.mxu1 %v5199_v4  ;;  %5396 = vmatprep.subr.mxu0 %v5286_v51  ;;  %v5275_v4 = vld [vmem:[#allocation5 + $0xea0] sm:$0xff] }
 0x9d3   : > { %5491 = vmatprep.subr.mxu1 %v5324_v32  ;;  %5397 = vmatpush2.msra.mxu0 %v5285_v60  ;;  %v5270_v32 = vld [vmem:[#allocation5 + $0xdd8] sm:$0xff] }
 0x9d4   : > { %5492 = vmatpush2.msra.mxu1 %v5323_v54  ;;  %5398 = vmatprep.subr.mxu0 %v5282_v38  ;;  %v5272_v54 = vld [vmem:[#allocation5 + $0xde8] sm:$0xff] }
 0x9d5   : > { %5493 = vmatprep.subr.mxu1 %v5320_v13  ;;  %5399 = vmatpush2.msra.mxu0 %v5281_v39  ;;  %v5269_v13 = vld [vmem:[#allocation5 + $0xdd0] sm:$0xff]  ;;  %v234_v39 = vld [vmem:[#allocation7 + $0x6] ss:$8 sm:$0x3] }
 0x9d6   : > { %5494 = vmatpush2.msra.mxu1 %v5319_v26  ;;  %5400 = vmatprep.subr.mxu0 %v5278_v31  ;;  %v5271_v26 = vld [vmem:[#allocation5 + $0xde0] sm:$0xff] }
 0x9d7   : > { %5495 = vmatprep.subr.mxu1 %v5316_v46  ;;  %5401 = vmatpush2.msra.mxu0 %v5277_v6  ;;  %v5266_v46 = vld [vmem:[#allocation5 + $0xd18] sm:$0xff] }
 0x9d8   : > { %5496 = vmatpush2.msra.mxu1 %v5315_v7  ;;  %5402 = vmatprep.subr.mxu0 %v5274_v15  ;;  %v5268_v7 = vld [vmem:[#allocation5 + $0xd28] sm:$0xff]  ;;  %v11285_v15 = vrot.slane %v234_v39, %v12501_v41 }
 0x9d9   : > { %5497 = vmatprep.subr.mxu1 %v5312_v9  ;;  %5403 = vmatpush2.msra.mxu0 %v5273_v23  ;;  %v5267_v9 = vld [vmem:[#allocation5 + $0xd20] sm:$0xff] }
 0x9da   : > { %5498 = vmatpush2.msra.mxu1 %v5311_v3  ;;  %5404 = vmatprep.subr.mxu0 %v5270_v32  ;;  %v5264_v3 = vld [vmem:[#allocation5 + $0xc68] sm:$0xff] }
 0x9db   : > { %5499 = vmatprep.subr.mxu1 %v5308_v2  ;;  %5405 = vmatpush2.msra.mxu0 %v5269_v13  ;;  %v5263_v2 = vld [vmem:[#allocation5 + $0xc60] sm:$0xff] }
 0x9dc   : > { %5500 = vmatpush2.msra.mxu1 %v5307_v16  ;;  %5406 = vmatprep.subr.mxu0 %v5266_v46  ;;  %v5635_v16 = vld [vmem:[#allocation5 + $0xbb8] sm:$0xff] }
 0x9dd   : > { %5501 = vmatprep.subr.mxu1 %v5304_v40  ;;  %5407 = vmatpush2.msra.mxu0 %v5265_v61 }
 0x9de   : > { %5502 = vmatpush2.msra.mxu1 %v5303_v10  ;;  %5408 = vmatprep.subr.mxu0 %v5262_v55 }
 0x9df   : > { %5503 = vmatprep.subr.mxu1 %v5300_v56  ;;  %5409 = vmatpush2.msra.mxu0 %v5261_v21 }
 0x9e0   : > { %5504 = vmatpush2.msra.mxu1 %v5299_v1  ;;  %5732 = vmatprep.subr.mxu0 %v5699_v33  ;;  %v5634_v33 = vld [vmem:[#allocation5 + $0xbb0] sm:$0xff] }
 0x9e1   : > { %5505 = vmatprep.subr.mxu1 %v5296_v48 }
 0x9e2   : > { %5506 = vmatpush2.msra.mxu1 %v5295_v36 }
 0x9e3   : > { %5507 = vmatprep.subr.mxu1 %v5292_v19  ;;  %v232_v19 = vld [vmem:[#allocation7 + $0x5] ss:$8 sm:$0x3] }
 0x9e4   : > { %5508 = vmatpush2.msra.mxu1 %v5291_v20  ;;  %v11277_v60 = vrot.slane %v232_v19, %v12500_v28 }
 0x9e5   : > { %5509 = vmatprep.subr.mxu1 %v5288_v14 }
 0x9e6   : > { %5510 = vmatpush2.msra.mxu1 %v5287_v44 }
 0x9e7   : > { %5511 = vmatprep.subr.mxu1 %v5284_v49 }
 0x9e8   : > { %5512 = vmatpush2.msra.mxu1 %v5283_v59  ;;  %v11281_v59 = vrot.slane %v232_v19, %v12501_v41 }
 0x9e9   : > { %5513 = vmatprep.subr.mxu1 %v5280_v22 }
 0x9ea   : > { %5514 = vmatpush2.msra.mxu1 %v5279_v43 }
 0x9eb   : > { %5515 = vmatprep.subr.mxu1 %v5276_v52 }
 0x9ec   : > { %5516 = vmatpush2.msra.mxu1 %v5275_v4 }
 0x9ed   : > { %5517 = vmatprep.subr.mxu1 %v5272_v54 }
 0x9ee   : > { %5518 = vmatpush2.msra.mxu1 %v5271_v26 }
 0x9ef   : > { %5519 = vmatprep.subr.mxu1 %v5268_v7 }
 0x9f0   : > { %5520 = vmatpush2.msra.mxu1 %v5267_v9 }
 0x9f1   : > { %5521 = vmatprep.subr.mxu1 %v5264_v3 }
 0x9f2   : > { %5522 = vmatpush2.msra.mxu1 %v5263_v2  ;;  %v5698_v2 = vld [vmem:[#allocation5 + $0xbc0] sm:$0xff] }
 0x9f3   : > { %5845 = vmatprep.subr.mxu1 %v5635_v16 }
 0xa72   : > { %v5064_v27 = vpop.f32.mrf.mxu1 }
 0xa73   : > { %v5065_v40 = vadd.f32 1e-05, %v5064_v27 }
 0xa74   : > { %v5066_v62 = vpop.f32.mrf.mxu1 }
 0xa75   : > { %7311 = vrsqrt.f32 %v5065_v40  ;;  %v5067_v10 = vadd.f32 1e-05, %v5066_v62  ;;  %v5633_v40 = vld [vmem:[#allocation5 + $0xaf8] sm:$0xff] }
 0xa76   : > { %v5070_v42 = vpop.f32.mrf.mxu1 }
 0xa77   : > { %7313 = vrsqrt.f32 %v5067_v10  ;;  %v5071_v56 = vadd.f32 1e-05, %v5070_v42 }
 0xa78   : > { %v5072_v45 = vpop.f32.mrf.mxu1 }
 0xa79   : > { %7315 = vrsqrt.f32 %v5071_v56  ;;  %v5073_v1 = vadd.f32 1e-05, %v5072_v45 }
 0xa7a   : > { %v5076_v50 = vpop.f32.mrf.mxu1 }
 0xa7b   : > { %7317 = vrsqrt.f32 %v5073_v1  ;;  %v5077_v48 = vadd.f32 1e-05, %v5076_v50 }
 0xa7c   : > { %v5078_v37 = vpop.f32.mrf.mxu1 }
 0xa7d   : > { %7319 = vrsqrt.f32 %v5077_v48  ;;  %v5079_v36 = vadd.f32 1e-05, %v5078_v37  ;;  %v5696_v37 = vld [vmem:[#allocation5 + $0xb00] sm:$0xff] }
 0xa7e   : > { %v5082_v35 = vpop.f32.mrf.mxu1 }
 0xa7f   : > { %7321 = vrsqrt.f32 %v5079_v36  ;;  %v5083_v63 = vadd.f32 1e-05, %v5082_v35  ;;  %v5632_v36 = vld [vmem:[#allocation5 + $0xaf0] sm:$0xff] }
 0xa80   : > { %v5084_v20 = vpop.f32.mrf.mxu1 }
 0xa81   : > { %7323 = vrsqrt.f32 %v5083_v63  ;;  %v5085_v51 = vadd.f32 1e-05, %v5084_v20  ;;  %v5695_v63 = vld [vmem:[#allocation5 + $0xa48] sm:$0xff]  ;;  %v5631_v20 = vld [vmem:[#allocation5 + $0xa38] sm:$0xff] }
 0xa82   : > { %v7312_v14 = vpop.eup %7311 }
 0xa83   : > { %v5088_v44 = vpop.f32.mrf.mxu1  ;;  %v5127_v38 = vmul.f32 %v7312_v14, %v11197_v8  ;;  %7325 = vrsqrt.f32 %v5085_v51  ;;  %v11289_v8 = vrot.slane %v234_v39, %v12500_v28 }
 0xa84   : > { %v5089_v49 = vadd.f32 1e-05, %v5088_v44  ;;  %v7314_v31 = vpop.eup %7313 }
 0xa85   : > { %v5090_v22 = vpop.f32.mrf.mxu1  ;;  %v5128_v43 = vmul.f32 %v7314_v31, %v11200_v53  ;;  %v5154_v23 = vmul.f32 %v11277_v60, %v5127_v38 }
 0xa86   : > { %7327 = vrsqrt.f32 %v5089_v49  ;;  %v5091_v6 = vadd.f32 1e-05, %v5090_v22  ;;  %v7316_v52 = vpop.eup %7315  ;;  %v5694_v22 = vld [vmem:[#allocation5 + $0xa40] sm:$0xff] }
 0xa87   : > { %v5094_v4 = vpop.f32.mrf.mxu1  ;;  %v5155_v54 = vmul.f32 %v11281_v59, %v5128_v43  ;;  %v5129_v46 = vmul.f32 %v7316_v52, %v11207_v34  ;;  %v11298_v3 = vadd.f32 %v11289_v8, %v5154_v23  ;;  %v5693_v52 = vld [vmem:[#allocation5 + $0x988] sm:$0xff]  ;;  %v5629_v23 = vld [vmem:[#allocation5 + $0x978] sm:$0xff] }
 0xa88   : > { %7329 = vrsqrt.f32 %v5091_v6  ;;  %v5095_v32 = vadd.f32 1e-05, %v5094_v4  ;;  %v7318_v13 = vpop.eup %7317  ;;  %v5630_v6 = vld [vmem:[#allocation5 + $0xa30] sm:$0xff] }
 0xa89   : > { %v5096_v26 = vpop.f32.mrf.mxu1  ;;  %v11294_v7 = vadd.f32 %v11285_v15, %v5155_v54  ;;  %v5130_v61 = vmul.f32 %v7318_v13, %v11210_v18  ;;  %v5156_v21 = vmul.f32 %v11277_v60, %v5129_v46  ;;  %v5697_v18 = vld [vmem:[#allocation5 + $0xb08] sm:$0xff]  ;;  %v5692_v46 = vld [vmem:[#allocation5 + $0x980] sm:$0xff] }
 0xa8a   : > { %7331 = vrsqrt.f32 %v5095_v32  ;;  %v5097_v53 = vadd.f32 1e-05, %v5096_v26  ;;  %v7320_v9 = vpop.eup %7319 }
 0xa8b   : > { %v5100_v55 = vpop.f32.mrf.mxu1  ;;  %5410 = vmatprep.mubr.f32.mxu0 %v11294_v7  ;;  %5523 = vmatprep.mubr.f32.mxu1 %v11294_v7  ;;  %v5157_v34 = vmul.f32 %v11281_v59, %v5130_v61  ;;  %v5131_v27 = vmul.f32 %v7320_v9, %v11217_v30  ;;  %v11312_v30 = vadd.f32 %v11289_v8, %v5156_v21  ;;  %v5691_v9 = vld [vmem:[#allocation5 + $0x8c8] sm:$0xff] }
 0xa8c   : > { %7333 = vrsqrt.f32 %v5097_v53  ;;  %v5101_v16 = vadd.f32 1e-05, %v5100_v55  ;;  %v7322_v62 = vpop.eup %7321  ;;  %5411 = vmatmul.mubr.f32.vlgmr.msra.gmra.mxu0 %v11298_v3  ;;  %5524 = vmatmul.mubr.f32.vlgmr.msra.gmra.mxu1 %v11298_v3  ;;  %v5628_v53 = vld [vmem:[#allocation5 + $0x970] sm:$0xff]  ;;  %v5627_v55 = vld [vmem:[#allocation5 + $0x8b8] sm:$0xff] }
 0xa8d   : > { %v5102_v10 = vpop.f32.mrf.mxu1  ;;  %v11308_v56 = vadd.f32 %v11285_v15, %v5157_v34  ;;  %v5132_v45 = vmul.f32 %v7322_v62, %v11220_v11  ;;  %5733 = vmatpush1.msra.mxu0 %v5698_v2  ;;  %5846 = vmatpush1.msra.mxu1 %v5634_v33  ;;  %v5158_v48 = vmul.f32 %v11277_v60, %v5131_v27  ;;  %v5690_v27 = vld [vmem:[#allocation5 + $0x8c0] sm:$0xff]  ;;  %v5689_v62 = vld [vmem:[#allocation5 + $0x808] sm:$0xff] }
 0xa8e   : > { %7335 = vrsqrt.f32 %v5101_v16  ;;  %v5103_v42 = vadd.f32 1e-05, %v5102_v10  ;;  %v7324_v1 = vpop.eup %7323  ;;  %5734 = vmatprep.subr.mxu0 %v5697_v18  ;;  %5847 = vmatprep.subr.mxu1 %v5633_v40  ;;  %v5626_v18 = vld [vmem:[#allocation5 + $0x8b0] sm:$0xff]  ;;  %v5625_v10 = vld [vmem:[#allocation5 + $0x7f8] sm:$0xff] }
 0xa8f   : > { %v5106_v50 = vpop.f32.mrf.mxu1  ;;  %5416 = vmatprep.mubr.f32.mxu0 %v11308_v56  ;;  %5529 = vmatprep.mubr.f32.mxu1 %v11308_v56  ;;  %v5159_v11 = vmul.f32 %v11281_v59, %v5132_v45  ;;  %v5133_v19 = vmul.f32 %v7324_v1, %v11227_v12  ;;  %v11326_v12 = vadd.f32 %v11289_v8, %v5158_v48 }
 0xa90   : > { %7337 = vrsqrt.f32 %v5103_v42  ;;  %v5107_v35 = vadd.f32 1e-05, %v5106_v50  ;;  %v7326_v51 = vpop.eup %7325  ;;  %5417 = vmatmul.mubr.f32.gmra.mxu0 %v11312_v30  ;;  %5530 = vmatmul.mubr.f32.gmra.mxu1 %v11312_v30 }
 0xa91   : > { %v5108_v14 = vpop.f32.mrf.mxu1  ;;  %v11322_v38 = vadd.f32 %v11285_v15, %v5159_v11  ;;  %v5134_v49 = vmul.f32 %v7326_v51, %v11230_v5  ;;  %5735 = vmatpush1.msra.mxu0 %v5696_v37  ;;  %5848 = vmatpush1.msra.mxu1 %v5632_v36  ;;  %v5160_v31 = vmul.f32 %v11277_v60, %v5133_v19  ;;  %v5688_v37 = vld [vmem:[#allocation5 + $0x800] sm:$0xff]  ;;  %v5624_v36 = vld [vmem:[#allocation5 + $0x7f0] sm:$0xff]  ;;  %v5687_v11 = vld [vmem:[#allocation5 + $0x748] sm:$0xff] }
 0xa92   : > { %7339 = vrsqrt.f32 %v5107_v35  ;;  %v5109_v44 = vadd.f32 1e-05, %v5108_v14  ;;  %5736 = vmatprep.subr.mxu0 %v5695_v63  ;;  %5849 = vmatprep.subr.mxu1 %v5631_v20  ;;  %v5623_v19 = vld [vmem:[#allocation5 + $0x738] sm:$0xff] }
 0xa93   : > { %v7328_v39 = vpop.eup %7327  ;;  %5422 = vmatprep.mubr.f32.mxu0 %v11322_v38  ;;  %5535 = vmatprep.mubr.f32.mxu1 %v11322_v38  ;;  %v5161_v43 = vmul.f32 %v11281_v59, %v5134_v49  ;;  %v11340_v26 = vadd.f32 %v11289_v8, %v5160_v31  ;;  %v5622_v49 = vld [vmem:[#allocation5 + $0x730] sm:$0xff]  ;;  %v5685_v31 = vld [vmem:[#allocation5 + $0x688] sm:$0xff] }
 0xa94   : > { %7341 = vrsqrt.f32 %v5109_v44  ;;  %v5135_v5 = vmul.f32 %v7328_v39, %v11237_v24  ;;  %5423 = vmatmul.mubr.f32.gmra.mxu0 %v11326_v12  ;;  %5536 = vmatmul.mubr.f32.gmra.mxu1 %v11326_v12 }
 0xa95   : > { %v7330_v4 = vpop.eup %7329  ;;  %v11336_v32 = vadd.f32 %v11285_v15, %v5161_v43  ;;  %5737 = vmatpush1.msra.mxu0 %v5694_v22  ;;  %5850 = vmatpush1.msra.mxu1 %v5630_v6  ;;  %v5621_v22 = vld [vmem:[#allocation5 + $0x678] sm:$0xff]  ;;  %v5684_v6 = vld [vmem:[#allocation5 + $0x680] sm:$0xff]  ;;  %v5620_v43 = vld [vmem:[#allocation5 + $0x670] sm:$0xff] }
 0xa96   : > { %v5136_v54 = vmul.f32 %v7330_v4, %v11240_v25  ;;  %v5162_v24 = vmul.f32 %v11277_v60, %v5135_v5  ;;  %5738 = vmatprep.subr.mxu0 %v5693_v52  ;;  %5851 = vmatprep.subr.mxu1 %v5629_v23  ;;  %v5619_v5 = vld [vmem:[#allocation5 + $0x5b8] sm:$0xff]  ;;  %v5618_v52 = vld [vmem:[#allocation5 + $0x5b0] sm:$0xff]  ;;  %v5680_v4 = vld [vmem:[#allocation5 + $0x500] sm:$0xff] }
 0xa97   : > { %v7332_v13 = vpop.eup %7331  ;;  %5428 = vmatprep.mubr.f32.mxu0 %v11336_v32  ;;  %5541 = vmatprep.mubr.f32.mxu1 %v11336_v32  ;;  %v5617_v23 = vld [vmem:[#allocation5 + $0x4f8] sm:$0xff] }
 0xa98   : > { %v5163_v61 = vmul.f32 %v11281_v59, %v5136_v54  ;;  %v5137_v25 = vmul.f32 %v7332_v13, %v11247_v29  ;;  %5429 = vmatmul.mubr.f32.gmra.mxu0 %v11340_v26  ;;  %5542 = vmatmul.mubr.f32.gmra.mxu1 %v11340_v26  ;;  %v11354_v34 = vadd.f32 %v11289_v8, %v5162_v24  ;;  %v5616_v54 = vld [vmem:[#allocation5 + $0x4f0] sm:$0xff]  ;;  %v5679_v13 = vld [vmem:[#allocation5 + $0x448] sm:$0xff]  ;;  %v5615_v24 = vld [vmem:[#allocation5 + $0x438] sm:$0xff] }
 0xa99   : > { %v7334_v21 = vpop.eup %7333  ;;  %5739 = vmatpush1.msra.mxu0 %v5692_v46  ;;  %5852 = vmatpush1.msra.mxu1 %v5628_v53  ;;  %v5678_v46 = vld [vmem:[#allocation5 + $0x440] sm:$0xff]  ;;  %v5614_v53 = vld [vmem:[#allocation5 + $0x430] sm:$0xff] }
 0xa9a   : > { %v11350_v2 = vadd.f32 %v11285_v15, %v5163_v61  ;;  %v5138_v33 = vmul.f32 %v7334_v21, %v11250_v0  ;;  %v5164_v29 = vmul.f32 %v11277_v60, %v5137_v25  ;;  %5740 = vmatprep.subr.mxu0 %v5691_v9  ;;  %5853 = vmatprep.subr.mxu1 %v5627_v55  ;;  %v5677_v61 = vld [vmem:[#allocation5 + $0x388] sm:$0xff]  ;;  %v5613_v25 = vld [vmem:[#allocation5 + $0x378] sm:$0xff]  ;;  %v5676_v9 = vld [vmem:[#allocation5 + $0x380] sm:$0xff] }
 0xa9b   : > { %v7336_v16 = vpop.eup %7335  ;;  %5741 = vmatpush1.msra.mxu0 %v5690_v27  ;;  %5854 = vmatpush1.msra.mxu1 %v5626_v18  ;;  %v5612_v55 = vld [vmem:[#allocation5 + $0x370] sm:$0xff]  ;;  %v5675_v21 = vld [vmem:[#allocation5 + $0x2c8] sm:$0xff]  ;;  %v5609_v18 = vld [vmem:[#allocation5 + $0x1f8] sm:$0xff] }
 0xa9c   : > { %5434 = vmatprep.mubr.f32.mxu0 %v11350_v2  ;;  %5547 = vmatprep.mubr.f32.mxu1 %v11350_v2  ;;  %v5165_v40 = vmul.f32 %v11281_v59, %v5138_v33  ;;  %v5139_v0 = vmul.f32 %v7336_v16, %v11257_v17  ;;  %v11368_v48 = vadd.f32 %v11289_v8, %v5164_v29  ;;  %v5611_v33 = vld [vmem:[#allocation5 + $0x2b8] sm:$0xff]  ;;  %v5674_v16 = vld [vmem:[#allocation5 + $0x2c0] sm:$0xff]  ;;  %v5610_v29 = vld [vmem:[#allocation5 + $0x2b0] sm:$0xff] }
 0xa9d   : > { %v7338_v42 = vpop.eup %7337  ;;  %5435 = vmatmul.mubr.f32.gmra.mxu0 %v11354_v34  ;;  %5548 = vmatmul.mubr.f32.gmra.mxu1 %v11354_v34  ;;  %v5673_v27 = vld [vmem:[#allocation5 + $0x208] sm:$0xff] }
 0xa9e   : > { %v11364_v45 = vadd.f32 %v11285_v15, %v5165_v40  ;;  %v5140_v1 = vmul.f32 %v7338_v42, %v11260_v58  ;;  %v5166_v17 = vmul.f32 %v11277_v60, %v5139_v0  ;;  %5742 = vmatprep.subr.mxu0 %v5689_v62  ;;  %5855 = vmatprep.subr.mxu1 %v5625_v10  ;;  %v5672_v40 = vld [vmem:[#allocation5 + $0x200] sm:$0xff]  ;;  %v5608_v0 = vld [vmem:[#allocation5 + $0x1f0] sm:$0xff]  ;;  %v5671_v62 = vld [vmem:[#allocation5 + $0x148] sm:$0xff] }
 0xa9f   : > { %v7340_v50 = vpop.eup %7339  ;;  %5743 = vmatpush1.msra.mxu0 %v5688_v37  ;;  %5856 = vmatpush1.msra.mxu1 %v5624_v36  ;;  %v5607_v10 = vld [vmem:[#allocation5 + $0x138] sm:$0xff]  ;;  %v5670_v42 = vld [vmem:[#allocation5 + $0x140] sm:$0xff]  ;;  %v5604_v36 = vld [vmem:[#allocation5 + $0x70] sm:$0xff] }
 0xaa0   : > { %5440 = vmatprep.mubr.f32.mxu0 %v11364_v45  ;;  %5553 = vmatprep.mubr.f32.mxu1 %v11364_v45  ;;  %v5167_v35 = vmul.f32 %v11281_v59, %v5140_v1  ;;  %v5141_v58 = vmul.f32 %v7340_v50, %v11267_v47  ;;  %v11382_v14 = vadd.f32 %v11289_v8, %v5166_v17  ;;  %v5686_v47 = vld [vmem:[#allocation5 + $0x740] sm:$0xff]  ;;  %v5606_v1 = vld [vmem:[#allocation5 + $0x130] sm:$0xff]  ;;  %v5669_v50 = vld [vmem:[#allocation5 + $0x88] sm:$0xff] }
 0xaa1   : > { %v7342_v63 = vpop.eup %7341  ;;  %5441 = vmatmul.mubr.f32.gmra.mxu0 %v11368_v48  ;;  %5554 = vmatmul.mubr.f32.gmra.mxu1 %v11368_v48  ;;  %v5605_v17 = vld [vmem:[#allocation5 + $0x78] sm:$0xff]  ;;  %v5668_v37 = vld [vmem:[#allocation5 + $0x80] sm:$0xff] }
 0xaa2   : > { %v11378_v20 = vadd.f32 %v11285_v15, %v5167_v35  ;;  %v5142_v51 = vmul.f32 %v7342_v63, %v11270_v57  ;;  %v5168_v44 = vmul.f32 %v11277_v60, %v5141_v58  ;;  %5744 = vmatprep.subr.mxu0 %v5687_v11  ;;  %5857 = vmatprep.subr.mxu1 %v5623_v19  ;;  %v5731_v35 = vld [vmem:[#allocation5 + $0x17c8] sm:$0xff]  ;;  %v5667_v58 = vld [vmem:[#allocation5 + $0x17b8] sm:$0xff]  ;;  %v5730_v11 = vld [vmem:[#allocation5 + $0x17c0] sm:$0xff] }
 0xaa3   : > { %5745 = vmatpush1.msra.mxu0 %v5686_v47  ;;  %5858 = vmatpush1.msra.mxu1 %v5622_v49  ;;  %v5666_v19 = vld [vmem:[#allocation5 + $0x17b0] sm:$0xff]  ;;  %v5729_v63 = vld [vmem:[#allocation5 + $0x1708] sm:$0xff] }
 0xaa4   : > { %5446 = vmatprep.mubr.f32.mxu0 %v11378_v20  ;;  %5559 = vmatprep.mubr.f32.mxu1 %v11378_v20  ;;  %v5169_v39 = vmul.f32 %v11281_v59, %v5142_v51  ;;  %v11394_v60 = vadd.f32 %v11289_v8, %v5168_v44  ;;  %v5683_v59 = vld [vmem:[#allocation5 + $0x5c8] sm:$0xff]  ;;  %v5665_v51 = vld [vmem:[#allocation5 + $0x16f8] sm:$0xff]  ;;  %v5728_v44 = vld [vmem:[#allocation5 + $0x1700] sm:$0xff] }
 0xaa5   : > { %5447 = vmatmul.mubr.f32.gmra.mxu0 %v11382_v14  ;;  %5560 = vmatmul.mubr.f32.gmra.mxu1 %v11382_v14  ;;  %v5681_v8 = vld [vmem:[#allocation5 + $0x508] sm:$0xff]  ;;  %v5664_v47 = vld [vmem:[#allocation5 + $0x16f0] sm:$0xff] }
 0xaa6   : > { %v11391_v57 = vadd.f32 %v11285_v15, %v5169_v39  ;;  %5746 = vmatprep.subr.mxu0 %v5685_v31  ;;  %5859 = vmatprep.subr.mxu1 %v5621_v22  ;;  %v5682_v15 = vld [vmem:[#allocation5 + $0x5c0] sm:$0xff]  ;;  %v5727_v49 = vld [vmem:[#allocation5 + $0x1648] sm:$0xff]  ;;  %v5663_v39 = vld [vmem:[#allocation5 + $0x1638] sm:$0xff] }
 0xaa7   : > { %5747 = vmatpush1.msra.mxu0 %v5684_v6  ;;  %5860 = vmatpush1.msra.mxu1 %v5620_v43  ;;  %v5726_v31 = vld [vmem:[#allocation5 + $0x1640] sm:$0xff]  ;;  %v5662_v22 = vld [vmem:[#allocation5 + $0x1630] sm:$0xff]  ;;  %v5725_v6 = vld [vmem:[#allocation5 + $0x1588] sm:$0xff] }
 0xaa8   : > { %5452 = vmatprep.mubr.f32.mxu0 %v11391_v57  ;;  %5565 = vmatprep.mubr.f32.mxu1 %v11391_v57  ;;  %v5661_v43 = vld [vmem:[#allocation5 + $0x1578] sm:$0xff] }
 0xaa9   : > { %5453 = vmatmul.mubr.f32.gmra.mxu0 %v11394_v60  ;;  %5566 = vmatmul.mubr.f32.gmra.mxu1 %v11394_v60 }
 0xaaa   : > { %5748 = vmatprep.subr.mxu0 %v5683_v59  ;;  %5861 = vmatprep.subr.mxu1 %v5619_v5  ;;  %v5724_v59 = vld [vmem:[#allocation5 + $0x1580] sm:$0xff]  ;;  %v5660_v5 = vld [vmem:[#allocation5 + $0x1570] sm:$0xff] }
 0xaab   : > { %5749 = vmatpush1.msra.mxu0 %v5682_v15  ;;  %5862 = vmatpush1.msra.mxu1 %v5618_v52  ;;  %v5723_v15 = vld [vmem:[#allocation5 + $0x14c8] sm:$0xff]  ;;  %v5659_v52 = vld [vmem:[#allocation5 + $0x14b8] sm:$0xff] }
 0xaac   : > { %5750 = vmatprep.subr.mxu0 %v5681_v8  ;;  %5863 = vmatprep.subr.mxu1 %v5617_v23  ;;  %v5722_v8 = vld [vmem:[#allocation5 + $0x14c0] sm:$0xff]  ;;  %v5658_v23 = vld [vmem:[#allocation5 + $0x14b0] sm:$0xff] }
 0xaad   : > { %5751 = vmatpush1.msra.mxu0 %v5680_v4  ;;  %5864 = vmatpush1.msra.mxu1 %v5616_v54  ;;  %v5721_v4 = vld [vmem:[#allocation5 + $0x1408] sm:$0xff]  ;;  %v5657_v54 = vld [vmem:[#allocation5 + $0x13f8] sm:$0xff] }
 0xaae   : > { %5752 = vmatprep.subr.mxu0 %v5679_v13  ;;  %5865 = vmatprep.subr.mxu1 %v5615_v24  ;;  %v5720_v13 = vld [vmem:[#allocation5 + $0x1400] sm:$0xff]  ;;  %v5656_v24 = vld [vmem:[#allocation5 + $0x13f0] sm:$0xff] }
 0xaaf   : > { %5753 = vmatpush1.msra.mxu0 %v5678_v46  ;;  %5866 = vmatpush1.msra.mxu1 %v5614_v53  ;;  %v5719_v46 = vld [vmem:[#allocation5 + $0x1348] sm:$0xff]  ;;  %v5655_v53 = vld [vmem:[#allocation5 + $0x1338] sm:$0xff] }
 0xab0   : > { %5754 = vmatprep.subr.mxu0 %v5677_v61  ;;  %5867 = vmatprep.subr.mxu1 %v5613_v25  ;;  %v5718_v61 = vld [vmem:[#allocation5 + $0x1340] sm:$0xff]  ;;  %v5654_v25 = vld [vmem:[#allocation5 + $0x1330] sm:$0xff] }
 0xab1   : > { %5755 = vmatpush1.msra.mxu0 %v5676_v9  ;;  %5868 = vmatpush1.msra.mxu1 %v5612_v55  ;;  %v5717_v9 = vld [vmem:[#allocation5 + $0x1288] sm:$0xff]  ;;  %v5653_v55 = vld [vmem:[#allocation5 + $0x1278] sm:$0xff] }
 0xab2   : > { %5756 = vmatprep.subr.mxu0 %v5675_v21  ;;  %5869 = vmatprep.subr.mxu1 %v5611_v33  ;;  %v5716_v21 = vld [vmem:[#allocation5 + $0x1280] sm:$0xff]  ;;  %v5652_v33 = vld [vmem:[#allocation5 + $0x1270] sm:$0xff] }
 0xab3   : > { %5757 = vmatpush1.msra.mxu0 %v5674_v16  ;;  %5870 = vmatpush1.msra.mxu1 %v5610_v29  ;;  %v5715_v16 = vld [vmem:[#allocation5 + $0x11c8] sm:$0xff]  ;;  %v5651_v29 = vld [vmem:[#allocation5 + $0x11b8] sm:$0xff] }
 0xab4   : > { %5758 = vmatprep.subr.mxu0 %v5673_v27  ;;  %5871 = vmatprep.subr.mxu1 %v5609_v18  ;;  %v5714_v27 = vld [vmem:[#allocation5 + $0x11c0] sm:$0xff]  ;;  %v5650_v18 = vld [vmem:[#allocation5 + $0x11b0] sm:$0xff] }
 0xab5   : > { %5759 = vmatpush1.msra.mxu0 %v5672_v40  ;;  %5872 = vmatpush1.msra.mxu1 %v5608_v0  ;;  %v5713_v40 = vld [vmem:[#allocation5 + $0x1108] sm:$0xff]  ;;  %v5649_v0 = vld [vmem:[#allocation5 + $0x10f8] sm:$0xff] }
 0xab6   : > { %5760 = vmatprep.subr.mxu0 %v5671_v62  ;;  %5873 = vmatprep.subr.mxu1 %v5607_v10  ;;  %v5712_v62 = vld [vmem:[#allocation5 + $0x1100] sm:$0xff]  ;;  %v5648_v10 = vld [vmem:[#allocation5 + $0x10f0] sm:$0xff] }
 0xab7   : > { %5761 = vmatpush1.msra.mxu0 %v5670_v42  ;;  %5874 = vmatpush1.msra.mxu1 %v5606_v1  ;;  %v5711_v42 = vld [vmem:[#allocation5 + $0x1048] sm:$0xff]  ;;  %v5647_v1 = vld [vmem:[#allocation5 + $0x1038] sm:$0xff] }
 0xab8   : > { %5762 = vmatprep.subr.mxu0 %v5669_v50  ;;  %5875 = vmatprep.subr.mxu1 %v5605_v17  ;;  %v5710_v50 = vld [vmem:[#allocation5 + $0x1040] sm:$0xff]  ;;  %v5646_v17 = vld [vmem:[#allocation5 + $0x1030] sm:$0xff] }
 0xab9   : > { %5763 = vmatpush1.msra.mxu0 %v5668_v37  ;;  %5876 = vmatpush1.msra.mxu1 %v5604_v36  ;;  %v5709_v37 = vld [vmem:[#allocation5 + $0xf88] sm:$0xff]  ;;  %v5645_v36 = vld [vmem:[#allocation5 + $0xf78] sm:$0xff] }
 0xaba   : > { %5764 = vmatprep.subr.mxu0 %v5731_v35  ;;  %5877 = vmatprep.subr.mxu1 %v5667_v58  ;;  %v5708_v35 = vld [vmem:[#allocation5 + $0xf80] sm:$0xff]  ;;  %v5644_v58 = vld [vmem:[#allocation5 + $0xf70] sm:$0xff] }
 0xabb   : > { %5765 = vmatpush2.msra.mxu0 %v5730_v11  ;;  %5878 = vmatpush2.msra.mxu1 %v5666_v19  ;;  %v5707_v11 = vld [vmem:[#allocation5 + $0xec8] sm:$0xff]  ;;  %v5643_v19 = vld [vmem:[#allocation5 + $0xeb8] sm:$0xff] }
 0xabc   : > { %5766 = vmatprep.subr.mxu0 %v5729_v63  ;;  %5879 = vmatprep.subr.mxu1 %v5665_v51  ;;  %v5706_v63 = vld [vmem:[#allocation5 + $0xec0] sm:$0xff]  ;;  %v5642_v51 = vld [vmem:[#allocation5 + $0xeb0] sm:$0xff] }
 0xabd   : > { %5767 = vmatpush2.msra.mxu0 %v5728_v44  ;;  %5880 = vmatpush2.msra.mxu1 %v5664_v47  ;;  %v5705_v44 = vld [vmem:[#allocation5 + $0xe08] sm:$0xff]  ;;  %v5641_v47 = vld [vmem:[#allocation5 + $0xdf8] sm:$0xff] }
 0xabe   : > { %5768 = vmatprep.subr.mxu0 %v5727_v49  ;;  %5881 = vmatprep.subr.mxu1 %v5663_v39  ;;  %v5704_v49 = vld [vmem:[#allocation5 + $0xe00] sm:$0xff]  ;;  %v5640_v39 = vld [vmem:[#allocation5 + $0xdf0] sm:$0xff] }
 0xabf   : > { %5769 = vmatpush2.msra.mxu0 %v5726_v31  ;;  %5882 = vmatpush2.msra.mxu1 %v5662_v22  ;;  %v5703_v31 = vld [vmem:[#allocation5 + $0xd48] sm:$0xff]  ;;  %v5639_v22 = vld [vmem:[#allocation5 + $0xd38] sm:$0xff] }
 0xac0   : > { %5770 = vmatprep.subr.mxu0 %v5725_v6  ;;  %5883 = vmatprep.subr.mxu1 %v5661_v43  ;;  %v5702_v6 = vld [vmem:[#allocation5 + $0xd40] sm:$0xff]  ;;  %v5638_v43 = vld [vmem:[#allocation5 + $0xd30] sm:$0xff] }
 0xac1   : > { %5771 = vmatpush2.msra.mxu0 %v5724_v59  ;;  %5884 = vmatpush2.msra.mxu1 %v5660_v5  ;;  %v5701_v59 = vld [vmem:[#allocation5 + $0xc88] sm:$0xff]  ;;  %v5637_v5 = vld [vmem:[#allocation5 + $0xc78] sm:$0xff] }
 0xac2   : > { %5772 = vmatprep.subr.mxu0 %v5723_v15  ;;  %5885 = vmatprep.subr.mxu1 %v5659_v52  ;;  %v5700_v15 = vld [vmem:[#allocation5 + $0xc80] sm:$0xff]  ;;  %v5636_v52 = vld [vmem:[#allocation5 + $0xc70] sm:$0xff] }
 0xac3   : > { %5773 = vmatpush2.msra.mxu0 %v5722_v8  ;;  %5886 = vmatpush2.msra.mxu1 %v5658_v23  ;;  %v7407_v8 = vld [vmem:[#allocation5 + $0xbe0] sm:$0xff] }
 0xac4   : > { %5774 = vmatprep.subr.mxu0 %v5721_v4  ;;  %5887 = vmatprep.subr.mxu1 %v5657_v54  ;;  %v228_v23 = vld [vmem:[#allocation7 + $0x3] ss:$8 sm:$0xf] }
 0xac5   : > { %5775 = vmatpush2.msra.mxu0 %v5720_v13  ;;  %5888 = vmatpush2.msra.mxu1 %v5656_v24  ;;  %v11401_v4 = vrot.slane %v228_v23, %v12500_v28  ;;  %v12518_v54 = vld [vmem:[#allocation12_spill] sm:$0xff] }
 0xac6   : > { %5776 = vmatprep.subr.mxu0 %v5719_v46  ;;  %5889 = vmatprep.subr.mxu1 %v5655_v53  ;;  %v12519_v13 = vsub.s32 2, %v12518_v54  ;;  %v11408_v46 = vrot.slane %v228_v23, %v12501_v41  ;;  %v12520_v53 = vsub.s32 3, %v12518_v54 }
 0xac7   : > { %5777 = vmatpush2.msra.mxu0 %v5718_v61  ;;  %5890 = vmatpush2.msra.mxu1 %v5654_v25 }
 0xac8   : > { %5778 = vmatprep.subr.mxu0 %v5717_v9  ;;  %5891 = vmatprep.subr.mxu1 %v5653_v55  ;;  %v11405_v24 = vrot.slane %v228_v23, %v12519_v13  ;;  %v11412_v61 = vrot.slane %v228_v23, %v12520_v53  ;;  %v7410_v23 = vld [vmem:[#allocation5 + $0xb18] sm:$0xff] }
 0xac9   : > { %5779 = vmatpush2.msra.mxu0 %v5716_v21  ;;  %5892 = vmatpush2.msra.mxu1 %v5652_v33 }
 0xaca   : > { %5780 = vmatprep.subr.mxu0 %v5715_v16  ;;  %5893 = vmatprep.subr.mxu1 %v5651_v29 }
 0xacb   : > { %5781 = vmatpush2.msra.mxu0 %v5714_v27  ;;  %5894 = vmatpush2.msra.mxu1 %v5650_v18 }
 0xacc   : > { %5782 = vmatprep.subr.mxu0 %v5713_v40  ;;  %5895 = vmatprep.subr.mxu1 %v5649_v0 }
 0xacd   : > { %5783 = vmatpush2.msra.mxu0 %v5712_v62  ;;  %5896 = vmatpush2.msra.mxu1 %v5648_v10 }
 0xace   : > { %5784 = vmatprep.subr.mxu0 %v5711_v42  ;;  %5897 = vmatprep.subr.mxu1 %v5647_v1 }
 0xacf   : > { %5785 = vmatpush2.msra.mxu0 %v5710_v50  ;;  %5898 = vmatpush2.msra.mxu1 %v5646_v17 }
 0xad0   : > { %5786 = vmatprep.subr.mxu0 %v5709_v37  ;;  %5899 = vmatprep.subr.mxu1 %v5645_v36 }
 0xad1   : > { %5787 = vmatpush2.msra.mxu0 %v5708_v35  ;;  %5900 = vmatpush2.msra.mxu1 %v5644_v58 }
 0xad2   : > { %5788 = vmatprep.subr.mxu0 %v5707_v11  ;;  %5901 = vmatprep.subr.mxu1 %v5643_v19 }
 0xad3   : > { %5789 = vmatpush2.msra.mxu0 %v5706_v63  ;;  %5902 = vmatpush2.msra.mxu1 %v5642_v51  ;;  %v7408_v51 = vld [vmem:[#allocation5 + $0xbd8] sm:$0xff] }
 0xad4   : > { %5790 = vmatprep.subr.mxu0 %v5705_v44  ;;  %5903 = vmatprep.subr.mxu1 %v5641_v47 }
 0xad5   : > { %5791 = vmatpush2.msra.mxu0 %v5704_v49  ;;  %5904 = vmatpush2.msra.mxu1 %v5640_v39 }
 0xad6   : > { %5792 = vmatprep.subr.mxu0 %v5703_v31  ;;  %5905 = vmatprep.subr.mxu1 %v5639_v22 }
 0xad7   : > { %5793 = vmatpush2.msra.mxu0 %v5702_v6  ;;  %5906 = vmatpush2.msra.mxu1 %v5638_v43  ;;  %v7409_v6 = vld [vmem:[#allocation5 + $0xb20] sm:$0xff] }
 0xad8   : > { %5794 = vmatprep.subr.mxu0 %v5701_v59  ;;  %5907 = vmatprep.subr.mxu1 %v5637_v5 }
 0xad9   : > { %5795 = vmatpush2.msra.mxu0 %v5700_v15  ;;  %5908 = vmatpush2.msra.mxu1 %v5636_v52 }
 0xada   : > { %6001 = vmatprep.subr.mxu0 %v7407_v8  ;;  %6146 = vmatprep.subr.mxu1 %v7407_v8 }
 0xb4c   : > { %v5412_v25 = vpop.f32.mrf.mxu0  ;;  %v5525_v9 = vpop.f32.mrf.mxu1 }
 0xb4d   : > { %v5413_v55 = vadd.f32 %v5412_v25, %v11401_v4  ;;  %v5526_v21 = vadd.f32 %v5525_v9, %v11405_v24 }
 0xb4e   : > { %v5414_v33 = vpop.f32.mrf.mxu0  ;;  %v5527_v16 = vpop.f32.mrf.mxu1 }
 0xb4f   : > { %v5415_v29 = vadd.f32 %v5414_v33, %v11408_v46  ;;  %v5528_v27 = vadd.f32 %v5527_v16, %v11412_v61  ;;  %v5572_v10 = vmax.f32 %v5413_v55, 0.0  ;;  %v5574_v42 = vmax.f32 %v5526_v21, 0.0  ;;  %v7411_v21 = vld [vmem:[#allocation5 + $0xa60] sm:$0xff] }
 0xb50   : > { %v5418_v18 = vpop.f32.mrf.mxu0  ;;  %v5531_v40 = vpop.f32.mrf.mxu1 }
 0xb51   : > { %v5573_v0 = vmax.f32 %v5415_v29, 0.0  ;;  %v5575_v62 = vmax.f32 %v5528_v27, 0.0  ;;  %v5419_v1 = vadd.f32 %v5418_v18, %v11401_v4  ;;  %v5532_v50 = vadd.f32 %v5531_v40, %v11405_v24 }
 0xb52   : > { %v5420_v17 = vpop.f32.mrf.mxu0  ;;  %v5533_v37 = vpop.f32.mrf.mxu1 }
 0xb53   : > { %v5421_v36 = vadd.f32 %v5420_v17, %v11408_v46  ;;  %v5534_v35 = vadd.f32 %v5533_v37, %v11412_v61  ;;  %5796 = vmatprep.mubr.f32.mxu0 %v5575_v62  ;;  %5909 = vmatprep.mubr.f32.mxu1 %v5573_v0  ;;  %v5576_v44 = vmax.f32 %v5419_v1, 0.0  ;;  %v5578_v47 = vmax.f32 %v5532_v50, 0.0  ;;  %v7412_v0 = vld [vmem:[#allocation5 + $0xa58] sm:$0xff]  ;;  %v7413_v37 = vld [vmem:[#allocation5 + $0x9a0] sm:$0xff] }
 0xb54   : > { %v5424_v58 = vpop.f32.mrf.mxu0  ;;  %v5537_v11 = vpop.f32.mrf.mxu1  ;;  %5797 = vmatmul.mubr.f32.vlgmr.msra.gmra.mxu0 %v5574_v42  ;;  %5910 = vmatmul.mubr.f32.vlgmr.msra.gmra.mxu1 %v5572_v10 }
 0xb55   : > { %v5577_v19 = vmax.f32 %v5421_v36, 0.0  ;;  %v5579_v63 = vmax.f32 %v5534_v35, 0.0  ;;  %6002 = vmatpush1.msra.mxu0 %v7408_v51  ;;  %6147 = vmatpush1.msra.mxu1 %v7408_v51  ;;  %v5425_v49 = vadd.f32 %v5424_v58, %v11401_v4  ;;  %v5538_v39 = vadd.f32 %v5537_v11, %v11405_v24  ;;  %v7414_v51 = vld [vmem:[#allocation5 + $0x998] sm:$0xff] }
 0xb56   : > { %v5426_v31 = vpop.f32.mrf.mxu0  ;;  %v5539_v22 = vpop.f32.mrf.mxu1  ;;  %6003 = vmatprep.subr.mxu0 %v7409_v6  ;;  %6148 = vmatprep.subr.mxu1 %v7409_v6  ;;  %v7415_v6 = vld [vmem:[#allocation5 + $0x8e0] sm:$0xff] }
 0xb57   : > { %v5427_v43 = vadd.f32 %v5426_v31, %v11408_v46  ;;  %v5540_v59 = vadd.f32 %v5539_v22, %v11412_v61  ;;  %5802 = vmatprep.mubr.f32.mxu0 %v5579_v63  ;;  %5915 = vmatprep.mubr.f32.mxu1 %v5577_v19  ;;  %v5580_v54 = vmax.f32 %v5425_v49, 0.0  ;;  %v5582_v13 = vmax.f32 %v5538_v39, 0.0 }
 0xb58   : > { %v5430_v5 = vpop.f32.mrf.mxu0  ;;  %v5543_v15 = vpop.f32.mrf.mxu1  ;;  %5803 = vmatmul.mubr.f32.gmra.mxu0 %v5578_v47  ;;  %5916 = vmatmul.mubr.f32.gmra.mxu1 %v5576_v44 }
 0xb59   : > { %v5581_v52 = vmax.f32 %v5427_v43, 0.0  ;;  %v5583_v8 = vmax.f32 %v5540_v59, 0.0  ;;  %6004 = vmatpush1.msra.mxu0 %v7410_v23  ;;  %6149 = vmatpush1.msra.mxu1 %v7410_v23  ;;  %v5431_v53 = vadd.f32 %v5430_v5, %v11401_v4  ;;  %v5544_v25 = vadd.f32 %v5543_v15, %v11405_v24  ;;  %v7416_v23 = vld [vmem:[#allocation5 + $0x8d8] sm:$0xff] }
 0xb5a   : > { %v5432_v9 = vpop.f32.mrf.mxu0  ;;  %v5545_v55 = vpop.f32.mrf.mxu1  ;;  %6005 = vmatprep.subr.mxu0 %v7411_v21  ;;  %6150 = vmatprep.subr.mxu1 %v7411_v21  ;;  %v7417_v21 = vld [vmem:[#allocation5 + $0x820] sm:$0xff] }
 0xb5b   : > { %v5433_v33 = vadd.f32 %v5432_v9, %v11408_v46  ;;  %v5546_v16 = vadd.f32 %v5545_v55, %v11412_v61  ;;  %5808 = vmatprep.mubr.f32.mxu0 %v5583_v8  ;;  %5921 = vmatprep.mubr.f32.mxu1 %v5581_v52  ;;  %v5584_v62 = vmax.f32 %v5431_v53, 0.0  ;;  %v5586_v10 = vmax.f32 %v5544_v25, 0.0 }
 0xb5c   : > { %5809 = vmatmul.mubr.f32.gmra.mxu0 %v5582_v13  ;;  %5922 = vmatmul.mubr.f32.gmra.mxu1 %v5580_v54 }
 0xb5d   : > { %v5436_v29 = vpop.f32.mrf.mxu0  ;;  %v5549_v27 = vpop.f32.mrf.mxu1  ;;  %v5585_v18 = vmax.f32 %v5433_v33, 0.0  ;;  %v5587_v40 = vmax.f32 %v5546_v16, 0.0  ;;  %6006 = vmatpush1.msra.mxu0 %v7412_v0  ;;  %6151 = vmatpush1.msra.mxu1 %v7412_v0  ;;  %v7418_v0 = vld [vmem:[#allocation5 + $0x818] sm:$0xff] }
 0xb5e   : > { %v5437_v42 = vadd.f32 %v5436_v29, %v11401_v4  ;;  %v5550_v1 = vadd.f32 %v5549_v27, %v11405_v24  ;;  %6007 = vmatprep.subr.mxu0 %v7413_v37  ;;  %6152 = vmatprep.subr.mxu1 %v7413_v37  ;;  %v7419_v37 = vld [vmem:[#allocation5 + $0x760] sm:$0xff] }
 0xb5f   : > { %v5438_v50 = vpop.f32.mrf.mxu0  ;;  %v5551_v17 = vpop.f32.mrf.mxu1  ;;  %5814 = vmatprep.mubr.f32.mxu0 %v5587_v40  ;;  %5927 = vmatprep.mubr.f32.mxu1 %v5585_v18 }
 0xb60   : > { %v5439_v36 = vadd.f32 %v5438_v50, %v11408_v46  ;;  %v5552_v35 = vadd.f32 %v5551_v17, %v11412_v61  ;;  %5815 = vmatmul.mubr.f32.gmra.mxu0 %v5586_v10  ;;  %5928 = vmatmul.mubr.f32.gmra.mxu1 %v5584_v62  ;;  %v5588_v44 = vmax.f32 %v5437_v42, 0.0  ;;  %v5590_v47 = vmax.f32 %v5550_v1, 0.0 }
 0xb61   : > { %v5442_v58 = vpop.f32.mrf.mxu0  ;;  %v5555_v11 = vpop.f32.mrf.mxu1  ;;  %6008 = vmatpush1.msra.mxu0 %v7414_v51  ;;  %6153 = vmatpush1.msra.mxu1 %v7414_v51  ;;  %v7424_v51 = vld [vmem:[#allocation5 + $0x5d8] sm:$0xff] }
 0xb62   : > { %v5589_v19 = vmax.f32 %v5439_v36, 0.0  ;;  %v5591_v63 = vmax.f32 %v5552_v35, 0.0  ;;  %v5443_v49 = vadd.f32 %v5442_v58, %v11401_v4  ;;  %v5556_v39 = vadd.f32 %v5555_v11, %v11405_v24  ;;  %6009 = vmatprep.subr.mxu0 %v7415_v6  ;;  %6154 = vmatprep.subr.mxu1 %v7415_v6  ;;  %v7431_v6 = vld [vmem:[#allocation5 + $0x2e0] sm:$0xff] }
 0xb63   : > { %v5444_v31 = vpop.f32.mrf.mxu0  ;;  %v5557_v22 = vpop.f32.mrf.mxu1  ;;  %6010 = vmatpush1.msra.mxu0 %v7416_v23  ;;  %6155 = vmatpush1.msra.mxu1 %v7416_v23  ;;  %v7438_v23 = vld [vmem:[#allocation5 + $0x98] sm:$0xff] }
 0xb64   : > { %v5445_v43 = vadd.f32 %v5444_v31, %v11408_v46  ;;  %v5558_v59 = vadd.f32 %v5557_v22, %v11412_v61  ;;  %5820 = vmatprep.mubr.f32.mxu0 %v5591_v63  ;;  %5933 = vmatprep.mubr.f32.mxu1 %v5589_v19  ;;  %v5592_v54 = vmax.f32 %v5443_v49, 0.0  ;;  %v5594_v13 = vmax.f32 %v5556_v39, 0.0  ;;  %v7420_v19 = vld [vmem:[#allocation5 + $0x758] sm:$0xff]  ;;  %v7421_v63 = vld [vmem:[#allocation5 + $0x6a0] sm:$0xff] }
 0xb65   : > { %v5448_v5 = vpop.f32.mrf.mxu0  ;;  %v5561_v15 = vpop.f32.mrf.mxu1  ;;  %5821 = vmatmul.mubr.f32.gmra.mxu0 %v5590_v47  ;;  %5934 = vmatmul.mubr.f32.gmra.mxu1 %v5588_v44  ;;  %v7425_v44 = vld [vmem:[#allocation5 + $0x520] sm:$0xff]  ;;  %v7426_v47 = vld [vmem:[#allocation5 + $0x518] sm:$0xff] }
 0xb66   : > { %v5593_v52 = vmax.f32 %v5445_v43, 0.0  ;;  %v5595_v8 = vmax.f32 %v5558_v59, 0.0  ;;  %v5449_v53 = vadd.f32 %v5448_v5, %v11401_v4  ;;  %v5562_v25 = vadd.f32 %v5561_v15, %v11405_v24  ;;  %6011 = vmatprep.subr.mxu0 %v7417_v21  ;;  %6156 = vmatprep.subr.mxu1 %v7417_v21  ;;  %v7427_v49 = vld [vmem:[#allocation5 + $0x460] sm:$0xff]  ;;  %v7428_v39 = vld [vmem:[#allocation5 + $0x458] sm:$0xff] }
 0xb67   : > { %v5450_v9 = vpop.f32.mrf.mxu0  ;;  %v5563_v55 = vpop.f32.mrf.mxu1  ;;  %6012 = vmatpush1.msra.mxu0 %v7418_v0  ;;  %6157 = vmatpush1.msra.mxu1 %v7418_v0  ;;  %v7429_v31 = vld [vmem:[#allocation5 + $0x3a0] sm:$0xff]  ;;  %v7430_v22 = vld [vmem:[#allocation5 + $0x398] sm:$0xff] }
 0xb68   : > { %v5451_v33 = vadd.f32 %v5450_v9, %v11408_v46  ;;  %v5564_v16 = vadd.f32 %v5563_v55, %v11412_v61  ;;  %5826 = vmatprep.mubr.f32.mxu0 %v5595_v8  ;;  %5939 = vmatprep.mubr.f32.mxu1 %v5593_v52  ;;  %v5596_v62 = vmax.f32 %v5449_v53, 0.0  ;;  %v5598_v10 = vmax.f32 %v5562_v25, 0.0  ;;  %v7432_v43 = vld [vmem:[#allocation5 + $0x2d8] sm:$0xff]  ;;  %v7433_v59 = vld [vmem:[#allocation5 + $0x220] sm:$0xff] }
 0xb69   : > { %v5454_v29 = vpop.f32.mrf.mxu0  ;;  %v5567_v27 = vpop.f32.mrf.mxu1  ;;  %5827 = vmatmul.mubr.f32.gmra.mxu0 %v5594_v13  ;;  %5940 = vmatmul.mubr.f32.gmra.mxu1 %v5592_v54  ;;  %v7434_v5 = vld [vmem:[#allocation5 + $0x218] sm:$0xff]  ;;  %v7435_v15 = vld [vmem:[#allocation5 + $0x160] sm:$0xff] }
 0xb6a   : > { %v5597_v18 = vmax.f32 %v5451_v33, 0.0  ;;  %v5599_v40 = vmax.f32 %v5564_v16, 0.0  ;;  %v5455_v42 = vadd.f32 %v5454_v29, %v11401_v4  ;;  %v5568_v1 = vadd.f32 %v5567_v27, %v11405_v24  ;;  %6013 = vmatprep.subr.mxu0 %v7419_v37  ;;  %6158 = vmatprep.subr.mxu1 %v7419_v37  ;;  %v7436_v52 = vld [vmem:[#allocation5 + $0x158] sm:$0xff]  ;;  %v7437_v8 = vld [vmem:[#allocation5 + $0xa0] sm:$0xff] }
 0xb6b   : > { %v5456_v50 = vpop.f32.mrf.mxu0  ;;  %v5569_v17 = vpop.f32.mrf.mxu1  ;;  %6014 = vmatpush1.msra.mxu0 %v7420_v19  ;;  %6159 = vmatpush1.msra.mxu1 %v7420_v19  ;;  %v7439_v54 = vld [vmem:[#allocation5 + $0x17e0] sm:$0xff]  ;;  %v7440_v13 = vld [vmem:[#allocation5 + $0x17d8] sm:$0xff] }
 0xb6c   : > { %v5457_v36 = vadd.f32 %v5456_v50, %v11408_v46  ;;  %v5570_v35 = vadd.f32 %v5569_v17, %v11412_v61  ;;  %5832 = vmatprep.mubr.f32.mxu0 %v5599_v40  ;;  %5945 = vmatprep.mubr.f32.mxu1 %v5597_v18  ;;  %v5600_v4 = vmax.f32 %v5455_v42, 0.0  ;;  %v5602_v24 = vmax.f32 %v5568_v1, 0.0  ;;  %v7422_v46 = vld [vmem:[#allocation5 + $0x698] sm:$0xff]  ;;  %v7423_v61 = vld [vmem:[#allocation5 + $0x5e0] sm:$0xff] }
 0xb6d   : > { %5833 = vmatmul.mubr.f32.gmra.mxu0 %v5598_v10  ;;  %5946 = vmatmul.mubr.f32.gmra.mxu1 %v5596_v62  ;;  %v7441_v53 = vld [vmem:[#allocation5 + $0x1720] sm:$0xff]  ;;  %v7442_v25 = vld [vmem:[#allocation5 + $0x1718] sm:$0xff] }
 0xb6e   : > { %v5601_v58 = vmax.f32 %v5457_v36, 0.0  ;;  %v5603_v11 = vmax.f32 %v5570_v35, 0.0  ;;  %6015 = vmatprep.subr.mxu0 %v7421_v63  ;;  %6160 = vmatprep.subr.mxu1 %v7421_v63  ;;  %v7443_v9 = vld [vmem:[#allocation5 + $0x1660] sm:$0xff]  ;;  %v7444_v55 = vld [vmem:[#allocation5 + $0x1658] sm:$0xff] }
 0xb6f   : > { %6016 = vmatpush1.msra.mxu0 %v7422_v46  ;;  %6161 = vmatpush1.msra.mxu1 %v7422_v46  ;;  %v7445_v21 = vld [vmem:[#allocation5 + $0x15a0] sm:$0xff]  ;;  %v7446_v33 = vld [vmem:[#allocation5 + $0x1598] sm:$0xff] }
 0xb70   : > { %5838 = vmatprep.mubr.f32.mxu0 %v5603_v11  ;;  %5951 = vmatprep.mubr.f32.mxu1 %v5601_v58  ;;  %v7447_v16 = vld [vmem:[#allocation5 + $0x14e0] sm:$0xff]  ;;  %v7448_v29 = vld [vmem:[#allocation5 + $0x14d8] sm:$0xff] }
 0xb71   : > { %5839 = vmatmul.mubr.f32.gmra.mxu0 %v5602_v24  ;;  %5952 = vmatmul.mubr.f32.gmra.mxu1 %v5600_v4  ;;  %v7449_v27 = vld [vmem:[#allocation5 + $0x1420] sm:$0xff]  ;;  %v7450_v18 = vld [vmem:[#allocation5 + $0x1418] sm:$0xff] }
 0xb72   : > { %6017 = vmatprep.subr.mxu0 %v7423_v61  ;;  %6162 = vmatprep.subr.mxu1 %v7423_v61  ;;  %v7451_v40 = vld [vmem:[#allocation5 + $0x1360] sm:$0xff]  ;;  %v7452_v0 = vld [vmem:[#allocation5 + $0x1358] sm:$0xff] }
 0xb73   : > { %6018 = vmatpush1.msra.mxu0 %v7424_v51  ;;  %6163 = vmatpush1.msra.mxu1 %v7424_v51  ;;  %v7453_v62 = vld [vmem:[#allocation5 + $0x12a0] sm:$0xff]  ;;  %v7454_v10 = vld [vmem:[#allocation5 + $0x1298] sm:$0xff] }
 0xb74   : > { %6019 = vmatprep.subr.mxu0 %v7425_v44  ;;  %6164 = vmatprep.subr.mxu1 %v7425_v44  ;;  %v7455_v42 = vld [vmem:[#allocation5 + $0x11e0] sm:$0xff]  ;;  %v7456_v1 = vld [vmem:[#allocation5 + $0x11d8] sm:$0xff] }
 0xb75   : > { %6020 = vmatpush1.msra.mxu0 %v7426_v47  ;;  %6165 = vmatpush1.msra.mxu1 %v7426_v47  ;;  %v7457_v50 = vld [vmem:[#allocation5 + $0x1120] sm:$0xff]  ;;  %v7458_v17 = vld [vmem:[#allocation5 + $0x1118] sm:$0xff] }
 0xb76   : > { %6021 = vmatprep.subr.mxu0 %v7427_v49  ;;  %6166 = vmatprep.subr.mxu1 %v7427_v49  ;;  %v7459_v37 = vld [vmem:[#allocation5 + $0x1060] sm:$0xff]  ;;  %v7460_v36 = vld [vmem:[#allocation5 + $0x1058] sm:$0xff] }
 0xb77   : > { %6022 = vmatpush1.msra.mxu0 %v7428_v39  ;;  %6167 = vmatpush1.msra.mxu1 %v7428_v39  ;;  %v7461_v35 = vld [vmem:[#allocation5 + $0xfa0] sm:$0xff]  ;;  %v7462_v58 = vld [vmem:[#allocation5 + $0xf98] sm:$0xff] }
 0xb78   : > { %6023 = vmatprep.subr.mxu0 %v7429_v31  ;;  %6168 = vmatprep.subr.mxu1 %v7429_v31  ;;  %v7463_v11 = vld [vmem:[#allocation5 + $0xee0] sm:$0xff]  ;;  %v7464_v19 = vld [vmem:[#allocation5 + $0xed8] sm:$0xff] }
 0xb79   : > { %6024 = vmatpush1.msra.mxu0 %v7430_v22  ;;  %6169 = vmatpush1.msra.mxu1 %v7430_v22  ;;  %v7465_v4 = vld [vmem:[#allocation5 + $0xe20] sm:$0xff]  ;;  %v7466_v24 = vld [vmem:[#allocation5 + $0xe18] sm:$0xff] }
 0xb7a   : > { %6025 = vmatprep.subr.mxu0 %v7431_v6  ;;  %6170 = vmatprep.subr.mxu1 %v7431_v6  ;;  %v7467_v63 = vld [vmem:[#allocation5 + $0xd60] sm:$0xff]  ;;  %v7468_v46 = vld [vmem:[#allocation5 + $0xd58] sm:$0xff] }
 0xb7b   : > { %6026 = vmatpush1.msra.mxu0 %v7432_v43  ;;  %6171 = vmatpush1.msra.mxu1 %v7432_v43  ;;  %v7469_v61 = vld [vmem:[#allocation5 + $0xca0] sm:$0xff]  ;;  %v7470_v51 = vld [vmem:[#allocation5 + $0xc98] sm:$0xff] }
 0xb7c   : > { %6027 = vmatprep.subr.mxu0 %v7433_v59  ;;  %6172 = vmatprep.subr.mxu1 %v7433_v59  ;;  %v230_v44 = vld [vmem:[#allocation7 + $0x4] ss:$8 sm:$0x3] }
 0xb7d   : > { %6028 = vmatpush1.msra.mxu0 %v7434_v5  ;;  %6173 = vmatpush1.msra.mxu1 %v7434_v5  ;;  %v11447_v39 = vrot.slane %v230_v44, %v12500_v28  ;;  %v11450_v22 = vrot.slane %v230_v44, %v12501_v41 }
 0xb7e   : > { %6029 = vmatprep.subr.mxu0 %v7435_v15  ;;  %6174 = vmatprep.subr.mxu1 %v7435_v15 }
 0xb7f   : > { %6030 = vmatpush1.msra.mxu0 %v7436_v52  ;;  %6175 = vmatpush1.msra.mxu1 %v7436_v52 }
 0xb80   : > { %6031 = vmatprep.subr.mxu0 %v7437_v8  ;;  %6176 = vmatprep.subr.mxu1 %v7437_v8 }
 0xb81   : > { %6032 = vmatpush1.msra.mxu0 %v7438_v23  ;;  %6177 = vmatpush1.msra.mxu1 %v7438_v23 }
 0xb82   : > { %6033 = vmatprep.subr.mxu0 %v7439_v54  ;;  %6178 = vmatprep.subr.mxu1 %v7439_v54 }
 0xb83   : > { %6034 = vmatpush2.msra.mxu0 %v7440_v13  ;;  %6179 = vmatpush2.msra.mxu1 %v7440_v13 }
 0xb84   : > { %6035 = vmatprep.subr.mxu0 %v7441_v53  ;;  %6180 = vmatprep.subr.mxu1 %v7441_v53 }
 0xb85   : > { %6036 = vmatpush2.msra.mxu0 %v7442_v25  ;;  %6181 = vmatpush2.msra.mxu1 %v7442_v25 }
 0xb86   : > { %6037 = vmatprep.subr.mxu0 %v7443_v9  ;;  %6182 = vmatprep.subr.mxu1 %v7443_v9 }
 0xb87   : > { %6038 = vmatpush2.msra.mxu0 %v7444_v55  ;;  %6183 = vmatpush2.msra.mxu1 %v7444_v55 }
 0xb88   : > { %6039 = vmatprep.subr.mxu0 %v7445_v21  ;;  %6184 = vmatprep.subr.mxu1 %v7445_v21 }
 0xb89   : > { %6040 = vmatpush2.msra.mxu0 %v7446_v33  ;;  %6185 = vmatpush2.msra.mxu1 %v7446_v33 }
 0xb8a   : > { %6041 = vmatprep.subr.mxu0 %v7447_v16  ;;  %6186 = vmatprep.subr.mxu1 %v7447_v16 }
 0xb8b   : > { %6042 = vmatpush2.msra.mxu0 %v7448_v29  ;;  %6187 = vmatpush2.msra.mxu1 %v7448_v29 }
 0xb8c   : > { %6043 = vmatprep.subr.mxu0 %v7449_v27  ;;  %6188 = vmatprep.subr.mxu1 %v7449_v27 }
 0xb8d   : > { %6044 = vmatpush2.msra.mxu0 %v7450_v18  ;;  %6189 = vmatpush2.msra.mxu1 %v7450_v18 }
 0xb8e   : > { %6045 = vmatprep.subr.mxu0 %v7451_v40  ;;  %6190 = vmatprep.subr.mxu1 %v7451_v40 }
 0xb8f   : > { %6046 = vmatpush2.msra.mxu0 %v7452_v0  ;;  %6191 = vmatpush2.msra.mxu1 %v7452_v0 }
 0xb90   : > { %6047 = vmatprep.subr.mxu0 %v7453_v62  ;;  %6192 = vmatprep.subr.mxu1 %v7453_v62 }
 0xb91   : > { %6048 = vmatpush2.msra.mxu0 %v7454_v10  ;;  %6193 = vmatpush2.msra.mxu1 %v7454_v10 }
 0xb92   : > { %6049 = vmatprep.subr.mxu0 %v7455_v42  ;;  %6194 = vmatprep.subr.mxu1 %v7455_v42 }
 0xb93   : > { %6050 = vmatpush2.msra.mxu0 %v7456_v1  ;;  %6195 = vmatpush2.msra.mxu1 %v7456_v1 }
 0xb94   : > { %6051 = vmatprep.subr.mxu0 %v7457_v50  ;;  %6196 = vmatprep.subr.mxu1 %v7457_v50 }
 0xb95   : > { %6052 = vmatpush2.msra.mxu0 %v7458_v17  ;;  %6197 = vmatpush2.msra.mxu1 %v7458_v17 }
 0xb96   : > { %6053 = vmatprep.subr.mxu0 %v7459_v37  ;;  %6198 = vmatprep.subr.mxu1 %v7459_v37 }
 0xb97   : > { %6054 = vmatpush2.msra.mxu0 %v7460_v36  ;;  %6199 = vmatpush2.msra.mxu1 %v7460_v36 }
 0xb98   : > { %6055 = vmatprep.subr.mxu0 %v7461_v35  ;;  %6200 = vmatprep.subr.mxu1 %v7461_v35 }
 0xb99   : > { %6056 = vmatpush2.msra.mxu0 %v7462_v58  ;;  %6201 = vmatpush2.msra.mxu1 %v7462_v58 }
 0xb9a   : > { %6057 = vmatprep.subr.mxu0 %v7463_v11  ;;  %6202 = vmatprep.subr.mxu1 %v7463_v11 }
 0xb9b   : > { %6058 = vmatpush2.msra.mxu0 %v7464_v19  ;;  %6203 = vmatpush2.msra.mxu1 %v7464_v19 }
 0xb9c   : > { %6059 = vmatprep.subr.mxu0 %v7465_v4  ;;  %6204 = vmatprep.subr.mxu1 %v7465_v4 }
 0xb9d   : > { %6060 = vmatpush2.msra.mxu0 %v7466_v24  ;;  %6205 = vmatpush2.msra.mxu1 %v7466_v24 }
 0xb9e   : > { %6061 = vmatprep.subr.mxu0 %v7467_v63  ;;  %6206 = vmatprep.subr.mxu1 %v7467_v63 }
 0xb9f   : > { %6062 = vmatpush2.msra.mxu0 %v7468_v46  ;;  %6207 = vmatpush2.msra.mxu1 %v7468_v46 }
 0xba0   : > { %6063 = vmatprep.subr.mxu0 %v7469_v61  ;;  %6208 = vmatprep.subr.mxu1 %v7469_v61 }
 0xba1   : > { %6064 = vmatpush2.msra.mxu0 %v7470_v51  ;;  %6209 = vmatpush2.msra.mxu1 %v7470_v51 }
 0xc14   : > { %v5798_v47 = vpop.f32.mrf.mxu0  ;;  %v5911_v49 = vpop.f32.mrf.mxu1 }
 0xc15   : > { %v5912_v31 = vadd.f32 %v5911_v49, %v5798_v47 }
 0xc16   : > { %v5800_v6 = vpop.f32.mrf.mxu0  ;;  %v5913_v43 = vpop.f32.mrf.mxu1 }
 0xc17   : > { %v5914_v59 = vadd.f32 %v5913_v43, %v5800_v6  ;;  %v5969_v5 = vadd.f32 %v11447_v39, %v5912_v31 }
 0xc18   : > { %v5804_v15 = vpop.f32.mrf.mxu0  ;;  %v5917_v52 = vpop.f32.mrf.mxu1 }
 0xc19   : > { %v5970_v8 = vadd.f32 %v11450_v22, %v5914_v59  ;;  %v5918_v23 = vadd.f32 %v5917_v52, %v5804_v15  ;;  %v11458_v9 = vadd.f32 %v5969_v5, %v11298_v3 }
 0xc1a   : > { %v5806_v54 = vpop.f32.mrf.mxu0  ;;  %v5919_v13 = vpop.f32.mrf.mxu1 }
 0xc1b   : > { %v5920_v53 = vadd.f32 %v5919_v13, %v5806_v54  ;;  %v11455_v25 = vadd.f32 %v5970_v8, %v11294_v7  ;;  %v5971_v55 = vadd.f32 %v11447_v39, %v5918_v23 }
 0xc1c   : > { %v5810_v21 = vpop.f32.mrf.mxu0  ;;  %v5923_v33 = vpop.f32.mrf.mxu1 }
 0xc1d   : > { %v5972_v16 = vadd.f32 %v11450_v22, %v5920_v53  ;;  %v5924_v29 = vadd.f32 %v5923_v33, %v5810_v21  ;;  %6065 = vmatprep.mubr.f32.mxu0 %v11455_v25  ;;  %v11468_v3 = vadd.f32 %v5971_v55, %v11312_v30 }
 0xc1e   : > { %v5812_v27 = vpop.f32.mrf.mxu0  ;;  %v5925_v18 = vpop.f32.mrf.mxu1  ;;  %6066 = vmatmul.mubr.f32.vlgmr.msra.gmra.mxu0 %v11458_v9 }
 0xc1f   : > { %v5926_v40 = vadd.f32 %v5925_v18, %v5812_v27  ;;  %v11465_v7 = vadd.f32 %v5972_v16, %v11308_v56  ;;  %v5973_v0 = vadd.f32 %v11447_v39, %v5924_v29 }
 0xc20   : > { %v5816_v62 = vpop.f32.mrf.mxu0  ;;  %v5929_v10 = vpop.f32.mrf.mxu1 }
 0xc21   : > { %v5974_v42 = vadd.f32 %v11450_v22, %v5926_v40  ;;  %v5930_v1 = vadd.f32 %v5929_v10, %v5816_v62  ;;  %6071 = vmatprep.mubr.f32.mxu0 %v11465_v7  ;;  %v11478_v30 = vadd.f32 %v5973_v0, %v11326_v12  ;;  %v6375_v10 = vld [vmem:[#allocation5 + $0x1710] sm:$0xff] }
 0xc22   : > { %v5818_v50 = vpop.f32.mrf.mxu0  ;;  %v5931_v17 = vpop.f32.mrf.mxu1  ;;  %6072 = vmatmul.mubr.f32.gmra.mxu0 %v11468_v3 }
 0xc23   : > { %v5932_v37 = vadd.f32 %v5931_v17, %v5818_v50  ;;  %v11475_v56 = vadd.f32 %v5974_v42, %v11322_v38  ;;  %v5975_v36 = vadd.f32 %v11447_v39, %v5930_v1  ;;  %v6358_v42 = vld [vmem:[#allocation5 + $0xa50] sm:$0xff] }
 0xc24   : > { %v6373_v1 = vld [vmem:[#allocation5 + $0x1590] sm:$0xff] }
 0xc25   : > { %v5822_v35 = vpop.f32.mrf.mxu0  ;;  %v5935_v58 = vpop.f32.mrf.mxu1  ;;  %v5976_v11 = vadd.f32 %v11450_v22, %v5932_v37  ;;  %6077 = vmatprep.mubr.f32.mxu0 %v11475_v56  ;;  %v11488_v12 = vadd.f32 %v5975_v36, %v11340_v26 }
 0xc26   : > { %v5936_v19 = vadd.f32 %v5935_v58, %v5822_v35  ;;  %6078 = vmatmul.mubr.f32.gmra.mxu0 %v11478_v30 }
 0xc27   : > { %v5824_v4 = vpop.f32.mrf.mxu0  ;;  %v5937_v24 = vpop.f32.mrf.mxu1  ;;  %v11485_v38 = vadd.f32 %v5976_v11, %v11336_v32 }
 0xc28   : > { %v5938_v63 = vadd.f32 %v5937_v24, %v5824_v4  ;;  %v5977_v46 = vadd.f32 %v11447_v39, %v5936_v19 }
 0xc29   : > { %v5828_v61 = vpop.f32.mrf.mxu0  ;;  %v5941_v51 = vpop.f32.mrf.mxu1  ;;  %6083 = vmatprep.mubr.f32.mxu0 %v11485_v38 }
 0xc2a   : > { %v5978_v44 = vadd.f32 %v11450_v22, %v5938_v63  ;;  %v5942_v47 = vadd.f32 %v5941_v51, %v5828_v61  ;;  %6084 = vmatmul.mubr.f32.gmra.mxu0 %v11488_v12  ;;  %v11498_v26 = vadd.f32 %v5977_v46, %v11354_v34 }
 0xc2b   : > { %v5830_v49 = vpop.f32.mrf.mxu0  ;;  %v5943_v31 = vpop.f32.mrf.mxu1 }
 0xc2c   : > { %v5944_v6 = vadd.f32 %v5943_v31, %v5830_v49  ;;  %v11495_v32 = vadd.f32 %v5978_v44, %v11350_v2  ;;  %v5979_v43 = vadd.f32 %v11447_v39, %v5942_v47 }
 0xc2d   : > { %v5834_v59 = vpop.f32.mrf.mxu0  ;;  %v5947_v5 = vpop.f32.mrf.mxu1 }
 0xc2e   : > { %v5980_v15 = vadd.f32 %v11450_v22, %v5944_v6  ;;  %v5948_v52 = vadd.f32 %v5947_v5, %v5834_v59  ;;  %6089 = vmatprep.mubr.f32.mxu0 %v11495_v32  ;;  %v11508_v34 = vadd.f32 %v5979_v43, %v11368_v48 }
 0xc2f   : > { %v5836_v8 = vpop.f32.mrf.mxu0  ;;  %v5949_v23 = vpop.f32.mrf.mxu1  ;;  %6090 = vmatmul.mubr.f32.gmra.mxu0 %v11498_v26 }
 0xc30   : > { %v5950_v54 = vadd.f32 %v5949_v23, %v5836_v8  ;;  %v11505_v2 = vadd.f32 %v5980_v15, %v11364_v45  ;;  %v5981_v13 = vadd.f32 %v11447_v39, %v5948_v52 }
 0xc31   : > { %v5840_v53 = vpop.f32.mrf.mxu0  ;;  %v5953_v55 = vpop.f32.mrf.mxu1 }
 0xc32   : > { %v5982_v21 = vadd.f32 %v11450_v22, %v5950_v54  ;;  %v5954_v33 = vadd.f32 %v5953_v55, %v5840_v53  ;;  %6095 = vmatprep.mubr.f32.mxu0 %v11505_v2  ;;  %v11518_v48 = vadd.f32 %v5981_v13, %v11382_v14  ;;  %v6360_v14 = vld [vmem:[#allocation5 + $0xbd0] sm:$0xff] }
 0xc33   : > { %v5842_v16 = vpop.f32.mrf.mxu0  ;;  %v5955_v29 = vpop.f32.mrf.mxu1  ;;  %6096 = vmatmul.mubr.f32.gmra.mxu0 %v11508_v34 }
 0xc34   : > { %v5956_v27 = vadd.f32 %v5955_v29, %v5842_v16  ;;  %v11515_v45 = vadd.f32 %v5982_v21, %v11378_v20  ;;  %v5983_v18 = vadd.f32 %v11447_v39, %v5954_v33  ;;  %v6376_v20 = vld [vmem:[#allocation5 + $0x17d0] sm:$0xff] }
 0xc35   : > { %7128 = vmatprep.subr.mxu0 %v6376_v20  ;;  %v6359_v39 = vld [vmem:[#allocation5 + $0xb10] sm:$0xff] }
 0xc36   : > { %v5984_v40 = vadd.f32 %v11450_v22, %v5956_v27  ;;  %6101 = vmatprep.mubr.f32.mxu0 %v11515_v45  ;;  %v11528_v62 = vadd.f32 %v5983_v18, %v11394_v60  ;;  %7129 = vmatpush3.msra.mxu0 %v6360_v14  ;;  %v6374_v22 = vld [vmem:[#allocation5 + $0x1650] sm:$0xff] }
 0xc37   : > { %6102 = vmatmul.mubr.f32.gmra.mxu0 %v11518_v48  ;;  %7130 = vmatprep.subr.mxu0 %v6375_v10  ;;  %v6357_v27 = vld [vmem:[#allocation5 + $0x990] sm:$0xff] }
 0xc38   : > { %v11525_v0 = vadd.f32 %v5984_v40, %v11391_v57  ;;  %7131 = vmatpush3.msra.mxu0 %v6359_v39  ;;  %v6371_v18 = vld [vmem:[#allocation5 + $0x1410] sm:$0xff] }
 0xc39   : > { %7132 = vmatprep.subr.mxu0 %v6374_v22  ;;  %v6355_v40 = vld [vmem:[#allocation5 + $0x810] sm:$0xff] }
 0xc3a   : > { %6107 = vmatprep.mubr.f32.mxu0 %v11525_v0  ;;  %7133 = vmatpush3.msra.mxu0 %v6358_v42  ;;  %v6369_v20 = vld [vmem:[#allocation5 + $0x1290] sm:$0xff] }
 0xc3b   : > { %6108 = vmatmul.mubr.f32.gmra.mxu0 %v11528_v62  ;;  %7134 = vmatprep.subr.mxu0 %v6373_v1  ;;  %v6353_v14 = vld [vmem:[#allocation5 + $0x690] sm:$0xff] }
 0xc3c   : > { %7135 = vmatpush3.msra.mxu0 %v6357_v27  ;;  %v6368_v10 = vld [vmem:[#allocation5 + $0x11d0] sm:$0xff] }
 0xc3d   : > { %v6352_v39 = vld [vmem:[#allocation5 + $0x5d0] sm:$0xff] }
 0xc3e   : > { %v6367_v22 = vld [vmem:[#allocation5 + $0x1110] sm:$0xff] }
 0xc3f   : > { %v6351_v42 = vld [vmem:[#allocation5 + $0x510] sm:$0xff] }
 0xc40   : > { %v6366_v1 = vld [vmem:[#allocation5 + $0x1050] sm:$0xff] }
 0xcde   : > { %v6067_v57 = vpop.f32.mrf.mxu0 }
 0xcdf   : > { %v11533_v60 = vsub.f32 %v11458_v9, %v6067_v57  ;;  %v6350_v57 = vld [vmem:[#allocation5 + $0x450] sm:$0xff] }
 0xce0   : > { %v6069_v50 = vpop.f32.mrf.mxu0 }
 0xce1   : > { %v11536_v17 = vsub.f32 %v11455_v25, %v6069_v50  ;;  %v6130_v35 = vmul.f32 %v11533_v60, %v11533_v60  ;;  %v6365_v50 = vld [vmem:[#allocation5 + $0xf90] sm:$0xff] }
 0xce2   : > { %v6073_v37 = vpop.f32.mrf.mxu0 }
 0xce3   : > { %v6131_v36 = vmul.f32 %v11536_v17, %v11536_v17  ;;  %v11543_v58 = vsub.f32 %v11468_v3, %v6073_v37  ;;  %v6349_v37 = vld [vmem:[#allocation5 + $0x390] sm:$0xff] }
 0xce4   : > { %v6075_v11 = vpop.f32.mrf.mxu0 }
 0xce5   : > { %v11546_v19 = vsub.f32 %v11465_v7, %v6075_v11  ;;  %6210 = vmatprep.mubr.f32.mxu1 %v6131_v36  ;;  %v6132_v4 = vmul.f32 %v11543_v58, %v11543_v58  ;;  %v6364_v36 = vld [vmem:[#allocation5 + $0xed0] sm:$0xff] }
 0xce6   : > { %v6079_v9 = vpop.f32.mrf.mxu0  ;;  %6211 = vmatmul.mubr.f32.vlgmr.msra.gmra.mxu1 %v6130_v35  ;;  %v6348_v35 = vld [vmem:[#allocation5 + $0x2d0] sm:$0xff] }
 0xce7   : > { %v6133_v25 = vmul.f32 %v11546_v19, %v11546_v19  ;;  %v11553_v24 = vsub.f32 %v11478_v30, %v6079_v9  ;;  %v6363_v11 = vld [vmem:[#allocation5 + $0xe10] sm:$0xff] }
 0xce8   : > { %v6081_v63 = vpop.f32.mrf.mxu0  ;;  %v6347_v9 = vld [vmem:[#allocation5 + $0x210] sm:$0xff] }
 0xce9   : > { %v11556_v3 = vsub.f32 %v11475_v56, %v6081_v63  ;;  %6216 = vmatprep.mubr.f32.mxu1 %v6133_v25  ;;  %v6134_v61 = vmul.f32 %v11553_v24, %v11553_v24  ;;  %v6362_v25 = vld [vmem:[#allocation5 + $0xd50] sm:$0xff] }
 0xcea   : > { %v6085_v46 = vpop.f32.mrf.mxu0  ;;  %6217 = vmatmul.mubr.f32.gmra.mxu1 %v6132_v4  ;;  %v6346_v4 = vld [vmem:[#allocation5 + $0x150] sm:$0xff] }
 0xceb   : > { %v6135_v7 = vmul.f32 %v11556_v3, %v11556_v3  ;;  %v11563_v51 = vsub.f32 %v11488_v12, %v6085_v46  ;;  %v6361_v63 = vld [vmem:[#allocation5 + $0xc90] sm:$0xff] }
 0xcec   : > { %v6087_v44 = vpop.f32.mrf.mxu0  ;;  %v6345_v46 = vld [vmem:[#allocation5 + $0x90] sm:$0xff] }
 0xced   : > { %v11566_v30 = vsub.f32 %v11485_v38, %v6087_v44  ;;  %6222 = vmatprep.mubr.f32.mxu1 %v6135_v7  ;;  %v6136_v49 = vmul.f32 %v11563_v51, %v11563_v51 }
 0xcee   : > { %6223 = vmatmul.mubr.f32.gmra.mxu1 %v6134_v61 }
 0xcef   : > { %v6091_v47 = vpop.f32.mrf.mxu0  ;;  %v6137_v56 = vmul.f32 %v11566_v30, %v11566_v30 }
 0xcf0   : > { %v11573_v31 = vsub.f32 %v11498_v26, %v6091_v47 }
 0xcf1   : > { %v6093_v6 = vpop.f32.mrf.mxu0  ;;  %6228 = vmatprep.mubr.f32.mxu1 %v6137_v56 }
 0xcf2   : > { %v11576_v12 = vsub.f32 %v11495_v32, %v6093_v6  ;;  %6229 = vmatmul.mubr.f32.gmra.mxu1 %v6136_v49  ;;  %v6138_v59 = vmul.f32 %v11573_v31, %v11573_v31 }
 0xcf3   : > { %v6097_v43 = vpop.f32.mrf.mxu0 }
 0xcf4   : > { %v6139_v38 = vmul.f32 %v11576_v12, %v11576_v12  ;;  %v11583_v5 = vsub.f32 %v11508_v34, %v6097_v43 }
 0xcf5   : > { %v6099_v15 = vpop.f32.mrf.mxu0 }
 0xcf6   : > { %v11586_v26 = vsub.f32 %v11505_v2, %v6099_v15  ;;  %6234 = vmatprep.mubr.f32.mxu1 %v6139_v38  ;;  %v6140_v8 = vmul.f32 %v11583_v5, %v11583_v5 }
 0xcf7   : > { %v6103_v52 = vpop.f32.mrf.mxu0  ;;  %6235 = vmatmul.mubr.f32.gmra.mxu1 %v6138_v59 }
 0xcf8   : > { %v6141_v32 = vmul.f32 %v11586_v26, %v11586_v26  ;;  %v11593_v23 = vsub.f32 %v11518_v48, %v6103_v52  ;;  %v6356_v48 = vld [vmem:[#allocation5 + $0x8d0] sm:$0xff] }
 0xcf9   : > { %v6105_v54 = vpop.f32.mrf.mxu0 }
 0xcfa   : > { %v11596_v34 = vsub.f32 %v11515_v45, %v6105_v54  ;;  %6240 = vmatprep.mubr.f32.mxu1 %v6141_v32  ;;  %v6142_v53 = vmul.f32 %v11593_v23, %v11593_v23  ;;  %v6372_v45 = vld [vmem:[#allocation5 + $0x14d0] sm:$0xff] }
 0xcfb   : > { %v6109_v13 = vpop.f32.mrf.mxu0  ;;  %6241 = vmatmul.mubr.f32.gmra.mxu1 %v6140_v8  ;;  %7136 = vmatprep.subr.mxu0 %v6372_v45  ;;  %v236_v8 = vld [vmem:[#allocation7 + $0x7] ss:$8 sm:$0x3]  ;;  %v238_v45 = vld [vmem:[#allocation7 + $0x30] ss:$8 sm:$0x3] }
 0xcfc   : > { %v6143_v2 = vmul.f32 %v11596_v34, %v11596_v34  ;;  %v11603_v55 = vsub.f32 %v11528_v62, %v6109_v13  ;;  %7137 = vmatpush3.msra.mxu0 %v6356_v48  ;;  %v6354_v62 = vld [vmem:[#allocation5 + $0x750] sm:$0xff]  ;;  %v11617_v48 = vrot.slane %v236_v8, %v12501_v41 }
 0xcfd   : > { %v6111_v21 = vpop.f32.mrf.mxu0  ;;  %7138 = vmatprep.subr.mxu0 %v6371_v18 }
 0xcfe   : > { %v11606_v33 = vsub.f32 %v11525_v0, %v6111_v21  ;;  %6246 = vmatprep.mubr.f32.mxu1 %v6143_v2  ;;  %v6144_v29 = vmul.f32 %v11603_v55, %v11603_v55  ;;  %7139 = vmatpush3.msra.mxu0 %v6355_v40  ;;  %v6370_v0 = vld [vmem:[#allocation5 + $0x1350] sm:$0xff]  ;;  %v11613_v21 = vrot.slane %v236_v8, %v12500_v28 }
 0xcff   : > { %6247 = vmatmul.mubr.f32.gmra.mxu1 %v6142_v53  ;;  %7140 = vmatprep.subr.mxu0 %v6370_v0 }
 0xd00   : > { %v6145_v16 = vmul.f32 %v11606_v33, %v11606_v33  ;;  %7141 = vmatpush3.msra.mxu0 %v6354_v62 }
 0xd01   : > { %7142 = vmatprep.subr.mxu0 %v6369_v20  ;;  %v11621_v20 = vrot.slane %v238_v45, %v12501_v41 }
 0xd02   : > { %6252 = vmatprep.mubr.f32.mxu1 %v6145_v16  ;;  %7143 = vmatpush3.msra.mxu0 %v6353_v14 }
 0xd03   : > { %6253 = vmatmul.mubr.f32.gmra.mxu1 %v6144_v29  ;;  %7144 = vmatprep.subr.mxu0 %v6368_v10 }
 0xd04   : > { %7145 = vmatpush3.msra.mxu0 %v6352_v39 }
 0xd05   : > { %7146 = vmatprep.subr.mxu0 %v6367_v22 }
 0xd06   : > { %7147 = vmatpush3.msra.mxu0 %v6351_v42 }
 0xd07   : > { %7148 = vmatprep.subr.mxu0 %v6366_v1 }
 0xd08   : > { %7149 = vmatpush3.msra.mxu0 %v6350_v57 }
 0xd09   : > { %7150 = vmatprep.subr.mxu0 %v6365_v50 }
 0xd0a   : > { %7151 = vmatpush3.msra.mxu0 %v6349_v37 }
 0xd0b   : > { %7152 = vmatprep.subr.mxu0 %v6364_v36 }
 0xd0c   : > { %7153 = vmatpush3.msra.mxu0 %v6348_v35 }
 0xd0d   : > { %7154 = vmatprep.subr.mxu0 %v6363_v11 }
 0xd0e   : > { %7155 = vmatpush3.msra.mxu0 %v6347_v9 }
 0xd0f   : > { %7156 = vmatprep.subr.mxu0 %v6362_v25 }
 0xd10   : > { %7157 = vmatpush3.msra.mxu0 %v6346_v4 }
 0xd11   : > { %7158 = vmatprep.subr.mxu0 %v6361_v63 }
 0xd12   : > { %7159 = vmatpush3.msra.mxu0 %v6345_v46 }
 0xda6   : > { %v6212_v7 = vpop.f32.mrf.mxu1 }
 0xda7   : > { %v6213_v61 = vadd.f32 1e-05, %v6212_v7 }
 0xda8   : > { %v6214_v44 = vpop.f32.mrf.mxu1 }
 0xda9   : > { %7343 = vrsqrt.f32 %v6213_v61  ;;  %v6215_v47 = vadd.f32 1e-05, %v6214_v44 }
 0xdaa   : > { %v6218_v56 = vpop.f32.mrf.mxu1 }
 0xdab   : > { %7345 = vrsqrt.f32 %v6215_v47  ;;  %v6219_v49 = vadd.f32 1e-05, %v6218_v56 }
 0xdac   : > { %v6220_v6 = vpop.f32.mrf.mxu1 }
 0xdad   : > { %7347 = vrsqrt.f32 %v6219_v49  ;;  %v6221_v43 = vadd.f32 1e-05, %v6220_v6 }
 0xdae   : > { %v6224_v38 = vpop.f32.mrf.mxu1 }
 0xdaf   : > { %7349 = vrsqrt.f32 %v6221_v43  ;;  %v6225_v59 = vadd.f32 1e-05, %v6224_v38 }
 0xdb0   : > { %v6226_v15 = vpop.f32.mrf.mxu1 }
 0xdb1   : > { %7351 = vrsqrt.f32 %v6225_v59  ;;  %v6227_v52 = vadd.f32 1e-05, %v6226_v15 }
 0xdb2   : > { %v6230_v32 = vpop.f32.mrf.mxu1 }
 0xdb3   : > { %7353 = vrsqrt.f32 %v6227_v52  ;;  %v6231_v54 = vadd.f32 1e-05, %v6230_v32 }
 0xdb4   : > { %v6232_v13 = vpop.f32.mrf.mxu1 }
 0xdb5   : > { %7355 = vrsqrt.f32 %v6231_v54  ;;  %v6233_v2 = vadd.f32 1e-05, %v6232_v13 }
 0xdb6   : > { %v7344_v53 = vpop.eup %7343 }
 0xdb7   : > { %v6236_v16 = vpop.f32.mrf.mxu1  ;;  %v6275_v29 = vmul.f32 %v7344_v53, %v11533_v60  ;;  %7357 = vrsqrt.f32 %v6233_v2  ;;  %v11625_v60 = vrot.slane %v238_v45, %v12500_v28 }
 0xdb8   : > { %v6237_v27 = vadd.f32 1e-05, %v6236_v16  ;;  %v7346_v18 = vpop.eup %7345 }
 0xdb9   : > { %v6238_v40 = vpop.f32.mrf.mxu1  ;;  %v6276_v62 = vmul.f32 %v7346_v18, %v11536_v17  ;;  %v6302_v10 = vmul.f32 %v11613_v21, %v6275_v29 }
 0xdba   : > { %7359 = vrsqrt.f32 %v6237_v27  ;;  %v6239_v0 = vadd.f32 1e-05, %v6238_v40  ;;  %v7348_v14 = vpop.eup %7347 }
 0xdbb   : > { %v6242_v39 = vpop.f32.mrf.mxu1  ;;  %v6303_v42 = vmul.f32 %v11617_v48, %v6276_v62  ;;  %v6277_v50 = vmul.f32 %v7348_v14, %v11543_v58  ;;  %v6329_v11 = vadd.f32 %v11625_v60, %v6302_v10 }
 0xdbc   : > { %7361 = vrsqrt.f32 %v6239_v0  ;;  %v6243_v22 = vadd.f32 1e-05, %v6242_v39  ;;  %v7350_v1 = vpop.eup %7349 }
 0xdbd   : > { %v6244_v57 = vpop.f32.mrf.mxu1  ;;  %v6330_v41 = vadd.f32 %v11621_v20, %v6303_v42  ;;  %v6278_v37 = vmul.f32 %v7350_v1, %v11546_v19  ;;  %v6304_v28 = vmul.f32 %v11613_v21, %v6277_v50 }
 0xdbe   : > { %7363 = vrsqrt.f32 %v6243_v22  ;;  %v6245_v17 = vadd.f32 1e-05, %v6244_v57  ;;  %v7352_v36 = vpop.eup %7351 }
 0xdbf   : > { %v6248_v35 = vpop.f32.mrf.mxu1  ;;  %6441 = vmatprep.mubr.f32.mxu0 %v6330_v41  ;;  %v6305_v25 = vmul.f32 %v11617_v48, %v6278_v37  ;;  %v6279_v4 = vmul.f32 %v7352_v36, %v11553_v24  ;;  %v6331_v47 = vadd.f32 %v11625_v60, %v6304_v28  ;;  %v239_v28 = vld [vmem:[#allocation7 + $0x31] ss:$0 sm:$0xff] }
 0xdc0   : > { %7365 = vrsqrt.f32 %v6245_v17  ;;  %v6249_v9 = vadd.f32 1e-05, %v6248_v35  ;;  %v7354_v58 = vpop.eup %7353  ;;  %6442 = vmatmul.mubr.f32.vlgmr.msra.gmra.mxu0 %v6329_v11 }
 0xdc1   : > { %v6250_v63 = vpop.f32.mrf.mxu1  ;;  %v6332_v19 = vadd.f32 %v11621_v20, %v6305_v25  ;;  %v6280_v7 = vmul.f32 %v7354_v58, %v11556_v3  ;;  %v6306_v56 = vmul.f32 %v11613_v21, %v6279_v4 }
 0xdc2   : > { %7367 = vrsqrt.f32 %v6249_v9  ;;  %v6251_v46 = vadd.f32 1e-05, %v6250_v63  ;;  %v7356_v61 = vpop.eup %7355 }
 0xdc3   : > { %v6254_v44 = vpop.f32.mrf.mxu1  ;;  %6446 = vmatprep.mubr.f32.mxu0 %v6332_v19  ;;  %v6307_v24 = vmul.f32 %v11617_v48, %v6280_v7  ;;  %v6281_v6 = vmul.f32 %v7356_v61, %v11563_v51  ;;  %v6333_v32 = vadd.f32 %v11625_v60, %v6306_v56 }
 0xdc4   : > { %7369 = vrsqrt.f32 %v6251_v46  ;;  %v6255_v49 = vadd.f32 1e-05, %v6254_v44  ;;  %v7358_v43 = vpop.eup %7357  ;;  %6447 = vmatmul.mubr.f32.gmra.mxu0 %v6331_v47 }
 0xdc5   : > { %v6256_v38 = vpop.f32.mrf.mxu1  ;;  %v6334_v3 = vadd.f32 %v11621_v20, %v6307_v24  ;;  %v6282_v15 = vmul.f32 %v7358_v43, %v11566_v30  ;;  %v6308_v8 = vmul.f32 %v11613_v21, %v6281_v6 }
 0xdc6   : > { %7371 = vrsqrt.f32 %v6255_v49  ;;  %v6257_v59 = vadd.f32 1e-05, %v6256_v38 }
 0xdc7   : > { %v7360_v52 = vpop.eup %7359  ;;  %6451 = vmatprep.mubr.f32.mxu0 %v6334_v3  ;;  %v6309_v54 = vmul.f32 %v11617_v48, %v6282_v15  ;;  %v6335_v30 = vadd.f32 %v11625_v60, %v6308_v8 }
 0xdc8   : > { %7373 = vrsqrt.f32 %v6257_v59  ;;  %v6283_v51 = vmul.f32 %v7360_v52, %v11573_v31  ;;  %6452 = vmatmul.mubr.f32.gmra.mxu0 %v6333_v32 }
 0xdc9   : > { %v7362_v13 = vpop.eup %7361  ;;  %v6336_v2 = vadd.f32 %v11621_v20, %v6309_v54 }
 0xdca   : > { %v6284_v53 = vmul.f32 %v7362_v13, %v11576_v12  ;;  %v6310_v29 = vmul.f32 %v11613_v21, %v6283_v51 }
 0xdcb   : > { %v7364_v16 = vpop.eup %7363  ;;  %6456 = vmatprep.mubr.f32.mxu0 %v6336_v2 }
 0xdcc   : > { %v6311_v27 = vmul.f32 %v11617_v48, %v6284_v53  ;;  %v6285_v45 = vmul.f32 %v7364_v16, %v11583_v5  ;;  %6457 = vmatmul.mubr.f32.gmra.mxu0 %v6335_v30  ;;  %v6337_v62 = vadd.f32 %v11625_v60, %v6310_v29 }
 0xdcd   : > { %v7366_v18 = vpop.eup %7365 }
 0xdce   : > { %v6338_v31 = vadd.f32 %v11621_v20, %v6311_v27  ;;  %v6286_v40 = vmul.f32 %v7366_v18, %v11586_v26  ;;  %v6312_v12 = vmul.f32 %v11613_v21, %v6285_v45 }
 0xdcf   : > { %v7368_v0 = vpop.eup %7367 }
 0xdd0   : > { %6461 = vmatprep.mubr.f32.mxu0 %v6338_v31  ;;  %v6313_v14 = vmul.f32 %v11617_v48, %v6286_v40  ;;  %v6287_v10 = vmul.f32 %v7368_v0, %v11593_v23  ;;  %v6339_v1 = vadd.f32 %v11625_v60, %v6312_v12 }
 0xdd1   : > { %v7370_v39 = vpop.eup %7369  ;;  %6462 = vmatmul.mubr.f32.gmra.mxu0 %v6337_v62 }
 0xdd2   : > { %v6340_v5 = vadd.f32 %v11621_v20, %v6313_v14  ;;  %v6288_v22 = vmul.f32 %v7370_v39, %v11596_v34  ;;  %v6314_v26 = vmul.f32 %v11613_v21, %v6287_v10 }
 0xdd3   : > { %v7372_v42 = vpop.eup %7371 }
 0xdd4   : > { %6466 = vmatprep.mubr.f32.mxu0 %v6340_v5  ;;  %v6315_v57 = vmul.f32 %v11617_v48, %v6288_v22  ;;  %v6289_v50 = vmul.f32 %v7372_v42, %v11603_v55  ;;  %v6341_v37 = vadd.f32 %v11625_v60, %v6314_v26 }
 0xdd5   : > { %v7374_v17 = vpop.eup %7373  ;;  %6467 = vmatmul.mubr.f32.gmra.mxu0 %v6339_v1 }
 0xdd6   : > { %v6342_v23 = vadd.f32 %v11621_v20, %v6315_v57  ;;  %v6290_v41 = vmul.f32 %v7374_v17, %v11606_v33  ;;  %v6316_v34 = vmul.f32 %v11613_v21, %v6289_v50 }
 0xdd8   : > { %6471 = vmatprep.mubr.f32.mxu0 %v6342_v23  ;;  %v6317_v36 = vmul.f32 %v11617_v48, %v6290_v41  ;;  %v6343_v11 = vadd.f32 %v11625_v60, %v6316_v34 }
 0xdd9   : > { %6472 = vmatmul.mubr.f32.gmra.mxu0 %v6341_v37 }
 0xdda   : > { %v6344_v35 = vadd.f32 %v11621_v20, %v6317_v36 }
 0xddc   : > { %6476 = vmatprep.mubr.f32.mxu0 %v6344_v35 }
 0xddd   : > { %6477 = vmatmul.mubr.f32.gmra.mxu0 %v6343_v11 }
 0xe80   : > { %v7160_v55 = vpop.f32.mrf.mxu0 }
 0xe82   : > { %v7161_v9 = vpop.f32.mrf.mxu0 }
 0xe83   : > { %v7162_v25 = vadd.f32 %v7161_v9, %v7160_v55 }
 0xe84   : > { %v7163_v33 = vpop.f32.mrf.mxu0 }
 0xe85   : > { %v6444_v4 = vadd.f32 %v7162_v25, %v239_v28 }
 0xe86   : > { %v7164_v58 = vpop.f32.mrf.mxu0 }
 0xe87   : > { %6482 = vst [vmem:[%s11674_s29] sm:$0xff] %v6444_v4  ;;  %v7165_v21 = vadd.f32 %v7164_v58, %v7163_v33 }
 0xe88   : > { %v7166_v48 = vpop.f32.mrf.mxu0 }
 0xe89   : > { %v6449_v20 = vadd.f32 %v7165_v21, %v239_v28 }
 0xe8a   : > { %v7167_v60 = vpop.f32.mrf.mxu0 }
 0xe8b   : > { %6483 = vst [vmem:[%s11674_s29 + $0x8] sm:$0xff] %v6449_v20  ;;  %v7168_v63 = vadd.f32 %v7167_v60, %v7166_v48 }
 0xe8c   : > { %v7169_v46 = vpop.f32.mrf.mxu0 }
 0xe8d   : > { %v6454_v19 = vadd.f32 %v7168_v63, %v239_v28 }
 0xe8e   : > { %v7170_v7 = vpop.f32.mrf.mxu0 }
 0xe8f   : > { %6484 = vst [vmem:[%s11674_s29 + $0x10] sm:$0xff] %v6454_v19  ;;  %v7171_v61 = vadd.f32 %v7170_v7, %v7169_v46 }
 0xe91   : > { %v7172_v44 = vpop.f32.mrf.mxu0  ;;  %v6459_v47 = vadd.f32 %v7171_v61, %v239_v28 }
 0xe93   : > { %v7173_v56 = vpop.f32.mrf.mxu0  ;;  %6485 = vst [vmem:[%s11674_s29 + $0x18] sm:$0xff] %v6459_v47 }
 0xe94   : > { %v7174_v49 = vadd.f32 %v7173_v56, %v7172_v44 }
 0xe95   : > { %v7175_v24 = vpop.f32.mrf.mxu0 }
 0xe96   : > { %v6464_v6 = vadd.f32 %v7174_v49, %v239_v28 }
 0xe97   : > { %v7176_v43 = vpop.f32.mrf.mxu0 }
 0xe98   : > { %6486 = vst [vmem:[%s11674_s29 + $0x20] sm:$0xff] %v6464_v6  ;;  %v7177_v38 = vadd.f32 %v7176_v43, %v7175_v24 }
 0xe99   : > { %v7178_v59 = vpop.f32.mrf.mxu0 }
 0xe9a   : > { %v6469_v3 = vadd.f32 %v7177_v38, %v239_v28 }
 0xe9b   : > { %v7179_v15 = vpop.f32.mrf.mxu0 }
 0xe9c   : > { %6487 = vst [vmem:[%s11674_s29 + $0x28] sm:$0xff] %v6469_v3  ;;  %v7180_v52 = vadd.f32 %v7179_v15, %v7178_v59 }
 0xe9d   : > { %v7181_v32 = vpop.f32.mrf.mxu0 }
 0xe9e   : > { %v6474_v8 = vadd.f32 %v7180_v52, %v239_v28 }
 0xe9f   : > { %v7182_v54 = vpop.f32.mrf.mxu0 }
 0xea0   : > { %6488 = vst [vmem:[%s11674_s29 + $0x30] sm:$0xff] %v6474_v8  ;;  %v7183_v51 = vadd.f32 %v7182_v54, %v7181_v32 }
 0xea2   : > { %v6479_v13 = vadd.f32 %v7183_v51, %v239_v28 }
 0xea4   : > { %6489 = vst [vmem:[%s11674_s29 + $0x38] sm:$0xff] %v6479_v13 }
 0xea5   : > { %7564 = shalt.err (!%p7561_p9)
}
 0xea6   : > { %s7565_s28 = scalar_lea.hbm %s11690_s22, 1024  ;;  %s7569_s8 = scalar_lea.hbm %s11736_s3, 4096 }
 0xea7   : > { %p7566_p12 = scmp.ne.s32.totalorder %s11690_s22, %s7565_s28  ;;  %p7570_p4 = scmp.lt.s32.totalorder %s11690_s22, %s11736_s3 }
 0xea8   : > { %p7571_p8 = scmp.lt.s32.totalorder %s7569_s8, %s7565_s28 }
 0xea9   : > { %p7567_p3 = pnand %p7566_p12, %p12521_p0 }
 0xeaa   : > { %p7572_p7 = por %p7571_p8, %p7570_p4 }
 0xeab   : > { %p7568_p13 = pneg %p7567_p3 }
 0xead   : > { %p7573_p10 = pnand %p7572_p7, %p7568_p13 }
 0xeaf   : > { %7576 = shalt.err (!%p7573_p10)
}
 0xeb0   : > { %s7635_s27 = smov 128   ;;  %s7636_s29 = smov 8  }
 0xeb1   : > { %7194 = dma.vmem_to_hbm [thread:$0]  (%p12521_p0), %s11684_s30, 1024, %s11690_s22, %s6491_s23, %s7635_s27, %s7635_s27, %s7636_s29  }
 0xeb2 PF: > { %p7216_p1 = scmp.ge.s32.totalorder %s7619_s15, 2  ;;  %s6519_s4 = sand.u32 1, %s7607_s12  }
 0xeb3   : > { %p12522_p2 = scmp.ne.s32.totalorder %s11953_s19, 0  ;;  %s6520_s10 = scalar_lea.sflag [#allocation4], %s6519_s4 }
 0xeb5   : > { %p7208_p6 = pnand %p7216_p1, %p12522_p2 }
 0xeb7   : > { %p7209_p11 = pneg %p7208_p6 }
 0xeb9   : > { %7602 = dma.done.wait (%p7209_p11), %s6520_s10, 1024  }
 0xeba   : > { %7604 = vsyncadd (%p7209_p11), %s6520_s10, 4294966272  ;;  %p17_p5 = scmp.ge.s32.totalorder %s7728_s9, 6   ;;  %s12523_s12 = smov %s7611_s13 }
 0xebb   : > { %s12524_s13 = smov %s7615_s14  ;;  %s12525_s14 = smov %s7737_s17 }
 0xebc   : > { %s12526_s15 = smov %s7728_s9  ;;  %19 = sbr.rel (!%p17_p5) target bundleno = 6 (0x6), region = 93 }
 0xec1   :  { %6525 = vsyncpa [#allocation3], 1 }
 0xec2   :  { %6527 = vsyncpa [#allocation3 + $0x1], 1 }
 0xec3   :  { %6528 = vsyncpa [#allocation6], 1 }
 0xec4   :  { %6529 = vsyncpa [#allocation4], 1 }
 0xec5   :  { %6531 = vsyncpa [#allocation4 + $0x1], 1 }

</bundles_post_ra>
